<compile_context>
chip_gen: v7x
topology: tpu7x:2x2x1
jax: 0.10.0
libtpu: 0.0.40
codegen_flags: <defaults>
</compile_context>

<pallas_src>
import functools

import jax
import jax.numpy as jnp
from jax import lax
from jax.experimental import pallas as pl
from jax.experimental.pallas import tpu as pltpu


def _basic_block_kernel(x_ref, w1_ref, b1_ref, w2_ref, b2_ref, out_ref,
                        xin_ref, mid_ref, *, fuse_taps, slab_rows):
    """One grid step = a block of B images (NHWC), both 3x3 convs fused.

    x_ref  : (B, H, W, C)       input block (compute dtype, e.g. bf16)
    w1_ref : (9*C, C)           conv1 weights, im2col layout, BN1 scale folded in
    b1_ref : (1, C)   f32       folded BN1 bias
    w2_ref : (9*C, C)           conv2 weights, BN2 scale folded in
    b2_ref : (1, C)   f32       folded BN2 bias
    out_ref: (B, H, W, C)       output block (compute dtype)
    xin_ref: (B, H+2, W+2, C)   scratch: zero-padded input        (compute dtype)
    mid_ref: (B, H+2, W+2, C)   scratch: zero-padded intermediate (compute dtype)
    """
    B, H, W, C = out_ref.shape
    cdt = xin_ref.dtype
    HT = slab_rows                      # H rows per matmul slab (divides H)

    # Zero only the 1-pixel halo of the padded scratches; the interior is fully
    # overwritten below.  Done every step (cheap) so it stays correct however
    # the grid is sharded across TensorCores.
    zt = jnp.zeros((B, 1, W + 2, C), cdt)
    zc = jnp.zeros((B, H + 2, 1, C), cdt)
    for pad_ref in (xin_ref, mid_ref):
        pad_ref[:, 0:1, :, :] = zt
        pad_ref[:, H + 1:H + 2, :, :] = zt
        pad_ref[:, :, 0:1, :] = zc
        pad_ref[:, :, W + 1:W + 2, :] = zc

    # Interior of the padded conv1 input -- stored directly in compute dtype
    # (no f32 upcast of the activations).
    xin_ref[:, 1:H + 1, 1:W + 1, :] = x_ref[...]

    def conv3x3_slab(src_ref, w_ref, h0):
        rows = B * HT * W
        if fuse_taps:
            # im2col: 9 shifted (rows, C) windows (already compute dtype)
            # concatenated on the lane axis -> one (rows, 9C) @ (9C, C) MXU
            # matmul (K = 9C, single push per conv slab), f32 accumulation.
            cols = [src_ref[:, h0 + dy:h0 + dy + HT, dx:dx + W, :].reshape(rows, C)
                    for dy in range(3) for dx in range(3)]
            patches = jnp.concatenate(cols, axis=-1)
            return jnp.dot(patches, w_ref[...], preferred_element_type=jnp.float32)
        # Per-tap path: 9 lane-aligned K=C matmuls; preferred when C < 128 where
        # the 9-way lane concat above would be lane-unaligned (XLU relayouts).
        acc = jnp.zeros((rows, C), jnp.float32)
        for k in range(9):
            dy, dx = divmod(k, 3)
            tap = src_ref[:, h0 + dy:h0 + dy + HT, dx:dx + W, :].reshape(rows, C)
            acc = acc + jnp.dot(tap, w_ref[k * C:(k + 1) * C, :],
                                preferred_element_type=jnp.float32)
        return acc

    # conv1 -> folded BN1 -> ReLU, stored (compute dtype) into padded mid scratch.
    for h0 in range(0, H, HT):
        o1 = jnp.maximum(conv3x3_slab(xin_ref, w1_ref, h0) + b1_ref[...], 0.0)
        mid_ref[:, 1 + h0:1 + h0 + HT, 1:W + 1, :] = (
            o1.reshape(B, HT, W, C).astype(cdt))

    # conv2 -> folded BN2 -> + residual -> ReLU   (elementwise math in f32).
    for h0 in range(0, H, HT):
        o2 = conv3x3_slab(mid_ref, w2_ref, h0) + b2_ref[...]
        res = x_ref[:, h0:h0 + HT, :, :].reshape(B * HT * W, C).astype(jnp.float32)
        y = jnp.maximum(o2 + res, 0.0)
        out_ref[:, h0:h0 + HT, :, :] = y.reshape(B, HT, W, C).astype(out_ref.dtype)


def _pick_images_per_step(N, H, W, C, itemsize, target_rows=256,
                          act_budget_bytes=8 << 20):
    """Largest divisor B of N whose per-step activation working set fits the
    budget, stopping as soon as B*H*W fills the MXU rows (>= target_rows)."""
    best = 1
    for b in range(1, N + 1):
        if N % b:
            continue
        step_bytes = (2 * 2 * b * H * W * C * itemsize            # in/out, 2-buffered
                      + 2 * b * (H + 2) * (W + 2) * C * itemsize)  # padded scratches
        if b > 1 and step_bytes > act_budget_bytes:
            break
        best = b
        if b * H * W >= target_rows:
            break
    return best


def _pick_slab_rows(B, H, W, max_rows):
    """Largest divisor of H with B*HT*W <= max_rows (at least 1)."""
    ht = 1
    for cand in range(1, H + 1):
        if H % cand == 0 and B * cand * W <= max_rows:
            ht = cand
    return ht


def _resident_spec(shape):
    """Constant-index VMEM-resident block (weights / folded biases): the block
    index never changes, so request single buffering instead of the default 2."""
    index_map = lambda n: (0,) * len(shape)
    try:
        return pl.BlockSpec(shape, index_map, pipeline_mode=pl.Buffered(1))
    except TypeError:   # BlockSpec without pipeline_mode support
        return pl.BlockSpec(shape, index_map)


def basic_block_pallas_nhwc(x_nhwc, w1, g1, be1, m1, v1, w2, g2, be2, m2, v2,
                            *, eps=1e-5, compute_dtype=jnp.bfloat16,
                            fuse_taps=None, max_rows_per_slab=1024):
    """Fused BasicBlock forward on NHWC activations.

    x_nhwc : (N, H, W, C); output is (N, H, W, C) in compute_dtype.  Keep
             activations NHWC / compute_dtype when chaining blocks.
    w1/w2  : (Cout, Cin, 3, 3) PyTorch layout, Cin == Cout (downsample=None).
    """
    N, H, W, C = x_nhwc.shape
    assert w1.shape == (C, C, 3, 3) and w2.shape == (C, C, 3, 3), (
        "fused kernel only supports stride=1, Cin == Cout (downsample=None)")
    if fuse_taps is None:
        fuse_taps = (C % 128 == 0)      # lane-aligned concat only when C is 128-multiple

    itemsize = jnp.dtype(compute_dtype).itemsize
    x_nhwc = x_nhwc.astype(compute_dtype)

    def fold(w, gamma, beta, mean, var):
        # Eval-mode BN folded into the conv (in f32), cast once at the boundary.
        scale = gamma / jnp.sqrt(var + eps)                       # (C,)
        bias = (beta - mean * scale).reshape(1, C)                # (1, C)
        # (Cout, Cin, 3, 3) -> (ky, kx, Cin, Cout) -> (9*Cin, Cout), k = 3*ky + kx
        wk = jnp.transpose(w, (2, 3, 1, 0)).reshape(9 * C, C) * scale[None, :]
        return wk.astype(compute_dtype), bias.astype(jnp.float32)

    w1f, b1 = fold(w1, g1, be1, m1, v1)
    w2f, b2 = fold(w2, g2, be2, m2, v2)

    B = _pick_images_per_step(N, H, W, C, itemsize)
    slab_rows = _pick_slab_rows(B, H, W, max_rows_per_slab)

    # Scoped-VMEM budget sized from the real working set (+headroom), clamped to
    # the smallest physical VMEM across generations (v7x: 64 MiB per core).
    rows = B * slab_rows * W
    est = (2 * 2 * B * H * W * C * itemsize                    # in/out blocks, 2-buffered
           + 2 * B * (H + 2) * (W + 2) * C * itemsize          # padded scratches
           + 2 * 9 * C * C * itemsize + 4 * C * 4              # weights (1-buffered) + biases
           + 2 * rows * 9 * C * itemsize + 2 * rows * C * 4)   # live patches + f32 accs
    vmem_limit = int(min(max(2 * est + (4 << 20), 32 << 20), 64 << 20))

    flops = 2 * 2 * N * H * W * (9 * C) * C                    # two 3x3 convs
    bytes_accessed = int(2 * N * H * W * C * itemsize          # x in + out
                         + 2 * 9 * C * C * itemsize + 2 * C * 4)

    kernel = functools.partial(_basic_block_kernel,
                               fuse_taps=fuse_taps, slab_rows=slab_rows)

    return pl.pallas_call(
        kernel,
        out_shape=jax.ShapeDtypeStruct((N, H, W, C), compute_dtype),
        grid_spec=pltpu.PrefetchScalarGridSpec(
            num_scalar_prefetch=0,
            grid=(N // B,),
            in_specs=[
                pl.BlockSpec((B, H, W, C), lambda n: (n, 0, 0, 0)),
                _resident_spec((9 * C, C)),     # conv1 weights (VMEM-resident)
                _resident_spec((1, C)),         # folded BN1 bias
                _resident_spec((9 * C, C)),     # conv2 weights
                _resident_spec((1, C)),         # folded BN2 bias
            ],
            out_specs=pl.BlockSpec((B, H, W, C), lambda n: (n, 0, 0, 0)),
            scratch_shapes=[
                pltpu.VMEM((B, H + 2, W + 2, C), compute_dtype),  # padded input
                pltpu.VMEM((B, H + 2, W + 2, C), compute_dtype),  # padded intermediate
            ],
        ),
        compiler_params=pltpu.CompilerParams(
            dimension_semantics=("parallel",),
            vmem_limit_bytes=vmem_limit,
        ),
        cost_estimate=pl.CostEstimate(
            flops=flops, transcendentals=0, bytes_accessed=bytes_accessed),
    )(x_nhwc, w1f, b1, w2f, b2)


def basic_block_pallas_nchw(x_nchw, *params, eps=1e-5,
                            compute_dtype=jnp.bfloat16, fuse_taps=None,
                            max_rows_per_slab=1024, out_dtype=None):
    """PyTorch-layout convenience entry: NCHW in -> NCHW out (compute_dtype).

    The NCHW<->NHWC layout change happens exactly once here; when chaining
    BasicBlocks, stay in NHWC and call basic_block_pallas_nhwc directly to
    avoid the extra full-tensor HBM round trips."""
    x_nhwc = jnp.transpose(x_nchw, (0, 2, 3, 1))
    out = basic_block_pallas_nhwc(x_nhwc, *params, eps=eps,
                                  compute_dtype=compute_dtype,
                                  fuse_taps=fuse_taps,
                                  max_rows_per_slab=max_rows_per_slab)
    out = jnp.transpose(out, (0, 3, 1, 2))
    return out if out_dtype is None else out.astype(out_dtype)


def basic_block_reference(x_nchw, w1, g1, be1, m1, v1, w2, g2, be2, m2, v2,
                          eps=1e-5):
    """Pure-JAX f32 reference (lax.conv) matching the PyTorch forward (eval BN)."""
    def conv(x, w):  # x: NCHW, w: OIHW
        return lax.conv_general_dilated(
            x, w, window_strides=(1, 1), padding=((1, 1), (1, 1)),
            dimension_numbers=("NCHW", "OIHW", "NCHW"))

    def bn(x, g, b, m, v):
        sc = (g / jnp.sqrt(v + eps)).reshape(1, -1, 1, 1)
        bi = (b - m * g / jnp.sqrt(v + eps)).reshape(1, -1, 1, 1)
        return x * sc + bi

    out = jnp.maximum(bn(conv(x_nchw, w1), g1, be1, m1, v1), 0.0)
    out = bn(conv(out, w2), g2, be2, m2, v2)
    return jnp.maximum(out + x_nchw, 0.0)


if __name__ == "__main__":
    key = jax.random.PRNGKey(0)

    def make_inputs(k, N, C, H, W):
        ks = jax.random.split(k, 11)
        x = jax.random.normal(ks[0], (N, C, H, W), jnp.float32)
        w1 = jax.random.normal(ks[1], (C, C, 3, 3), jnp.float32) * 0.1
        w2 = jax.random.normal(ks[2], (C, C, 3, 3), jnp.float32) * 0.1
        g1 = jax.random.uniform(ks[3], (C,), jnp.float32, 0.5, 1.5)
        be1 = jax.random.normal(ks[4], (C,), jnp.float32) * 0.1
        m1 = jax.random.normal(ks[5], (C,), jnp.float32) * 0.1
        v1 = jax.random.uniform(ks[6], (C,), jnp.float32, 0.5, 1.5)
        g2 = jax.random.uniform(ks[7], (C,), jnp.float32, 0.5, 1.5)
        be2 = jax.random.normal(ks[8], (C,), jnp.float32) * 0.1
        m2 = jax.random.normal(ks[9], (C,), jnp.float32) * 0.1
        v2 = jax.random.uniform(ks[10], (C,), jnp.float32, 0.5, 1.5)
        return x, (w1, g1, be1, m1, v1, w2, g2, be2, m2, v2)

    k1, k2 = jax.random.split(key)

    # Test 1: N=2, C=8, 16x16 (stride=1, Cin==Cout, downsample=None).
    x, params = make_inputs(k1, 2, 8, 16, 16)
    ref = jax.block_until_ready(basic_block_reference(x, *params))

    # (a) bf16 compute, fused K=9C im2col matmul, default slabbing.
    out_a = jax.block_until_ready(
        basic_block_pallas_nchw(x, *params, fuse_taps=True))
    assert out_a.shape == x.shape
    err_a = float(jnp.max(jnp.abs(out_a.astype(jnp.float32) - ref)))
    assert err_a < 2e-1, err_a

    # (b) f32 compute, fused path, forced multi-slab (2 H-slabs): exact check.
    out_b = jax.block_until_ready(
        basic_block_pallas_nchw(x, *params, compute_dtype=jnp.float32,
                                fuse_taps=True, max_rows_per_slab=128))
    err_b = float(jnp.max(jnp.abs(out_b - ref)))
    assert err_b < 1e-3, err_b

    # (c) f32 compute, per-tap path (the default for C < 128): exact check.
    out_c = jax.block_until_ready(
        basic_block_pallas_nchw(x, *params, compute_dtype=jnp.float32,
                                fuse_taps=False))
    err_c = float(jnp.max(jnp.abs(out_c - ref)))
    assert err_c < 1e-3, err_c

    # Test 2: small-spatial block (8x8): several images packed per grid step.
    x2, params2 = make_inputs(k2, 4, 16, 8, 8)
    ref2 = jax.block_until_ready(basic_block_reference(x2, *params2))
    out_d = jax.block_until_ready(basic_block_pallas_nchw(x2, *params2))
    assert out_d.shape == x2.shape
    err_d = float(jnp.max(jnp.abs(out_d.astype(jnp.float32) - ref2)))
    assert err_d < 2e-1, err_d

    print("KERNEL_OK")
</pallas_src>

<mosaic_0001>
module attributes {stable_mosaic.version = 11 : i64} {
  func.func @_basic_block_kernel(%arg0: i32, %arg1: memref<1x16x16x8xbf16, #tpu.memory_space<vmem>>, %arg2: memref<72x8xbf16, #tpu.memory_space<vmem>>, %arg3: memref<1x8xf32, #tpu.memory_space<vmem>>, %arg4: memref<72x8xbf16, #tpu.memory_space<vmem>>, %arg5: memref<1x8xf32, #tpu.memory_space<vmem>>, %arg6: memref<1x16x16x8xbf16, #tpu.memory_space<vmem>>, %arg7: memref<1x18x18x8xbf16, #tpu.memory_space<vmem>>, %arg8: memref<1x18x18x8xbf16, #tpu.memory_space<vmem>>) attributes {dimension_semantics = [#tpu.dimension_semantics<parallel>], iteration_bounds = array<i64: 2>, scalar_prefetch = 0 : i64, scratch_operands = 2 : i64, tpu.core_type = #tpu.core_type<tc>, window_params = [{transform_indices = @transform_0, window_bounds = array<i64: 1, 16, 16, 8>}, {pipeline_mode = #tpu.pipeline_mode<synchronous>, transform_indices = @transform_1, window_bounds = array<i64: 72, 8>}, {pipeline_mode = #tpu.pipeline_mode<synchronous>, transform_indices = @transform_2, window_bounds = array<i64: 1, 8>}, {pipeline_mode = #tpu.pipeline_mode<synchronous>, transform_indices = @transform_3, window_bounds = array<i64: 72, 8>}, {pipeline_mode = #tpu.pipeline_mode<synchronous>, transform_indices = @transform_4, window_bounds = array<i64: 1, 8>}, {transform_indices = @transform_5, window_bounds = array<i64: 1, 16, 16, 8>}]} {
    %cst = arith.constant 0.000000e+00 : bf16
    %0 = vector.broadcast %cst : bf16 to vector<1x1x18x8xbf16>
    %cst_0 = arith.constant 0.000000e+00 : bf16
    %1 = vector.broadcast %cst_0 : bf16 to vector<1x18x1x8xbf16>
    %c0 = arith.constant 0 : index
    %c0_1 = arith.constant 0 : index
    %c0_2 = arith.constant 0 : index
    %c0_3 = arith.constant 0 : index
    %2 = vector.load %arg7[%c0, %c0_1, %c0_2, %c0_3] : memref<1x18x18x8xbf16, #tpu.memory_space<vmem>>, vector<1x1x18x8xbf16>
    tpu.vector_store %arg7[%c0, %c0_1, %c0_2, %c0_3], %0 {strides = array<i32>} : memref<1x18x18x8xbf16, #tpu.memory_space<vmem>>, vector<1x1x18x8xbf16>,
    %c0_4 = arith.constant 0 : index
    %c17 = arith.constant 17 : index
    %c0_5 = arith.constant 0 : index
    %c0_6 = arith.constant 0 : index
    %3 = vector.load %arg7[%c0_4, %c17, %c0_5, %c0_6] : memref<1x18x18x8xbf16, #tpu.memory_space<vmem>>, vector<1x1x18x8xbf16>
    tpu.vector_store %arg7[%c0_4, %c17, %c0_5, %c0_6], %0 {strides = array<i32>} : memref<1x18x18x8xbf16, #tpu.memory_space<vmem>>, vector<1x1x18x8xbf16>,
    %c0_7 = arith.constant 0 : index
    %c0_8 = arith.constant 0 : index
    %c0_9 = arith.constant 0 : index
    %c0_10 = arith.constant 0 : index
    %4 = vector.load %arg7[%c0_7, %c0_8, %c0_9, %c0_10] : memref<1x18x18x8xbf16, #tpu.memory_space<vmem>>, vector<1x18x1x8xbf16>
    tpu.vector_store %arg7[%c0_7, %c0_8, %c0_9, %c0_10], %1 {strides = array<i32>} : memref<1x18x18x8xbf16, #tpu.memory_space<vmem>>, vector<1x18x1x8xbf16>,
    %c0_11 = arith.constant 0 : index
    %c0_12 = arith.constant 0 : index
    %c17_13 = arith.constant 17 : index
    %c0_14 = arith.constant 0 : index
    %5 = vector.load %arg7[%c0_11, %c0_12, %c17_13, %c0_14] : memref<1x18x18x8xbf16, #tpu.memory_space<vmem>>, vector<1x18x1x8xbf16>
    tpu.vector_store %arg7[%c0_11, %c0_12, %c17_13, %c0_14], %1 {strides = array<i32>} : memref<1x18x18x8xbf16, #tpu.memory_space<vmem>>, vector<1x18x1x8xbf16>,
    %c0_15 = arith.constant 0 : index
    %c0_16 = arith.constant 0 : index
    %c0_17 = arith.constant 0 : index
    %c0_18 = arith.constant 0 : index
    %6 = vector.load %arg8[%c0_15, %c0_16, %c0_17, %c0_18] : memref<1x18x18x8xbf16, #tpu.memory_space<vmem>>, vector<1x1x18x8xbf16>
    tpu.vector_store %arg8[%c0_15, %c0_16, %c0_17, %c0_18], %0 {strides = array<i32>} : memref<1x18x18x8xbf16, #tpu.memory_space<vmem>>, vector<1x1x18x8xbf16>,
    %c0_19 = arith.constant 0 : index
    %c17_20 = arith.constant 17 : index
    %c0_21 = arith.constant 0 : index
    %c0_22 = arith.constant 0 : index
    %7 = vector.load %arg8[%c0_19, %c17_20, %c0_21, %c0_22] : memref<1x18x18x8xbf16, #tpu.memory_space<vmem>>, vector<1x1x18x8xbf16>
    tpu.vector_store %arg8[%c0_19, %c17_20, %c0_21, %c0_22], %0 {strides = array<i32>} : memref<1x18x18x8xbf16, #tpu.memory_space<vmem>>, vector<1x1x18x8xbf16>,
    %c0_23 = arith.constant 0 : index
    %c0_24 = arith.constant 0 : index
    %c0_25 = arith.constant 0 : index
    %c0_26 = arith.constant 0 : index
    %8 = vector.load %arg8[%c0_23, %c0_24, %c0_25, %c0_26] : memref<1x18x18x8xbf16, #tpu.memory_space<vmem>>, vector<1x18x1x8xbf16>
    tpu.vector_store %arg8[%c0_23, %c0_24, %c0_25, %c0_26], %1 {strides = array<i32>} : memref<1x18x18x8xbf16, #tpu.memory_space<vmem>>, vector<1x18x1x8xbf16>,
    %c0_27 = arith.constant 0 : index
    %c0_28 = arith.constant 0 : index
    %c17_29 = arith.constant 17 : index
    %c0_30 = arith.constant 0 : index
    %9 = vector.load %arg8[%c0_27, %c0_28, %c17_29, %c0_30] : memref<1x18x18x8xbf16, #tpu.memory_space<vmem>>, vector<1x18x1x8xbf16>
    tpu.vector_store %arg8[%c0_27, %c0_28, %c17_29, %c0_30], %1 {strides = array<i32>} : memref<1x18x18x8xbf16, #tpu.memory_space<vmem>>, vector<1x18x1x8xbf16>,
    %c0_31 = arith.constant 0 : index
    %c0_32 = arith.constant 0 : index
    %c0_33 = arith.constant 0 : index
    %c0_34 = arith.constant 0 : index
    %10 = vector.load %arg1[%c0_31, %c0_32, %c0_33, %c0_34] : memref<1x16x16x8xbf16, #tpu.memory_space<vmem>>, vector<1x16x16x8xbf16>
    %c0_35 = arith.constant 0 : index
    %c1 = arith.constant 1 : index
    %c1_36 = arith.constant 1 : index
    %c0_37 = arith.constant 0 : index
    %11 = vector.load %arg7[%c0_35, %c1, %c1_36, %c0_37] : memref<1x18x18x8xbf16, #tpu.memory_space<vmem>>, vector<1x16x16x8xbf16>
    tpu.vector_store %arg7[%c0_35, %c1, %c1_36, %c0_37], %10 {strides = array<i32>} : memref<1x18x18x8xbf16, #tpu.memory_space<vmem>>, vector<1x16x16x8xbf16>,
    %c0_38 = arith.constant 0 : index
    %c0_39 = arith.constant 0 : index
    %c0_40 = arith.constant 0 : index
    %c0_41 = arith.constant 0 : index
    %12 = vector.load %arg7[%c0_38, %c0_39, %c0_40, %c0_41] : memref<1x18x18x8xbf16, #tpu.memory_space<vmem>>, vector<1x16x16x8xbf16>
    %13 = vector.shape_cast %12 : vector<1x16x16x8xbf16> to vector<256x8xbf16>
    %c0_42 = arith.constant 0 : index
    %c0_43 = arith.constant 0 : index
    %c1_44 = arith.constant 1 : index
    %c0_45 = arith.constant 0 : index
    %14 = vector.load %arg7[%c0_42, %c0_43, %c1_44, %c0_45] : memref<1x18x18x8xbf16, #tpu.memory_space<vmem>>, vector<1x16x16x8xbf16>
    %15 = vector.shape_cast %14 : vector<1x16x16x8xbf16> to vector<256x8xbf16>
    %c0_46 = arith.constant 0 : index
    %c0_47 = arith.constant 0 : index
    %c2 = arith.constant 2 : index
    %c0_48 = arith.constant 0 : index
    %16 = vector.load %arg7[%c0_46, %c0_47, %c2, %c0_48] : memref<1x18x18x8xbf16, #tpu.memory_space<vmem>>, vector<1x16x16x8xbf16>
    %17 = vector.shape_cast %16 : vector<1x16x16x8xbf16> to vector<256x8xbf16>
    %c0_49 = arith.constant 0 : index
    %c1_50 = arith.constant 1 : index
    %c0_51 = arith.constant 0 : index
    %c0_52 = arith.constant 0 : index
    %18 = vector.load %arg7[%c0_49, %c1_50, %c0_51, %c0_52] : memref<1x18x18x8xbf16, #tpu.memory_space<vmem>>, vector<1x16x16x8xbf16>
    %19 = vector.shape_cast %18 : vector<1x16x16x8xbf16> to vector<256x8xbf16>
    %c0_53 = arith.constant 0 : index
    %c1_54 = arith.constant 1 : index
    %c1_55 = arith.constant 1 : index
    %c0_56 = arith.constant 0 : index
    %20 = vector.load %arg7[%c0_53, %c1_54, %c1_55, %c0_56] : memref<1x18x18x8xbf16, #tpu.memory_space<vmem>>, vector<1x16x16x8xbf16>
    %21 = vector.shape_cast %20 : vector<1x16x16x8xbf16> to vector<256x8xbf16>
    %c0_57 = arith.constant 0 : index
    %c1_58 = arith.constant 1 : index
    %c2_59 = arith.constant 2 : index
    %c0_60 = arith.constant 0 : index
    %22 = vector.load %arg7[%c0_57, %c1_58, %c2_59, %c0_60] : memref<1x18x18x8xbf16, #tpu.memory_space<vmem>>, vector<1x16x16x8xbf16>
    %23 = vector.shape_cast %22 : vector<1x16x16x8xbf16> to vector<256x8xbf16>
    %c0_61 = arith.constant 0 : index
    %c2_62 = arith.constant 2 : index
    %c0_63 = arith.constant 0 : index
    %c0_64 = arith.constant 0 : index
    %24 = vector.load %arg7[%c0_61, %c2_62, %c0_63, %c0_64] : memref<1x18x18x8xbf16, #tpu.memory_space<vmem>>, vector<1x16x16x8xbf16>
    %25 = vector.shape_cast %24 : vector<1x16x16x8xbf16> to vector<256x8xbf16>
    %c0_65 = arith.constant 0 : index
    %c2_66 = arith.constant 2 : index
    %c1_67 = arith.constant 1 : index
    %c0_68 = arith.constant 0 : index
    %26 = vector.load %arg7[%c0_65, %c2_66, %c1_67, %c0_68] : memref<1x18x18x8xbf16, #tpu.memory_space<vmem>>, vector<1x16x16x8xbf16>
    %27 = vector.shape_cast %26 : vector<1x16x16x8xbf16> to vector<256x8xbf16>
    %c0_69 = arith.constant 0 : index
    %c2_70 = arith.constant 2 : index
    %c2_71 = arith.constant 2 : index
    %c0_72 = arith.constant 0 : index
    %28 = vector.load %arg7[%c0_69, %c2_70, %c2_71, %c0_72] : memref<1x18x18x8xbf16, #tpu.memory_space<vmem>>, vector<1x16x16x8xbf16>
    %29 = vector.shape_cast %28 : vector<1x16x16x8xbf16> to vector<256x8xbf16>
    %30 = tpu.concatenate %13, %15, %17, %19, %21, %23, %25, %27, %29 in 1 : vector<256x8xbf16>, vector<256x8xbf16>, vector<256x8xbf16>, vector<256x8xbf16>, vector<256x8xbf16>, vector<256x8xbf16>, vector<256x8xbf16>, vector<256x8xbf16>, vector<256x8xbf16> -> vector<256x72xbf16>
    %c0_73 = arith.constant 0 : index
    %c0_74 = arith.constant 0 : index
    %31 = vector.load %arg2[%c0_73, %c0_74] : memref<72x8xbf16, #tpu.memory_space<vmem>>, vector<72x8xbf16>
    %cst_75 = arith.constant dense<0.000000e+00> : vector<256x8xf32>
    %32 = tpu.matmul %30, %31, %cst_75 {dimension_numbers = #tpu.dot_dimension_numbers<[1], [0], [0], [1], [0, 0, 1, 1], [], []>} : vector<256x72xbf16>, vector<72x8xbf16>, vector<256x8xf32> -> vector<256x8xf32>
    %c0_76 = arith.constant 0 : index
    %c0_77 = arith.constant 0 : index
    %33 = vector.load %arg3[%c0_76, %c0_77] : memref<1x8xf32, #tpu.memory_space<vmem>>, vector<1x8xf32>
    %34 = vector.broadcast %33 : vector<1x8xf32> to vector<256x8xf32>
    %35 = arith.addf %32, %34 : vector<256x8xf32>
    %cst_78 = arith.constant 0.000000e+00 : f32
    %36 = vector.broadcast %cst_78 : f32 to vector<256x8xf32>
    %37 = arith.maximumf %35, %36 : vector<256x8xf32>
    %38 = vector.shape_cast %37 : vector<256x8xf32> to vector<1x16x16x8xf32>
    %39 = arith.truncf %38 : vector<1x16x16x8xf32> to vector<1x16x16x8xbf16>
    %c0_79 = arith.constant 0 : index
    %c1_80 = arith.constant 1 : index
    %c1_81 = arith.constant 1 : index
    %c0_82 = arith.constant 0 : index
    %40 = vector.load %arg8[%c0_79, %c1_80, %c1_81, %c0_82] : memref<1x18x18x8xbf16, #tpu.memory_space<vmem>>, vector<1x16x16x8xbf16>
    tpu.vector_store %arg8[%c0_79, %c1_80, %c1_81, %c0_82], %39 {strides = array<i32>} : memref<1x18x18x8xbf16, #tpu.memory_space<vmem>>, vector<1x16x16x8xbf16>,
    %c0_83 = arith.constant 0 : index
    %c0_84 = arith.constant 0 : index
    %c0_85 = arith.constant 0 : index
    %c0_86 = arith.constant 0 : index
    %41 = vector.load %arg8[%c0_83, %c0_84, %c0_85, %c0_86] : memref<1x18x18x8xbf16, #tpu.memory_space<vmem>>, vector<1x16x16x8xbf16>
    %42 = vector.shape_cast %41 : vector<1x16x16x8xbf16> to vector<256x8xbf16>
    %c0_87 = arith.constant 0 : index
    %c0_88 = arith.constant 0 : index
    %c1_89 = arith.constant 1 : index
    %c0_90 = arith.constant 0 : index
    %43 = vector.load %arg8[%c0_87, %c0_88, %c1_89, %c0_90] : memref<1x18x18x8xbf16, #tpu.memory_space<vmem>>, vector<1x16x16x8xbf16>
    %44 = vector.shape_cast %43 : vector<1x16x16x8xbf16> to vector<256x8xbf16>
    %c0_91 = arith.constant 0 : index
    %c0_92 = arith.constant 0 : index
    %c2_93 = arith.constant 2 : index
    %c0_94 = arith.constant 0 : index
    %45 = vector.load %arg8[%c0_91, %c0_92, %c2_93, %c0_94] : memref<1x18x18x8xbf16, #tpu.memory_space<vmem>>, vector<1x16x16x8xbf16>
    %46 = vector.shape_cast %45 : vector<1x16x16x8xbf16> to vector<256x8xbf16>
    %c0_95 = arith.constant 0 : index
    %c1_96 = arith.constant 1 : index
    %c0_97 = arith.constant 0 : index
    %c0_98 = arith.constant 0 : index
    %47 = vector.load %arg8[%c0_95, %c1_96, %c0_97, %c0_98] : memref<1x18x18x8xbf16, #tpu.memory_space<vmem>>, vector<1x16x16x8xbf16>
    %48 = vector.shape_cast %47 : vector<1x16x16x8xbf16> to vector<256x8xbf16>
    %c0_99 = arith.constant 0 : index
    %c1_100 = arith.constant 1 : index
    %c1_101 = arith.constant 1 : index
    %c0_102 = arith.constant 0 : index
    %49 = vector.load %arg8[%c0_99, %c1_100, %c1_101, %c0_102] : memref<1x18x18x8xbf16, #tpu.memory_space<vmem>>, vector<1x16x16x8xbf16>
    %50 = vector.shape_cast %49 : vector<1x16x16x8xbf16> to vector<256x8xbf16>
    %c0_103 = arith.constant 0 : index
    %c1_104 = arith.constant 1 : index
    %c2_105 = arith.constant 2 : index
    %c0_106 = arith.constant 0 : index
    %51 = vector.load %arg8[%c0_103, %c1_104, %c2_105, %c0_106] : memref<1x18x18x8xbf16, #tpu.memory_space<vmem>>, vector<1x16x16x8xbf16>
    %52 = vector.shape_cast %51 : vector<1x16x16x8xbf16> to vector<256x8xbf16>
    %c0_107 = arith.constant 0 : index
    %c2_108 = arith.constant 2 : index
    %c0_109 = arith.constant 0 : index
    %c0_110 = arith.constant 0 : index
    %53 = vector.load %arg8[%c0_107, %c2_108, %c0_109, %c0_110] : memref<1x18x18x8xbf16, #tpu.memory_space<vmem>>, vector<1x16x16x8xbf16>
    %54 = vector.shape_cast %53 : vector<1x16x16x8xbf16> to vector<256x8xbf16>
    %c0_111 = arith.constant 0 : index
    %c2_112 = arith.constant 2 : index
    %c1_113 = arith.constant 1 : index
    %c0_114 = arith.constant 0 : index
    %55 = vector.load %arg8[%c0_111, %c2_112, %c1_113, %c0_114] : memref<1x18x18x8xbf16, #tpu.memory_space<vmem>>, vector<1x16x16x8xbf16>
    %56 = vector.shape_cast %55 : vector<1x16x16x8xbf16> to vector<256x8xbf16>
    %c0_115 = arith.constant 0 : index
    %c2_116 = arith.constant 2 : index
    %c2_117 = arith.constant 2 : index
    %c0_118 = arith.constant 0 : index
    %57 = vector.load %arg8[%c0_115, %c2_116, %c2_117, %c0_118] : memref<1x18x18x8xbf16, #tpu.memory_space<vmem>>, vector<1x16x16x8xbf16>
    %58 = vector.shape_cast %57 : vector<1x16x16x8xbf16> to vector<256x8xbf16>
    %59 = tpu.concatenate %42, %44, %46, %48, %50, %52, %54, %56, %58 in 1 : vector<256x8xbf16>, vector<256x8xbf16>, vector<256x8xbf16>, vector<256x8xbf16>, vector<256x8xbf16>, vector<256x8xbf16>, vector<256x8xbf16>, vector<256x8xbf16>, vector<256x8xbf16> -> vector<256x72xbf16>
    %c0_119 = arith.constant 0 : index
    %c0_120 = arith.constant 0 : index
    %60 = vector.load %arg4[%c0_119, %c0_120] : memref<72x8xbf16, #tpu.memory_space<vmem>>, vector<72x8xbf16>
    %cst_121 = arith.constant dense<0.000000e+00> : vector<256x8xf32>
    %61 = tpu.matmul %59, %60, %cst_121 {dimension_numbers = #tpu.dot_dimension_numbers<[1], [0], [0], [1], [0, 0, 1, 1], [], []>} : vector<256x72xbf16>, vector<72x8xbf16>, vector<256x8xf32> -> vector<256x8xf32>
    %c0_122 = arith.constant 0 : index
    %c0_123 = arith.constant 0 : index
    %62 = vector.load %arg5[%c0_122, %c0_123] : memref<1x8xf32, #tpu.memory_space<vmem>>, vector<1x8xf32>
    %63 = vector.broadcast %62 : vector<1x8xf32> to vector<256x8xf32>
    %64 = arith.addf %61, %63 : vector<256x8xf32>
    %c0_124 = arith.constant 0 : index
    %c0_125 = arith.constant 0 : index
    %c0_126 = arith.constant 0 : index
    %c0_127 = arith.constant 0 : index
    %65 = vector.load %arg1[%c0_124, %c0_125, %c0_126, %c0_127] : memref<1x16x16x8xbf16, #tpu.memory_space<vmem>>, vector<1x16x16x8xbf16>
    %66 = vector.shape_cast %65 : vector<1x16x16x8xbf16> to vector<256x8xbf16>
    %67 = arith.extf %66 : vector<256x8xbf16> to vector<256x8xf32>
    %68 = arith.addf %64, %67 : vector<256x8xf32>
    %cst_128 = arith.constant 0.000000e+00 : f32
    %69 = vector.broadcast %cst_128 : f32 to vector<256x8xf32>
    %70 = arith.maximumf %68, %69 : vector<256x8xf32>
    %71 = vector.shape_cast %70 : vector<256x8xf32> to vector<1x16x16x8xf32>
    %72 = arith.truncf %71 : vector<1x16x16x8xf32> to vector<1x16x16x8xbf16>
    %c0_129 = arith.constant 0 : index
    %c0_130 = arith.constant 0 : index
    %c0_131 = arith.constant 0 : index
    %c0_132 = arith.constant 0 : index
    %73 = vector.load %arg6[%c0_129, %c0_130, %c0_131, %c0_132] : memref<1x16x16x8xbf16, #tpu.memory_space<vmem>>, vector<1x16x16x8xbf16>
    tpu.vector_store %arg6[%c0_129, %c0_130, %c0_131, %c0_132], %72 {strides = array<i32>} : memref<1x16x16x8xbf16, #tpu.memory_space<vmem>>, vector<1x16x16x8xbf16>,
    return
  }
  func.func @transform_0(%arg0: i32) -> (i32, i32, i32, i32) {
    %c0_i32 = arith.constant 0 : i32
    %c0_i32_0 = arith.constant 0 : i32
    %c0_i32_1 = arith.constant 0 : i32
    %c0_i32_2 = arith.constant 0 : i32
    return %arg0, %c0_i32, %c0_i32_0, %c0_i32_1 : i32, i32, i32, i32
  }
  func.func @transform_1(%arg0: i32) -> (i32, i32) {
    %c0_i32 = arith.constant 0 : i32
    %c0_i32_0 = arith.constant 0 : i32
    %c0_i32_1 = arith.constant 0 : i32
    return %c0_i32, %c0_i32_0 : i32, i32
  }
  func.func @transform_2(%arg0: i32) -> (i32, i32) {
    %c0_i32 = arith.constant 0 : i32
    %c0_i32_0 = arith.constant 0 : i32
    %c0_i32_1 = arith.constant 0 : i32
    return %c0_i32, %c0_i32_0 : i32, i32
  }
  func.func @transform_3(%arg0: i32) -> (i32, i32) {
    %c0_i32 = arith.constant 0 : i32
    %c0_i32_0 = arith.constant 0 : i32
    %c0_i32_1 = arith.constant 0 : i32
    return %c0_i32, %c0_i32_0 : i32, i32
  }
  func.func @transform_4(%arg0: i32) -> (i32, i32) {
    %c0_i32 = arith.constant 0 : i32
    %c0_i32_0 = arith.constant 0 : i32
    %c0_i32_1 = arith.constant 0 : i32
    return %c0_i32, %c0_i32_0 : i32, i32
  }
  func.func @transform_5(%arg0: i32) -> (i32, i32, i32, i32) {
    %c0_i32 = arith.constant 0 : i32
    %c0_i32_0 = arith.constant 0 : i32
    %c0_i32_1 = arith.constant 0 : i32
    %c0_i32_2 = arith.constant 0 : i32
    return %arg0, %c0_i32, %c0_i32_0, %c0_i32_1 : i32, i32, i32, i32
  }
}

</mosaic_0001>

<bundles_post_ra>
// kernel: tpu_custom_call.1
= control target key start
LH: loop header
LB: loop body
LE: loop exit
PB: predicated region body
PF: predicated region fallthrough
CT: control target
= control target key end

     0   :  { %s8959_s18 = smov 0   ;;  %s12906_s0 = inlined_call_operand.vmem [shape: bf16[2,16,16,8], index: 0, kind: input, shape index: {}]   ;;  %s12907_s1 = inlined_call_operand.vmem [shape: bf16[72,8], index: 1, kind: input, shape index: {}]   ;;  %s12908_s2 = inlined_call_operand.vmem [shape: f32[1,8], index: 2, kind: input, shape index: {}]   ;;  %s12909_s3 = inlined_call_operand.vmem [shape: bf16[72,8], index: 3, kind: input, shape index: {}]   ;;  %s12910_s4 = inlined_call_operand.vmem [shape: f32[1,8], index: 4, kind: input, shape index: {}]   ;;  %s12911_s5 = inlined_call_operand.vmem [shape: bf16[2,16,16,8], index: 5, kind: output, shape index: {}]  }
   0x1 LB: > { %s7996_s19 = sadd.s32 4294967295, %s8918_s18   ;;  %p8000_p0 = scmp.ge.s32.totalorder %s8918_s18, 1  ;;  %s8918_s18 = sphi %s8959_s18, %s15_s18  }
   0x2   : > { %p187_p1 = scmp.lt.s32.totalorder %s8918_s18, 3 }
   0x4   : > { %p188_p2 = pnand %p8000_p0, %p187_p1 }
   0x6   : > { %191 = sbr.rel (%p188_p2) target bundleno = 1230 (0x4ce), region = 40 }
   0xd   : > { %vm226_vm0 = vcmask 60416   ;;  %vm229_vm1 = vcmask 57344   ;;  %vm236_vm2 = vsmask.f32 256  ;;  %v8920_v0 = vmov 0   ;;  %p215_p3 = scmp.lt.s32.totalorder %s7996_s19, 1 }
   0xe   : > { %227 = vst.msk [vmem:[#allocation2] sm:$0xf] %vm226_vm0, %v8920_v0  ;;  %228 = vst.msk [vmem:[#allocation2 + $0x4] sm:$0xf] %vm226_vm0, %v8920_v0  ;;  %vm292_vm4 = vsmask.f32 7938 }
   0xf   : > { %230 = vst.msk [vmem:[#allocation2 + $0x8] sm:$0x1] %vm229_vm1, %v8920_v0  ;;  %vm8972_vm3 = vmand %vm229_vm1, %vm236_vm2  ;;  %v241_v2 = vld [vmem:[#allocation2 + $0xc] sm:$0x1]  ;;  %v244_v3 = vld [vmem:[#allocation2 + $0x18] sm:$0x1] }
  0x10   : > { %232 = vst.msk [vmem:[#allocation2 + $0xcc] sm:$0xf] %vm226_vm0, %v8920_v0  ;;  %233 = vst.msk [vmem:[#allocation2 + $0xd0] sm:$0xf] %vm226_vm0, %v8920_v0  ;;  %s13014_s19 = smov (!%p215_p3, %s7996_s19), 1  ;;  %v242_v4 = vsel %vm8972_vm3, 0, %v241_v2 }
  0x11   : > { %234 = vst.msk [vmem:[#allocation2 + $0xd4] sm:$0x1] %vm229_vm1, %v8920_v0  ;;  %350 = vst.msk [vmem:[#allocation3 + $0x8] sm:$0x1] %vm229_vm1, %v8920_v0  ;;  %v245_v5 = vsel %vm8972_vm3, 0, %v244_v3  ;;  %vm1431_vm6 = vcmask 1042432  }
  0x12   : > { %348 = vst.msk [vmem:[#allocation3] sm:$0xf] %vm226_vm0, %v8920_v0  ;;  %349 = vst.msk [vmem:[#allocation3 + $0x4] sm:$0xf] %vm226_vm0, %v8920_v0  ;;  %v247_v6 = vld [vmem:[#allocation2 + $0x24] sm:$0x1] }
  0x13   : > { %352 = vst.msk [vmem:[#allocation3 + $0xcc] sm:$0xf] %vm226_vm0, %v8920_v0  ;;  %353 = vst.msk [vmem:[#allocation3 + $0xd0] sm:$0xf] %vm226_vm0, %v8920_v0  ;;  %v248_v7 = vsel %vm8972_vm3, 0, %v247_v6  ;;  %s8499_s20 = sshll.u32 %s13014_s19, 7 }
  0x14   : > { %354 = vst.msk [vmem:[#allocation3 + $0xd4] sm:$0x1] %vm229_vm1, %v8920_v0  ;;  %243 = vst [vmem:[#allocation2 + $0xc] sm:$0x1] %v242_v4  ;;  %v297_v9 = vld [vmem:[#allocation2 + $0x14] sm:$0x1]  ;;  %s9005_s23 = scalar_lea.vmem %s12906_s0, %s8499_s20 }
  0x15   : > { %246 = vst [vmem:[#allocation2 + $0x18] sm:$0x1] %v245_v5  ;;  %vm8995_vm5 = vmand %vm229_vm1, %vm292_vm4  ;;  %v300_v10 = vld [vmem:[#allocation2 + $0x20] sm:$0x1]  ;;  %vm1432_vm7 = vcmask 1046532   ;;  %s8921_s24 = smov 16  }
  0x16   : > { %249 = vst [vmem:[#allocation2 + $0x24] sm:$0x1] %v248_v7  ;;  %vm495_vm8 = vsmask.f32 4368  ;;  %v298_v11 = vsel %vm8995_vm5, 0, %v297_v9  ;;  %v301_v12 = vsel %vm8995_vm5, 0, %v300_v10  ;;  %vm9024_vm9 = vmor %vm1431_vm6, %vm1432_vm7 }
  0x17   : > { %v463_v13 = vld [vmem:[%s9005_s23] sm:$0xf]  ;;  %v464_v14 = vld [vmem:[%s9005_s23 + $0x4] sm:$0xf]  ;;  %v465_v15 = vld [vmem:[%s9005_s23 + $0x8] sm:$0xf] }
  0x18   : > { %299 = vst [vmem:[#allocation2 + $0x14] sm:$0x1] %v298_v11  ;;  %302 = vst [vmem:[#allocation2 + $0x20] sm:$0x1] %v301_v12  ;;  %v294_v16 = vld [vmem:[#allocation2 + $0x8] sm:$0x1] }
  0x19   : > { %v9014_v17 = vld [vmem:[#allocation2 + $0x4] sm:$0xf]  ;;  %v1367_v18 = vld [vmem:[#allocation2] sm:$0xe]  ;;  %v295_v19 = vsel %vm8995_vm5, 0, %v294_v16  ;;  %v498_v23 = vshrl.u32 %v463_v13, 16  ;;  %vm9030_vm10 = vmand %vm226_vm0, %vm292_vm4 }
  0x1a   : > { %v8005_v20 = vrot.slane %v1367_v18, 9  ;;  %v1436_v21 = vrot.slane %v9014_v17, 5  ;;  %v238_v22 = vld [vmem:[#allocation2] sm:$0x1]  ;;  %296 = vst [vmem:[#allocation2 + $0x8] sm:$0x1] %v295_v19  ;;  %vm9036_vm11 = vmor %vm236_vm2, %vm495_vm8 }
  0x1b   : > { %v239_v24 = vsel %vm8972_vm3, 0, %v238_v22  ;;  %v501_v25 = vshll.u32 %v463_v13, 16  ;;  %v506_v26 = vshrl.u32 %v464_v14, 16  ;;  %v509_v27 = vshll.u32 %v464_v14, 16  ;;  %v466_v28 = vld [vmem:[%s9005_s23 + $0xc] sm:$0xf] }
  0x1c   : > { %240 = vst [vmem:[#allocation2] sm:$0x1] %v239_v24  ;;  %v500_v30 = vrot.slane %v498_v23, 7  ;;  %v515_v31 = vshrl.u32 %v465_v15, 16  ;;  %v820_v34 = vld [vmem:[#allocation2 + $0xc] sm:$0xf]  ;;  %v1437_v44 = vsel %vm9024_vm9, %v8005_v20, %v1436_v21 }
  0x1d   : > { %v508_v32 = vrot.slane %v506_v26, 7  ;;  %v518_v35 = vshll.u32 %v465_v15, 16  ;;  %v523_v36 = vshrl.u32 %v466_v28, 16  ;;  %v526_v37 = vshll.u32 %v466_v28, 16  ;;  %v467_v43 = vld [vmem:[%s9005_s23 + $0x10] sm:$0xf] }
  0x1e   : > { %v1438_v38 = vrot.slane %v1436_v21, 4  ;;  %v503_v40 = vor.u32 %v501_v25, %v500_v30  ;;  %v504_v41 = vrot.slane %v500_v30, 4  ;;  %v517_v42 = vrot.slane %v515_v31, 7  ;;  %v827_v47 = vld [vmem:[#allocation2 + $0x18] sm:$0xf]  ;;  %s8922_s25 = smov 24  }
  0x1f   : > { %v511_v45 = vor.u32 %v509_v27, %v508_v32  ;;  %v525_v46 = vrot.slane %v523_v36, 7  ;;  %v468_v48 = vld [vmem:[%s9005_s23 + $0x14] sm:$0xf]  ;;  %v532_v49 = vshrl.u32 %v467_v43, 16  ;;  %v535_v53 = vshll.u32 %v467_v43, 16  ;;  %s8923_s26 = smov 48  }
  0x20   : > { %v821_v50 = vsel %vm9030_vm10, %v503_v40, %v820_v34  ;;  %v520_v51 = vor.u32 %v518_v35, %v517_v42  ;;  %v521_v52 = vrot.slane %v517_v42, 4  ;;  %v513_v55 = vrot.slane %v508_v32, 4  ;;  %v834_v58 = vld [vmem:[#allocation2 + $0x24] sm:$0xf]  ;;  %v824_v11 = vld [vmem:[#allocation2 + $0x14] sm:$0x1] }
  0x21   : > { %v512_v54 = vsel %vm9036_vm11, %v504_v41, %v511_v45  ;;  %822 = vst [vmem:[#allocation2 + $0xc] sm:$0xf] %v821_v50  ;;  %v528_v56 = vor.u32 %v526_v37, %v525_v46  ;;  %v534_v57 = vrot.slane %v532_v49, 7  ;;  %v964_v59 = vld [vmem:[#allocation2 + $0x8] sm:$0x1]  ;;  %v540_v61 = vshrl.u32 %v468_v48, 16 }
  0x22   : > { %823 = vst.msk [vmem:[#allocation2 + $0x10] sm:$0xf] %vm226_vm0, %v512_v54  ;;  %v828_v60 = vsel %vm9030_vm10, %v520_v51, %v827_v47  ;;  %v543_v62 = vshll.u32 %v468_v48, 16  ;;  %v993_v63 = vshll.u32 %v9014_v17, 16  ;;  %v1439_v0 = vrot.slane %v964_v59, 5  ;;  %s8924_s27 = smov 8  }
  0x23   : > { %v529_v2 = vsel %vm9036_vm11, %v521_v52, %v528_v56  ;;  %v530_v3 = vrot.slane %v525_v46, 4  ;;  %829 = vst [vmem:[#allocation2 + $0x18] sm:$0xf] %v828_v60  ;;  %v537_v4 = vor.u32 %v535_v53, %v534_v57  ;;  %v932_v5 = vld [vmem:[#allocation2] sm:$0xf]  ;;  %v538_v6 = vrot.slane %v534_v57, 4 }
  0x24   : > { %830 = vst.msk [vmem:[#allocation2 + $0x1c] sm:$0xf] %vm226_vm0, %v529_v2  ;;  %v9055_v7 = vrot.slane %v540_v61, 7  ;;  %v984_v9 = vshrl.u32 %v932_v5, 16  ;;  %v987_v10 = vshll.u32 %v932_v5, 16  ;;  %v1003_v12 = vshll.u32 %v964_v59, 16 }
  0x25   : > { %v1440_v13 = vsel %vm9024_vm9, %v1438_v38, %v1439_v0  ;;  %v835_v14 = vsel %vm9030_vm10, %v537_v4, %v834_v58  ;;  %v997_v15 = vshrl.u32 %v9014_v17, 16  ;;  %v831_v16 = vld [vmem:[#allocation2 + $0x20] sm:$0x1]  ;;  %v9063_v21 = vrot.slane %v993_v63, 5  ;;  %s8925_s28 = smov 40   ;;  %s8926_s29 = smov 64  }
  0x26   : > { %v8085_v18 = vcombine.low %v1437_v44, %v1440_v13  ;;  %v545_v19 = vor.u32 %v543_v62, %v9055_v7  ;;  %836 = vst [vmem:[#allocation2 + $0x24] sm:$0xf] %v835_v14  ;;  %v986_v20 = vrot.slane %v984_v9, 4  ;;  %v989_v22 = vrot.slane %v987_v10, 5  ;;  %s8927_s30 = smov 32   ;;  %s8928_s6 = smov 56  }
  0x27   : > { %v999_v23 = vrot.slane %v997_v15, 4  ;;  %v825_v24 = vsel %vm8972_vm3, %v513_v55, %v824_v11  ;;  %vm980_vm12 = vsmask.f32 3328  ;;  %vm981_vm13 = vsmask.f32 7440 }
  0x28   : > { %2955 = vrot.lane.b32.xlu1 %v8085_v18, %s8921_s24  ;;  %v1546_v25 = vld [vmem:[#allocation2 + $0xc] sm:$0xf]  ;;  %v546_v17 = vsel %vm9036_vm11, %v538_v6, %v545_v19  ;;  %826 = vst [vmem:[#allocation2 + $0x14] sm:$0x1] %v825_v24  ;;  %v832_v26 = vsel %vm8972_vm3, %v530_v3, %v831_v16  ;;  %v547_v31 = vrot.slane %v9055_v7, 4  ;;  %v1005_v32 = vrot.slane %v1003_v12, 5  ;;  %vm9111_vm14 = vmor %vm980_vm12, %vm981_vm13 }
  0x29   : > { %v9072_v27 = vld [vmem:[#allocation2 + $0x10] sm:$0xf]  ;;  %v1595_v28 = vshrl.u32 %v1546_v25, 16  ;;  %v1598_v30 = vshll.u32 %v1546_v25, 16  ;;  %837 = vst.msk [vmem:[#allocation2 + $0x28] sm:$0xf] %vm226_vm0, %v546_v17  ;;  %v990_v38 = vor.u32 %v989_v22, %v986_v20  ;;  %v1000_v40 = vor.u32 %v999_v23, %v9063_v21 }
  0x2a   : > { %833 = vst [vmem:[#allocation2 + $0x20] sm:$0x1] %v832_v26  ;;  %v1608_v34 = vshrl.u32 %v9072_v27, 16  ;;  %v8101_v35 = vcombine.low %v1546_v25, %v9072_v27  ;;  %v1548_v36 = vld [vmem:[#allocation2 + $0x18] sm:$0xf]  ;;  %v1604_v48 = vshll.u32 %v9072_v27, 16 }
  0x2b   : > { %v9078_v37 = vld [vmem:[#allocation2 + $0x18] sm:$0xf]  ;;  %v9081_v41 = vrot.slane %v1595_v28, 4  ;;  %v9083_v42 = vrot.slane %v1598_v30, 5  ;;  %v9085_v43 = vld [vmem:[#allocation2 + $0x1c] sm:$0xf] }
  0x2c   : > { %v1619_v44 = vshrl.u32 %v1548_v36, 16  ;;  %v1622_v45 = vshll.u32 %v1548_v36, 16  ;;  %v9087_v46 = vld [vmem:[#allocation2 + $0x10] sm:$0xf]  ;;  %v1368_v47 = vld [vmem:[#allocation2 + $0xc] sm:$0xe]  ;;  %3051 = vrot.lane.b32.xlu0 %v8101_v35, %s8922_s25  ;;  %v8102_v50 = vcombine.low %v1548_v36, %v9085_v43 }
  0x2d   : > { %v9090_v49 = vrot.slane %v1608_v34, 4  ;;  %v9094_v51 = vld [vmem:[#allocation2 + $0x1c] sm:$0xf]  ;;  %v2204_v52 = vshrl.u32 %v9078_v37, 16  ;;  %v1632_v53 = vshrl.u32 %v9085_v43, 16  ;;  %v2207_v56 = vshll.u32 %v9078_v37, 16 }
  0x2e   : > { %v9098_v54 = vrot.slane %v1619_v44, 4  ;;  %v9100_v55 = vrot.slane %v1622_v45, 5  ;;  %v2157_v57 = vld [vmem:[#allocation2 + $0x24] sm:$0xf]  ;;  %3053 = vrot.lane.b32.xlu1 %v8102_v50, %s8922_s25  ;;  %v2217_v59 = vshrl.u32 %v9094_v51, 16  ;;  %v8149_v60 = vcombine.low %v9078_v37, %v9094_v51 }
  0x2f   : > { %v9104_v58 = vrot.slane %v2204_v52, 4  ;;  %v2228_v61 = vshrl.u32 %v2157_v57, 16  ;;  %v1978_v63 = vld [vmem:[#allocation2 + $0xc] sm:$0xe]  ;;  %v1601_v0 = vor.u32 %v9083_v42, %v9081_v41  ;;  %v2231_v2 = vshll.u32 %v2157_v57, 16 }
  0x30   : > { %v991_v3 = vrot.slane %v990_v38, 4  ;;  %v9117_v4 = vld [vmem:[#allocation2 + $0x14] sm:$0x1]  ;;  %v1979_v5 = vld [vmem:[#allocation2 + $0x18] sm:$0xe]  ;;  %3307 = vrot.lane.b32.xlu0 %v8149_v60, %s8923_s26  ;;  %v1001_v10 = vrot.slane %v1000_v40, 4 }
  0x31   : > { %v9120_v6 = vld [vmem:[#allocation2 + $0x28] sm:$0xf]  ;;  %v9122_v9 = vrot.slane %v2228_v61, 4  ;;  %v8006_v11 = vrot.slane %v1368_v47, 9  ;;  %v1443_v12 = vrot.slane %v9087_v46, 5  ;;  %v9125_v13 = vrot.slane %v2231_v2, 5 }
  0x32   : > { %v2241_v14 = vshrl.u32 %v9120_v6, 16  ;;  %v8150_v15 = vcombine.low %v2157_v57, %v9120_v6  ;;  %v996_v16 = vsel %vm9111_vm14, %v991_v3, %v9063_v21  ;;  %v9132_v18 = vld [vmem:[#allocation2 + $0x14] sm:$0x1]  ;;  %v1579_v19 = vld [vmem:[#allocation2 + $0x20] sm:$0x1]  ;;  %v1006_v20 = vsel %vm9111_vm14, %v1001_v10, %v1005_v32 }
  0x33   : > { %v1444_v22 = vsel %vm9024_vm9, %v8006_v11, %v1443_v12  ;;  %v1445_v23 = vrot.slane %v1443_v12, 4  ;;  %v1446_v24 = vrot.slane %v9117_v4, 5  ;;  %v2587_v25 = vld [vmem:[#allocation2 + $0x18] sm:$0xe]  ;;  %v8069_v17 = vcombine.low %v996_v16, %v1006_v20  ;;  %v9142_v30 = vld [vmem:[#allocation2 + $0x20] sm:$0x1] }
  0x34   : > { %3309 = vrot.lane.b32.xlu1 %v8150_v15, %s8923_s26  ;;  %v8021_v26 = vrot.slane %v1978_v63, 9  ;;  %v2044_v28 = vrot.slane %v9072_v27, 5  ;;  %v2047_v21 = vrot.slane %v9132_v18, 5  ;;  %v8022_v34 = vrot.slane %v1979_v5, 9  ;;  %v303_v63 = vld [vmem:[#allocation2 + $0x2c] sm:$0x1] }
  0x35   : > { %v1447_v32 = vsel %vm9024_vm9, %v1445_v23, %v1446_v24  ;;  %v2051_v35 = vrot.slane %v9085_v43, 5  ;;  %v2054_v36 = vrot.slane %v1579_v19, 5  ;;  %2875 = vrot.lane.b32.xlu0 %v8069_v17, %s8924_s27  ;;  %v8037_v42 = vrot.slane %v2587_v25, 9  ;;  %v2588_v2 = vld [vmem:[#allocation2 + $0x24] sm:$0xe] }
  0x36   : > { %v8086_v38 = vcombine.low %v1444_v22, %v1447_v32  ;;  %v2045_v40 = vsel %vm9024_vm9, %v8021_v26, %v2044_v28  ;;  %v2046_v41 = vrot.slane %v2044_v28, 4  ;;  %v2653_v47 = vrot.slane %v9094_v51, 5 }
  0x37   : > { %v2052_v44 = vsel %vm9024_vm9, %v8022_v34, %v2051_v35  ;;  %v2053_v45 = vrot.slane %v2051_v35, 4  ;;  %v2656_v50 = vrot.slane %v9142_v30, 5  ;;  %v1625_v57 = vor.u32 %v9100_v55, %v9098_v54  ;;  %v9171_v55 = vld [vmem:[#allocation2 + $0xc] sm:$0xf] }
  0x38   : > { %2957 = vrot.lane.b32.xlu1 %v8086_v38, %s8921_s24  ;;  %v2048_v52 = vsel %vm9024_vm9, %v2046_v41, %v2047_v21  ;;  %v1628_v60 = vshll.u32 %v9085_v43, 16  ;;  %v1634_v61 = vrot.slane %v1632_v53, 4  ;;  %v2654_v10 = vsel %vm9024_vm9, %v8037_v42, %v2653_v47  ;;  %v9200_v41 = vld [vmem:[#allocation2 + $0x1c] sm:$0xf] }
  0x39   : > { %v8133_v3 = vcombine.low %v2045_v40, %v2048_v52  ;;  %v2055_v5 = vsel %vm9024_vm9, %v2053_v45, %v2054_v36  ;;  %v2655_v11 = vrot.slane %v2653_v47, 4  ;;  %v1626_v15 = vrot.slane %v1625_v57, 4  ;;  %v9207_v57 = vld [vmem:[#allocation2 + $0x20] sm:$0x1] }
  0x3a   : > { %v8134_v12 = vcombine.low %v2052_v44, %v2055_v5  ;;  %v1630_v16 = vrot.slane %v1628_v60, 5  ;;  %v1638_v20 = vshll.u32 %v1579_v19, 16  ;;  %v9164_v22 = vrot.slane %v1601_v0, 4 }
  0x3b   : > { %3211 = vrot.lane.b32.xlu0 %v8133_v3, %s8925_s28  ;;  %v2657_v43 = vsel %vm9024_vm9, %v2655_v11, %v2656_v50  ;;  %v304_v53 = vsel %vm8995_vm5, 0, %v303_v63  ;;  %v8038_v54 = vrot.slane %v2588_v2, 9  ;;  %v9175_v23 = vrot.slane %v2207_v56, 5 }
  0x3c   : > { %3213 = vrot.lane.b32.xlu1 %v8134_v12, %s8925_s28  ;;  %v8181_v0 = vcombine.low %v2654_v10, %v2657_v43  ;;  %v1635_v19 = vor.u32 %v1634_v61, %v1630_v16  ;;  %v1640_v24 = vrot.slane %v1638_v20, 5  ;;  %305 = vst [vmem:[#allocation2 + $0x2c] sm:$0x1] %v304_v53  ;;  %v1631_v25 = vsel %vm9111_vm14, %v1626_v15, %v1630_v16  ;;  %v9218_v15 = vld [vmem:[#allocation2 + $0x24] sm:$0xf] }
  0x3d   : > { %v2660_v17 = vrot.slane %v9120_v6, 5  ;;  %v2234_v26 = vor.u32 %v9125_v13, %v9122_v9  ;;  %v2237_v28 = vshll.u32 %v9120_v6, 16  ;;  %v2243_v37 = vrot.slane %v2241_v14, 4  ;;  %v9195_v6 = vld [vmem:[#allocation2 + $0x18] sm:$0xf] }
  0x3e   : > { %v1636_v21 = vrot.slane %v1635_v19, 4  ;;  %v1008_v56 = vshrl.u32 %v9171_v55, 16  ;;  %v1011_v32 = vshll.u32 %v9171_v55, 16  ;;  %v1017_v36 = vshll.u32 %v9087_v46, 16 }
  0x3f   : > { %3467 = vrot.lane.b32.xlu0 %v8181_v0, %s8926_s29  ;;  %v9189_v34 = vsel %vm9024_vm9, %v8038_v54, %v2660_v17  ;;  %v9191_v35 = vrot.slane %v2237_v28, 5  ;;  %v1021_v9 = vshrl.u32 %v9087_v46, 16  ;;  %v1027_v40 = vshll.u32 %v9117_v4, 16 }
  0x40   : > { %v1641_v13 = vsel %vm9111_vm14, %v1636_v21, %v1640_v24  ;;  %v1010_v14 = vrot.slane %v1008_v56, 4  ;;  %v1013_v38 = vrot.slane %v1011_v32, 5  ;;  %v9202_v44 = vrot.slane %v2660_v17, 4  ;;  %v9230_v17 = vld [vmem:[#allocation2 + $0x28] sm:$0xf] }
  0x41   : > { %v8118_v42 = vcombine.low %v1631_v25, %v1641_v13  ;;  %v9204_v45 = vrot.slane %v2234_v26, 4  ;;  %v1019_v47 = vrot.slane %v1017_v36, 5  ;;  %v2244_v50 = vor.u32 %v2243_v37, %v9191_v35 }
  0x42   : > { %v1014_v46 = vor.u32 %v1013_v38, %v1010_v14  ;;  %v1023_v52 = vrot.slane %v1021_v9, 4  ;;  %v1032_v60 = vshrl.u32 %v9195_v6, 16  ;;  %v1029_v61 = vrot.slane %v1027_v40, 5 }
  0x43   : > { %3133 = vrot.lane.b32.xlu1 %v8118_v42, %s8927_s30  ;;  %v838_v4 = vld [vmem:[#allocation2 + $0x2c] sm:$0x1]  ;;  %v1035_v63 = vshll.u32 %v9195_v6, 16  ;;  %v1041_v2 = vshll.u32 %v9200_v41, 16  ;;  %v1045_v3 = vshrl.u32 %v9200_v41, 16  ;;  %v1051_v53 = vshll.u32 %v9207_v57, 16 }
  0x44   : > { %v839_v5 = vsel %vm8972_vm3, %v547_v31, %v838_v4  ;;  %v1015_v10 = vrot.slane %v1014_v46, 4  ;;  %v1024_v11 = vor.u32 %v1023_v52, %v1019_v47  ;;  %v1034_v12 = vrot.slane %v1032_v60, 4 }
  0x45   : > { %840 = vst [vmem:[#allocation2 + $0x2c] sm:$0x1] %v839_v5  ;;  %v1037_v16 = vrot.slane %v1035_v63, 5  ;;  %v1043_v20 = vrot.slane %v1041_v2, 5  ;;  %v1047_v43 = vrot.slane %v1045_v3, 4  ;;  %v2240_v54 = vsel %vm9111_vm14, %v9204_v45, %v9191_v35 }
  0x46   : > { %v1025_v7 = vrot.slane %v1024_v11, 4  ;;  %v9227_v31 = vrot.slane %v1604_v48, 5  ;;  %v1614_v0 = vshll.u32 %v9132_v18, 16  ;;  %v1053_v25 = vrot.slane %v1051_v53, 5  ;;  %v1370_v2 = vld [vmem:[#allocation2 + $0x24] sm:$0xe] }
  0x47   : > { %v1038_v19 = vor.u32 %v1037_v16, %v1034_v12  ;;  %v1048_v24 = vor.u32 %v1047_v43, %v1043_v20  ;;  %v1056_v26 = vshrl.u32 %v9218_v15, 16  ;;  %v2245_v28 = vrot.slane %v2244_v50, 4  ;;  %v1369_v16 = vld [vmem:[#allocation2 + $0x18] sm:$0xe] }
  0x48   : > { %v1020_v21 = vsel %vm9111_vm14, %v1015_v10, %v1019_v47  ;;  %v1030_v37 = vsel %vm9111_vm14, %v1025_v7, %v1029_v61  ;;  %v1611_v27 = vor.u32 %v9090_v49, %v9227_v31  ;;  %v1616_v18 = vrot.slane %v1614_v0, 5 }
  0x49   : > { %v1039_v48 = vrot.slane %v1038_v19, 4  ;;  %v1049_v56 = vrot.slane %v1048_v24, 4  ;;  %v1058_v32 = vrot.slane %v1056_v26, 4  ;;  %v1059_v36 = vshll.u32 %v9218_v15, 16 }
  0x4a   : > { %v1612_v35 = vrot.slane %v1611_v27, 4  ;;  %v1065_v9 = vshll.u32 %v9230_v17, 16  ;;  %v1069_v13 = vshrl.u32 %v9230_v17, 16  ;;  %v2210_v49 = vor.u32 %v9175_v23, %v9104_v58 }
  0x4b   : > { %v1044_v14 = vsel %vm9111_vm14, %v1039_v48, %v1043_v20  ;;  %v1054_v38 = vsel %vm9111_vm14, %v1049_v56, %v1053_v25  ;;  %v2213_v40 = vshll.u32 %v9094_v51, 16  ;;  %v8070_v45 = vcombine.low %v1020_v21, %v1030_v37  ;;  %v469_v25 = vld [vmem:[%s9005_s23 + $0x18] sm:$0xf]  ;;  %v470_v21 = vld [vmem:[%s9005_s23 + $0x1c] sm:$0xf] }
  0x4c   : > { %v2188_v42 = vld [vmem:[#allocation2 + $0x2c] sm:$0x1]  ;;  %v1607_v47 = vsel %vm9111_vm14, %v9164_v22, %v9227_v31  ;;  %v1061_v46 = vrot.slane %v1059_v36, 5  ;;  %v1067_v52 = vrot.slane %v1065_v9, 5  ;;  %v8071_v61 = vcombine.low %v1044_v14, %v1054_v38  ;;  %v250_v31 = vld [vmem:[#allocation2 + $0x30] sm:$0x1] }
  0x4d   : > { %v967_v50 = vld [vmem:[#allocation2 + $0x2c] sm:$0x1]  ;;  %v2663_v60 = vrot.slane %v2188_v42, 5  ;;  %v2247_v4 = vshll.u32 %v2188_v42, 16  ;;  %v1071_v63 = vrot.slane %v1069_v13, 4  ;;  %v2211_v58 = vrot.slane %v2210_v49, 4 }
  0x4e   : > { %v1062_v3 = vor.u32 %v1061_v46, %v1058_v32  ;;  %v1075_v5 = vshll.u32 %v967_v50, 16  ;;  %v2215_v23 = vrot.slane %v2213_v40, 5  ;;  %v2219_v22 = vrot.slane %v2217_v59, 4  ;;  %v9279_v13 = vld [vmem:[#allocation2 + $0x24] sm:$0xf] }
  0x4f   : > { %v2664_v10 = vsel %vm9024_vm9, %v9202_v44, %v2663_v60  ;;  %v2249_v11 = vrot.slane %v2247_v4, 5  ;;  %v1072_v12 = vor.u32 %v1071_v63, %v1067_v52  ;;  %v1617_v43 = vsel %vm9111_vm14, %v1612_v35, %v1616_v18  ;;  %v9286_v42 = vld [vmem:[#allocation2 + $0x28] sm:$0xf]  ;;  %v306_v63 = vld [vmem:[#allocation2 + $0x38] sm:$0x1] }
  0x50   : > { %v8182_v20 = vcombine.low %v9189_v34, %v2664_v10  ;;  %v1063_v53 = vrot.slane %v1062_v3, 4  ;;  %v1077_v7 = vrot.slane %v1075_v5, 5  ;;  %v2220_v44 = vor.u32 %v2219_v22, %v2215_v23  ;;  %v1980_v22 = vld [vmem:[#allocation2 + $0x24] sm:$0xe] }
  0x51   : > { %v2250_v0 = vsel %vm9111_vm14, %v2245_v28, %v2249_v11  ;;  %v1073_v19 = vrot.slane %v1072_v12, 4  ;;  %v2223_v24 = vshll.u32 %v9142_v30, 16  ;;  %v8008_v34 = vrot.slane %v1370_v2, 9 }
  0x52   : > { %3469 = vrot.lane.b32.xlu0 %v8182_v20, %s8926_s29  ;;  %v8166_v51 = vcombine.low %v2240_v54, %v2250_v0  ;;  %v1068_v59 = vsel %vm9111_vm14, %v1063_v53, %v1067_v52  ;;  %v1457_v26 = vrot.slane %v9230_v17, 5  ;;  %v2221_v27 = vrot.slane %v2220_v44, 4 }
  0x53   : > { %v1078_v37 = vsel %vm9111_vm14, %v1073_v19, %v1077_v7  ;;  %v2225_v28 = vrot.slane %v2223_v24, 5  ;;  %v1460_v48 = vrot.slane %v967_v50, 5  ;;  %v8117_v30 = vcombine.low %v1607_v47, %v1617_v43  ;;  %v253_v7 = vld [vmem:[#allocation2 + $0x3c] sm:$0x1]  ;;  %v471_v24 = vld [vmem:[%s9005_s23 + $0x20] sm:$0xf] }
  0x54   : > { %3389 = vrot.lane.b32.xlu1 %v8166_v51, %s8928_s6  ;;  %v2216_v54 = vsel %vm9111_vm14, %v2211_v58, %v2215_v23  ;;  %v1459_v56 = vrot.slane %v1457_v26, 4  ;;  %v8007_v18 = vrot.slane %v1369_v16, 9  ;;  %v8072_v32 = vcombine.low %v1068_v59, %v1078_v37  ;;  %v1580_v23 = vld [vmem:[#allocation2 + $0x2c] sm:$0x1] }
  0x55   : > { %v1450_v35 = vrot.slane %v9200_v41, 5  ;;  %v1453_v36 = vrot.slane %v9207_v57, 5  ;;  %v251_v9 = vsel %vm8972_vm3, 0, %v250_v31  ;;  %v2226_v14 = vsel %vm9111_vm14, %v2221_v27, %v2225_v28 }
  0x56   : > { %2877 = vrot.lane.b32.xlu0 %v8070_v45, %s8924_s27  ;;  %v1458_v38 = vsel %vm9024_vm9, %v8008_v34, %v1457_v26  ;;  %252 = vst [vmem:[#allocation2 + $0x30] sm:$0x1] %v251_v9  ;;  %v549_v49 = vshrl.u32 %v469_v25, 16  ;;  %v552_v40 = vshll.u32 %v469_v25, 16  ;;  %v1461_v57 = vsel %vm9024_vm9, %v1459_v56, %v1460_v48 }
  0x57   : > { %v1451_v47 = vsel %vm9024_vm9, %v8007_v18, %v1450_v35  ;;  %v1452_v50 = vrot.slane %v1450_v35, 4  ;;  %v557_v46 = vshrl.u32 %v470_v21, 16  ;;  %v560_v52 = vshll.u32 %v470_v21, 16  ;;  %v472_v21 = vld [vmem:[%s9005_s23 + $0x24] sm:$0xf] }
  0x58   : > { %2879 = vrot.lane.b32.xlu1 %v8071_v61, %s8924_s27  ;;  %v551_v45 = vrot.slane %v549_v49, 7  ;;  %v1643_v60 = vshrl.u32 %v9279_v13, 16  ;;  %v1646_v4 = vshll.u32 %v9279_v13, 16  ;;  %v8165_v2 = vcombine.low %v2216_v54, %v2226_v14  ;;  %v256_v35 = vld [vmem:[#allocation2 + $0x48] sm:$0x1] }
  0x59   : > { %v1454_v3 = vsel %vm9024_vm9, %v1452_v50, %v1453_v36  ;;  %v9297_v5 = vrot.slane %v557_v46, 7  ;;  %v1656_v58 = vshrl.u32 %v9286_v42, 16  ;;  %v8088_v10 = vcombine.low %v1458_v38, %v1461_v57 }
  0x5a   : > { %3131 = vrot.lane.b32.xlu0 %v8117_v30, %s8927_s30  ;;  %v554_v61 = vor.u32 %v552_v40, %v551_v45  ;;  %v555_v11 = vrot.slane %v551_v45, 4  ;;  %v1645_v12 = vrot.slane %v1643_v60, 4  ;;  %v8087_v16 = vcombine.low %v1451_v47, %v1454_v3  ;;  %v309_v30 = vld [vmem:[#allocation2 + $0x44] sm:$0x1] }
  0x5b   : > { %v562_v20 = vor.u32 %v560_v52, %v9297_v5  ;;  %v1648_v43 = vrot.slane %v1646_v4, 5  ;;  %v307_v53 = vsel %vm8995_vm5, 0, %v306_v63  ;;  %v564_v31 = vrot.slane %v9297_v5, 4 }
  0x5c   : > { %2881 = vrot.lane.b32.xlu1 %v8072_v32, %s8924_s27  ;;  %308 = vst [vmem:[#allocation2 + $0x38] sm:$0x1] %v307_v53  ;;  %v1652_v0 = vshll.u32 %v9286_v42, 16  ;;  %v1658_v19 = vrot.slane %v1656_v58, 4  ;;  %v1662_v44 = vshll.u32 %v1580_v23, 16  ;;  %v8023_v34 = vrot.slane %v1980_v22, 9 }
  0x5d   : > { %v563_v25 = vsel %vm9036_vm11, %v555_v11, %v562_v20  ;;  %v841_v51 = vld [vmem:[#allocation2 + $0x30] sm:$0xf]  ;;  %v1649_v59 = vor.u32 %v1648_v43, %v1645_v12  ;;  %v2058_v26 = vrot.slane %v9286_v42, 5  ;;  %v2061_v28 = vrot.slane %v1580_v23, 5  ;;  %v8805_v58 = vld [vmem:[%s12907_s1] sm:$0xff]  }
  0x5e   : > { %3387 = vrot.lane.b32.xlu0 %v8165_v2, %s8928_s6  ;;  %v842_v37 = vsel %vm9030_vm10, %v554_v61, %v841_v51  ;;  %844 = vst.msk [vmem:[#allocation2 + $0x34] sm:$0xf] %vm226_vm0, %v563_v25  ;;  %v1654_v27 = vrot.slane %v1652_v0, 5  ;;  %v254_v48 = vsel %vm8972_vm3, 0, %v253_v7  ;;  %v1664_v56 = vrot.slane %v1662_v44, 5  ;;  %8686 = vmatprep.subr.bf16.mxu0 %v8805_v58 }
  0x5f   : > { %843 = vst [vmem:[#allocation2 + $0x30] sm:$0xf] %v842_v37  ;;  %v1650_v54 = vrot.slane %v1649_v59, 4  ;;  %v2060_v18 = vrot.slane %v2058_v26, 4  ;;  %255 = vst [vmem:[#allocation2 + $0x3c] sm:$0x1] %v254_v48  ;;  %v8103_v49 = vcombine.low %v9279_v13, %v9286_v42  ;;  %v9323_v40 = vsel %vm9024_vm9, %v8023_v34, %v2058_v26  ;;  %8687 = vmatpush3.bf16.msra.mxu0 %v8805_v58 }
  0x60   : > { %v566_v32 = vshrl.u32 %v471_v24, 16  ;;  %2961 = vrot.lane.b32.xlu1 %v8088_v10, %s8921_s24  ;;  %v1659_v36 = vor.u32 %v1658_v19, %v1654_v27  ;;  %v569_v9 = vshll.u32 %v471_v24, 16  ;;  %v574_v14 = vshrl.u32 %v472_v21, 16  ;;  %v9337_v42 = vld [vmem:[%s9005_s23 + $0x28] sm:$0xf] }
  0x61   : > { %v577_v38 = vshll.u32 %v472_v21, 16  ;;  %v310_v47 = vsel %vm8995_vm5, 0, %v309_v30  ;;  %v9330_v46 = vsel %vm9024_vm9, %v2060_v18, %v2061_v28  ;;  %v257_v13 = vsel %vm8972_vm3, 0, %v256_v35  ;;  %v8806_v21 = vld [vmem:[%s12907_s1 + $0x8] sm:$0xff]  }
  0x62   : > { %v568_v57 = vrot.slane %v566_v32, 7  ;;  %2959 = vrot.lane.b32.xlu0 %v8087_v16, %s8921_s24  ;;  %v1660_v50 = vrot.slane %v1659_v36, 4  ;;  %v9332_v45 = vrot.slane %v574_v14, 7  ;;  %311 = vst [vmem:[#allocation2 + $0x44] sm:$0x1] %v310_v47  ;;  %v1655_v60 = vsel %vm9111_vm14, %v1650_v54, %v1654_v27  ;;  %8688 = vmatprep.subr.bf16.mxu0 %v8806_v21 }
  0x63   : > { %v845_v52 = vld [vmem:[#allocation2 + $0x38] sm:$0x1]  ;;  %258 = vst [vmem:[#allocation2 + $0x48] sm:$0x1] %v257_v13  ;;  %v8135_v10 = vcombine.low %v9323_v40, %v9330_v46  ;;  %v583_v12 = vshrl.u32 %v9337_v42, 16  ;;  %v586_v32 = vshll.u32 %v9337_v42, 16  ;;  %8689 = vmatpush3.bf16.msra.mxu0 %v8806_v21 }
  0x64   : > { %v572_v4 = vrot.slane %v568_v57, 4  ;;  %v846_v63 = vsel %vm8972_vm3, %v564_v31, %v845_v52  ;;  %v1665_v2 = vsel %vm9111_vm14, %v1660_v50, %v1664_v56  ;;  %v571_v3 = vor.u32 %v569_v9, %v568_v57  ;;  %v259_v42 = vld [vmem:[#allocation2 + $0x54] sm:$0x1] }
  0x65   : > { %v579_v5 = vor.u32 %v577_v38, %v9332_v45  ;;  %v1553_v23 = vld [vmem:[#allocation2 + $0x34] sm:$0xf]  ;;  %847 = vst [vmem:[#allocation2 + $0x38] sm:$0x1] %v846_v63  ;;  %v581_v61 = vrot.slane %v9332_v45, 4  ;;  %v8119_v43 = vcombine.low %v1655_v60, %v1665_v2  ;;  %vm3499_vm15 = vcmask 64512  }
  0x66   : > { %v9352_v11 = vld [vmem:[#allocation2 + $0x34] sm:$0xf]  ;;  %v1552_v22 = vld [vmem:[#allocation2 + $0x30] sm:$0xf]  ;;  %v1680_v16 = vshrl.u32 %v1553_v23, 16  ;;  %3055 = vrot.lane.b32.xlu0 %v8103_v49, %s8922_s25  ;;  %v1676_v20 = vshll.u32 %v1553_v23, 16 }
  0x67   : > { %v1981_v53 = vld [vmem:[#allocation2 + $0x30] sm:$0xe]  ;;  %v580_v7 = vsel %vm9036_vm11, %v572_v4, %v579_v5  ;;  %v1667_v31 = vshrl.u32 %v1552_v22, 16  ;;  %v1670_v0 = vshll.u32 %v1552_v22, 16  ;;  %v8104_v19 = vcombine.low %v1552_v22, %v1553_v23  ;;  %v848_v24 = vld [vmem:[#allocation2 + $0x3c] sm:$0xf] }
  0x68   : > { %v8024_v44 = vrot.slane %v1981_v53, 9  ;;  %851 = vst.msk [vmem:[#allocation2 + $0x40] sm:$0xf] %vm226_vm0, %v580_v7  ;;  %v1678_v25 = vrot.slane %v1676_v20, 5  ;;  %v1682_v51 = vrot.slane %v1680_v16, 4  ;;  %v2065_v59 = vrot.slane %v1553_v23, 5 }
  0x69   : > { %v849_v34 = vsel %vm9030_vm10, %v571_v3, %v848_v24  ;;  %v2159_v26 = vld [vmem:[#allocation2 + $0x30] sm:$0xf]  ;;  %v1669_v37 = vrot.slane %v1667_v31, 4  ;;  %v1672_v27 = vrot.slane %v1670_v0, 5  ;;  %3057 = vrot.lane.b32.xlu1 %v8104_v19, %s8922_s25  ;;  %v852_v30 = vld [vmem:[#allocation2 + $0x44] sm:$0x1] }
  0x6a   : > { %850 = vst [vmem:[#allocation2 + $0x3c] sm:$0xf] %v849_v34  ;;  %v2252_v28 = vshrl.u32 %v2159_v26, 16  ;;  %v2255_v48 = vshll.u32 %v2159_v26, 16  ;;  %v1683_v54 = vor.u32 %v1682_v51, %v1678_v25  ;;  %3135 = vrot.lane.b32.xlu0 %v8119_v43, %s8927_s30  ;;  %v9368_v56 = vsel %vm9024_vm9, %v8024_v44, %v2065_v59  ;;  %v940_v38 = vld [vmem:[#allocation2 + $0x30] sm:$0xf] }
  0x6b   : > { %v2265_v18 = vshrl.u32 %v9352_v11, 16  ;;  %v1673_v35 = vor.u32 %v1672_v27, %v1669_v37  ;;  %v2067_v36 = vrot.slane %v2065_v59, 4  ;;  %v8151_v57 = vcombine.low %v2159_v26, %v9352_v11  ;;  %v9392_v44 = vld [vmem:[#allocation2 + $0x34] sm:$0xf] }
  0x6c   : > { %v2254_v9 = vrot.slane %v2252_v28, 4  ;;  %v2257_v14 = vrot.slane %v2255_v48, 5  ;;  %v1581_v49 = vld [vmem:[#allocation2 + $0x38] sm:$0x1]  ;;  %v1684_v40 = vrot.slane %v1683_v54, 4  ;;  %v853_v47 = vsel %vm8972_vm3, %v581_v61, %v852_v30  ;;  %12930 = vst [vmem:[#allocation4_spill] sm:$0xff] %v9392_v44 }
  0x6d   : > { %v9375_v50 = vld [vmem:[#allocation2 + $0x38] sm:$0x1]  ;;  %v2261_v46 = vshll.u32 %v9352_v11, 16  ;;  %v1674_v45 = vrot.slane %v1673_v35, 4  ;;  %v1686_v13 = vshll.u32 %v1581_v49, 16  ;;  %v2068_v52 = vrot.slane %v1581_v49, 5 }
  0x6e   : > { %854 = vst [vmem:[#allocation2 + $0x44] sm:$0x1] %v853_v47  ;;  %v2258_v60 = vor.u32 %v2257_v14, %v2254_v9  ;;  %3215 = vrot.lane.b32.xlu0 %v8135_v10, %s8925_s28  ;;  %v2267_v2 = vrot.slane %v2265_v18, 4  ;;  %v2271_v3 = vshll.u32 %v9375_v50, 16  ;;  %v1080_v5 = vshrl.u32 %v940_v38, 16  ;;  %v8809_v28 = vld [vmem:[%s12907_s1 + $0x10] sm:$0xff]  }
  0x6f   : > { %v9379_v4 = vld [vmem:[#allocation2 + $0x40] sm:$0xf]  ;;  %v2263_v63 = vrot.slane %v2261_v46, 5  ;;  %v1679_v58 = vsel %vm9111_vm14, %v1674_v45, %v1678_v25  ;;  %v1688_v23 = vrot.slane %v1686_v13, 5  ;;  %v2069_v61 = vsel %vm9024_vm9, %v2067_v36, %v2068_v52  ;;  %v9397_v34 = vld [vmem:[#allocation2 + $0x38] sm:$0x1]  ;;  %8690 = vmatprep.subr.bf16.mxu0 %v8809_v28 }
  0x70   : > { %v2289_v22 = vshrl.u32 %v9379_v4, 16  ;;  %v8136_v16 = vcombine.low %v9368_v56, %v2069_v61  ;;  %v2285_v10 = vshll.u32 %v9379_v4, 16  ;;  %v2259_v43 = vrot.slane %v2258_v60, 4  ;;  %v2589_v49 = vld [vmem:[#allocation2 + $0x30] sm:$0xe]  ;;  %8691 = vmatpush3.bf16.msra.mxu0 %v8809_v28 }
  0x71   : > { %v2161_v20 = vld [vmem:[#allocation2 + $0x3c] sm:$0xf]  ;;  %v2268_v53 = vor.u32 %v2267_v2, %v2263_v63  ;;  %v1689_v7 = vsel %vm9111_vm14, %v1684_v40, %v1688_v23  ;;  %v2273_v27 = vrot.slane %v2271_v3, 5  ;;  %v1082_v54 = vrot.slane %v1080_v5, 4  ;;  %v943_v60 = vld [vmem:[#allocation2 + $0x40] sm:$0xf] }
  0x72   : > { %v2276_v31 = vshrl.u32 %v2161_v20, 16  ;;  %v2279_v0 = vshll.u32 %v2161_v20, 16  ;;  %v8152_v19 = vcombine.low %v2161_v20, %v9379_v4  ;;  %v8120_v24 = vcombine.low %v1679_v58, %v1689_v7  ;;  %3311 = vrot.lane.b32.xlu0 %v8151_v57, %s8923_s26  ;;  %v942_v58 = vld [vmem:[#allocation2 + $0x3c] sm:$0xf] }
  0x73   : > { %v2287_v25 = vrot.slane %v2285_v10, 5  ;;  %v2291_v51 = vrot.slane %v2289_v22, 4  ;;  %v2264_v59 = vsel %vm9111_vm14, %v2259_v43, %v2263_v63  ;;  %v2269_v37 = vrot.slane %v2268_v53, 4 }
  0x74   : > { %v2278_v26 = vrot.slane %v2276_v31, 4  ;;  %v2281_v21 = vrot.slane %v2279_v0, 5  ;;  %3137 = vrot.lane.b32.xlu1 %v8120_v24, %s8927_s30  ;;  %v1083_v56 = vshll.u32 %v940_v38, 16  ;;  %v1089_v18 = vshll.u32 %v9392_v44, 16 }
  0x75   : > { %v9403_v48 = vld [vmem:[#allocation2 + $0x44] sm:$0x1]  ;;  %v2292_v30 = vor.u32 %v2291_v51, %v2287_v25  ;;  %v2274_v9 = vsel %vm9111_vm14, %v2269_v37, %v2273_v27  ;;  %v1093_v14 = vshrl.u32 %v9392_v44, 16  ;;  %v1099_v52 = vshll.u32 %v9397_v34, 16 }
  0x76   : > { %v2282_v35 = vor.u32 %v2281_v21, %v2278_v26  ;;  %v2295_v36 = vshll.u32 %v9403_v48, 16  ;;  %v8167_v57 = vcombine.low %v2264_v59, %v2274_v9  ;;  %v1085_v47 = vrot.slane %v1083_v56, 5  ;;  %v969_v10 = vld [vmem:[#allocation2 + $0x44] sm:$0x1]  ;;  %v2590_v26 = vld [vmem:[#allocation2 + $0x3c] sm:$0xe] }
  0x77   : > { %v2293_v40 = vrot.slane %v2292_v30, 4  ;;  %v1091_v46 = vrot.slane %v1089_v18, 5  ;;  %v1095_v38 = vrot.slane %v1093_v14, 4  ;;  %v8039_v2 = vrot.slane %v2589_v49, 9  ;;  %v1372_v30 = vld [vmem:[#allocation2 + $0x3c] sm:$0xe] }
  0x78   : > { %v2283_v45 = vrot.slane %v2282_v35, 4  ;;  %v2297_v13 = vrot.slane %v2295_v36, 5  ;;  %3217 = vrot.lane.b32.xlu1 %v8136_v16, %s8925_s28  ;;  %3391 = vrot.lane.b32.xlu0 %v8167_v57, %s8928_s6  ;;  %v1086_v63 = vor.u32 %v1085_v47, %v1082_v54  ;;  %v2667_v3 = vrot.slane %v9352_v11, 5  ;;  %v1371_v35 = vld [vmem:[#allocation2 + $0x30] sm:$0xe]  ;;  %v8810_v36 = vld [vmem:[%s12907_s1 + $0x18] sm:$0xff]  }
  0x79   : > { %v2670_v5 = vrot.slane %v9375_v50, 5  ;;  %v1096_v22 = vor.u32 %v1095_v38, %v1091_v46  ;;  %v1101_v20 = vrot.slane %v1099_v52, 5  ;;  %v1104_v11 = vshrl.u32 %v942_v58, 16  ;;  %8692 = vmatprep.subr.bf16.mxu0 %v8810_v36 }
  0x7a   : > { %v2288_v23 = vsel %vm9111_vm14, %v2283_v45, %v2287_v25  ;;  %v2298_v61 = vsel %vm9111_vm14, %v2293_v40, %v2297_v13  ;;  %v1087_v16 = vrot.slane %v1086_v63, 4  ;;  %v2668_v53 = vsel %vm9024_vm9, %v8039_v2, %v2667_v3  ;;  %8693 = vmatpush3.bf16.msra.mxu0 %v8810_v36 }
  0x7b   : > { %v8168_v43 = vcombine.low %v2288_v23, %v2298_v61  ;;  %v2669_v7 = vrot.slane %v2667_v3, 4  ;;  %v1097_v31 = vrot.slane %v1096_v22, 4  ;;  %v1107_v0 = vshll.u32 %v942_v58, 16  ;;  %v474_v23 = vld [vmem:[%s9005_s23 + $0x2c] sm:$0xf] }
  0x7c   : > { %v1113_v50 = vshll.u32 %v943_v60, 16  ;;  %3313 = vrot.lane.b32.xlu1 %v8152_v19, %s8923_s26  ;;  %v1092_v24 = vsel %vm9111_vm14, %v1087_v16, %v1091_v46  ;;  %v1117_v51 = vshrl.u32 %v943_v60, 16  ;;  %v1123_v59 = vshll.u32 %v969_v10, 16  ;;  %v1554_v22 = vld [vmem:[#allocation2 + $0x3c] sm:$0xf] }
  0x7d   : > { %v2671_v25 = vsel %vm9024_vm9, %v2669_v7, %v2670_v5  ;;  %v1102_v21 = vsel %vm9111_vm14, %v1097_v31, %v1101_v20  ;;  %v1106_v27 = vrot.slane %v1104_v11, 4  ;;  %v1109_v28 = vrot.slane %v1107_v0, 5  ;;  %v855_v16 = vld [vmem:[#allocation2 + $0x48] sm:$0xf]  ;;  %v9455_v7 = vld [vmem:[#allocation2 + $0x4] sm:$0xf] }
  0x7e   : > { %v8183_v37 = vcombine.low %v2668_v53, %v2671_v25  ;;  %v8073_v54 = vcombine.low %v1092_v24, %v1102_v21  ;;  %v1115_v56 = vrot.slane %v1113_v50, 5  ;;  %v1119_v18 = vrot.slane %v1117_v51, 4  ;;  %v9453_v53 = vld [vmem:[#allocation2 + $0x40] sm:$0xf] }
  0x7f   : > { %v1125_v19 = vrot.slane %v1123_v59, 5  ;;  %v1110_v9 = vor.u32 %v1109_v28, %v1106_v27  ;;  %v8040_v14 = vrot.slane %v2590_v26, 9  ;;  %v2674_v49 = vrot.slane %v9379_v4, 5  ;;  %v312_v26 = vld [vmem:[#allocation2 + $0x50] sm:$0x1] }
  0x80   : > { %3471 = vrot.lane.b32.xlu0 %v8183_v37, %s8926_s29  ;;  %v2677_v40 = vrot.slane %v9403_v48, 5  ;;  %3393 = vrot.lane.b32.xlu1 %v8168_v43, %s8928_s6  ;;  %v1120_v57 = vor.u32 %v1119_v18, %v1115_v56  ;;  %v8010_v47 = vrot.slane %v1372_v30, 9  ;;  %v1471_v46 = vrot.slane %v943_v60, 5  ;;  %v1582_v30 = vld [vmem:[#allocation2 + $0x44] sm:$0x1] }
  0x81   : > { %v1474_v45 = vrot.slane %v969_v10, 5  ;;  %v1111_v13 = vrot.slane %v1110_v9, 4  ;;  %v2675_v38 = vsel %vm9024_vm9, %v8040_v14, %v2674_v49  ;;  %v2676_v52 = vrot.slane %v2674_v49, 4  ;;  %v475_v49 = vld [vmem:[%s9005_s23 + $0x30] sm:$0xf] }
  0x82   : > { %v8009_v63 = vrot.slane %v1371_v35, 9  ;;  %v1121_v2 = vrot.slane %v1120_v57, 4  ;;  %v1472_v4 = vsel %vm9024_vm9, %v8010_v47, %v1471_v46  ;;  %v1473_v48 = vrot.slane %v1471_v46, 4 }
  0x83   : > { %v1464_v3 = vrot.slane %v9392_v44, 5  ;;  %v1116_v5 = vsel %vm9111_vm14, %v1111_v13, %v1115_v56  ;;  %v2678_v60 = vsel %vm9024_vm9, %v2676_v52, %v2677_v40  ;;  %v1467_v58 = vrot.slane %v9397_v34, 5  ;;  %v9457_v34 = vld [vmem:[#allocation2] sm:$0xf] }
  0x84   : > { %v585_v61 = vrot.slane %v583_v12, 7  ;;  %2883 = vrot.lane.b32.xlu1 %v8073_v54, %s8924_s27  ;;  %v1126_v20 = vsel %vm9111_vm14, %v1121_v2, %v1125_v19  ;;  %v8184_v10 = vcombine.low %v2675_v38, %v2678_v60  ;;  %v1475_v43 = vsel %vm9024_vm9, %v1473_v48, %v1474_v45  ;;  %v1982_v19 = vld [vmem:[#allocation2 + $0x3c] sm:$0xe] }
  0x85   : > { %v8053_v12 = vcombine.low %v9457_v34, %v9455_v7  ;;  %v8074_v31 = vcombine.low %v1116_v5, %v1126_v20  ;;  %v1465_v11 = vsel %vm9024_vm9, %v8009_v63, %v1464_v3  ;;  %v1466_v0 = vrot.slane %v1464_v3, 4  ;;  %v476_v63 = vld [vmem:[%s9005_s23 + $0x34] sm:$0xf]  ;;  %v315_v5 = vld [vmem:[#allocation2 + $0x5c] sm:$0x1] }
  0x86   : > { %v588_v50 = vor.u32 %v586_v32, %v585_v61  ;;  %3473 = vrot.lane.b32.xlu0 %v8184_v10, %s8926_s29  ;;  %v8090_v24 = vcombine.low %v1472_v4, %v1475_v43  ;;  %v591_v25 = vshrl.u32 %v474_v23, 16  ;;  %v594_v51 = vshll.u32 %v474_v23, 16 }
  0x87   : > { %v1691_v59 = vshrl.u32 %v1554_v22, 16  ;;  %v1468_v21 = vsel %vm9024_vm9, %v1466_v0, %v1467_v58  ;;  %v1694_v27 = vshll.u32 %v1554_v22, 16  ;;  %v1704_v28 = vshrl.u32 %v9453_v53, 16 }
  0x88   : > { %v856_v37 = vsel %vm9030_vm10, %v588_v50, %v855_v16  ;;  %2885 = vrot.lane.b32.xlu1 %v8074_v31, %s8924_s27  ;;  %v8089_v32 = vcombine.low %v1465_v11, %v1468_v21  ;;  %v589_v54 = vrot.slane %v585_v61, 4  ;;  %v593_v56 = vrot.slane %v591_v25, 7 }
  0x89   : > { %857 = vst [vmem:[#allocation2 + $0x48] sm:$0xf] %v856_v37  ;;  %v1693_v18 = vrot.slane %v1691_v59, 4  ;;  %v1696_v35 = vrot.slane %v1694_v27, 5  ;;  %v313_v36 = vsel %vm8995_vm5, 0, %v312_v26  ;;  %v1700_v9 = vshll.u32 %v9453_v53, 16 }
  0x8a   : > { %v1706_v14 = vrot.slane %v1704_v28, 4  ;;  %2963 = vrot.lane.b32.xlu0 %v8089_v32, %s8921_s24  ;;  %v596_v40 = vor.u32 %v594_v51, %v593_v56  ;;  %v598_v57 = vrot.slane %v593_v56, 4  ;;  %v8105_v47 = vcombine.low %v1554_v22, %v9453_v53  ;;  %314 = vst [vmem:[#allocation2 + $0x50] sm:$0x1] %v313_v36 }
  0x8b   : > { %v1710_v46 = vshll.u32 %v1582_v30, 16  ;;  %v1697_v45 = vor.u32 %v1696_v35, %v1693_v18  ;;  %v1702_v13 = vrot.slane %v1700_v9, 5  ;;  %v8025_v38 = vrot.slane %v1982_v19, 9 }
  0x8c   : > { %v2072_v52 = vrot.slane %v9453_v53, 5  ;;  %2965 = vrot.lane.b32.xlu1 %v8090_v24, %s8921_s24  ;;  %v597_v2 = vsel %vm9036_vm11, %v589_v54, %v596_v40  ;;  %v2075_v4 = vrot.slane %v1582_v30, 5  ;;  %v260_v48 = vsel %vm8972_vm3, 0, %v259_v42 }
  0x8d   : > { %v600_v3 = vshrl.u32 %v475_v49, 16  ;;  %858 = vst.msk [vmem:[#allocation2 + $0x4c] sm:$0xf] %vm226_vm0, %v597_v2  ;;  %v1698_v60 = vrot.slane %v1697_v45, 4  ;;  %v1707_v58 = vor.u32 %v1706_v14, %v1702_v13  ;;  %v1712_v23 = vrot.slane %v1710_v46, 5 }
  0x8e   : > { %v2074_v61 = vrot.slane %v2072_v52, 4  ;;  %261 = vst [vmem:[#allocation2 + $0x54] sm:$0x1] %v260_v48  ;;  %3059 = vrot.lane.b32.xlu0 %v8105_v47, %s8922_s25  ;;  %v603_v20 = vshll.u32 %v475_v49, 16  ;;  %v608_v10 = vshrl.u32 %v476_v63, 16  ;;  %v611_v43 = vshll.u32 %v476_v63, 16 }
  0x8f   : > { %v602_v22 = vrot.slane %v600_v3, 7  ;;  %v1703_v53 = vsel %vm9111_vm14, %v1698_v60, %v1702_v13  ;;  %v1708_v31 = vrot.slane %v1707_v58, 4  ;;  %v2073_v0 = vsel %vm9024_vm9, %v8025_v38, %v2072_v52  ;;  %v9504_v47 = vld [vmem:[#allocation2 + $0x10] sm:$0xf] }
  0x90   : > { %v1556_v16 = vld [vmem:[#allocation2 + $0x48] sm:$0xf]  ;;  %v316_v50 = vsel %vm8995_vm5, 0, %v315_v5  ;;  %v2076_v59 = vsel %vm9024_vm9, %v2074_v61, %v2075_v4  ;;  %v610_v30 = vrot.slane %v608_v10, 7  ;;  %vm3548_vm1 = vcmask 130048  }
  0x91   : > { %v1983_v11 = vld [vmem:[#allocation2 + $0x48] sm:$0xe]  ;;  %v1715_v24 = vshrl.u32 %v1556_v16, 16  ;;  %v1718_v25 = vshll.u32 %v1556_v16, 16  ;;  %317 = vst [vmem:[#allocation2 + $0x5c] sm:$0x1] %v316_v50  ;;  %v1713_v37 = vsel %vm9111_vm14, %v1708_v31, %v1712_v23  ;;  %v605_v27 = vor.u32 %v603_v20, %v602_v22 }
  0x92   : > { %v8026_v51 = vrot.slane %v1983_v11, 9  ;;  %v9495_v26 = vld [vmem:[#allocation2 + $0x48] sm:$0xf]  ;;  %v859_v21 = vld [vmem:[#allocation2 + $0x50] sm:$0x1]  ;;  %v606_v28 = vrot.slane %v602_v22, 4  ;;  %v8121_v56 = vcombine.low %v1703_v53, %v1713_v37  ;;  %v8137_v18 = vcombine.low %v2073_v0, %v2076_v59 }
  0x93   : > { %v1717_v42 = vrot.slane %v1715_v24, 4  ;;  %v1720_v32 = vrot.slane %v1718_v25, 5  ;;  %v860_v54 = vsel %vm8972_vm3, %v598_v57, %v859_v21  ;;  %v613_v19 = vor.u32 %v611_v43, %v610_v30  ;;  %v944_v5 = vld [vmem:[#allocation2 + $0x48] sm:$0xf] }
  0x94   : > { %861 = vst [vmem:[#allocation2 + $0x50] sm:$0x1] %v860_v54  ;;  %v615_v35 = vrot.slane %v610_v30, 4  ;;  %v2300_v36 = vshrl.u32 %v9495_v26, 16  ;;  %v1557_v9 = vld [vmem:[#allocation2 + $0x4c] sm:$0xf]  ;;  %3139 = vrot.lane.b32.xlu0 %v8121_v56, %s8927_s30 }
  0x95   : > { %v1721_v14 = vor.u32 %v1720_v32, %v1717_v42  ;;  %v862_v49 = vld [vmem:[#allocation2 + $0x54] sm:$0xf]  ;;  %v2303_v40 = vshll.u32 %v9495_v26, 16  ;;  %v1728_v45 = vshrl.u32 %v1557_v9, 16  ;;  %v8106_v13 = vcombine.low %v1556_v16, %v1557_v9  ;;  %v9510_v63 = vld [vmem:[#allocation2 + $0x4c] sm:$0xf] }
  0x96   : > { %v1724_v38 = vshll.u32 %v1557_v9, 16  ;;  %v2079_v52 = vrot.slane %v1557_v9, 5  ;;  %v614_v4 = vsel %vm9036_vm11, %v606_v28, %v613_v19  ;;  %v863_v48 = vsel %vm9030_vm10, %v605_v27, %v862_v49  ;;  %v9531_v0 = vld [vmem:[#allocation2 + $0x4c] sm:$0xf] }
  0x97   : > { %v1722_v2 = vrot.slane %v1721_v14, 4  ;;  %v2302_v3 = vrot.slane %v2300_v36, 4  ;;  %3061 = vrot.lane.b32.xlu1 %v8106_v13, %s8922_s25  ;;  %v1730_v58 = vrot.slane %v1728_v45, 4  ;;  %864 = vst [vmem:[#allocation2 + $0x54] sm:$0xf] %v863_v48  ;;  %v2305_v20 = vrot.slane %v2303_v40, 5 }
  0x98   : > { %v1726_v60 = vrot.slane %v1724_v38, 5  ;;  %v9519_v23 = vsel %vm9024_vm9, %v8026_v51, %v2079_v52  ;;  %865 = vst.msk [vmem:[#allocation2 + $0x58] sm:$0xf] %vm226_vm0, %v614_v4  ;;  %v866_v61 = vld [vmem:[#allocation2 + $0x5c] sm:$0x1]  ;;  %3219 = vrot.lane.b32.xlu0 %v8137_v18, %s8925_s28  ;;  %v2313_v10 = vshrl.u32 %v9510_v63, 16  ;;  %v8153_v43 = vcombine.low %v9495_v26, %v9510_v63 }
  0x99   : > { %v867_v16 = vsel %vm8972_vm3, %v615_v35, %v866_v61  ;;  %v2081_v31 = vrot.slane %v2079_v52, 4  ;;  %v2309_v11 = vshll.u32 %v9510_v63, 16  ;;  %v1128_v50 = vshrl.u32 %v944_v5, 16 }
  0x9a   : > { %v1731_v53 = vor.u32 %v1730_v58, %v1726_v60  ;;  %868 = vst [vmem:[#allocation2 + $0x5c] sm:$0x1] %v867_v16  ;;  %v1727_v25 = vsel %vm9111_vm14, %v1722_v2, %v1726_v60  ;;  %v2306_v59 = vor.u32 %v2305_v20, %v2302_v3  ;;  %v2315_v21 = vrot.slane %v2313_v10, 4 }
  0x9b   : > { %v1583_v24 = vld [vmem:[#allocation2 + $0x50] sm:$0x1]  ;;  %v1131_v26 = vshll.u32 %v944_v5, 16  ;;  %v2311_v30 = vrot.slane %v2309_v11, 5  ;;  %v1130_v54 = vrot.slane %v1128_v50, 4  ;;  %v1137_v36 = vshll.u32 %v9531_v0, 16 }
  0x9c   : > { %v9535_v51 = vld [vmem:[#allocation2 + $0x50] sm:$0x1]  ;;  %v1732_v37 = vrot.slane %v1731_v53, 4  ;;  %v1734_v27 = vshll.u32 %v1583_v24, 16  ;;  %v2082_v28 = vrot.slane %v1583_v24, 5  ;;  %3315 = vrot.lane.b32.xlu0 %v8153_v43, %s8923_s26  ;;  %v2307_v42 = vrot.slane %v2306_v59, 4 }
  0x9d   : > { %v2319_v32 = vshll.u32 %v9535_v51, 16  ;;  %v1133_v56 = vrot.slane %v1131_v26, 5  ;;  %v2316_v35 = vor.u32 %v2315_v21, %v2311_v30  ;;  %v9555_v16 = vld [vmem:[#allocation2 + $0x50] sm:$0x1]  ;;  %v1139_v50 = vrot.slane %v1137_v36, 5 }
  0x9e   : > { %v1736_v18 = vrot.slane %v1734_v27, 5  ;;  %v2083_v19 = vsel %vm9024_vm9, %v2081_v31, %v2082_v28  ;;  %v2165_v14 = vld [vmem:[#allocation2 + $0x54] sm:$0xf]  ;;  %v2312_v40 = vsel %vm9111_vm14, %v2307_v42, %v2311_v30  ;;  %v1141_v21 = vshrl.u32 %v9531_v0, 16  ;;  %v9564_v42 = vpop.permute.xlu1 %2955 }
  0x9f   : > { %v8138_v9 = vcombine.low %v9519_v23, %v2083_v19  ;;  %v9543_v49 = vld [vmem:[#allocation2 + $0x58] sm:$0xf]  ;;  %v2321_v45 = vrot.slane %v2319_v32, 5  ;;  %v1134_v13 = vor.u32 %v1133_v56, %v1130_v54  ;;  %v2324_v52 = vshrl.u32 %v2165_v14, 16  ;;  %v2591_v23 = vld [vmem:[#allocation2 + $0x48] sm:$0xe] }
  0xa0   : > { %v1737_v38 = vsel %vm9111_vm14, %v1732_v37, %v1736_v18  ;;  %v2327_v2 = vshll.u32 %v2165_v14, 16  ;;  %v2337_v4 = vshrl.u32 %v9543_v49, 16  ;;  %v8154_v3 = vcombine.low %v2165_v14, %v9543_v49  ;;  %v946_v26 = vld [vmem:[#allocation2 + $0x54] sm:$0xf]  ;;  %v947_v19 = vld [vmem:[#allocation2 + $0x58] sm:$0xf] }
  0xa1   : > { %v8122_v48 = vcombine.low %v1727_v25, %v1737_v38  ;;  %v9551_v5 = vld [vmem:[#allocation2 + $0x5c] sm:$0x1]  ;;  %v2333_v60 = vshll.u32 %v9543_v49, 16  ;;  %v2317_v58 = vrot.slane %v2316_v35, 4  ;;  %v2326_v61 = vrot.slane %v2324_v52, 4 }
  0xa2   : > { %v2329_v20 = vrot.slane %v2327_v2, 5  ;;  %v2339_v10 = vrot.slane %v2337_v4, 4  ;;  %v2343_v43 = vshll.u32 %v9551_v5, 16  ;;  %v1135_v11 = vrot.slane %v1134_v13, 4 }
  0xa3   : > { %3141 = vrot.lane.b32.xlu1 %v8122_v48, %s8927_s30  ;;  %v2335_v53 = vrot.slane %v2333_v60, 5  ;;  %v2322_v31 = vsel %vm9111_vm14, %v2317_v58, %v2321_v45  ;;  %v1147_v28 = vshll.u32 %v9555_v16, 16  ;;  %v8041_v30 = vrot.slane %v2591_v23, 9  ;;  %v9570_v45 = vpop.permute.xlu0 %3051  ;;  %v2592_v60 = vld [vmem:[#allocation2 + $0x54] sm:$0xe] }
  0xa4   : > { %v2330_v24 = vor.u32 %v2329_v20, %v2326_v61  ;;  %v2345_v25 = vrot.slane %v2343_v43, 5  ;;  %v8169_v59 = vcombine.low %v2312_v40, %v2322_v31  ;;  %v1140_v27 = vsel %vm9111_vm14, %v1135_v11, %v1139_v50  ;;  %v1374_v11 = vld [vmem:[#allocation2 + $0x54] sm:$0xe] }
  0xa5   : > { %v2340_v37 = vor.u32 %v2339_v10, %v2335_v53  ;;  %v1143_v54 = vrot.slane %v1141_v21, 4  ;;  %v2681_v56 = vrot.slane %v9510_v63, 5  ;;  %v2684_v18 = vrot.slane %v9535_v51, 5  ;;  %v971_v63 = vld [vmem:[#allocation2 + $0x5c] sm:$0x1] }
  0xa6   : > { %v2331_v32 = vrot.slane %v2330_v24, 4  ;;  %3395 = vrot.lane.b32.xlu0 %v8169_v59, %s8928_s6  ;;  %v1149_v36 = vrot.slane %v1147_v28, 5  ;;  %v1152_v14 = vshrl.u32 %v946_v26, 16  ;;  %v1155_v40 = vshll.u32 %v946_v26, 16  ;;  %v1373_v26 = vld [vmem:[#allocation2 + $0x48] sm:$0xe] }
  0xa7   : > { %3221 = vrot.lane.b32.xlu1 %v8138_v9, %s8925_s28  ;;  %v2341_v35 = vrot.slane %v2340_v37, 4  ;;  %v1144_v38 = vor.u32 %v1143_v54, %v1139_v50  ;;  %v2682_v52 = vsel %vm9024_vm9, %v8041_v30, %v2681_v56  ;;  %v2683_v2 = vrot.slane %v2681_v56, 4  ;;  %v9581_v50 = vpop.permute.xlu1 %3053 }
  0xa8   : > { %v2336_v13 = vsel %vm9111_vm14, %v2331_v32, %v2335_v53  ;;  %v1154_v4 = vrot.slane %v1152_v14, 4  ;;  %v1157_v9 = vrot.slane %v1155_v40, 5  ;;  %v1161_v48 = vshll.u32 %v947_v19, 16  ;;  %v9588_v32 = vpop.permute.xlu0 %3307 }
  0xa9   : > { %v2346_v51 = vsel %vm9111_vm14, %v2341_v35, %v2345_v25  ;;  %v1145_v23 = vrot.slane %v1144_v38, 4  ;;  %v2685_v61 = vsel %vm9024_vm9, %v2683_v2, %v2684_v18  ;;  %v1165_v20 = vshrl.u32 %v947_v19, 16 }
  0xaa   : > { %v8170_v58 = vcombine.low %v2336_v13, %v2346_v51  ;;  %v8185_v10 = vcombine.low %v2682_v52, %v2685_v61  ;;  %v1158_v43 = vor.u32 %v1157_v9, %v1154_v4  ;;  %v1163_v53 = vrot.slane %v1161_v48, 5  ;;  %v477_v13 = vld [vmem:[%s9005_s23 + $0x38] sm:$0xf]  ;;  %v478_v51 = vld [vmem:[%s9005_s23 + $0x3c] sm:$0xf] }
  0xab   : > { %3317 = vrot.lane.b32.xlu1 %v8154_v3, %s8923_s26  ;;  %v1171_v31 = vshll.u32 %v971_v63, 16  ;;  %v1150_v24 = vsel %vm9111_vm14, %v1145_v23, %v1149_v36  ;;  %v1167_v25 = vrot.slane %v1165_v20, 4  ;;  %v8042_v59 = vrot.slane %v2592_v60, 9  ;;  %v262_v36 = vld [vmem:[#allocation2 + $0x60] sm:$0x1] }
  0xac   : > { %v2688_v21 = vrot.slane %v9543_v49, 5  ;;  %v8075_v37 = vcombine.low %v1140_v27, %v1150_v24  ;;  %3475 = vrot.lane.b32.xlu0 %v8185_v10, %s8926_s29  ;;  %v1159_v3 = vrot.slane %v1158_v43, 4  ;;  %v2691_v30 = vrot.slane %v9551_v5, 5  ;;  %v1558_v23 = vld [vmem:[#allocation2 + $0x54] sm:$0xf] }
  0xad   : > { %v1173_v28 = vrot.slane %v1171_v31, 5  ;;  %v1168_v54 = vor.u32 %v1167_v25, %v1163_v53  ;;  %v8012_v35 = vrot.slane %v1374_v11, 9  ;;  %v1485_v27 = vrot.slane %v947_v19, 5  ;;  %v9615_v31 = vpop.permute.xlu0 %2875 }
  0xae   : > { %v2689_v56 = vsel %vm9024_vm9, %v8042_v59, %v2688_v21  ;;  %v2690_v18 = vrot.slane %v2688_v21, 4  ;;  %v1164_v49 = vsel %vm9111_vm14, %v1159_v3, %v1163_v53  ;;  %v1488_v14 = vrot.slane %v971_v63, 5  ;;  %v9605_v63 = vpop.permute.xlu1 %3309  ;;  %v1559_v53 = vld [vmem:[#allocation2 + $0x58] sm:$0xf]  ;;  %v318_v21 = vld [vmem:[#allocation2 + $0x68] sm:$0x1] }
  0xaf   : > { %3397 = vrot.lane.b32.xlu1 %v8170_v58, %s8928_s6  ;;  %v8011_v40 = vrot.slane %v1373_v26, 9  ;;  %v1169_v5 = vrot.slane %v1168_v54, 4  ;;  %v1478_v52 = vrot.slane %v9531_v0, 5  ;;  %v1481_v2 = vrot.slane %v9555_v16, 5 }
  0xb0   : > { %v2692_v38 = vsel %vm9024_vm9, %v2690_v18, %v2691_v30  ;;  %v1486_v9 = vsel %vm9024_vm9, %v8012_v35, %v1485_v27  ;;  %v1487_v48 = vrot.slane %v1485_v27, 4  ;;  %v263_v19 = vsel %vm8972_vm3, 0, %v262_v36  ;;  %v1584_v30 = vld [vmem:[#allocation2 + $0x5c] sm:$0x1]  ;;  %v1984_v36 = vld [vmem:[#allocation2 + $0x54] sm:$0xe] }
  0xb1   : > { %v8186_v4 = vcombine.low %v2689_v56, %v2692_v38  ;;  %v1174_v60 = vsel %vm9111_vm14, %v1169_v5, %v1173_v28  ;;  %v1479_v58 = vsel %vm9024_vm9, %v8011_v40, %v1478_v52  ;;  %v1480_v0 = vrot.slane %v1478_v52, 4  ;;  %264 = vst [vmem:[#allocation2 + $0x60] sm:$0x1] %v263_v19 }
  0xb2   : > { %v617_v16 = vshrl.u32 %v477_v13, 16  ;;  %v8076_v61 = vcombine.low %v1164_v49, %v1174_v60  ;;  %v1489_v20 = vsel %vm9024_vm9, %v1487_v48, %v1488_v14  ;;  %v620_v10 = vshll.u32 %v477_v13, 16  ;;  %v265_v13 = vld [vmem:[#allocation2 + $0x6c] sm:$0x1]  ;;  %v9625_v5 = vpop.permute.xlu1 %2957 }
  0xb3   : > { %2887 = vrot.lane.b32.xlu1 %v8075_v37, %s8924_s27  ;;  %3477 = vrot.lane.b32.xlu0 %v8186_v4, %s8926_s29  ;;  %v625_v43 = vshrl.u32 %v478_v51, 16  ;;  %v8092_v11 = vcombine.low %v1486_v9, %v1489_v20  ;;  %v1482_v24 = vsel %vm9024_vm9, %v1480_v0, %v1481_v2  ;;  %v628_v59 = vshll.u32 %v478_v51, 16  ;;  %v479_v4 = vld [vmem:[%s9005_s23 + $0x40] sm:$0xf]  ;;  %v480_v0 = vld [vmem:[%s9005_s23 + $0x44] sm:$0xf] }
  0xb4   : > { %v619_v25 = vrot.slane %v617_v16, 7  ;;  %v8091_v26 = vcombine.low %v1479_v58, %v1482_v24  ;;  %v1739_v3 = vshrl.u32 %v1558_v23, 16  ;;  %v1742_v28 = vshll.u32 %v1558_v23, 16  ;;  %v9633_v16 = vpop.permute.xlu0 %3211 }
  0xb5   : > { %v9619_v37 = vrot.slane %v625_v43, 7  ;;  %v1752_v18 = vshrl.u32 %v1559_v53, 16  ;;  %v8107_v35 = vcombine.low %v1558_v23, %v1559_v53  ;;  %v319_v38 = vsel %vm8995_vm5, 0, %v318_v21  ;;  %v321_v43 = vld [vmem:[#allocation2 + $0x74] sm:$0x1] }
  0xb6   : > { %v622_v54 = vor.u32 %v620_v10, %v619_v25  ;;  %v623_v56 = vrot.slane %v619_v25, 4  ;;  %v1741_v14 = vrot.slane %v1739_v3, 4  ;;  %v1744_v40 = vrot.slane %v1742_v28, 5  ;;  %320 = vst [vmem:[#allocation2 + $0x68] sm:$0x1] %v319_v38 }
  0xb7   : > { %2889 = vrot.lane.b32.xlu1 %v8076_v61, %s8924_s27  ;;  %2967 = vrot.lane.b32.xlu0 %v8091_v26, %s8921_s24  ;;  %v630_v49 = vor.u32 %v628_v59, %v9619_v37  ;;  %v632_v27 = vrot.slane %v9619_v37, 4  ;;  %v1748_v52 = vshll.u32 %v1559_v53, 16  ;;  %v1754_v2 = vrot.slane %v1752_v18, 4  ;;  %v268_v21 = vld [vmem:[#allocation2 + $0x78] sm:$0x1] }
  0xb8   : > { %v1758_v51 = vshll.u32 %v1584_v30, 16  ;;  %v869_v48 = vld [vmem:[#allocation2 + $0x60] sm:$0xf]  ;;  %v1745_v19 = vor.u32 %v1744_v40, %v1741_v14  ;;  %v8027_v60 = vrot.slane %v1984_v36, 9  ;;  %v2086_v58 = vrot.slane %v1559_v53, 5 }
  0xb9   : > { %v631_v9 = vsel %vm9036_vm11, %v623_v56, %v630_v49  ;;  %v870_v23 = vsel %vm9030_vm10, %v622_v54, %v869_v48  ;;  %v1750_v61 = vrot.slane %v1748_v52, 5  ;;  %v2089_v10 = vrot.slane %v1584_v30, 5  ;;  %v9647_v30 = vld [vmem:[%s9005_s23 + $0x48] sm:$0xf] }
  0xba   : > { %872 = vst.msk [vmem:[#allocation2 + $0x64] sm:$0xf] %vm226_vm0, %v631_v9  ;;  %v1760_v20 = vrot.slane %v1758_v51, 5  ;;  %871 = vst [vmem:[#allocation2 + $0x60] sm:$0xf] %v870_v23  ;;  %v1746_v24 = vrot.slane %v1745_v19, 4  ;;  %v9642_v53 = vsel %vm9024_vm9, %v8027_v60, %v2086_v58 }
  0xbb   : > { %2969 = vrot.lane.b32.xlu1 %v8092_v11, %s8921_s24  ;;  %3063 = vrot.lane.b32.xlu0 %v8107_v35, %s8922_s25  ;;  %v2088_v25 = vrot.slane %v2086_v58, 4  ;;  %v266_v59 = vsel %vm8972_vm3, 0, %v265_v13  ;;  %v1755_v26 = vor.u32 %v1754_v2, %v1750_v61  ;;  %v634_v37 = vshrl.u32 %v479_v4, 16  ;;  %v9655_v35 = vpop.permute.xlu1 %3213  ;;  %v9658_v13 = vpop.permute.xlu0 %3467 }
  0xbc   : > { %267 = vst [vmem:[#allocation2 + $0x6c] sm:$0x1] %v266_v59  ;;  %v637_v3 = vshll.u32 %v479_v4, 16  ;;  %v642_v28 = vshrl.u32 %v480_v0, 16  ;;  %v1751_v11 = vsel %vm9111_vm14, %v1746_v24, %v1750_v61  ;;  %v645_v56 = vshll.u32 %v480_v0, 16 }
  0xbd   : > { %v2090_v54 = vsel %vm9024_vm9, %v2088_v25, %v2089_v10  ;;  %v322_v18 = vsel %vm8995_vm5, 0, %v321_v43  ;;  %v1756_v36 = vrot.slane %v1755_v26, 4  ;;  %v636_v14 = vrot.slane %v634_v37, 7  ;;  %v873_v2 = vld [vmem:[#allocation2 + $0x68] sm:$0x1] }
  0xbe   : > { %v8139_v49 = vcombine.low %v9642_v53, %v2090_v54  ;;  %v644_v40 = vrot.slane %v642_v28, 7  ;;  %323 = vst [vmem:[#allocation2 + $0x74] sm:$0x1] %v322_v18  ;;  %v269_v38 = vsel %vm8972_vm3, 0, %v268_v21  ;;  %v874_v60 = vsel %vm8972_vm3, %v632_v27, %v873_v2 }
  0xbf   : > { %v1761_v51 = vsel %vm9111_vm14, %v1756_v36, %v1760_v20  ;;  %v639_v4 = vor.u32 %v637_v3, %v636_v14  ;;  %v640_v9 = vrot.slane %v636_v14, 4  ;;  %270 = vst [vmem:[#allocation2 + $0x78] sm:$0x1] %v269_v38  ;;  %v3502_v61 = vsel %vm3499_vm15, %v8053_v12, %v9615_v31  ;;  %875 = vst [vmem:[#allocation2 + $0x68] sm:$0x1] %v874_v60  ;;  %v9682_v12 = vpop.permute.xlu1 %3133 }
  0xc0   : > { %v647_v48 = vor.u32 %v645_v56, %v644_v40  ;;  %v8123_v58 = vcombine.low %v1751_v11, %v1761_v51  ;;  %v649_v0 = vrot.slane %v644_v40, 4  ;;  %v9678_v27 = vsel %vm3548_vm1, %v3502_v61, %v9564_v42 }
  0xc1   : > { %v1561_v19 = vld [vmem:[#allocation2 + $0x64] sm:$0xf]  ;;  %v1560_v10 = vld [vmem:[#allocation2 + $0x60] sm:$0xf]  ;;  %vm3581_vm2 = vcmask 195584   ;;  %vm3614_vm4 = vcmask 261120  }
  0xc2   : > { %v9667_v23 = vld [vmem:[#allocation2 + $0x64] sm:$0xf]  ;;  %v1776_v20 = vshrl.u32 %v1561_v19, 16  ;;  %v1772_v43 = vshll.u32 %v1561_v19, 16  ;;  %v1985_v24 = vld [vmem:[#allocation2 + $0x60] sm:$0xe]  ;;  %v648_v53 = vsel %vm9036_vm11, %v640_v9, %v647_v48  ;;  %v8108_v21 = vcombine.low %v1560_v10, %v1561_v19  ;;  %3143 = vrot.lane.b32.xlu0 %v8123_v58, %s8927_s30 }
  0xc3   : > { %v1763_v25 = vshrl.u32 %v1560_v10, 16  ;;  %v1766_v59 = vshll.u32 %v1560_v10, 16  ;;  %v8028_v7 = vrot.slane %v1985_v24, 9  ;;  %v876_v34 = vld [vmem:[#allocation2 + $0x6c] sm:$0xf]  ;;  %v2093_v37 = vrot.slane %v1561_v19, 5 }
  0xc4   : > { %879 = vst.msk [vmem:[#allocation2 + $0x70] sm:$0xf] %vm226_vm0, %v648_v53  ;;  %v9684_v31 = vrot.slane %v1772_v43, 5  ;;  %v1778_v26 = vrot.slane %v1776_v20, 4  ;;  %v877_v3 = vsel %vm9030_vm10, %v639_v4, %v876_v34  ;;  %v2167_v42 = vld [vmem:[#allocation2 + $0x60] sm:$0xf]  ;;  %3065 = vrot.lane.b32.xlu1 %v8108_v21, %s8922_s25  ;;  %v9689_v36 = vpop.permute.xlu0 %3469 }
  0xc5   : > { %v1765_v28 = vrot.slane %v1763_v25, 4  ;;  %v1768_v11 = vrot.slane %v1766_v59, 5  ;;  %878 = vst [vmem:[#allocation2 + $0x6c] sm:$0xf] %v877_v3  ;;  %v2348_v54 = vshrl.u32 %v2167_v42, 16  ;;  %v2351_v56 = vshll.u32 %v2167_v42, 16 }
  0xc6   : > { %v880_v18 = vld [vmem:[#allocation2 + $0x74] sm:$0x1]  ;;  %v1779_v14 = vor.u32 %v1778_v26, %v9684_v31  ;;  %v9694_v40 = vsel %vm9024_vm9, %v8028_v7, %v2093_v37  ;;  %v2095_v38 = vrot.slane %v2093_v37, 4  ;;  %v2361_v2 = vshrl.u32 %v9667_v23, 16  ;;  %v9697_v51 = vld [vmem:[#allocation2 + $0x60] sm:$0xf]  ;;  %3223 = vrot.lane.b32.xlu0 %v8139_v49, %s8925_s28  ;;  %v9707_v49 = vpop.permute.xlu1 %3389 }
  0xc7   : > { %v1769_v4 = vor.u32 %v1768_v11, %v1765_v28  ;;  %v2350_v9 = vrot.slane %v2348_v54, 4  ;;  %v2353_v48 = vrot.slane %v2351_v56, 5  ;;  %v8155_v19 = vcombine.low %v2167_v42, %v9667_v23  ;;  %v1585_v20 = vld [vmem:[#allocation2 + $0x68] sm:$0x1]  ;;  %v9711_v21 = vld [vmem:[#allocation2 + $0x30] sm:$0xf] }
  0xc8   : > { %v1780_v60 = vrot.slane %v1779_v14, 4  ;;  %v881_v58 = vsel %vm8972_vm3, %v649_v0, %v880_v18  ;;  %v2357_v61 = vshll.u32 %v9667_v23, 16  ;;  %v2363_v10 = vrot.slane %v2361_v2, 4  ;;  %v9704_v24 = vld [vmem:[#allocation2 + $0x68] sm:$0x1]  ;;  %v9709_v59 = vpop.permute.xlu0 %2877  ;;  %12931 = vst [vmem:[#allocation5_spill] sm:$0xff] %v9711_v21 }
  0xc9   : > { %v1770_v43 = vrot.slane %v1769_v4, 4  ;;  %882 = vst [vmem:[#allocation2 + $0x74] sm:$0x1] %v881_v58  ;;  %v2354_v53 = vor.u32 %v2353_v48, %v2350_v9  ;;  %v1176_v25 = vshrl.u32 %v9697_v51, 16  ;;  %v1782_v7 = vshll.u32 %v1585_v20, 16 }
  0xca   : > { %v2096_v34 = vrot.slane %v1585_v20, 5  ;;  %v2359_v37 = vrot.slane %v2357_v61, 5  ;;  %v2367_v3 = vshll.u32 %v9704_v24, 16  ;;  %3319 = vrot.lane.b32.xlu0 %v8155_v19, %s8923_s26  ;;  %v9733_v58 = vld [vmem:[#allocation2 + $0x64] sm:$0xf]  ;;  %v1179_v57 = vshll.u32 %v9697_v51, 16 }
  0xcb   : > { %v9715_v26 = vld [vmem:[#allocation2 + $0x70] sm:$0xf]  ;;  %v1775_v42 = vsel %vm9111_vm14, %v1770_v43, %v9684_v31  ;;  %v2355_v54 = vrot.slane %v2354_v53, 4  ;;  %v1784_v56 = vrot.slane %v1782_v7, 5  ;;  %v1178_v22 = vrot.slane %v1176_v25, 4 }
  0xcc   : > { %v2385_v28 = vshrl.u32 %v9715_v26, 16  ;;  %v2381_v11 = vshll.u32 %v9715_v26, 16  ;;  %v2097_v18 = vsel %vm9024_vm9, %v2095_v38, %v2096_v34  ;;  %v9726_v14 = vld [vmem:[#allocation2 + $0x6c] sm:$0xf]  ;;  %v2364_v2 = vor.u32 %v2363_v10, %v2359_v37  ;;  %v9735_v61 = vpop.permute.xlu0 %3131  ;;  %v951_v52 = vld [vmem:[#allocation2 + $0x70] sm:$0xf] }
  0xcd   : > { %v2369_v4 = vrot.slane %v2367_v3, 5  ;;  %v8140_v9 = vcombine.low %v9694_v40, %v2097_v18  ;;  %v2372_v48 = vshrl.u32 %v9726_v14, 16  ;;  %v2375_v31 = vshll.u32 %v9726_v14, 16  ;;  %v9741_v3 = vld [vmem:[#allocation2 + $0x68] sm:$0x1]  ;;  %v9743_v18 = vpop.permute.xlu1 %2879 }
  0xce   : > { %v8156_v19 = vcombine.low %v9726_v14, %v9715_v26  ;;  %v1785_v38 = vsel %vm9111_vm14, %v1780_v60, %v1784_v56  ;;  %v2383_v20 = vrot.slane %v2381_v11, 5  ;;  %v2387_v43 = vrot.slane %v2385_v28, 4  ;;  %v1375_v44 = vld [vmem:[#allocation2 + $0x60] sm:$0xe] }
  0xcf   : > { %v2360_v10 = vsel %vm9111_vm14, %v2355_v54, %v2359_v37  ;;  %v8124_v40 = vcombine.low %v1775_v42, %v1785_v38  ;;  %v2374_v53 = vrot.slane %v2372_v48, 4  ;;  %v2377_v7 = vrot.slane %v2375_v31, 5  ;;  %v2593_v54 = vld [vmem:[#allocation2 + $0x60] sm:$0xe] }
  0xd0   : > { %v2365_v34 = vrot.slane %v2364_v2, 4  ;;  %v9745_v14 = vld [vmem:[#allocation2 + $0x74] sm:$0x1]  ;;  %v2388_v0 = vor.u32 %v2387_v43, %v2383_v20  ;;  %v1185_v60 = vshll.u32 %v9733_v58, 16  ;;  %v1189_v11 = vshrl.u32 %v9733_v58, 16  ;;  %v9754_v56 = vpop.permute.xlu0 %3387 }
  0xd1   : > { %3145 = vrot.lane.b32.xlu1 %v8124_v40, %s8927_s30  ;;  %v2378_v28 = vor.u32 %v2377_v7, %v2374_v53  ;;  %v2391_v37 = vshll.u32 %v9745_v14, 16  ;;  %v1181_v25 = vrot.slane %v1179_v57, 5  ;;  %v1195_v40 = vshll.u32 %v9741_v3, 16  ;;  %v950_v53 = vld [vmem:[#allocation2 + $0x6c] sm:$0xf] }
  0xd2   : > { %v2370_v42 = vsel %vm9111_vm14, %v2365_v34, %v2369_v4  ;;  %v2389_v2 = vrot.slane %v2388_v0, 4  ;;  %v1187_v31 = vrot.slane %v1185_v60, 5  ;;  %v1191_v43 = vrot.slane %v1189_v11, 4 }
  0xd3   : > { %v8171_v48 = vcombine.low %v2360_v10, %v2370_v42  ;;  %v2379_v51 = vrot.slane %v2378_v28, 4  ;;  %v2393_v38 = vrot.slane %v2391_v37, 5  ;;  %v1182_v7 = vor.u32 %v1181_v25, %v1178_v22  ;;  %v973_v28 = vld [vmem:[#allocation2 + $0x74] sm:$0x1]  ;;  %v9765_v37 = vpop.permute.xlu1 %2881 }
  0xd4   : > { %v8043_v46 = vrot.slane %v2593_v54, 9  ;;  %v2695_v4 = vrot.slane %v9667_v23, 5  ;;  %v2698_v34 = vrot.slane %v9704_v24, 5  ;;  %v1192_v10 = vor.u32 %v1191_v43, %v1187_v31  ;;  %v9767_v22 = vpop.permute.xlu0 %2959  ;;  %v2594_v43 = vld [vmem:[#allocation2 + $0x6c] sm:$0xe] }
  0xd5   : > { %3399 = vrot.lane.b32.xlu0 %v8171_v48, %s8928_s6  ;;  %3225 = vrot.lane.b32.xlu1 %v8140_v9, %s8925_s28  ;;  %v2384_v57 = vsel %vm9111_vm14, %v2379_v51, %v2383_v20  ;;  %v2394_v0 = vsel %vm9111_vm14, %v2389_v2, %v2393_v38  ;;  %v1197_v60 = vrot.slane %v1195_v40, 5  ;;  %v1183_v23 = vrot.slane %v1182_v7, 4 }
  0xd6   : > { %v8172_v42 = vcombine.low %v2384_v57, %v2394_v0  ;;  %v2696_v24 = vsel %vm9024_vm9, %v8043_v46, %v2695_v4  ;;  %v2697_v11 = vrot.slane %v2695_v4, 4  ;;  %v1193_v9 = vrot.slane %v1192_v10, 4  ;;  %v1376_v57 = vld [vmem:[#allocation2 + $0x6c] sm:$0xe] }
  0xd7   : > { %v1200_v54 = vshrl.u32 %v950_v53, 16  ;;  %v1203_v48 = vshll.u32 %v950_v53, 16  ;;  %v1209_v20 = vshll.u32 %v951_v52, 16  ;;  %v1188_v2 = vsel %vm9111_vm14, %v1183_v23, %v1187_v31 }
  0xd8   : > { %v2699_v25 = vsel %vm9024_vm9, %v2697_v11, %v2698_v34  ;;  %v1213_v51 = vshrl.u32 %v951_v52, 16  ;;  %v1219_v38 = vshll.u32 %v973_v28, 16  ;;  %v1198_v40 = vsel %vm9111_vm14, %v1193_v9, %v1197_v60  ;;  %v9778_v53 = vpop.permute.xlu0 %3055  ;;  %v9783_v60 = vpop.permute.xlu1 %2961 }
  0xd9   : > { %3321 = vrot.lane.b32.xlu1 %v8156_v19, %s8923_s26  ;;  %v8187_v46 = vcombine.low %v2696_v24, %v2699_v25  ;;  %v1202_v7 = vrot.slane %v1200_v54, 4  ;;  %v1205_v4 = vrot.slane %v1203_v48, 5  ;;  %v8077_v0 = vcombine.low %v1188_v2, %v1198_v40 }
  0xda   : > { %v1211_v10 = vrot.slane %v1209_v20, 5  ;;  %v1215_v31 = vrot.slane %v1213_v51, 4  ;;  %v1221_v23 = vrot.slane %v1219_v38, 5  ;;  %v8044_v11 = vrot.slane %v2594_v43, 9 }
  0xdb   : > { %3479 = vrot.lane.b32.xlu0 %v8187_v46, %s8926_s29  ;;  %v1206_v34 = vor.u32 %v1205_v4, %v1202_v7  ;;  %v2702_v19 = vrot.slane %v9715_v26, 5  ;;  %v2705_v21 = vrot.slane %v9745_v14, 5  ;;  %v8014_v9 = vrot.slane %v1376_v57, 9  ;;  %v482_v46 = vld [vmem:[%s9005_s23 + $0x4c] sm:$0xf] }
  0xdc   : > { %v1216_v24 = vor.u32 %v1215_v31, %v1211_v10  ;;  %v1499_v54 = vrot.slane %v951_v52, 5  ;;  %v1502_v48 = vrot.slane %v973_v28, 5  ;;  %v8013_v51 = vrot.slane %v1375_v44, 9  ;;  %v9788_v38 = vpop.permute.xlu0 %3135  ;;  %v1562_v4 = vld [vmem:[#allocation2 + $0x6c] sm:$0xf] }
  0xdd   : > { %3401 = vrot.lane.b32.xlu1 %v8172_v42, %s8928_s6  ;;  %v1207_v20 = vrot.slane %v1206_v34, 4  ;;  %v2703_v2 = vsel %vm9024_vm9, %v8044_v11, %v2702_v19  ;;  %v2704_v25 = vrot.slane %v2702_v19, 4  ;;  %v1492_v40 = vrot.slane %v9733_v58, 5  ;;  %v9807_v34 = vld [vmem:[#allocation2 + $0x70] sm:$0xf] }
  0xde   : > { %v1217_v26 = vrot.slane %v1216_v24, 4  ;;  %v1500_v14 = vsel %vm9024_vm9, %v8014_v9, %v1499_v54  ;;  %v1501_v43 = vrot.slane %v1499_v54, 4  ;;  %v1495_v42 = vrot.slane %v9741_v3, 5  ;;  %v9811_v24 = vpop.permute.xlu1 %3057 }
  0xdf   : > { %v1212_v52 = vsel %vm9111_vm14, %v1207_v20, %v1211_v10  ;;  %v2706_v28 = vsel %vm9024_vm9, %v2704_v25, %v2705_v21  ;;  %v12932_v44 = vshrl.u32 %v9647_v30, 16  ;;  %v1493_v10 = vsel %vm9024_vm9, %v8013_v51, %v1492_v40  ;;  %v883_v20 = vld [vmem:[#allocation2 + $0x78] sm:$0xf] }
  0xe0   : > { %v1222_v57 = vsel %vm9111_vm14, %v1217_v26, %v1221_v23  ;;  %v8188_v31 = vcombine.low %v2703_v2, %v2706_v28  ;;  %v1503_v58 = vsel %vm9024_vm9, %v1501_v43, %v1502_v48  ;;  %v1494_v11 = vrot.slane %v1492_v40, 4  ;;  %v9813_v9 = vpop.permute.xlu0 %3215 }
  0xe1   : > { %v653_v7 = vrot.slane %v12932_v44, 7  ;;  %2891 = vrot.lane.b32.xlu1 %v8077_v0, %s8924_s27  ;;  %v8078_v21 = vcombine.low %v1212_v52, %v1222_v57  ;;  %v8094_v3 = vcombine.low %v1500_v14, %v1503_v58  ;;  %v654_v19 = vshll.u32 %v9647_v30, 16  ;;  %v324_v14 = vld [vmem:[#allocation2 + $0x80] sm:$0x1] }
  0xe2   : > { %3481 = vrot.lane.b32.xlu0 %v8188_v31, %s8926_s29  ;;  %v659_v54 = vshrl.u32 %v482_v46, 16  ;;  %v662_v48 = vshll.u32 %v482_v46, 16  ;;  %v1787_v2 = vshrl.u32 %v1562_v4, 16  ;;  %v1496_v25 = vsel %vm9024_vm9, %v1494_v11, %v1495_v42  ;;  %v1586_v42 = vld [vmem:[#allocation2 + $0x74] sm:$0x1] }
  0xe3   : > { %v657_v23 = vrot.slane %v653_v7, 4  ;;  %v656_v0 = vor.u32 %v654_v19, %v653_v7  ;;  %v1790_v51 = vshll.u32 %v1562_v4, 16  ;;  %v1800_v26 = vshrl.u32 %v9807_v34, 16  ;;  %v1986_v19 = vld [vmem:[#allocation2 + $0x6c] sm:$0xe] }
  0xe4   : > { %v8093_v30 = vcombine.low %v1493_v10, %v1496_v25  ;;  %v9819_v43 = vrot.slane %v659_v54, 7  ;;  %v1789_v40 = vrot.slane %v1787_v2, 4  ;;  %v8109_v52 = vcombine.low %v1562_v4, %v9807_v34 }
  0xe5   : > { %2893 = vrot.lane.b32.xlu1 %v8078_v21, %s8924_s27  ;;  %v884_v28 = vsel %vm9030_vm10, %v656_v0, %v883_v20  ;;  %v1792_v46 = vrot.slane %v1790_v51, 5  ;;  %v12933_v4 = vcombine.low %v9171_v55, %v9504_v47  ;;  %v325_v31 = vsel %vm8995_vm5, 0, %v324_v14 }
  0xe6   : > { %2971 = vrot.lane.b32.xlu0 %v8093_v30, %s8921_s24  ;;  %v664_v44 = vor.u32 %v662_v48, %v9819_v43  ;;  %v666_v7 = vrot.slane %v9819_v43, 4  ;;  %885 = vst [vmem:[#allocation2 + $0x78] sm:$0xf] %v884_v28  ;;  %326 = vst [vmem:[#allocation2 + $0x80] sm:$0x1] %v325_v31  ;;  %v1796_v21 = vshll.u32 %v9807_v34, 16  ;;  %v9838_v54 = vpop.permute.xlu1 %3137  ;;  %v9840_v48 = vpop.permute.xlu0 %3311 }
  0xe7   : > { %v3505_v57 = vsel %vm3499_vm15, %v12933_v4, %v9709_v59  ;;  %v1793_v10 = vor.u32 %v1792_v46, %v1789_v40  ;;  %v1802_v11 = vrot.slane %v1800_v26, 4  ;;  %v1806_v59 = vshll.u32 %v1586_v42, 16  ;;  %v483_v31 = vld [vmem:[%s9005_s23 + $0x50] sm:$0xf] }
  0xe8   : > { %v3552_v58 = vsel %vm3548_vm1, %v3505_v57, %v9625_v5  ;;  %v665_v55 = vsel %vm9036_vm11, %v657_v23, %v664_v44  ;;  %v12934_v5 = vcombine.low %v9195_v6, %v9200_v41  ;;  %v1798_v25 = vrot.slane %v1796_v21, 5  ;;  %v8811_v6 = vld [vmem:[%s12907_s1 + $0x20] ss:$0 sps:$4 sm:$0xff]   ;;  %v271_v57 = vld [vmem:[#allocation2 + $0x84] sm:$0x1] }
  0xe9   : > { %v3585_v47 = vsel %vm3581_vm2, %v3552_v58, %v9581_v50  ;;  %2973 = vrot.lane.b32.xlu1 %v8094_v3, %s8921_s24  ;;  %886 = vst.msk [vmem:[#allocation2 + $0x7c] sm:$0xf] %vm226_vm0, %v665_v55  ;;  %v1794_v23 = vrot.slane %v1793_v10, 4  ;;  %v3583_v50 = vsel %vm3581_vm2, %v9678_v27, %v9570_v45  ;;  %v1808_v41 = vrot.slane %v1806_v59, 5 }
  0xea   : > { %v9851_v20 = vsel %vm3499_vm15, %v12934_v5, %v9743_v18  ;;  %v9857_v2 = vsel %vm3614_vm4, %v3585_v47, %v9682_v12  ;;  %3067 = vrot.lane.b32.xlu0 %v8109_v52, %s8922_s25  ;;  %vm3647_vm6 = vcmask 326656   ;;  %v3616_v18 = vsel %vm3614_vm4, %v3583_v50, %v9735_v61  ;;  %v9880_v61 = vpop.permute.xlu1 %3217  ;;  %v484_v5 = vld [vmem:[%s9005_s23 + $0x54] sm:$0xf] }
  0xeb   : > { %v8029_v3 = vrot.slane %v1986_v19, 9  ;;  %v1799_v12 = vsel %vm9111_vm14, %v1794_v23, %v1798_v25  ;;  %v1803_v0 = vor.u32 %v1802_v11, %v1798_v25  ;;  %v3649_v51 = vsel %vm3647_vm6, %v3616_v18, %v9633_v16 }
  0xec   : > { %v2100_v45 = vrot.slane %v9807_v34, 5  ;;  %v2103_v27 = vrot.slane %v1586_v42, 5  ;;  %v12935_v26 = vcombine.low %v9218_v15, %v9230_v17  ;;  %vm12914_vm7 = vcmask 1043456   ;;  %v9887_v17 = vpop.permute.xlu0 %3391 }
  0xed   : > { %vm3680_vm8 = vcmask 392192   ;;  %v1564_v30 = vld [vmem:[#allocation2 + $0x78] sm:$0xf]  ;;  %v1804_v43 = vrot.slane %v1803_v0, 4  ;;  %8770 = vmatprep.subr.msk.bf16.mxu0 %vm12914_vm7, %v8811_v6  ;;  %v887_v28 = vld [vmem:[#allocation2 + $0x80] sm:$0x1] }
  0xee   : > { %v9878_v14 = vsel %vm3499_vm15, %v12935_v26, %v9765_v37  ;;  %v1987_v40 = vld [vmem:[#allocation2 + $0x78] sm:$0xe]  ;;  %v2101_v16 = vsel %vm9024_vm9, %v8029_v3, %v2100_v45  ;;  %v2102_v34 = vrot.slane %v2100_v45, 4  ;;  %v3682_v15 = vsel %vm3680_vm8, %v3649_v51, %v9588_v32  ;;  %v9905_v18 = vpop.permute.xlu1 %3313 }
  0xef   : > { %v1811_v37 = vshrl.u32 %v1564_v30, 16  ;;  %v1814_v52 = vshll.u32 %v1564_v30, 16  ;;  %v8030_v46 = vrot.slane %v1987_v40, 9  ;;  %vm3713_vm12 = vcmask 457728  }
  0xf0   : > { %v888_v42 = vsel %vm8972_vm3, %v666_v7, %v887_v28  ;;  %v1809_v44 = vsel %vm9111_vm14, %v1804_v43, %v1808_v41  ;;  %v2104_v4 = vsel %vm9024_vm9, %v2102_v34, %v2103_v27  ;;  %v9897_v32 = vsel %vm3713_vm12, %v3682_v15, %v9754_v56  ;;  %v1565_v58 = vld [vmem:[#allocation2 + $0x7c] sm:$0xf]  ;;  %v2171_v41 = vld [vmem:[#allocation2 + $0x78] sm:$0xf] }
  0xf1   : > { %v1813_v10 = vrot.slane %v1811_v37, 4  ;;  %v1816_v21 = vrot.slane %v1814_v52, 5  ;;  %889 = vst [vmem:[#allocation2 + $0x80] sm:$0x1] %v888_v42  ;;  %v8125_v11 = vcombine.low %v1799_v12, %v1809_v44  ;;  %v8141_v19 = vcombine.low %v2101_v16, %v2104_v4  ;;  %v9914_v43 = vld [vmem:[#allocation2 + $0x7c] sm:$0xf] }
  0xf2   : > { %v1824_v7 = vshrl.u32 %v1565_v58, 16  ;;  %v8110_v55 = vcombine.low %v1564_v30, %v1565_v58  ;;  %v1820_v47 = vshll.u32 %v1565_v58, 16  ;;  %v2107_v59 = vrot.slane %v1565_v58, 5  ;;  %v9912_v45 = vpop.permute.xlu0 %3471 }
  0xf3   : > { %v1817_v23 = vor.u32 %v1816_v21, %v1813_v10  ;;  %3147 = vrot.lane.b32.xlu0 %v8125_v11, %s8927_s30  ;;  %v3857_v25 = vsel %vm12914_vm7, %v8811_v6, 0  ;;  %v272_v56 = vsel %vm8972_vm3, 0, %v271_v57  ;;  %v668_v50 = vshrl.u32 %v483_v31, 16 }
  0xf4   : > { %3069 = vrot.lane.b32.xlu1 %v8110_v55, %s8922_s25  ;;  %v1822_v3 = vrot.slane %v1820_v47, 5  ;;  %v1826_v12 = vrot.slane %v1824_v7, 4  ;;  %v9910_v0 = vsel %vm9024_vm9, %v8030_v46, %v2107_v59  ;;  %v2109_v51 = vrot.slane %v2107_v59, 4  ;;  %8695 = vmatpush3.bf16.msra.mxu0 %v3857_v25  ;;  %273 = vst [vmem:[#allocation2 + $0x84] sm:$0x1] %v272_v56  ;;  %v9924_v55 = vpop.permute.xlu1 %3393 }
  0xf5   : > { %v1818_v6 = vrot.slane %v1817_v23, 4  ;;  %v670_v27 = vrot.slane %v668_v50, 7  ;;  %v671_v26 = vshll.u32 %v483_v31, 16  ;;  %v676_v30 = vshrl.u32 %v484_v5, 16  ;;  %v327_v7 = vld [vmem:[#allocation2 + $0x8c] sm:$0x1] }
  0xf6   : > { %v1827_v40 = vor.u32 %v1826_v12, %v1822_v3  ;;  %v679_v16 = vshll.u32 %v484_v5, 16  ;;  %v2396_v34 = vshrl.u32 %v2171_v41, 16  ;;  %v2399_v15 = vshll.u32 %v2171_v41, 16 }
  0xf7   : > { %v1823_v37 = vsel %vm9111_vm14, %v1818_v6, %v1822_v3  ;;  %3227 = vrot.lane.b32.xlu0 %v8141_v19, %s8925_s28  ;;  %v673_v52 = vor.u32 %v671_v26, %v670_v27  ;;  %v674_v28 = vrot.slane %v670_v27, 4  ;;  %v9919_v46 = vrot.slane %v676_v30, 7  ;;  %v952_v6 = vld [vmem:[#allocation2 + $0x78] sm:$0xf]  ;;  %v9962_v30 = vld [vmem:[#allocation2 + $0x7c] sm:$0xf] }
  0xf8   : > { %v1587_v42 = vld [vmem:[#allocation2 + $0x80] sm:$0x1]  ;;  %v1828_v44 = vrot.slane %v1827_v40, 4  ;;  %v2398_v4 = vrot.slane %v2396_v34, 4  ;;  %v2401_v57 = vrot.slane %v2399_v15, 5  ;;  %v2409_v31 = vshrl.u32 %v9914_v43, 16  ;;  %v9930_v59 = vpop.permute.xlu0 %3473  ;;  %v9971_v34 = vpop.permute.xlu1 %2883 }
  0xf9   : > { %v1830_v58 = vshll.u32 %v1587_v42, 16  ;;  %v2110_v10 = vrot.slane %v1587_v42, 5  ;;  %v681_v21 = vor.u32 %v679_v16, %v9919_v46  ;;  %v683_v11 = vrot.slane %v9919_v46, 4  ;;  %v9950_v12 = vld [vmem:[#allocation2 + $0x80] sm:$0x1] }
  0xfa   : > { %v8157_v19 = vcombine.low %v2171_v41, %v9914_v43  ;;  %v3556_v47 = vsel %vm3548_vm1, %v9878_v14, %v9783_v60  ;;  %vm3746_vm13 = vcmask 523264   ;;  %vm12915_vm7 = vcmask 588800   ;;  %v9964_v40 = vld [vmem:[#allocation2 + $0x80] sm:$0x1] }
  0xfb   : > { %v1832_v5 = vrot.slane %v1830_v58, 5  ;;  %v2111_v23 = vsel %vm9024_vm9, %v2109_v51, %v2110_v10  ;;  %v682_v25 = vsel %vm9036_vm11, %v674_v28, %v681_v21  ;;  %v890_v56 = vld [vmem:[#allocation2 + $0x84] sm:$0xf]  ;;  %v3748_v50 = vsel %vm3746_vm13, %v9897_v32, %v9658_v13  ;;  %v2595_v28 = vld [vmem:[#allocation2 + $0x78] sm:$0xe] }
  0xfc   : > { %v8142_v41 = vcombine.low %v9910_v0, %v2111_v23  ;;  %v891_v60 = vsel %vm9030_vm10, %v673_v52, %v890_v56  ;;  %893 = vst.msk [vmem:[#allocation2 + $0x88] sm:$0xf] %vm226_vm0, %v682_v25  ;;  %3323 = vrot.lane.b32.xlu0 %v8157_v19, %s8923_s26  ;;  %8696 = vmatprep.mubr.msk.bf16.mxu0 %vm12915_vm7, %v3748_v50  ;;  %v328_v3 = vsel %vm8995_vm5, 0, %v327_v7  ;;  %v2405_v27 = vshll.u32 %v9914_v43, 16  ;;  %v9973_v15 = vpop.permute.xlu0 %2963 }
  0xfd   : > { %v3651_v14 = vsel %vm3647_vm6, %v9857_v2, %v9655_v35  ;;  %v1833_v13 = vsel %vm9111_vm14, %v1828_v44, %v1832_v5  ;;  %892 = vst [vmem:[#allocation2 + $0x84] sm:$0xf] %v891_v60  ;;  %v3554_v0 = vsel %vm3548_vm1, %v9851_v20, %v9767_v22  ;;  %329 = vst [vmem:[#allocation2 + $0x8c] sm:$0x1] %v328_v3  ;;  %v2411_v26 = vrot.slane %v2409_v31, 4 }
  0xfe   : > { %v3684_v32 = vsel %vm3680_vm8, %v3651_v14, %v9605_v63  ;;  %v2402_v51 = vor.u32 %v2401_v57, %v2398_v4  ;;  %v8126_v35 = vcombine.low %v1823_v37, %v1833_v13  ;;  %v2415_v22 = vshll.u32 %v9950_v12, 16 }
  0xff   : > { %v3717_v2 = vsel %vm3713_vm12, %v3684_v32, %v9707_v49  ;;  %v3589_v20 = vsel %vm3581_vm2, %v3556_v47, %v9811_v24  ;;  %v2407_v49 = vrot.slane %v2405_v27, 5  ;;  %v3587_v37 = vsel %vm3581_vm2, %v3554_v0, %v9778_v53 }
 0x100   : > { %v3750_v63 = vsel %vm3746_vm13, %v3717_v2, %v9689_v36  ;;  %v2403_v16 = vrot.slane %v2402_v51, 4  ;;  %3149 = vrot.lane.b32.xlu1 %v8126_v35, %s8927_s30  ;;  %v1224_v52 = vshrl.u32 %v952_v6, 16  ;;  %v1227_v36 = vshll.u32 %v952_v6, 16  ;;  %v9998_v0 = vpop.permute.xlu0 %3059 }
 0x101   : > { %8697 = vmatmul.mubr.msk.bf16.vlgmr.msra.gmra.mrb[0].mxu0 %vm12915_vm7, %v3750_v63  ;;  %v2417_v42 = vrot.slane %v2415_v22, 5  ;;  %v1233_v44 = vshll.u32 %v9962_v30, 16  ;;  %v1237_v24 = vshrl.u32 %v9962_v30, 16  ;;  %v1243_v4 = vshll.u32 %v9964_v40, 16 }
 0x102   : > { %v2408_v57 = vsel %vm9111_vm14, %v2403_v16, %v2407_v49  ;;  %v2412_v31 = vor.u32 %v2411_v26, %v2407_v49  ;;  %v1226_v58 = vrot.slane %v1224_v52, 4  ;;  %v1229_v10 = vrot.slane %v1227_v36, 5 }
 0x103   : > { %v9984_v21 = vld [vmem:[#allocation2 + $0x88] sm:$0xf]  ;;  %v1235_v7 = vrot.slane %v1233_v44, 5  ;;  %v1239_v53 = vrot.slane %v1237_v24, 4  ;;  %v1245_v19 = vrot.slane %v1243_v4, 5  ;;  %v8045_v47 = vrot.slane %v2595_v28, 9 }
 0x104   : > { %3229 = vrot.lane.b32.xlu1 %v8142_v41, %s8925_s28  ;;  %v2173_v5 = vld [vmem:[#allocation2 + $0x84] sm:$0xf]  ;;  %v2433_v23 = vshrl.u32 %v9984_v21, 16  ;;  %v894_v25 = vld [vmem:[#allocation2 + $0x8c] sm:$0x1]  ;;  %v2429_v56 = vshll.u32 %v9984_v21, 16  ;;  %v1230_v50 = vor.u32 %v1229_v10, %v1226_v58  ;;  %v3622_v60 = vsel %vm3614_vm4, %v3589_v20, %v9838_v54  ;;  %v9996_v41 = vpop.permute.xlu1 %2885 }
 0x105   : > { %v2420_v14 = vshrl.u32 %v2173_v5, 16  ;;  %v2423_v3 = vshll.u32 %v2173_v5, 16  ;;  %v8158_v13 = vcombine.low %v2173_v5, %v9984_v21  ;;  %v895_v32 = vsel %vm8972_vm3, %v683_v11, %v894_v25  ;;  %v954_v16 = vld [vmem:[#allocation2 + $0x84] sm:$0xf]  ;;  %v955_v49 = vld [vmem:[#allocation2 + $0x88] sm:$0xf] }
 0x106   : > { %896 = vst [vmem:[#allocation2 + $0x8c] sm:$0x1] %v895_v32  ;;  %v10000_v51 = vrot.slane %v2429_v56, 5  ;;  %v2435_v6 = vrot.slane %v2433_v23, 4  ;;  %v2413_v35 = vrot.slane %v2412_v31, 4  ;;  %v1231_v2 = vrot.slane %v1230_v50, 4 }
 0x107   : > { %v2422_v54 = vrot.slane %v2420_v14, 4  ;;  %v2425_v27 = vrot.slane %v2423_v3, 5  ;;  %v1240_v26 = vor.u32 %v1239_v53, %v1235_v7  ;;  %v2709_v63 = vrot.slane %v9914_v43, 5  ;;  %v10019_v53 = vpop.permute.xlu0 %3139 }
 0x108   : > { %3325 = vrot.lane.b32.xlu1 %v8158_v13, %s8923_s26  ;;  %v2436_v46 = vor.u32 %v2435_v6, %v10000_v51  ;;  %v2418_v11 = vsel %vm9111_vm14, %v2413_v35, %v2417_v42  ;;  %v1236_v22 = vsel %vm9111_vm14, %v1231_v2, %v1235_v7  ;;  %v2712_v20 = vrot.slane %v9950_v12, 5  ;;  %v2596_v7 = vld [vmem:[#allocation2 + $0x84] sm:$0xe] }
 0x109   : > { %v2426_v52 = vor.u32 %v2425_v27, %v2422_v54  ;;  %v8173_v36 = vcombine.low %v2408_v57, %v2418_v11  ;;  %v1241_v28 = vrot.slane %v1240_v26, 4  ;;  %v2710_v43 = vsel %vm9024_vm9, %v8045_v47, %v2709_v63  ;;  %v10017_v57 = vpop.permute.xlu1 %2965  ;;  %v1378_v35 = vld [vmem:[#allocation2 + $0x84] sm:$0xe]  ;;  %v1377_v11 = vld [vmem:[#allocation2 + $0x78] sm:$0xe] }
 0x10a   : > { %v2437_v44 = vrot.slane %v2436_v46, 4  ;;  %v2711_v24 = vrot.slane %v2709_v63, 4  ;;  %v3620_v4 = vsel %vm3614_vm4, %v3587_v37, %v9788_v38  ;;  %v1248_v31 = vshrl.u32 %v954_v16, 16 }
 0x10b   : > { %v2427_v58 = vrot.slane %v2426_v52, 4  ;;  %3403 = vrot.lane.b32.xlu0 %v8173_v36, %s8928_s6  ;;  %v1246_v42 = vsel %vm9111_vm14, %v1241_v28, %v1245_v19  ;;  %v1251_v12 = vshll.u32 %v954_v16, 16  ;;  %v1257_v10 = vshll.u32 %v955_v49, 16 }
 0x10c   : > { %v10021_v47 = vcombine.low %v1236_v22, %v1246_v42  ;;  %v2713_v5 = vsel %vm9024_vm9, %v2711_v24, %v2712_v20  ;;  %v1250_v38 = vrot.slane %v1248_v31, 4  ;;  %v1261_v37 = vshrl.u32 %v955_v49, 16  ;;  %v274_v42 = vld [vmem:[#allocation2 + $0x90] sm:$0x1] }
 0x10d   : > { %v2196_v23 = vld [vmem:[#allocation2 + $0x8c] sm:$0x1]  ;;  %v2432_v25 = vsel %vm9111_vm14, %v2427_v58, %v10000_v51  ;;  %v8189_v19 = vcombine.low %v2710_v43, %v2713_v5  ;;  %v1253_v50 = vrot.slane %v1251_v12, 5  ;;  %v1259_v14 = vrot.slane %v1257_v10, 5  ;;  %v10036_v28 = vpop.permute.xlu1 %3061  ;;  %v485_v12 = vld [vmem:[%s9005_s23 + $0x58] sm:$0xf] }
 0x10e   : > { %v975_v56 = vld [vmem:[#allocation2 + $0x8c] sm:$0x1]  ;;  %v2439_v3 = vshll.u32 %v2196_v23, 16  ;;  %v1263_v13 = vrot.slane %v1261_v37, 4  ;;  %v8046_v6 = vrot.slane %v2596_v7, 9  ;;  %v2716_v54 = vrot.slane %v9984_v21, 5  ;;  %v10038_v21 = vpop.permute.xlu0 %3219 }
 0x10f   : > { %v1267_v32 = vshll.u32 %v975_v56, 16  ;;  %3483 = vrot.lane.b32.xlu0 %v8189_v19, %s8926_s29  ;;  %v1254_v2 = vor.u32 %v1253_v50, %v1250_v38  ;;  %v2719_v27 = vrot.slane %v2196_v23, 5  ;;  %v3655_v26 = vsel %vm3647_vm6, %v3622_v60, %v9880_v61  ;;  %v1566_v19 = vld [vmem:[#allocation2 + $0x84] sm:$0xf] }
 0x110   : > { %v2441_v63 = vrot.slane %v2439_v3, 5  ;;  %v1264_v51 = vor.u32 %v1263_v13, %v1259_v14  ;;  %v3653_v46 = vsel %vm3647_vm6, %v3620_v4, %v9813_v9  ;;  %v2717_v20 = vsel %vm9024_vm9, %v8046_v6, %v2716_v54  ;;  %v10068_v3 = vld [vmem:[#allocation2 + $0x88] sm:$0xf] }
 0x111   : > { %v1269_v16 = vrot.slane %v1267_v32, 5  ;;  %v1255_v22 = vrot.slane %v1254_v2, 4  ;;  %v2718_v52 = vrot.slane %v2716_v54, 4  ;;  %v8016_v36 = vrot.slane %v1378_v35, 9 }
 0x112   : > { %v2442_v61 = vsel %vm9111_vm14, %v2437_v44, %v2441_v63  ;;  %v1265_v60 = vrot.slane %v1264_v51, 4  ;;  %v1513_v43 = vrot.slane %v955_v49, 5  ;;  %v1516_v24 = vrot.slane %v975_v56, 5  ;;  %v10076_v35 = vpop.permute.xlu0 %3315 }
 0x113   : > { %v8174_v9 = vcombine.low %v2432_v25, %v2442_v61  ;;  %v1260_v4 = vsel %vm9111_vm14, %v1255_v22, %v1259_v14  ;;  %v2720_v31 = vsel %vm9024_vm9, %v2718_v52, %v2719_v27  ;;  %v8015_v58 = vrot.slane %v1377_v11, 9  ;;  %v486_v25 = vld [vmem:[%s9005_s23 + $0x5c] sm:$0xf] }
 0x114   : > { %v1270_v10 = vsel %vm9111_vm14, %v1265_v60, %v1269_v16  ;;  %v8190_v7 = vcombine.low %v2717_v20, %v2720_v31  ;;  %v10051_v44 = vsel %vm9024_vm9, %v8016_v36, %v1513_v43  ;;  %v1515_v49 = vrot.slane %v1513_v43, 4  ;;  %v1588_v36 = vld [vmem:[#allocation2 + $0x8c] sm:$0x1] }
 0x115   : > { %3405 = vrot.lane.b32.xlu1 %v8174_v9, %s8928_s6  ;;  %v8080_v5 = vcombine.low %v1260_v4, %v1270_v10  ;;  %v1506_v38 = vrot.slane %v9962_v30, 5  ;;  %v1509_v37 = vrot.slane %v9964_v40, 5  ;;  %v3688_v23 = vsel %vm3680_vm8, %v3655_v26, %v9905_v18  ;;  %v10074_v6 = vpop.permute.xlu1 %3141  ;;  %v12937_v10 = vld [vmem:[#allocation4_spill] sm:$0xff] }
 0x116   : > { %3485 = vrot.lane.b32.xlu0 %v8190_v7, %s8926_s29  ;;  %v10062_v56 = vsel %vm9024_vm9, %v1515_v49, %v1516_v24  ;;  %v3686_v50 = vsel %vm3680_vm8, %v3653_v46, %v9840_v48  ;;  %v275_v14 = vsel %vm8972_vm3, 0, %v274_v42  ;;  %v685_v30 = vshrl.u32 %v485_v12, 16  ;;  %v330_v46 = vld [vmem:[#allocation2 + $0x98] sm:$0x1]  ;;  %v1988_v24 = vld [vmem:[#allocation2 + $0x84] sm:$0xe] }
 0x117   : > { %v8096_v18 = vcombine.low %v10051_v44, %v10062_v56  ;;  %v1507_v40 = vsel %vm9024_vm9, %v8015_v58, %v1506_v38  ;;  %v1508_v13 = vrot.slane %v1506_v38, 4  ;;  %276 = vst [vmem:[#allocation2 + $0x90] sm:$0x1] %v275_v14  ;;  %v688_v32 = vshll.u32 %v485_v12, 16  ;;  %v277_v56 = vld [vmem:[#allocation2 + $0x9c] sm:$0x1] }
 0x118   : > { %v687_v48 = vrot.slane %v685_v30, 7  ;;  %v693_v2 = vshrl.u32 %v486_v25, 16  ;;  %v696_v54 = vshll.u32 %v486_v25, 16  ;;  %v1835_v27 = vshrl.u32 %v1566_v19, 16  ;;  %v10104_v38 = vpop.permute.xlu0 %3395 }
 0x119   : > { %2895 = vrot.lane.b32.xlu1 %v10021_v47, %s8924_s27  ;;  %v1510_v26 = vsel %vm9024_vm9, %v1508_v13, %v1509_v37  ;;  %v1838_v63 = vshll.u32 %v1566_v19, 16  ;;  %v1848_v51 = vshrl.u32 %v10068_v3, 16  ;;  %v8111_v16 = vcombine.low %v1566_v19, %v10068_v3  ;;  %v10102_v49 = vpop.permute.xlu1 %3221 }
 0x11a   : > { %v8095_v11 = vcombine.low %v1507_v40, %v1510_v26  ;;  %v690_v22 = vor.u32 %v688_v32, %v687_v48  ;;  %v691_v20 = vrot.slane %v687_v48, 4  ;;  %v10084_v52 = vrot.slane %v693_v2, 7  ;;  %v487_v40 = vld [vmem:[%s9005_s23 + $0x60] sm:$0xf]  ;;  %v8872_v48 = vld [vmem:[#allocation2 + $0x3c] sm:$0xf] }
 0x11b   : > { %v1837_v61 = vrot.slane %v1835_v27, 4  ;;  %v1840_v60 = vrot.slane %v1838_v63, 5  ;;  %v3721_v47 = vsel %vm3713_vm12, %v3688_v23, %v9924_v55  ;;  %v3719_v43 = vsel %vm3713_vm12, %v3686_v50, %v9887_v17  ;;  %v12936_v17 = vld [vmem:[#allocation5_spill] sm:$0xff]  ;;  %v8871_v32 = vld [vmem:[#allocation2 + $0x40] sm:$0xf] }
 0x11c   : > { %2975 = vrot.lane.b32.xlu0 %v8095_v11, %s8921_s24  ;;  %v698_v9 = vor.u32 %v696_v54, %v10084_v52  ;;  %v700_v4 = vrot.slane %v10084_v52, 4  ;;  %v331_v31 = vsel %vm8995_vm5, 0, %v330_v46  ;;  %v1844_v58 = vshll.u32 %v10068_v3, 16  ;;  %v488_v27 = vld [vmem:[%s9005_s23 + $0x64] sm:$0xf] }
 0x11d   : > { %2897 = vrot.lane.b32.xlu1 %v8080_v5, %s8924_s27  ;;  %332 = vst [vmem:[#allocation2 + $0x98] sm:$0x1] %v331_v31  ;;  %v1841_v42 = vor.u32 %v1840_v60, %v1837_v61  ;;  %v1850_v55 = vrot.slane %v1848_v51, 4  ;;  %v1854_v12 = vshll.u32 %v1588_v36, 16  ;;  %v12938_v7 = vcombine.low %v12936_v17, %v12937_v10  ;;  %v10134_v61 = vpop.permute.xlu1 %3317 }
 0x11e   : > { %v699_v37 = vsel %vm9036_vm11, %v691_v20, %v698_v9  ;;  %v897_v23 = vld [vmem:[#allocation2 + $0x90] sm:$0xf]  ;;  %v1846_v5 = vrot.slane %v1844_v58, 5  ;;  %v3752_v25 = vsel %vm3746_vm13, %v3719_v43, %v9912_v45  ;;  %v8031_v19 = vrot.slane %v1988_v24, 9  ;;  %v10136_v60 = vpop.permute.xlu0 %3475 }
 0x11f   : > { %v3514_v44 = vsel %vm3499_vm15, %v12938_v7, %v9971_v34  ;;  %v898_v50 = vsel %vm9030_vm10, %v690_v22, %v897_v23  ;;  %900 = vst.msk [vmem:[#allocation2 + $0x94] sm:$0xf] %vm226_vm0, %v699_v37  ;;  %v1842_v34 = vrot.slane %v1841_v42, 4  ;;  %v1856_v14 = vrot.slane %v1854_v12, 5  ;;  %8700 = vmatprep.mubr.msk.bf16.mxu0 %vm12915_vm7, %v3752_v25 }
 0x120   : > { %v2114_v30 = vrot.slane %v10068_v3, 5  ;;  %899 = vst [vmem:[#allocation2 + $0x90] sm:$0xf] %v898_v50  ;;  %3071 = vrot.lane.b32.xlu0 %v8111_v16, %s8922_s25  ;;  %v1851_v13 = vor.u32 %v1850_v55, %v1846_v5  ;;  %v2117_v45 = vrot.slane %v1588_v36, 5  ;;  %v8058_v2 = vcombine.low %v8872_v48, %v8871_v32 }
 0x121   : > { %v3754_v54 = vsel %vm3746_vm13, %v3721_v47, %v9930_v59  ;;  %2977 = vrot.lane.b32.xlu1 %v8096_v18, %s8921_s24  ;;  %v1847_v3 = vsel %vm9111_vm14, %v1842_v34, %v1846_v5  ;;  %v278_v51 = vsel %vm8972_vm3, 0, %v277_v56  ;;  %v702_v59 = vshrl.u32 %v487_v40, 16  ;;  %v333_v18 = vld [vmem:[#allocation2 + $0xa4] sm:$0x1] }
 0x122   : > { %v2115_v26 = vsel %vm9024_vm9, %v8031_v19, %v2114_v30  ;;  %v2116_v63 = vrot.slane %v2114_v30, 4  ;;  %8701 = vmatmul.mubr.msk.bf16.gmra.mrb[4].mxu0 %vm12915_vm7, %v3754_v54  ;;  %v1852_v16 = vrot.slane %v1851_v13, 4  ;;  %v3517_v46 = vsel %vm3499_vm15, %v8058_v2, %v9996_v41  ;;  %279 = vst [vmem:[#allocation2 + $0x9c] sm:$0x1] %v278_v51 }
 0x123   : > { %v705_v11 = vshll.u32 %v487_v40, 16  ;;  %v710_v20 = vshrl.u32 %v488_v27, 16  ;;  %v713_v52 = vshll.u32 %v488_v27, 16  ;;  %v3560_v36 = vsel %vm3548_vm1, %v3517_v46, %v10017_v57 }
 0x124   : > { %v2118_v22 = vsel %vm9024_vm9, %v2116_v63, %v2117_v45  ;;  %v901_v47 = vld [vmem:[#allocation2 + $0x98] sm:$0x1]  ;;  %v1857_v41 = vsel %vm9111_vm14, %v1852_v16, %v1856_v14  ;;  %v704_v24 = vrot.slane %v702_v59, 7  ;;  %v334_v42 = vsel %vm8995_vm5, 0, %v333_v18  ;;  %v10155_v45 = vpop.permute.xlu1 %3397 }
 0x125   : > { %v8143_v43 = vcombine.low %v2115_v26, %v2118_v22  ;;  %v902_v9 = vsel %vm8972_vm3, %v700_v4, %v901_v47  ;;  %v8127_v31 = vcombine.low %v1847_v3, %v1857_v41  ;;  %v712_v58 = vrot.slane %v710_v20, 7  ;;  %335 = vst [vmem:[#allocation2 + $0xa4] sm:$0x1] %v334_v42  ;;  %v10157_v32 = vpop.permute.xlu0 %3477 }
 0x126   : > { %v1569_v55 = vld [vmem:[#allocation2 + $0x94] sm:$0xf]  ;;  %903 = vst [vmem:[#allocation2 + $0x98] sm:$0x1] %v902_v9  ;;  %v707_v57 = vor.u32 %v705_v11, %v704_v24  ;;  %v708_v12 = vrot.slane %v704_v24, 4  ;;  %v3558_v17 = vsel %vm3548_vm1, %v3514_v44, %v9973_v15  ;;  %v3593_v10 = vsel %vm3581_vm2, %v3560_v36, %v10036_v28 }
 0x127   : > { %v1568_v7 = vld [vmem:[#allocation2 + $0x90] sm:$0xf]  ;;  %v1872_v37 = vshrl.u32 %v1569_v55, 16  ;;  %v1868_v23 = vshll.u32 %v1569_v55, 16  ;;  %3151 = vrot.lane.b32.xlu0 %v8127_v31, %s8927_s30  ;;  %v715_v5 = vor.u32 %v713_v52, %v712_v58  ;;  %v10149_v25 = vld [vmem:[#allocation2 + $0x94] sm:$0xf]  ;;  %v3591_v19 = vsel %vm3581_vm2, %v3558_v17, %v9998_v0 }
 0x128   : > { %v1989_v4 = vld [vmem:[#allocation2 + $0x90] sm:$0xe]  ;;  %v1859_v56 = vshrl.u32 %v1568_v7, 16  ;;  %v1862_v50 = vshll.u32 %v1568_v7, 16  ;;  %v8112_v34 = vcombine.low %v1568_v7, %v1569_v55  ;;  %v2121_v28 = vrot.slane %v1569_v55, 5 }
 0x129   : > { %v8032_v15 = vrot.slane %v1989_v4, 9  ;;  %v2175_v44 = vld [vmem:[#allocation2 + $0x90] sm:$0xf]  ;;  %v1870_v14 = vrot.slane %v1868_v23, 5  ;;  %v1874_v30 = vrot.slane %v1872_v37, 4  ;;  %v716_v40 = vsel %vm9036_vm11, %v708_v12, %v715_v5 }
 0x12a   : > { %v904_v13 = vld [vmem:[#allocation2 + $0x9c] sm:$0xf]  ;;  %v1861_v48 = vrot.slane %v1859_v56, 4  ;;  %v1864_v2 = vrot.slane %v1862_v50, 5  ;;  %3073 = vrot.lane.b32.xlu1 %v8112_v34, %s8922_s25  ;;  %907 = vst.msk [vmem:[#allocation2 + $0xa0] sm:$0xf] %vm226_vm0, %v716_v40  ;;  %v3626_v54 = vsel %vm3614_vm4, %v3593_v10, %v10074_v6  ;;  %v8159_v59 = vcombine.low %v2175_v44, %v10149_v25 }
 0x12b   : > { %v905_v0 = vsel %vm9030_vm10, %v707_v57, %v904_v13  ;;  %v1875_v27 = vor.u32 %v1874_v30, %v1870_v14  ;;  %v2123_v3 = vrot.slane %v2121_v28, 4  ;;  %3231 = vrot.lane.b32.xlu0 %v8143_v43, %s8925_s28  ;;  %v717_v26 = vrot.slane %v712_v58, 4  ;;  %v956_v11 = vld [vmem:[#allocation2 + $0x90] sm:$0xf]  ;;  %v10181_v57 = vpop.permute.xlu1 %2887  ;;  %v10199_v13 = vld [vmem:[#allocation2 + $0x94] sm:$0xf] }
 0x12c   : > { %906 = vst [vmem:[#allocation2 + $0x9c] sm:$0xf] %v905_v0  ;;  %v2444_v63 = vshrl.u32 %v2175_v44, 16  ;;  %v1865_v51 = vor.u32 %v1864_v2, %v1861_v48  ;;  %v2447_v16 = vshll.u32 %v2175_v44, 16  ;;  %v2457_v46 = vshrl.u32 %v10149_v25, 16 }
 0x12d   : > { %v1589_v18 = vld [vmem:[#allocation2 + $0x98] sm:$0x1]  ;;  %v1876_v22 = vrot.slane %v1875_v27, 4  ;;  %v2122_v20 = vsel %vm9024_vm9, %v8032_v15, %v2121_v28  ;;  %v908_v52 = vld [vmem:[#allocation2 + $0xa4] sm:$0x1]  ;;  %v10172_v36 = vsel %vm3614_vm4, %v3591_v19, %v10019_v53  ;;  %v2453_v58 = vshll.u32 %v10149_v25, 16  ;;  %v10183_v53 = vpop.permute.xlu0 %2967 }
 0x12e   : > { %v2446_v6 = vrot.slane %v2444_v63, 4  ;;  %v1866_v47 = vrot.slane %v1865_v51, 4  ;;  %v1878_v41 = vshll.u32 %v1589_v18, 16  ;;  %v2124_v43 = vrot.slane %v1589_v18, 5  ;;  %v10174_v9 = vld [vmem:[#allocation2 + $0x98] sm:$0x1] }
 0x12f   : > { %v2449_v24 = vrot.slane %v2447_v16, 5  ;;  %3327 = vrot.lane.b32.xlu0 %v8159_v59, %s8923_s26  ;;  %v909_v31 = vsel %vm8972_vm3, %v717_v26, %v908_v52  ;;  %v2459_v42 = vrot.slane %v2457_v46, 4  ;;  %v2463_v55 = vshll.u32 %v10174_v9, 16  ;;  %v10206_v51 = vpop.permute.xlu1 %2889 }
 0x130   : > { %v1871_v12 = vsel %vm9111_vm14, %v1866_v47, %v1870_v14  ;;  %v1880_v17 = vrot.slane %v1878_v41, 5  ;;  %v2125_v10 = vsel %vm9024_vm9, %v2123_v3, %v2124_v43  ;;  %910 = vst [vmem:[#allocation2 + $0xa4] sm:$0x1] %v909_v31  ;;  %v2455_v4 = vrot.slane %v2453_v58, 5  ;;  %v2597_v43 = vld [vmem:[#allocation2 + $0x90] sm:$0xe] }
 0x131   : > { %v2450_v7 = vor.u32 %v2449_v24, %v2446_v6  ;;  %v8144_v37 = vcombine.low %v2122_v20, %v2125_v10  ;;  %v10189_v23 = vld [vmem:[#allocation2 + $0xa0] sm:$0xf]  ;;  %v1272_v5 = vshrl.u32 %v956_v11, 16  ;;  %v10193_v19 = vsel %vm3647_vm6, %v3626_v54, %v10102_v49  ;;  %v10203_v54 = vld [vmem:[#allocation2 + $0x98] sm:$0x1]  ;;  %v10208_v16 = vpop.permute.xlu0 %3063 }
 0x132   : > { %v1881_v56 = vsel %vm9111_vm14, %v1876_v22, %v1880_v17  ;;  %v2481_v34 = vshrl.u32 %v10189_v23, 16  ;;  %v2477_v15 = vshll.u32 %v10189_v23, 16  ;;  %v2465_v40 = vrot.slane %v2463_v55, 5 }
 0x133   : > { %v2177_v50 = vld [vmem:[#allocation2 + $0x9c] sm:$0xf]  ;;  %v2451_v44 = vrot.slane %v2450_v7, 4  ;;  %v8128_v14 = vcombine.low %v1871_v12, %v1881_v56  ;;  %v2460_v0 = vor.u32 %v2459_v42, %v2455_v4  ;;  %v1274_v26 = vrot.slane %v1272_v5, 4 }
 0x134   : > { %v2468_v30 = vshrl.u32 %v2177_v50, 16  ;;  %v2471_v28 = vshll.u32 %v2177_v50, 16  ;;  %v2479_v48 = vrot.slane %v2477_v15, 5  ;;  %v2483_v2 = vrot.slane %v2481_v34, 4  ;;  %v958_v10 = vld [vmem:[#allocation2 + $0x9c] sm:$0xf] }
 0x135   : > { %v2456_v49 = vsel %vm9111_vm14, %v2451_v44, %v2455_v4  ;;  %3153 = vrot.lane.b32.xlu1 %v8128_v14, %s8927_s30  ;;  %v1275_v63 = vshll.u32 %v956_v11, 16  ;;  %v2461_v59 = vrot.slane %v2460_v0, 4  ;;  %v1281_v18 = vshll.u32 %v10199_v13, 16  ;;  %v10225_v14 = vpop.permute.xlu1 %2969 }
 0x136   : > { %v2470_v27 = vrot.slane %v2468_v30, 4  ;;  %v2473_v3 = vrot.slane %v2471_v28, 5  ;;  %v2484_v46 = vor.u32 %v2483_v2, %v2479_v48  ;;  %v1285_v22 = vshrl.u32 %v10199_v13, 16  ;;  %v10227_v30 = vpop.permute.xlu0 %3143 }
 0x137   : > { %v8160_v20 = vcombine.low %v2177_v50, %v10189_v23  ;;  %v10213_v6 = vld [vmem:[#allocation2 + $0xa4] sm:$0x1]  ;;  %v1277_v47 = vrot.slane %v1275_v63, 5  ;;  %v1291_v41 = vshll.u32 %v10203_v54, 16  ;;  %v2466_v31 = vsel %vm9111_vm14, %v2461_v59, %v2465_v40  ;;  %v2598_v59 = vld [vmem:[#allocation2 + $0x9c] sm:$0xe] }
 0x138   : > { %v2474_v52 = vor.u32 %v2473_v3, %v2470_v27  ;;  %v2485_v11 = vrot.slane %v2484_v46, 4  ;;  %v2487_v24 = vshll.u32 %v10213_v6, 16  ;;  %v1283_v58 = vrot.slane %v1281_v18, 5  ;;  %v977_v2 = vld [vmem:[#allocation2 + $0xa4] sm:$0x1] }
 0x139   : > { %3233 = vrot.lane.b32.xlu1 %v8144_v37, %s8925_s28  ;;  %v8175_v55 = vcombine.low %v2456_v49, %v2466_v31  ;;  %v1278_v12 = vor.u32 %v1277_v47, %v1274_v26  ;;  %v1287_v17 = vrot.slane %v1285_v22, 4  ;;  %v1293_v4 = vrot.slane %v1291_v41, 5  ;;  %v959_v37 = vld [vmem:[#allocation2 + $0xa0] sm:$0xf] }
 0x13a   : > { %v2475_v42 = vrot.slane %v2474_v52, 4  ;;  %v2489_v7 = vrot.slane %v2487_v24, 5  ;;  %v8047_v5 = vrot.slane %v2597_v43, 9  ;;  %v2723_v56 = vrot.slane %v10149_v25, 5 }
 0x13b   : > { %3407 = vrot.lane.b32.xlu0 %v8175_v55, %s8928_s6  ;;  %v1279_v34 = vrot.slane %v1278_v12, 4  ;;  %v1288_v15 = vor.u32 %v1287_v17, %v1283_v58  ;;  %v2726_v44 = vrot.slane %v10174_v9, 5  ;;  %v1299_v27 = vshll.u32 %v958_v10, 16  ;;  %v1379_v12 = vld [vmem:[#allocation2 + $0x90] sm:$0xe]  ;;  %v10244_v17 = vpop.permute.xlu1 %3065 }
 0x13c   : > { %v2480_v50 = vsel %vm9111_vm14, %v2475_v42, %v2479_v48  ;;  %v2490_v28 = vsel %vm9111_vm14, %v2485_v11, %v2489_v7  ;;  %v2724_v25 = vsel %vm9024_vm9, %v8047_v5, %v2723_v56  ;;  %v2725_v40 = vrot.slane %v2723_v56, 4 }
 0x13d   : > { %v1296_v48 = vshrl.u32 %v958_v10, 16  ;;  %3329 = vrot.lane.b32.xlu1 %v8160_v20, %s8923_s26  ;;  %v8176_v49 = vcombine.low %v2480_v50, %v2490_v28  ;;  %v1284_v9 = vsel %vm9111_vm14, %v1279_v34, %v1283_v58  ;;  %v1289_v0 = vrot.slane %v1288_v15, 4  ;;  %v1380_v20 = vld [vmem:[#allocation2 + $0x9c] sm:$0xe]  ;;  %v10246_v10 = vpop.permute.xlu0 %3223 }
 0x13e   : > { %v2727_v3 = vsel %vm9024_vm9, %v2725_v40, %v2726_v44  ;;  %v1305_v63 = vshll.u32 %v959_v37, 16  ;;  %v1309_v46 = vshrl.u32 %v959_v37, 16  ;;  %v1301_v52 = vrot.slane %v1299_v27, 5  ;;  %v280_v40 = vld [vmem:[#allocation2 + $0xa8] sm:$0x1] }
 0x13f   : > { %v1298_v26 = vrot.slane %v1296_v48, 4  ;;  %v1294_v18 = vsel %vm9111_vm14, %v1289_v0, %v1293_v4  ;;  %v8191_v22 = vcombine.low %v2724_v25, %v2727_v3  ;;  %v1315_v47 = vshll.u32 %v977_v2, 16  ;;  %v490_v0 = vld [vmem:[%s9005_s23 + $0x6c] sm:$0xf]  ;;  %v1570_v27 = vld [vmem:[#allocation2 + $0x9c] sm:$0xf] }
 0x140   : > { %v1523_v41 = vrot.slane %v10203_v54, 5  ;;  %v8081_v43 = vcombine.low %v1284_v9, %v1294_v18  ;;  %v1307_v11 = vrot.slane %v1305_v63, 5  ;;  %v1311_v24 = vrot.slane %v1309_v46, 4 }
 0x141   : > { %3409 = vrot.lane.b32.xlu1 %v8176_v49, %s8928_s6  ;;  %3487 = vrot.lane.b32.xlu0 %v8191_v22, %s8926_s29  ;;  %v1302_v31 = vor.u32 %v1301_v52, %v1298_v26  ;;  %v1530_v58 = vrot.slane %v977_v2, 5  ;;  %v8048_v42 = vrot.slane %v2598_v59, 9  ;;  %v2730_v55 = vrot.slane %v10189_v23, 5  ;;  %v489_v49 = vld [vmem:[%s9005_s23 + $0x68] sm:$0xf]  ;;  %v10279_v22 = vpop.permute.xlu0 %3319 }
 0x142   : > { %v1312_v7 = vor.u32 %v1311_v24, %v1307_v11  ;;  %v1317_v4 = vrot.slane %v1315_v47, 5  ;;  %v2733_v54 = vrot.slane %v10213_v6, 5  ;;  %v8018_v5 = vrot.slane %v1380_v20, 9  ;;  %v10275_v59 = vld [vmem:[#allocation2 + $0xa0] sm:$0xf] }
 0x143   : > { %v1303_v56 = vrot.slane %v1302_v31, 4  ;;  %v2731_v50 = vsel %vm9024_vm9, %v8048_v42, %v2730_v55  ;;  %v2732_v34 = vrot.slane %v2730_v55, 4  ;;  %v1527_v15 = vrot.slane %v959_v37, 5  ;;  %v10277_v18 = vpop.permute.xlu1 %3145  ;;  %v336_v31 = vld [vmem:[#allocation2 + $0xb0] sm:$0x1] }
 0x144   : > { %v1313_v44 = vrot.slane %v1312_v7, 4  ;;  %v3657_v23 = vsel %vm3647_vm6, %v10172_v36, %v10038_v21  ;;  %v8017_v28 = vrot.slane %v1379_v12, 9  ;;  %v1520_v25 = vrot.slane %v10199_v13, 5 }
 0x145   : > { %2899 = vrot.lane.b32.xlu1 %v8081_v43, %s8924_s27  ;;  %v1308_v6 = vsel %vm9111_vm14, %v1303_v56, %v1307_v11  ;;  %v2734_v2 = vsel %vm9024_vm9, %v2732_v34, %v2733_v54  ;;  %v1528_v37 = vsel %vm9024_vm9, %v8018_v5, %v1527_v15  ;;  %v1529_v48 = vrot.slane %v1527_v15, 4  ;;  %v1590_v5 = vld [vmem:[#allocation2 + $0xa4] sm:$0x1]  ;;  %v1990_v15 = vld [vmem:[#allocation2 + $0x9c] sm:$0xe] }
 0x146   : > { %v1318_v21 = vsel %vm9111_vm14, %v1313_v44, %v1317_v4  ;;  %v8192_v36 = vcombine.low %v2731_v50, %v2734_v2  ;;  %v1521_v13 = vsel %vm9024_vm9, %v8017_v28, %v1520_v25  ;;  %v1522_v9 = vrot.slane %v1520_v25, 4 }
 0x147   : > { %v8082_v3 = vcombine.low %v1308_v6, %v1318_v21  ;;  %v1531_v26 = vsel %vm9024_vm9, %v1529_v48, %v1530_v58  ;;  %v3692_v63 = vsel %vm3680_vm8, %v10193_v19, %v10134_v61  ;;  %v281_v46 = vsel %vm8972_vm3, 0, %v280_v40  ;;  %v10301_v25 = vpop.permute.xlu1 %3225  ;;  %v10303_v40 = vpop.permute.xlu0 %3399  ;;  %v8874_v48 = vld [vmem:[#allocation2 + $0x4c] sm:$0xf] }
 0x148   : > { %3489 = vrot.lane.b32.xlu0 %v8192_v36, %s8926_s29  ;;  %v8098_v52 = vcombine.low %v1528_v37, %v1531_v26  ;;  %v1524_v47 = vsel %vm9024_vm9, %v1522_v9, %v1523_v41  ;;  %282 = vst [vmem:[#allocation2 + $0xa8] sm:$0x1] %v281_v46  ;;  %v719_v20 = vshrl.u32 %v489_v49, 16  ;;  %v722_v43 = vshll.u32 %v489_v49, 16  ;;  %v8873_v37 = vld [vmem:[#allocation2 + $0x48] sm:$0xf] }
 0x149   : > { %2901 = vrot.lane.b32.xlu1 %v8082_v3, %s8924_s27  ;;  %v8097_v61 = vcombine.low %v1521_v13, %v1524_v47  ;;  %v727_v19 = vshrl.u32 %v490_v0, 16  ;;  %v730_v11 = vshll.u32 %v490_v0, 16  ;;  %v1883_v24 = vshrl.u32 %v1570_v27, 16  ;;  %v283_v36 = vld [vmem:[#allocation2 + $0xb4] sm:$0x1] }
 0x14a   : > { %v3690_v58 = vsel %vm3680_vm8, %v3657_v23, %v10076_v35  ;;  %v721_v42 = vrot.slane %v719_v20, 7  ;;  %v1886_v55 = vshll.u32 %v1570_v27, 16  ;;  %v1896_v12 = vshrl.u32 %v10275_v59, 16  ;;  %v491_v46 = vld [vmem:[%s9005_s23 + $0x70] sm:$0xf] }
 0x14b   : > { %v10288_v7 = vrot.slane %v727_v19, 7  ;;  %v1885_v41 = vrot.slane %v1883_v24, 4  ;;  %v8113_v4 = vcombine.low %v1570_v27, %v10275_v59  ;;  %v3725_v54 = vsel %vm3713_vm12, %v3692_v63, %v10155_v45  ;;  %v8875_v19 = vld [vmem:[#allocation2 + $0x54] sm:$0xf] }
 0x14c   : > { %2979 = vrot.lane.b32.xlu0 %v8097_v61, %s8921_s24  ;;  %v724_v56 = vor.u32 %v722_v43, %v721_v42  ;;  %v725_v50 = vrot.slane %v721_v42, 4  ;;  %v1888_v34 = vrot.slane %v1886_v55, 5  ;;  %v337_v35 = vsel %vm8995_vm5, 0, %v336_v31  ;;  %v492_v43 = vld [vmem:[%s9005_s23 + $0x74] sm:$0xf] }
 0x14d   : > { %2981 = vrot.lane.b32.xlu1 %v8098_v52, %s8921_s24  ;;  %v732_v44 = vor.u32 %v730_v11, %v10288_v7  ;;  %v3723_v23 = vsel %vm3713_vm12, %v3690_v58, %v10104_v38  ;;  %338 = vst [vmem:[#allocation2 + $0xb0] sm:$0x1] %v337_v35  ;;  %v1892_v45 = vshll.u32 %v10275_v59, 16  ;;  %v1898_v28 = vrot.slane %v1896_v12, 4  ;;  %v8876_v11 = vld [vmem:[#allocation2 + $0x58] sm:$0xf] }
 0x14e   : > { %v1889_v6 = vor.u32 %v1888_v34, %v1885_v41  ;;  %v1902_v2 = vshll.u32 %v1590_v5, 16  ;;  %v8059_v49 = vcombine.low %v8873_v37, %v8874_v48  ;;  %v3756_v21 = vsel %vm3746_vm13, %v3723_v23, %v10136_v60  ;;  %v10331_v41 = vpop.permute.xlu1 %3321 }
 0x14f   : > { %v733_v38 = vsel %vm9036_vm11, %v725_v50, %v732_v44  ;;  %v911_v13 = vld [vmem:[#allocation2 + $0xa8] sm:$0xf]  ;;  %v1894_v9 = vrot.slane %v1892_v45, 5  ;;  %v8033_v0 = vrot.slane %v1990_v15, 9  ;;  %v2128_v27 = vrot.slane %v10275_v59, 5  ;;  %8704 = vmatprep.mubr.msk.bf16.mxu0 %vm12915_vm7, %v3756_v21 }
 0x150   : > { %v734_v3 = vrot.slane %v10288_v7, 4  ;;  %v912_v26 = vsel %vm9030_vm10, %v724_v56, %v911_v13  ;;  %914 = vst.msk [vmem:[#allocation2 + $0xac] sm:$0xf] %vm226_vm0, %v733_v38  ;;  %3075 = vrot.lane.b32.xlu0 %v8113_v4, %s8922_s25  ;;  %v1890_v60 = vrot.slane %v1889_v6, 4  ;;  %v1904_v63 = vrot.slane %v1902_v2, 5  ;;  %v10333_v4 = vpop.permute.xlu0 %3479 }
 0x151   : > { %913 = vst [vmem:[#allocation2 + $0xa8] sm:$0xf] %v912_v26  ;;  %v1899_v52 = vor.u32 %v1898_v28, %v1894_v9  ;;  %v3520_v47 = vsel %vm3499_vm15, %v8059_v49, %v10181_v57  ;;  %v2130_v59 = vrot.slane %v2128_v27, 4  ;;  %v2131_v20 = vrot.slane %v1590_v5, 5  ;;  %v339_v7 = vld [vmem:[#allocation2 + $0xbc] sm:$0x1] }
 0x152   : > { %v10322_v61 = vsel %vm9024_vm9, %v8033_v0, %v2128_v27  ;;  %v8060_v24 = vcombine.low %v8875_v19, %v8876_v11  ;;  %v3758_v31 = vsel %vm3746_vm13, %v3725_v54, %v10157_v32  ;;  %v284_v58 = vsel %vm8972_vm3, 0, %v283_v36 }
 0x153   : > { %v1895_v42 = vsel %vm9111_vm14, %v1890_v60, %v1894_v9  ;;  %v1900_v57 = vrot.slane %v1899_v52, 4  ;;  %285 = vst [vmem:[#allocation2 + $0xb4] sm:$0x1] %v284_v58  ;;  %v736_v55 = vshrl.u32 %v491_v46, 16  ;;  %v739_v12 = vshll.u32 %v491_v46, 16  ;;  %8705 = vmatmul.mubr.msk.bf16.gmra.mrb[8].mxu0 %vm12915_vm7, %v3758_v31  ;;  %v10359_v60 = vpop.permute.xlu1 %3401 }
 0x154   : > { %v915_v5 = vld [vmem:[#allocation2 + $0xb0] sm:$0x1]  ;;  %v2132_v32 = vsel %vm9024_vm9, %v2130_v59, %v2131_v20  ;;  %v3523_v54 = vsel %vm3499_vm15, %v8060_v24, %v10206_v51  ;;  %v744_v56 = vshrl.u32 %v492_v43, 16  ;;  %v747_v50 = vshll.u32 %v492_v43, 16 }
 0x155   : > { %v916_v34 = vsel %vm8972_vm3, %v734_v3, %v915_v5  ;;  %v1905_v35 = vsel %vm9111_vm14, %v1900_v57, %v1904_v63  ;;  %v738_v15 = vrot.slane %v736_v55, 7  ;;  %v3564_v44 = vsel %vm3548_vm1, %v3523_v54, %v10225_v14  ;;  %v10361_v63 = vpop.permute.xlu0 %3481 }
 0x156   : > { %917 = vst [vmem:[#allocation2 + $0xb0] sm:$0x1] %v916_v34  ;;  %v8129_v23 = vcombine.low %v1895_v42, %v1905_v35  ;;  %v746_v45 = vrot.slane %v744_v56, 7  ;;  %v340_v28 = vsel %vm8995_vm5, 0, %v339_v7  ;;  %v8145_v51 = vcombine.low %v10322_v61, %v2132_v32 }
 0x157   : > { %v1573_v6 = vld [vmem:[#allocation2 + $0xac] sm:$0xf]  ;;  %v741_v2 = vor.u32 %v739_v12, %v738_v15  ;;  %v742_v37 = vrot.slane %v738_v15, 4  ;;  %v10350_v48 = vsel %vm3548_vm1, %v3520_v47, %v10183_v53  ;;  %341 = vst [vmem:[#allocation2 + $0xbc] sm:$0x1] %v340_v28  ;;  %v10357_v9 = vsel %vm3581_vm2, %v3564_v44, %v10244_v17  ;;  %v10383_v28 = vpop.permute.xlu1 %2891 }
 0x158   : > { %v1572_v49 = vld [vmem:[#allocation2 + $0xa8] sm:$0xf]  ;;  %v1920_v21 = vshrl.u32 %v1573_v6, 16  ;;  %v1916_v36 = vshll.u32 %v1573_v6, 16  ;;  %3155 = vrot.lane.b32.xlu0 %v8129_v23, %s8927_s30  ;;  %v749_v38 = vor.u32 %v747_v50, %v746_v45  ;;  %v10353_v13 = vld [vmem:[#allocation2 + $0xac] sm:$0xf] }
 0x159   : > { %v1991_v14 = vld [vmem:[#allocation2 + $0xa8] sm:$0xe]  ;;  %v1907_v0 = vshrl.u32 %v1572_v49, 16  ;;  %v1910_v27 = vshll.u32 %v1572_v49, 16  ;;  %v8114_v3 = vcombine.low %v1572_v49, %v1573_v6  ;;  %v2135_v47 = vrot.slane %v1573_v6, 5  ;;  %v10385_v6 = vpop.permute.xlu0 %2971 }
 0x15a   : > { %v8034_v26 = vrot.slane %v1991_v14, 9  ;;  %v2179_v53 = vld [vmem:[#allocation2 + $0xa8] sm:$0xf]  ;;  %v1918_v46 = vrot.slane %v1916_v36, 5  ;;  %v1922_v52 = vrot.slane %v1920_v21, 4  ;;  %v750_v59 = vsel %vm9036_vm11, %v742_v37, %v749_v38 }
 0x15b   : > { %v918_v20 = vld [vmem:[#allocation2 + $0xb4] sm:$0xf]  ;;  %v1909_v43 = vrot.slane %v1907_v0, 4  ;;  %v1912_v61 = vrot.slane %v1910_v27, 5  ;;  %3077 = vrot.lane.b32.xlu1 %v8114_v3, %s8922_s25  ;;  %v751_v17 = vrot.slane %v746_v45, 4  ;;  %v2137_v31 = vrot.slane %v2135_v47, 4 }
 0x15c   : > { %v919_v19 = vsel %vm9030_vm10, %v741_v2, %v918_v20  ;;  %921 = vst.msk [vmem:[#allocation2 + $0xb8] sm:$0xf] %vm226_vm0, %v750_v59  ;;  %v1923_v11 = vor.u32 %v1922_v52, %v1918_v46  ;;  %v10371_v24 = vsel %vm9024_vm9, %v8034_v26, %v2135_v47  ;;  %3235 = vrot.lane.b32.xlu0 %v8145_v51, %s8925_s28  ;;  %v2492_v58 = vshrl.u32 %v2179_v53, 16  ;;  %v10381_v45 = vld [vmem:[#allocation2 + $0xa8] sm:$0xf] }
 0x15d   : > { %920 = vst [vmem:[#allocation2 + $0xb4] sm:$0xf] %v919_v19  ;;  %v1591_v42 = vld [vmem:[#allocation2 + $0xb0] sm:$0x1]  ;;  %v1913_v57 = vor.u32 %v1912_v61, %v1909_v43  ;;  %v2495_v55 = vshll.u32 %v2179_v53, 16  ;;  %v2505_v12 = vshrl.u32 %v10353_v13, 16  ;;  %v8161_v7 = vcombine.low %v2179_v53, %v10353_v13 }
 0x15e   : > { %v10376_v5 = vld [vmem:[#allocation2 + $0xb0] sm:$0x1]  ;;  %v1924_v32 = vrot.slane %v1923_v11, 4  ;;  %v1926_v54 = vshll.u32 %v1591_v42, 16  ;;  %v2138_v56 = vrot.slane %v1591_v42, 5  ;;  %v2494_v50 = vrot.slane %v2492_v58, 4 }
 0x15f   : > { %v922_v34 = vld [vmem:[#allocation2 + $0xbc] sm:$0x1]  ;;  %v1914_v35 = vrot.slane %v1913_v57, 4  ;;  %v2497_v15 = vrot.slane %v2495_v55, 5  ;;  %v2501_v23 = vshll.u32 %v10353_v13, 16  ;;  %v2507_v37 = vrot.slane %v2505_v12, 4  ;;  %v10410_v55 = vpop.permute.xlu1 %2893  ;;  %v10412_v12 = vpop.permute.xlu0 %3067 }
 0x160   : > { %v923_v44 = vsel %vm8972_vm3, %v751_v17, %v922_v34  ;;  %v1928_v51 = vrot.slane %v1926_v54, 5  ;;  %v2139_v2 = vsel %vm9024_vm9, %v2137_v31, %v2138_v56  ;;  %3331 = vrot.lane.b32.xlu0 %v8161_v7, %s8923_s26  ;;  %v2511_v49 = vshll.u32 %v10376_v5, 16  ;;  %v10403_v11 = vld [vmem:[#allocation2 + $0xac] sm:$0xf] }
 0x161   : > { %924 = vst [vmem:[#allocation2 + $0xbc] sm:$0x1] %v923_v44  ;;  %v1919_v21 = vsel %vm9111_vm14, %v1914_v35, %v1918_v46  ;;  %v8146_v36 = vcombine.low %v10371_v24, %v2139_v2  ;;  %v2498_v14 = vor.u32 %v2497_v15, %v2494_v50  ;;  %v2503_v38 = vrot.slane %v2501_v23, 5  ;;  %v10405_v24 = vld [vmem:[#allocation2 + $0xb0] sm:$0x1] }
 0x162   : > { %v1929_v0 = vsel %vm9111_vm14, %v1924_v32, %v1928_v51  ;;  %v2513_v3 = vrot.slane %v2511_v49, 5  ;;  %v1320_v26 = vshrl.u32 %v10381_v45, 16  ;;  %v1323_v53 = vshll.u32 %v10381_v45, 16  ;;  %v2599_v49 = vld [vmem:[#allocation2 + $0xa8] sm:$0xe] }
 0x163   : > { %v10396_v27 = vld [vmem:[#allocation2 + $0xb8] sm:$0xf]  ;;  %v8130_v52 = vcombine.low %v1919_v21, %v1929_v0  ;;  %v2499_v20 = vrot.slane %v2498_v14, 4  ;;  %v2508_v19 = vor.u32 %v2507_v37, %v2503_v38  ;;  %v1329_v35 = vshll.u32 %v10403_v11, 16 }
 0x164   : > { %v2181_v47 = vld [vmem:[#allocation2 + $0xb4] sm:$0xf]  ;;  %v2529_v59 = vshrl.u32 %v10396_v27, 16  ;;  %v2525_v46 = vshll.u32 %v10396_v27, 16  ;;  %v1322_v57 = vrot.slane %v1320_v26, 4  ;;  %v1325_v56 = vrot.slane %v1323_v53, 5 }
 0x165   : > { %v2516_v43 = vshrl.u32 %v2181_v47, 16  ;;  %v2519_v61 = vshll.u32 %v2181_v47, 16  ;;  %v8162_v17 = vcombine.low %v2181_v47, %v10396_v27  ;;  %3157 = vrot.lane.b32.xlu1 %v8130_v52, %s8927_s30  ;;  %v2504_v42 = vsel %vm9111_vm14, %v2499_v20, %v2503_v38 }
 0x166   : > { %v2527_v31 = vrot.slane %v2525_v46, 5  ;;  %v2531_v58 = vrot.slane %v2529_v59, 4  ;;  %v2509_v54 = vrot.slane %v2508_v19, 4  ;;  %v1333_v15 = vshrl.u32 %v10403_v11, 16  ;;  %v10423_v59 = vld [vmem:[#allocation2 + $0xb4] sm:$0xf]  ;;  %v10432_v19 = vpop.permute.xlu0 %3147 }
 0x167   : > { %v2518_v7 = vrot.slane %v2516_v43, 4  ;;  %v2521_v32 = vrot.slane %v2519_v61, 5  ;;  %v1339_v44 = vshll.u32 %v10405_v24, 16  ;;  %v1326_v37 = vor.u32 %v1325_v56, %v1322_v57  ;;  %v10428_v61 = vld [vmem:[#allocation2 + $0xb8] sm:$0xf] }
 0x168   : > { %v10414_v50 = vld [vmem:[#allocation2 + $0xbc] sm:$0x1]  ;;  %v2532_v34 = vor.u32 %v2531_v58, %v2527_v31  ;;  %v2514_v2 = vsel %vm9111_vm14, %v2509_v54, %v2513_v3  ;;  %v1331_v38 = vrot.slane %v1329_v35, 5  ;;  %v1335_v0 = vrot.slane %v1333_v15, 4 }
 0x169   : > { %v2522_v23 = vor.u32 %v2521_v32, %v2518_v7  ;;  %v2535_v51 = vshll.u32 %v10414_v50, 16  ;;  %3237 = vrot.lane.b32.xlu1 %v8146_v36, %s8925_s28  ;;  %v8177_v14 = vcombine.low %v2504_v42, %v2514_v2  ;;  %v1327_v52 = vrot.slane %v1326_v37, 4  ;;  %v10430_v36 = vpop.permute.xlu1 %2973  ;;  %v2600_v7 = vld [vmem:[#allocation2 + $0xb4] sm:$0xe] }
 0x16a   : > { %v2533_v21 = vrot.slane %v2532_v34, 4  ;;  %v1341_v47 = vrot.slane %v1339_v44, 5  ;;  %v1336_v46 = vor.u32 %v1335_v0, %v1331_v38  ;;  %v8049_v20 = vrot.slane %v2599_v49, 9 }
 0x16b   : > { %v2523_v26 = vrot.slane %v2522_v23, 4  ;;  %v2537_v53 = vrot.slane %v2535_v51, 5  ;;  %3411 = vrot.lane.b32.xlu0 %v8177_v14, %s8928_s6  ;;  %v2737_v3 = vrot.slane %v10353_v13, 5  ;;  %v2740_v43 = vrot.slane %v10376_v5, 5  ;;  %v10443_v5 = vld [vmem:[#allocation2 + $0xbc] sm:$0x1] }
 0x16c   : > { %v3595_v57 = vsel %vm3581_vm2, %v10350_v48, %v10208_v16  ;;  %v1332_v13 = vsel %vm9111_vm14, %v1327_v52, %v1331_v38  ;;  %v1337_v54 = vrot.slane %v1336_v46, 4  ;;  %v1344_v34 = vshrl.u32 %v10423_v59, 16 }
 0x16d   : > { %v2528_v58 = vsel %vm9111_vm14, %v2523_v26, %v2527_v31  ;;  %v2538_v42 = vsel %vm9111_vm14, %v2533_v21, %v2537_v53  ;;  %3333 = vrot.lane.b32.xlu1 %v8162_v17, %s8923_s26  ;;  %v2738_v31 = vsel %vm9024_vm9, %v8049_v20, %v2737_v3  ;;  %v2739_v56 = vrot.slane %v2737_v3, 4  ;;  %v1382_v21 = vld [vmem:[#allocation2 + $0xb4] sm:$0xe]  ;;  %v1381_v53 = vld [vmem:[#allocation2 + $0xa8] sm:$0xe]  ;;  %v10462_v52 = vpop.permute.xlu1 %3069 }
 0x16e   : > { %v8178_v32 = vcombine.low %v2528_v58, %v2538_v42  ;;  %v1347_v35 = vshll.u32 %v10423_v59, 16  ;;  %v1353_v16 = vshll.u32 %v10428_v61, 16  ;;  %v1357_v48 = vshrl.u32 %v10428_v61, 16 }
 0x16f   : > { %v1342_v15 = vsel %vm9111_vm14, %v1337_v54, %v1341_v47  ;;  %v2741_v17 = vsel %vm9024_vm9, %v2739_v56, %v2740_v43  ;;  %v1363_v44 = vshll.u32 %v10443_v5, 16  ;;  %v8050_v23 = vrot.slane %v2600_v7, 9  ;;  %v10464_v47 = vpop.permute.xlu0 %3227 }
 0x170   : > { %v8193_v51 = vcombine.low %v2738_v31, %v2741_v17  ;;  %v3630_v2 = vsel %vm3614_vm4, %v10357_v9, %v10277_v18  ;;  %v1346_v37 = vrot.slane %v1344_v34, 4  ;;  %v1349_v49 = vrot.slane %v1347_v35, 5  ;;  %v286_v31 = vld [vmem:[#allocation2 + $0xc0] sm:$0x1] }
 0x171   : > { %3413 = vrot.lane.b32.xlu1 %v8178_v32, %s8928_s6  ;;  %v8083_v14 = vcombine.low %v1332_v13, %v1342_v15  ;;  %v1355_v38 = vrot.slane %v1353_v16, 5  ;;  %v1359_v0 = vrot.slane %v1357_v48, 4  ;;  %v2744_v26 = vrot.slane %v10396_v27, 5  ;;  %v493_v16 = vld [vmem:[%s9005_s23 + $0x78] sm:$0xf] }
 0x172   : > { %3491 = vrot.lane.b32.xlu0 %v8193_v51, %s8926_s29  ;;  %v3628_v18 = vsel %vm3614_vm4, %v3595_v57, %v10227_v30  ;;  %v1350_v9 = vor.u32 %v1349_v49, %v1346_v37  ;;  %v1365_v46 = vrot.slane %v1363_v44, 5  ;;  %v2747_v20 = vrot.slane %v10414_v50, 5  ;;  %v494_v44 = vld [vmem:[%s9005_s23 + $0x7c] sm:$0xf]  ;;  %v10491_v51 = vpop.permute.xlu1 %3149 }
 0x173   : > { %v1360_v3 = vor.u32 %v1359_v0, %v1355_v38  ;;  %v2745_v43 = vsel %vm9024_vm9, %v8050_v23, %v2744_v26  ;;  %v2746_v58 = vrot.slane %v2744_v26, 4  ;;  %v8020_v27 = vrot.slane %v1382_v21, 9  ;;  %v1574_v23 = vld [vmem:[#allocation2 + $0xb4] sm:$0xf]  ;;  %v10493_v37 = vpop.permute.xlu0 %3323 }
 0x174   : > { %v1351_v42 = vrot.slane %v1350_v9, 4  ;;  %v1541_v13 = vrot.slane %v10428_v61, 5  ;;  %v1544_v7 = vrot.slane %v10443_v5, 5  ;;  %v8019_v32 = vrot.slane %v1381_v53, 9 }
 0x175   : > { %2903 = vrot.lane.b32.xlu1 %v8083_v14, %s8924_s27  ;;  %v1361_v30 = vrot.slane %v1360_v3, 4  ;;  %v2748_v50 = vsel %vm9024_vm9, %v2746_v58, %v2747_v20  ;;  %v1534_v57 = vrot.slane %v10403_v11, 5  ;;  %v1537_v54 = vrot.slane %v10405_v24, 5  ;;  %v342_v20 = vld [vmem:[#allocation2 + $0xc8] sm:$0x1] }
 0x176   : > { %v1356_v56 = vsel %vm9111_vm14, %v1351_v42, %v1355_v38  ;;  %v8194_v34 = vcombine.low %v2745_v43, %v2748_v50  ;;  %v1542_v5 = vsel %vm9024_vm9, %v8020_v27, %v1541_v13  ;;  %v1543_v35 = vrot.slane %v1541_v13, 4 }
 0x177   : > { %v1366_v48 = vsel %vm9111_vm14, %v1361_v30, %v1365_v46  ;;  %v3663_v15 = vsel %vm3647_vm6, %v3630_v2, %v10301_v25  ;;  %v1535_v17 = vsel %vm9024_vm9, %v8019_v32, %v1534_v57  ;;  %v1536_v24 = vrot.slane %v1534_v57, 4  ;;  %v10502_v2 = vld [vmem:[#allocation2 + $0xb8] sm:$0xf]  ;;  %v1592_v30 = vld [vmem:[#allocation2 + $0xbc] sm:$0x1] }
 0x178   : > { %v8084_v49 = vcombine.low %v1356_v56, %v1366_v48  ;;  %3493 = vrot.lane.b32.xlu0 %v8194_v34, %s8926_s29  ;;  %v3661_v21 = vsel %vm3647_vm6, %v3628_v18, %v10246_v10  ;;  %v1545_v14 = vsel %vm9024_vm9, %v1543_v35, %v1544_v7  ;;  %v287_v25 = vsel %vm8972_vm3, 0, %v286_v31  ;;  %v1992_v31 = vld [vmem:[#allocation2 + $0xb4] sm:$0xe]  ;;  %v10518_v56 = vpop.permute.xlu1 %3229 }
 0x179   : > { %v8100_v38 = vcombine.low %v1542_v5, %v1545_v14  ;;  %v1538_v0 = vsel %vm9024_vm9, %v1536_v24, %v1537_v54  ;;  %288 = vst [vmem:[#allocation2 + $0xc0] sm:$0x1] %v287_v25  ;;  %v753_v26 = vshrl.u32 %v493_v16, 16  ;;  %v756_v53 = vshll.u32 %v493_v16, 16  ;;  %v8878_v24 = vld [vmem:[#allocation2 + $0x64] sm:$0xf] }
 0x17a   : > { %2905 = vrot.lane.b32.xlu1 %v8084_v49, %s8924_s27  ;;  %v8099_v9 = vcombine.low %v1535_v17, %v1538_v0  ;;  %v761_v46 = vshrl.u32 %v494_v44, 16  ;;  %v764_v10 = vshll.u32 %v494_v44, 16  ;;  %v1931_v18 = vshrl.u32 %v1574_v23, 16  ;;  %v8877_v17 = vld [vmem:[#allocation2 + $0x60] sm:$0xf] }
 0x17b   : > { %v3696_v3 = vsel %vm3680_vm8, %v3663_v15, %v10331_v41  ;;  %v755_v43 = vrot.slane %v753_v26, 7  ;;  %v1934_v58 = vshll.u32 %v1574_v23, 16  ;;  %v1944_v27 = vshrl.u32 %v10502_v2, 16  ;;  %v289_v49 = vld [vmem:[#allocation2 + $0xcc] sm:$0x1] }
 0x17c   : > { %2983 = vrot.lane.b32.xlu0 %v8099_v9, %s8921_s24  ;;  %v3694_v42 = vsel %vm3680_vm8, %v3661_v21, %v10279_v22  ;;  %v10513_v13 = vrot.slane %v761_v46, 7  ;;  %v1933_v7 = vrot.slane %v1931_v18, 4  ;;  %v8115_v32 = vcombine.low %v1574_v23, %v10502_v2  ;;  %v10540_v9 = vld [vmem:[#allocation2 + $0xd0] sm:$0xf] }
 0x17d   : > { %v758_v50 = vor.u32 %v756_v53, %v755_v43  ;;  %v759_v57 = vrot.slane %v755_v43, 4  ;;  %v1936_v54 = vrot.slane %v1934_v58, 5  ;;  %v343_v41 = vsel %vm8995_vm5, 0, %v342_v20  ;;  %v10520_v34 = vpop.permute.xlu0 %3403  ;;  %v345_v20 = vld [vmem:[#allocation2 + $0xd4] sm:$0x1] }
 0x17e   : > { %2985 = vrot.lane.b32.xlu1 %v8100_v38, %s8921_s24  ;;  %v766_v22 = vor.u32 %v764_v10, %v10513_v13  ;;  %v3727_v5 = vsel %vm3713_vm12, %v3694_v42, %v10303_v40  ;;  %344 = vst [vmem:[#allocation2 + $0xc8] sm:$0x1] %v343_v41  ;;  %v1940_v35 = vshll.u32 %v10502_v2, 16  ;;  %v1946_v16 = vrot.slane %v1944_v27, 4  ;;  %v8879_v58 = vld [vmem:[#allocation2 + $0x6c] sm:$0xf] }
 0x17f   : > { %v1937_v48 = vor.u32 %v1936_v54, %v1933_v7  ;;  %v1950_v15 = vshll.u32 %v1592_v30, 16  ;;  %v8061_v44 = vcombine.low %v8877_v17, %v8878_v24  ;;  %v3760_v23 = vsel %vm3746_vm13, %v3727_v5, %v10333_v4  ;;  %v8880_v27 = vld [vmem:[#allocation2 + $0x70] sm:$0xf] }
 0x180   : > { %v767_v21 = vsel %vm9036_vm11, %v759_v57, %v766_v22  ;;  %v925_v14 = vld [vmem:[#allocation2 + $0xc0] sm:$0xf]  ;;  %3079 = vrot.lane.b32.xlu0 %v8115_v32, %s8922_s25  ;;  %v1942_v40 = vrot.slane %v1940_v35, 5  ;;  %v8035_v25 = vrot.slane %v1992_v31, 9  ;;  %v2142_v38 = vrot.slane %v10502_v2, 5  ;;  %8708 = vmatprep.mubr.msk.bf16.mxu0 %vm12915_vm7, %v3760_v23 }
 0x181   : > { %v768_v0 = vrot.slane %v10513_v13, 4  ;;  %v926_v26 = vsel %vm9030_vm10, %v758_v50, %v925_v14  ;;  %928 = vst.msk [vmem:[#allocation2 + $0xc4] sm:$0xf] %vm226_vm0, %v767_v21  ;;  %v3729_v4 = vsel %vm3713_vm12, %v3696_v3, %v10359_v60  ;;  %v1938_v53 = vrot.slane %v1937_v48, 4  ;;  %v10548_v3 = vpop.permute.xlu1 %3325  ;;  %v10550_v7 = vpop.permute.xlu0 %3483 }
 0x182   : > { %927 = vst [vmem:[#allocation2 + $0xc0] sm:$0xf] %v926_v26  ;;  %v1947_v46 = vor.u32 %v1946_v16, %v1942_v40  ;;  %v1952_v10 = vrot.slane %v1950_v15, 5  ;;  %v2144_v18 = vrot.slane %v2142_v38, 4  ;;  %v2145_v2 = vrot.slane %v1592_v30, 5 }
 0x183   : > { %v3526_v43 = vsel %vm3499_vm15, %v8061_v44, %v10383_v28  ;;  %v8062_v42 = vcombine.low %v8879_v58, %v8880_v27  ;;  %v3762_v13 = vsel %vm3746_vm13, %v3729_v4, %v10361_v63  ;;  %v290_v60 = vsel %vm8972_vm3, 0, %v289_v49 }
 0x184   : > { %v1943_v32 = vsel %vm9111_vm14, %v1938_v53, %v1942_v40  ;;  %v1948_v30 = vrot.slane %v1947_v46, 4  ;;  %v2143_v28 = vsel %vm9024_vm9, %v8035_v25, %v2142_v38  ;;  %291 = vst [vmem:[#allocation2 + $0xcc] sm:$0x1] %v290_v60  ;;  %v2577_v50 = vshrl.u32 %v10540_v9, 16  ;;  %8709 = vmatmul.mubr.msk.bf16.gmra.mrb[12].mxu0 %vm12915_vm7, %v3762_v13 }
 0x185   : > { %v929_v63 = vld [vmem:[#allocation2 + $0xc8] sm:$0x1]  ;;  %v2146_v57 = vsel %vm9024_vm9, %v2144_v18, %v2145_v2  ;;  %v3529_v54 = vsel %vm3499_vm15, %v8062_v42, %v10410_v55  ;;  %v346_v41 = vsel %vm8995_vm5, 0, %v345_v20  ;;  %v2573_v31 = vshll.u32 %v10540_v9, 16 }
 0x186   : > { %v930_v22 = vsel %vm8972_vm3, %v768_v0, %v929_v63  ;;  %v1953_v5 = vsel %vm9111_vm14, %v1948_v30, %v1952_v10  ;;  %v3568_v35 = vsel %vm3548_vm1, %v3529_v54, %v10430_v36  ;;  %347 = vst [vmem:[#allocation2 + $0xd4] sm:$0x1] %v346_v41  ;;  %v8147_v15 = vcombine.low %v2143_v28, %v2146_v57 }
 0x187   : > { %931 = vst [vmem:[#allocation2 + $0xc8] sm:$0x1] %v930_v22  ;;  %v8131_v16 = vcombine.low %v1943_v32, %v1953_v5  ;;  %v3566_v55 = vsel %vm3548_vm1, %v3526_v43, %v10385_v6  ;;  %v2579_v17 = vrot.slane %v2577_v50, 4  ;;  %v10574_v49 = vrot.slane %v2573_v31, 5  ;;  %v10580_v36 = vpop.permute.xlu1 %3405 }
 0x188   : > { %v1577_v48 = vld [vmem:[#allocation2 + $0xc4] sm:$0xf]  ;;  %v10578_v21 = vsel %vm3581_vm2, %v3568_v35, %v10462_v52  ;;  %v10582_v14 = vpop.permute.xlu0 %3485  ;;  %v10586_v26 = vsel %vm3581_vm2, %v3566_v55, %v10412_v12 }
 0x189   : > { %v1576_v24 = vld [vmem:[#allocation2 + $0xc0] sm:$0xf]  ;;  %v1968_v44 = vshrl.u32 %v1577_v48, 16  ;;  %v1964_v23 = vshll.u32 %v1577_v48, 16  ;;  %3159 = vrot.lane.b32.xlu0 %v8131_v16, %s8927_s30  ;;  %v2149_v46 = vrot.slane %v1577_v48, 5  ;;  %v2580_v13 = vor.u32 %v2579_v17, %v10574_v49 }
 0x18a   : > { %v1955_v40 = vshrl.u32 %v1576_v24, 16  ;;  %v1958_v25 = vshll.u32 %v1576_v24, 16  ;;  %v8116_v38 = vcombine.low %v1576_v24, %v1577_v48  ;;  %v1993_v6 = vld [vmem:[#allocation2 + $0xc0] sm:$0xe]  ;;  %v10594_v12 = vld [vmem:[#allocation2 + $0xc4] sm:$0xf] }
 0x18b   : > { %v2183_v0 = vld [vmem:[#allocation2 + $0xc0] sm:$0xf]  ;;  %v1966_v4 = vrot.slane %v1964_v23, 5  ;;  %v1970_v53 = vrot.slane %v1968_v44, 4  ;;  %v10588_v10 = vld [vmem:[#allocation2 + $0xcc] sm:$0xf]  ;;  %v10599_v22 = vpop.permute.xlu1 %2895 }
 0x18c   : > { %v2540_v52 = vshrl.u32 %v2183_v0, 16  ;;  %v1957_v18 = vrot.slane %v1955_v40, 4  ;;  %v1960_v2 = vrot.slane %v1958_v25, 5  ;;  %3081 = vrot.lane.b32.xlu1 %v8116_v38, %s8922_s25  ;;  %v2564_v20 = vshrl.u32 %v10588_v10, 16 }
 0x18d   : > { %v2567_v43 = vshll.u32 %v10588_v10, 16  ;;  %v1971_v58 = vor.u32 %v1970_v53, %v1966_v4  ;;  %v8036_v27 = vrot.slane %v1993_v6, 9  ;;  %v2151_v42 = vrot.slane %v2149_v46, 4  ;;  %3239 = vrot.lane.b32.xlu0 %v8147_v15, %s8925_s28  ;;  %v10597_v31 = vld [vmem:[#allocation2 + $0xd4] sm:$0x1] }
 0x18e   : > { %v1593_v60 = vld [vmem:[#allocation2 + $0xc8] sm:$0x1]  ;;  %v1961_v32 = vor.u32 %v1960_v2, %v1957_v18  ;;  %v2566_v30 = vrot.slane %v2564_v20, 4  ;;  %v2542_v50 = vrot.slane %v2540_v52, 4  ;;  %v2543_v41 = vshll.u32 %v2183_v0, 16  ;;  %v10601_v5 = vpop.permute.xlu0 %2975 }
 0x18f   : > { %v2569_v28 = vrot.slane %v2567_v43, 5  ;;  %v1972_v63 = vrot.slane %v1971_v58, 4  ;;  %v1974_v57 = vshll.u32 %v1593_v60, 16  ;;  %v2152_v54 = vrot.slane %v1593_v60, 5  ;;  %v2201_v44 = vld [vmem:[#allocation2 + $0xc8] sm:$0x1] }
 0x190   : > { %v1962_v35 = vrot.slane %v1961_v32, 4  ;;  %v2553_v16 = vshrl.u32 %v10594_v12, 16  ;;  %v8163_v48 = vcombine.low %v2183_v0, %v10594_v12  ;;  %v2150_v17 = vsel %vm9024_vm9, %v8036_v27, %v2149_v46  ;;  %v10614_v0 = vld [vmem:[#allocation2 + $0xcc] sm:$0xe]  ;;  %v2601_v2 = vld [vmem:[#allocation2 + $0xc0] sm:$0xe]  ;;  %v10623_v32 = vpop.permute.xlu1 %2897 }
 0x191   : > { %v2570_v15 = vor.u32 %v2569_v28, %v2566_v30  ;;  %v1976_v55 = vrot.slane %v1974_v57, 5  ;;  %v2545_v24 = vrot.slane %v2543_v41, 5  ;;  %v2758_v23 = vrot.slane %v10540_v9, 5 }
 0x192   : > { %v1967_v40 = vsel %vm9111_vm14, %v1962_v35, %v1966_v4  ;;  %v2153_v25 = vsel %vm9024_vm9, %v2151_v42, %v2152_v54  ;;  %3335 = vrot.lane.b32.xlu0 %v8163_v48, %s8923_s26  ;;  %v2581_v38 = vrot.slane %v2580_v13, 4  ;;  %v2583_v6 = vshll.u32 %v10597_v31, 16  ;;  %v10625_v30 = vpop.permute.xlu0 %3071 }
 0x193   : > { %v1977_v53 = vsel %vm9111_vm14, %v1972_v63, %v1976_v55  ;;  %v2546_v46 = vor.u32 %v2545_v24, %v2542_v50  ;;  %v2549_v52 = vshll.u32 %v10594_v12, 16  ;;  %v2555_v18 = vrot.slane %v2553_v16, 4 }
 0x194   : > { %v8132_v20 = vcombine.low %v1967_v40, %v1977_v53  ;;  %v2571_v4 = vrot.slane %v2570_v15, 4  ;;  %v2585_v43 = vrot.slane %v2583_v6, 5  ;;  %v2559_v58 = vshll.u32 %v2201_v44, 16  ;;  %v10663_v40 = vpop.permute.xlu1 %2977  ;;  %v355_v53 = vld [vmem:[#allocation3] sm:$0x1] }
 0x195   : > { %v2547_v27 = vrot.slane %v2546_v46, 4  ;;  %v2551_v42 = vrot.slane %v2549_v52, 5  ;;  %v8052_v13 = vrot.slane %v10614_v0, 9  ;;  %v3634_v60 = vsel %vm3614_vm4, %v10578_v21, %v10491_v51  ;;  %v358_v0 = vld [vmem:[#allocation3 + $0xc] sm:$0x1] }
 0x196   : > { %3161 = vrot.lane.b32.xlu1 %v8132_v20, %s8927_s30  ;;  %v8148_v28 = vcombine.low %v2150_v17, %v2153_v25  ;;  %v8051_v50 = vrot.slane %v2601_v2, 9  ;;  %v3632_v63 = vsel %vm3614_vm4, %v10586_v26, %v10432_v19  ;;  %v3667_v57 = vsel %vm3647_vm6, %v3634_v60, %v10518_v56  ;;  %v412_v46 = vld [vmem:[#allocation3 + $0x14] sm:$0x1]  ;;  %v409_v52 = vld [vmem:[#allocation3 + $0x8] sm:$0x1] }
 0x197   : > { %v8164_v54 = vcombine.low %v10588_v10, %v10540_v9  ;;  %v2556_v41 = vor.u32 %v2555_v18, %v2551_v42  ;;  %v2561_v51 = vrot.slane %v2559_v58, 5  ;;  %v2751_v21 = vrot.slane %v10594_v12, 5  ;;  %v367_v20 = vld [vmem:[#allocation3 + $0x30] sm:$0x1]  ;;  %v421_v60 = vld [vmem:[#allocation3 + $0x38] sm:$0x1] }
 0x198   : > { %v2576_v35 = vsel %vm9111_vm14, %v2571_v4, %v10574_v49  ;;  %v2586_v16 = vsel %vm9111_vm14, %v2581_v38, %v2585_v43  ;;  %v2760_v19 = vrot.slane %v2758_v23, 4  ;;  %v2754_v26 = vrot.slane %v2201_v44, 5 }
 0x199   : > { %v2552_v56 = vsel %vm9111_vm14, %v2547_v27, %v2551_v42  ;;  %v2557_v48 = vrot.slane %v2556_v41, 4  ;;  %v2753_v10 = vrot.slane %v2751_v21, 4  ;;  %v3665_v15 = vsel %vm3647_vm6, %v3632_v63, %v10464_v47  ;;  %v10665_v25 = vpop.permute.xlu0 %3151  ;;  %v364_v42 = vld [vmem:[#allocation3 + $0x24] sm:$0x1] }
 0x19a   : > { %3241 = vrot.lane.b32.xlu1 %v8148_v28, %s8925_s28  ;;  %v2761_v12 = vrot.slane %v10597_v31, 5  ;;  %v2752_v49 = vsel %vm9024_vm9, %v8051_v50, %v2751_v21  ;;  %v3700_v55 = vsel %vm3680_vm8, %v3667_v57, %v10548_v3  ;;  %v3698_v17 = vsel %vm3680_vm8, %v3665_v15, %v10493_v37  ;;  %v361_v3 = vld [vmem:[#allocation3 + $0x18] sm:$0x1]  ;;  %v418_v28 = vld [vmem:[#allocation3 + $0x2c] sm:$0x1] }
 0x19b   : > { %v2562_v24 = vsel %vm9111_vm14, %v2557_v48, %v2561_v51  ;;  %v2755_v44 = vsel %vm9024_vm9, %v2753_v10, %v2754_v26  ;;  %v3733_v47 = vsel %vm3713_vm12, %v3700_v55, %v10580_v36  ;;  %v3731_v31 = vsel %vm3713_vm12, %v3698_v17, %v10520_v34  ;;  %v415_v36 = vld [vmem:[#allocation3 + $0x20] sm:$0x1]  ;;  %v373_v51 = vld [vmem:[#allocation3 + $0x48] sm:$0x1] }
 0x19c   : > { %v8179_v38 = vcombine.low %v2552_v56, %v2562_v24  ;;  %v3764_v37 = vsel %vm3746_vm13, %v3731_v31, %v10550_v7  ;;  %v3766_v6 = vsel %vm3746_vm13, %v3733_v47, %v10582_v14  ;;  %v8180_v34 = vcombine.low %v2576_v35, %v2586_v16  ;;  %v10678_v14 = vld [vmem:[#allocation3 + $0x4] sm:$0xf]  ;;  %v10697_v50 = vpop.permute.xlu1 %3073  ;;  %v8881_v15 = vld [vmem:[#allocation2 + $0x78] sm:$0xf]  ;;  %v8884_v47 = vld [vmem:[#allocation2 + $0x88] sm:$0xf] }
 0x19d   : > { %8712 = vmatprep.mubr.msk.bf16.mxu0 %vm12915_vm7, %v3764_v37  ;;  %v8195_v18 = vcombine.low %v2752_v49, %v2755_v44  ;;  %v8067_v2 = vcombine.low %v10381_v45, %v10403_v11  ;;  %v362_v7 = vsel %vm8972_vm3, 0, %v361_v3  ;;  %v2759_v4 = vsel %vm9024_vm9, %v8052_v13, %v2758_v23  ;;  %v3232_v63 = vpop.permute.xlu0 %3231  ;;  %v8883_v44 = vld [vmem:[#allocation2 + $0x84] sm:$0xf] }
 0x19e   : > { %3337 = vrot.lane.b32.xlu1 %v8164_v54, %s8923_s26  ;;  %3415 = vrot.lane.b32.xlu0 %v8179_v38, %s8928_s6  ;;  %v2762_v43 = vsel %vm9024_vm9, %v2760_v19, %v2761_v12  ;;  %v8068_v58 = vcombine.low %v10423_v59, %v10428_v61  ;;  %363 = vst [vmem:[#allocation3 + $0x18] sm:$0x1] %v362_v7  ;;  %v359_v27 = vsel %vm8972_vm3, 0, %v358_v0  ;;  %v416_v9 = vsel %vm8995_vm5, 0, %v415_v36  ;;  %v8882_v12 = vld [vmem:[#allocation2 + $0x7c] sm:$0xf] }
 0x19f   : > { %8713 = vmatmul.mubr.msk.bf16.gmra.mrb[16].mxu0 %vm12915_vm7, %v3766_v6  ;;  %360 = vst [vmem:[#allocation3 + $0xc] sm:$0x1] %v359_v27  ;;  %v413_v23 = vsel %vm8995_vm5, 0, %v412_v46  ;;  %v356_v13 = vsel %vm8972_vm3, 0, %v355_v53  ;;  %417 = vst [vmem:[#allocation3 + $0x20] sm:$0x1] %v416_v9  ;;  %v8196_v21 = vcombine.low %v2759_v4, %v2762_v43  ;;  %v8063_v49 = vcombine.low %v8881_v15, %v8882_v12 }
 0x1a0   : > { %414 = vst [vmem:[#allocation3 + $0x14] sm:$0x1] %v413_v23  ;;  %357 = vst [vmem:[#allocation3] sm:$0x1] %v356_v13  ;;  %v410_v57 = vsel %vm8995_vm5, 0, %v409_v52  ;;  %v4639_v54 = vshll.u32 %v10678_v14, 16  ;;  %v8064_v31 = vcombine.low %v8883_v44, %v8884_v47 }
 0x1a1   : > { %v4643_v41 = vshrl.u32 %v10678_v14, 16  ;;  %411 = vst [vmem:[#allocation3 + $0x8] sm:$0x1] %v410_v57  ;;  %v368_v35 = vsel %vm8972_vm3, 0, %v367_v20  ;;  %v365_v16 = vsel %vm8972_vm3, 0, %v364_v42  ;;  %v422_v56 = vsel %vm8995_vm5, 0, %v421_v60  ;;  %v3328_v17 = vpop.permute.xlu0 %3327 }
 0x1a2   : > { %3417 = vrot.lane.b32.xlu1 %v8180_v34, %s8928_s6  ;;  %3495 = vrot.lane.b32.xlu0 %v8195_v18, %s8926_s29  ;;  %v4641_v19 = vrot.slane %v4639_v54, 5  ;;  %369 = vst [vmem:[#allocation3 + $0x30] sm:$0x1] %v368_v35  ;;  %366 = vst [vmem:[#allocation3 + $0x24] sm:$0x1] %v365_v16  ;;  %v419_v48 = vsel %vm8995_vm5, 0, %v418_v28  ;;  %v3532_v46 = vsel %vm3499_vm15, %v8063_v49, %v10599_v22 }
 0x1a3   : > { %v4645_v26 = vrot.slane %v4643_v41, 4  ;;  %423 = vst [vmem:[#allocation3 + $0x38] sm:$0x1] %v422_v56  ;;  %420 = vst [vmem:[#allocation3 + $0x2c] sm:$0x1] %v419_v48  ;;  %v374_v10 = vsel %vm8972_vm3, 0, %v373_v51  ;;  %v3535_v20 = vsel %vm3499_vm15, %v8064_v31, %v10623_v32  ;;  %v3570_v23 = vsel %vm3548_vm1, %v3532_v46, %v10601_v5 }
 0x1a4   : > { %375 = vst [vmem:[#allocation3 + $0x48] sm:$0x1] %v374_v10  ;;  %v5079_v0 = vrot.slane %v10678_v14, 5  ;;  %v5013_v36 = vld [vmem:[#allocation3] sm:$0xe]  ;;  %v3603_v13 = vsel %vm3581_vm2, %v3570_v23, %v10625_v30  ;;  %v3572_v57 = vsel %vm3548_vm1, %v3535_v20, %v10663_v40 }
 0x1a5   : > { %v4646_v24 = vor.u32 %v4645_v26, %v4641_v19  ;;  %v8251_v42 = vrot.slane %v5013_v36, 9  ;;  %v3636_v32 = vsel %vm3614_vm4, %v3603_v13, %v10665_v25  ;;  %v3605_v25 = vsel %vm3581_vm2, %v3572_v57, %v10697_v50  ;;  %v370_v26 = vld [vmem:[#allocation3 + $0x3c] sm:$0x1]  ;;  %v427_v48 = vld [vmem:[#allocation3 + $0x50] sm:$0x1] }
 0x1a6   : > { %3497 = vrot.lane.b32.xlu1 %v8196_v21, %s8926_s29  ;;  %v5081_v60 = vrot.slane %v5079_v0, 4  ;;  %v3669_v54 = vsel %vm3647_vm6, %v3636_v32, %v3232_v63  ;;  %v371_v56 = vsel %vm8972_vm3, 0, %v370_v26  ;;  %v428_v10 = vsel %vm8995_vm5, 0, %v427_v48  ;;  %v424_v15 = vld [vmem:[#allocation3 + $0x44] sm:$0x1] }
 0x1a7   : > { %v3154_v55 = vpop.permute.xlu1 %3153  ;;  %v10716_v3 = vld [vmem:[#allocation3] sm:$0xf]  ;;  %v4647_v7 = vrot.slane %v4646_v24, 4  ;;  %v5080_v5 = vsel %vm9024_vm9, %v8251_v42, %v5079_v0  ;;  %v3702_v21 = vsel %vm3680_vm8, %v3669_v54, %v3328_v17  ;;  %372 = vst [vmem:[#allocation3 + $0x3c] sm:$0x1] %v371_v56  ;;  %v425_v49 = vsel %vm8995_vm5, 0, %v424_v15 }
 0x1a8   : > { %v4613_v38 = vld [vmem:[#allocation3 + $0x8] sm:$0x1]  ;;  %v4630_v37 = vshrl.u32 %v10716_v3, 16  ;;  %v4633_v6 = vshll.u32 %v10716_v3, 16  ;;  %v3638_v12 = vsel %vm3614_vm4, %v3605_v25, %v3154_v55  ;;  %429 = vst [vmem:[#allocation3 + $0x50] sm:$0x1] %v428_v10 }
 0x1a9   : > { %v4649_v53 = vshll.u32 %v4613_v38, 16  ;;  %v5082_v9 = vrot.slane %v4613_v38, 5  ;;  %426 = vst [vmem:[#allocation3 + $0x44] sm:$0x1] %v425_v49  ;;  %v8886_v20 = vld [vmem:[#allocation2 + $0x94] sm:$0xf] }
 0x1aa   : > { %v4632_v34 = vrot.slane %v4630_v37, 4  ;;  %v4635_v18 = vrot.slane %v4633_v6, 5  ;;  %v379_v6 = vld [vmem:[#allocation3 + $0x60] sm:$0x1] }
 0x1ab   : > { %v3234_v52 = vpop.permute.xlu1 %3233  ;;  %v4651_v4 = vrot.slane %v4649_v53, 5  ;;  %v5083_v30 = vsel %vm9024_vm9, %v5081_v60, %v5082_v9  ;;  %v380_v53 = vsel %vm8972_vm3, 0, %v379_v6  ;;  %v8887_v60 = vld [vmem:[#allocation2 + $0x9c] sm:$0xf]  ;;  %v8888_v9 = vld [vmem:[#allocation2 + $0xa0] sm:$0xf] }
 0x1ac   : > { %v4636_v27 = vor.u32 %v4635_v18, %v4632_v34  ;;  %v3671_v17 = vsel %vm3647_vm6, %v3638_v12, %v3234_v52  ;;  %381 = vst [vmem:[#allocation3 + $0x60] sm:$0x1] %v380_v53  ;;  %v10767_v34 = vld [vmem:[%s12908_s2] ss:$0 sm:$0xff]  ;;  %v8066_v23 = vcombine.low %v8887_v60, %v8888_v9  ;;  %v4469_v6 = vld [vmem:[#allocation3 + $0xc] sm:$0xf] }
 0x1ad   : > { %v3408_v43 = vpop.permute.xlu0 %3407  ;;  %v4652_v28 = vsel %vm9111_vm14, %v4647_v7, %v4651_v4  ;;  %v8885_v7 = vld [vmem:[#allocation2 + $0x90] sm:$0xf] }
 0x1ae   : > { %v4637_v22 = vrot.slane %v4636_v27, 4  ;;  %v3735_v40 = vsel %vm3713_vm12, %v3702_v21, %v3408_v43  ;;  %v8065_v4 = vcombine.low %v8885_v7, %v8886_v20 }
 0x1af   : > { %v3330_v41 = vpop.permute.xlu1 %3329 }
 0x1b0   : > { %v4642_v51 = vsel %vm9111_vm14, %v4637_v22, %v4641_v19  ;;  %v8331_v19 = vcombine.low %v5080_v5, %v5083_v30  ;;  %v3704_v24 = vsel %vm3680_vm8, %v3671_v17, %v3330_v41 }
 0x1b1   : > { %v8315_v35 = vcombine.low %v4642_v51, %v4652_v28 }
 0x1b3   : > { %v3488_v16 = vpop.permute.xlu0 %3487  ;;  %6518 = vrot.lane.b32.xlu0 %v8315_v35, %s8924_s27  ;;  %v3410_v50 = vpop.permute.xlu1 %3409 }
 0x1b4   : > { %v3768_v63 = vsel %vm3746_vm13, %v3735_v40, %v3488_v16  ;;  %v3737_v44 = vsel %vm3713_vm12, %v3704_v24, %v3410_v50  ;;  %v4476_v24 = vld [vmem:[#allocation3 + $0x18] sm:$0xf] }
 0x1b5   : > { %8716 = vmatprep.mubr.msk.bf16.mxu0 %vm12915_vm7, %v3768_v63 }
 0x1b7   : > { %6598 = vrot.lane.b32.xlu0 %v8331_v19, %s8921_s24  ;;  %v2900_v55 = vpop.permute.xlu1 %2899 }
 0x1b8   : > { %v3538_v54 = vsel %vm3499_vm15, %v8065_v4, %v2900_v55 }
 0x1ba   : > { %v3490_v47 = vpop.permute.xlu0 %3489 }
 0x1bb   : > { %v3770_v31 = vsel %vm3746_vm13, %v3737_v44, %v3490_v47  ;;  %v2902_v37 = vpop.permute.xlu1 %2901 }
 0x1bc   : > { %8717 = vmatmul.mubr.msk.bf16.gmra.mrb[20].mxu0 %vm12915_vm7, %v3770_v31  ;;  %v3541_v40 = vsel %vm3499_vm15, %v8066_v23, %v2902_v37 }
 0x1be   : > { %v2980_v38 = vpop.permute.xlu0 %2979 }
 0x1bf   : > { %v2982_v36 = vpop.permute.xlu1 %2981  ;;  %v3574_v63 = vsel %vm3548_vm1, %v3538_v54, %v2980_v38 }
 0x1c0   : > { %v3576_v15 = vsel %vm3548_vm1, %v3541_v40, %v2982_v36 }
 0x1c2   : > { %v3076_v0 = vpop.permute.xlu0 %3075 }
 0x1c3   : > { %v3607_v17 = vsel %vm3581_vm2, %v3574_v63, %v3076_v0 }
 0x1ca   : > { %v3156_v46 = vpop.permute.xlu0 %3155 }
 0x1cb   : > { %v3640_v55 = vsel %vm3614_vm4, %v3607_v17, %v3156_v46 }
 0x1cd   : > { %v3078_v52 = vpop.permute.xlu1 %3077 }
 0x1ce   : > { %v10769_v18 = vpop.permute.xlu0 %3235  ;;  %v3609_v20 = vsel %vm3581_vm2, %v3576_v15, %v3078_v52 }
 0x1cf   : > { %v3673_v52 = vsel %vm3647_vm6, %v3640_v55, %v10769_v18 }
 0x1d2   : > { %v3332_v30 = vpop.permute.xlu0 %3331 }
 0x1d4   : > { %v8698_v43 = vpop.f32.mrb[0].mxu0 }
 0x1d5   : > { %v3902_v27 = vadd.f32 %v8698_v43, %v10767_v34  ;;  %v3893_v42 = vpop.f32.mrb[1].mxu0  ;;  %v4480_v43 = vld [vmem:[#allocation3 + $0x20] sm:$0x1] }
 0x1d6   : > { %v3894_v13 = vadd.f32 %v10767_v34, %v3893_v42  ;;  %v8699_v22 = vpop.f32.mrb[2].mxu0 }
 0x1d7   : > { %v4022_v28 = vmax.f32 %v3902_v27, 0.0  ;;  %v3905_v57 = vadd.f32 %v8699_v22, %v10767_v34  ;;  %v3896_v32 = vpop.f32.mrb[3].mxu0  ;;  %v3158_v41 = vpop.permute.xlu1 %3157 }
 0x1d8   : > { %v4020_v51 = vmax.f32 %v3894_v13, 0.0  ;;  %v3897_v5 = vadd.f32 %v10767_v34, %v3896_v32  ;;  %v4473_v13 = vld [vmem:[#allocation3 + $0x14] sm:$0x1]  ;;  %v3642_v18 = vsel %vm3614_vm4, %v3609_v20, %v3158_v41 }
 0x1d9   : > { %v8503_v21 = vpack.c.bf16 %v4022_v28, %v4022_v28  ;;  %v4023_v35 = vmax.f32 %v3905_v57, 0.0 }
 0x1da   : > { %v8501_v16 = vpack.c.bf16 %v4020_v51, %v4020_v51  ;;  %v4021_v25 = vmax.f32 %v3897_v5, 0.0  ;;  %v3706_v51 = vsel %vm3680_vm8, %v3673_v52, %v3332_v30 }
 0x1db   : > { %v4166_v19 = vshrl.u32 %v8503_v21, 16  ;;  %v8504_v26 = vpack.c.bf16 %v4023_v35, %v4023_v35  ;;  %v3238_v56 = vpop.permute.xlu1 %3237  ;;  %v4169_v50 = vshll.u32 %v8503_v21, 16 }
 0x1dc   : > { %v4149_v48 = vshrl.u32 %v8501_v16, 16  ;;  %v8502_v10 = vpack.c.bf16 %v4021_v25, %v4021_v25  ;;  %v4152_v47 = vshll.u32 %v8501_v16, 16  ;;  %v376_v25 = vld [vmem:[#allocation3 + $0x54] sm:$0x1] }
 0x1dd   : > { %v4168_v12 = vrot.slane %v4166_v19, 7  ;;  %v4174_v49 = vshrl.u32 %v8504_v26, 16  ;;  %v3412_v37 = vpop.permute.xlu0 %3411  ;;  %v4177_v7 = vshll.u32 %v8504_v26, 16  ;;  %v377_v63 = vsel %vm8972_vm3, 0, %v376_v25  ;;  %v433_v19 = vld [vmem:[#allocation3 + $0x68] sm:$0x1] }
 0x1de   : > { %v4151_v44 = vrot.slane %v4149_v48, 7  ;;  %v4157_v31 = vshrl.u32 %v8502_v10, 16  ;;  %v4160_v42 = vshll.u32 %v8502_v10, 16  ;;  %v3739_v40 = vsel %vm3713_vm12, %v3706_v51, %v3412_v37  ;;  %378 = vst [vmem:[#allocation3 + $0x54] sm:$0x1] %v377_v63 }
 0x1df   : > { %v4171_v38 = vor.u32 %v4169_v50, %v4168_v12  ;;  %v4176_v53 = vrot.slane %v4174_v49, 7  ;;  %v3334_v4 = vpop.permute.xlu1 %3333  ;;  %v4172_v60 = vrot.slane %v4168_v12, 4  ;;  %v3675_v26 = vsel %vm3647_vm6, %v3642_v18, %v3238_v56 }
 0x1e0   : > { %v4154_v36 = vor.u32 %v4152_v47, %v4151_v44  ;;  %v4159_v27 = vrot.slane %v4157_v31, 7  ;;  %v4155_v46 = vrot.slane %v4151_v44, 4  ;;  %v434_v41 = vsel %vm8995_vm5, 0, %v433_v19 }
 0x1e1   : > { %v4477_v0 = vsel %vm9030_vm10, %v4171_v38, %v4476_v24  ;;  %v4179_v9 = vor.u32 %v4177_v7, %v4176_v53  ;;  %v4181_v23 = vrot.slane %v4176_v53, 4  ;;  %v3708_v10 = vsel %vm3680_vm8, %v3675_v26, %v3334_v4  ;;  %435 = vst [vmem:[#allocation3 + $0x68] sm:$0x1] %v434_v41 }
 0x1e2   : > { %4478 = vst [vmem:[#allocation3 + $0x18] sm:$0xf] %v4477_v0  ;;  %v4470_v22 = vsel %vm9030_vm10, %v4154_v36, %v4469_v6  ;;  %v4162_v28 = vor.u32 %v4160_v42, %v4159_v27  ;;  %v4164_v57 = vrot.slane %v4159_v27, 4 }
 0x1e3   : > { %4471 = vst [vmem:[#allocation3 + $0xc] sm:$0xf] %v4470_v22  ;;  %v4180_v32 = vsel %vm9036_vm11, %v4172_v60, %v4179_v9  ;;  %v4481_v54 = vsel %vm8972_vm3, %v4181_v23, %v4480_v43  ;;  %v3414_v5 = vpop.permute.xlu1 %3413 }
 0x1e4   : > { %4479 = vst.msk [vmem:[#allocation3 + $0x1c] sm:$0xf] %vm226_vm0, %v4180_v32  ;;  %4482 = vst [vmem:[#allocation3 + $0x20] sm:$0x1] %v4481_v54  ;;  %v4163_v21 = vsel %vm9036_vm11, %v4155_v46, %v4162_v28  ;;  %v4474_v35 = vsel %vm8972_vm3, %v4164_v57, %v4473_v13  ;;  %v3492_v16 = vpop.permute.xlu0 %3491  ;;  %v3741_v47 = vsel %vm3713_vm12, %v3708_v10, %v3414_v5 }
 0x1e5   : > { %4472 = vst.msk [vmem:[#allocation3 + $0x10] sm:$0xf] %vm226_vm0, %v4163_v21  ;;  %4475 = vst [vmem:[#allocation3 + $0x14] sm:$0x1] %v4474_v35  ;;  %v3772_v30 = vsel %vm3746_vm13, %v3739_v40, %v3492_v16 }
 0x1e6   : > { %8720 = vmatprep.mubr.msk.bf16.mxu0 %vm12915_vm7, %v3772_v30 }
 0x1e7   : > { %v2904_v48 = vpop.permute.xlu1 %2903 }
 0x1e8   : > { %v3544_v36 = vsel %vm3499_vm15, %v8067_v2, %v2904_v48 }
 0x1e9   : > { %v5191_v15 = vld [vmem:[#allocation3 + $0x18] sm:$0xf] }
 0x1ea   : > { %v5798_v12 = vld [vmem:[#allocation3 + $0x18] sm:$0xf]  ;;  %v5262_v50 = vshrl.u32 %v5191_v15, 16  ;;  %v5265_v49 = vshll.u32 %v5191_v15, 16  ;;  %v5189_v44 = vld [vmem:[#allocation3 + $0xc] sm:$0xf]  ;;  %v3494_v31 = vpop.permute.xlu0 %3493 }
 0x1eb   : > { %v5847_v17 = vshrl.u32 %v5798_v12, 16  ;;  %v5850_v24 = vshll.u32 %v5798_v12, 16  ;;  %v10810_v55 = vld [vmem:[#allocation3 + $0x1c] sm:$0xf]  ;;  %v5238_v37 = vshrl.u32 %v5189_v44, 16  ;;  %v5241_v38 = vshll.u32 %v5189_v44, 16 }
 0x1ec   : > { %v10812_v56 = vld [vmem:[#allocation3 + $0x1c] sm:$0xf]  ;;  %v3774_v6 = vsel %vm3746_vm13, %v3741_v47, %v3494_v31  ;;  %v10815_v53 = vrot.slane %v5262_v50, 4  ;;  %v10817_v7 = vrot.slane %v5265_v49, 5  ;;  %v8348_v20 = vcombine.low %v5191_v15, %v10810_v55  ;;  %v5622_v4 = vld [vmem:[#allocation3 + $0x18] sm:$0xe]  ;;  %v2906_v43 = vpop.permute.xlu1 %2905 }
 0x1ed   : > { %8721 = vmatmul.mubr.msk.bf16.gmra.mrb[24].mxu0 %vm12915_vm7, %v3774_v6  ;;  %v5275_v27 = vshrl.u32 %v10810_v55, 16  ;;  %v10826_v42 = vrot.slane %v5847_v17, 4  ;;  %v10828_v60 = vld [vmem:[#allocation3 + $0x10] sm:$0xf]  ;;  %v10830_v0 = vld [vmem:[#allocation3 + $0x20] sm:$0x1]  ;;  %v3547_v9 = vsel %vm3499_vm15, %v8068_v58, %v2906_v43  ;;  %v8395_v2 = vcombine.low %v5798_v12, %v10812_v56 }
 0x1ee   : > { %6696 = vrot.lane.b32.xlu1 %v8348_v20, %s8922_s25  ;;  %v10837_v45 = vrot.slane %v5850_v24, 5  ;;  %v5860_v11 = vshrl.u32 %v10812_v56, 16  ;;  %v10841_v23 = vld [vmem:[#allocation3 + $0x20] sm:$0x1]  ;;  %v6230_v13 = vld [vmem:[#allocation3 + $0x18] sm:$0xe]  ;;  %v2984_v46 = vpop.permute.xlu0 %2983  ;;  %v8347_v32 = vcombine.low %v5189_v44, %v10828_v60 }
 0x1ef   : > { %v10843_v22 = vrot.slane %v5238_v37, 4  ;;  %v10845_v28 = vrot.slane %v5241_v38, 5  ;;  %v8268_v57 = vrot.slane %v5622_v4, 9  ;;  %v5694_v59 = vrot.slane %v10810_v55, 5  ;;  %v10848_v61 = vld [vmem:[#allocation3 + $0x10] sm:$0xf]  ;;  %6950 = vrot.lane.b32.xlu0 %v8395_v2, %s8923_s26 }
 0x1f0   : > { %v3578_v58 = vsel %vm3548_vm1, %v3544_v36, %v2984_v46  ;;  %v5251_v52 = vshrl.u32 %v10828_v60, 16  ;;  %v6296_v54 = vrot.slane %v10812_v56, 5  ;;  %v10855_v51 = vld [vmem:[#allocation3 + $0x14] sm:$0x1]  ;;  %v5014_v5 = vld [vmem:[#allocation3 + $0xc] sm:$0xe]  ;;  %v2986_v30 = vpop.permute.xlu1 %2985 }
 0x1f1   : > { %v5695_v21 = vsel %vm9024_vm9, %v8268_v57, %v5694_v59  ;;  %v5696_v35 = vrot.slane %v5694_v59, 4  ;;  %v5697_v18 = vrot.slane %v10830_v0, 5  ;;  %v8283_v40 = vrot.slane %v6230_v13, 9  ;;  %v10860_v16 = vld [vmem:[#allocation3 + $0x1c] sm:$0xf] }
 0x1f2   : > { %v6298_v25 = vrot.slane %v6296_v54, 4  ;;  %v6299_v63 = vrot.slane %v10841_v23, 5  ;;  %v8252_v19 = vrot.slane %v5014_v5, 9  ;;  %v5086_v26 = vrot.slane %v10848_v61, 5  ;;  %v5015_v48 = vld [vmem:[#allocation3 + $0x18] sm:$0xe]  ;;  %v3080_v10 = vpop.permute.xlu0 %3079 }
 0x1f3   : > { %v10865_v41 = vsel %vm3548_vm1, %v3547_v9, %v2986_v30  ;;  %v5698_v15 = vsel %vm9024_vm9, %v5696_v35, %v5697_v18  ;;  %v6297_v12 = vsel %vm9024_vm9, %v8283_v40, %v6296_v54  ;;  %v10871_v50 = vld [vmem:[#allocation3 + $0x20] sm:$0x1]  ;;  %v5093_v49 = vrot.slane %v10860_v16, 5  ;;  %6694 = vrot.lane.b32.xlu0 %v8347_v32, %s8922_s25  ;;  %v10881_v4 = vld [vmem:[#allocation3 + $0x14] sm:$0x1] }
 0x1f4   : > { %v8380_v17 = vcombine.low %v5695_v21, %v5698_v15  ;;  %v6300_v24 = vsel %vm9024_vm9, %v6298_v25, %v6299_v63  ;;  %v5089_v44 = vrot.slane %v10855_v51, 5  ;;  %v8253_v47 = vrot.slane %v5015_v48, 9  ;;  %v5621_v13 = vld [vmem:[#allocation3 + $0xc] sm:$0xe] }
 0x1f5   : > { %v3611_v31 = vsel %vm3581_vm2, %v3578_v58, %v3080_v10  ;;  %v8702_v37 = vpop.f32.mrb[4].mxu0  ;;  %v5087_v38 = vsel %vm9024_vm9, %v8252_v19, %v5086_v26  ;;  %v5088_v6 = vrot.slane %v5086_v26, 4  ;;  %v5095_v20 = vrot.slane %v5093_v49, 4 }
 0x1f6   : > { %v3918_v36 = vadd.f32 %v8702_v37, %v10767_v34  ;;  %6856 = vrot.lane.b32.xlu1 %v8380_v17, %s8925_s28  ;;  %v3909_v43 = vpop.f32.mrb[5].mxu0  ;;  %v8427_v9 = vcombine.low %v6297_v12, %v6300_v24  ;;  %v5096_v2 = vrot.slane %v10871_v50, 5  ;;  %v5687_v46 = vrot.slane %v10828_v60, 5 }
 0x1f7   : > { %v3910_v57 = vadd.f32 %v10767_v34, %v3909_v43  ;;  %v8703_v59 = vpop.f32.mrb[6].mxu0  ;;  %v5090_v58 = vsel %vm9024_vm9, %v5088_v6, %v5089_v44  ;;  %v5094_v32 = vsel %vm9024_vm9, %v8253_v47, %v5093_v49  ;;  %v5268_v54 = vor.u32 %v10817_v7, %v10815_v53 }
 0x1f8   : > { %v4026_v5 = vmax.f32 %v3918_v36, 0.0  ;;  %v3921_v21 = vadd.f32 %v8703_v59, %v10767_v34  ;;  %v3912_v35 = vpop.f32.mrb[7].mxu0  ;;  %7110 = vrot.lane.b32.xlu0 %v8427_v9, %s8926_s29  ;;  %v8332_v18 = vcombine.low %v5087_v38, %v5090_v58  ;;  %v5097_v40 = vsel %vm9024_vm9, %v5095_v20, %v5096_v2 }
 0x1f9   : > { %v4024_v30 = vmax.f32 %v3910_v57, 0.0  ;;  %v3913_v25 = vadd.f32 %v10767_v34, %v3912_v35  ;;  %v8267_v63 = vrot.slane %v5621_v13, 9  ;;  %v5690_v19 = vrot.slane %v10881_v4, 5  ;;  %v4483_v35 = vld [vmem:[#allocation3 + $0x24] sm:$0xf] }
 0x1fa   : > { %v8507_v26 = vpack.c.bf16 %v4026_v5, %v4026_v5  ;;  %v4027_v48 = vmax.f32 %v3921_v21, 0.0  ;;  %6600 = vrot.lane.b32.xlu1 %v8332_v18, %s8921_s24  ;;  %v8333_v53 = vcombine.low %v5094_v32, %v5097_v40  ;;  %v5689_v7 = vrot.slane %v5687_v46, 4 }
 0x1fb   : > { %v8505_v10 = vpack.c.bf16 %v4024_v30, %v4024_v30  ;;  %v4025_v15 = vmax.f32 %v3913_v25, 0.0  ;;  %v5688_v12 = vsel %vm9024_vm9, %v8267_v63, %v5687_v46  ;;  %v5271_v49 = vshll.u32 %v10810_v55, 16  ;;  %v3160_v17 = vpop.permute.xlu0 %3159  ;;  %v4490_v46 = vld [vmem:[#allocation3 + $0x30] sm:$0xf]  ;;  %v4494_v25 = vld [vmem:[#allocation3 + $0x38] sm:$0x1] }
 0x1fc   : > { %v4200_v24 = vshrl.u32 %v8507_v26, 16  ;;  %v8508_v44 = vpack.c.bf16 %v4027_v48, %v4027_v48  ;;  %6602 = vrot.lane.b32.xlu0 %v8333_v53, %s8921_s24  ;;  %v5691_v47 = vsel %vm9024_vm9, %v5689_v7, %v5690_v19  ;;  %v10907_v37 = vrot.slane %v5268_v54, 4  ;;  %v4487_v7 = vld [vmem:[#allocation3 + $0x2c] sm:$0x1] }
 0x1fd   : > { %v4203_v38 = vshll.u32 %v8507_v26, 16  ;;  %v4183_v6 = vshrl.u32 %v8505_v10, 16  ;;  %v8506_v20 = vpack.c.bf16 %v4025_v15, %v4025_v15  ;;  %v5277_v36 = vrot.slane %v5275_v27, 4 }
 0x1fe   : > { %v3644_v43 = vsel %vm3614_vm4, %v3611_v31, %v3160_v17  ;;  %v4202_v9 = vrot.slane %v4200_v24, 7  ;;  %v4208_v2 = vshrl.u32 %v8508_v44, 16  ;;  %v8379_v13 = vcombine.low %v5688_v12, %v5691_v47  ;;  %v3082_v5 = vpop.permute.xlu1 %3081  ;;  %v10926_v47 = vld [vmem:[#allocation3 + $0x18] sm:$0xf] }
 0x1ff   : > { %v4185_v57 = vrot.slane %v4183_v6, 7  ;;  %v4186_v59 = vshll.u32 %v8505_v10, 16  ;;  %v4191_v58 = vshrl.u32 %v8506_v20, 16  ;;  %v5273_v32 = vrot.slane %v5271_v49, 5  ;;  %v3240_v21 = vpop.permute.xlu0 %3239 }
 0x200   : > { %v4205_v54 = vor.u32 %v4203_v38, %v4202_v9  ;;  %v4210_v18 = vrot.slane %v4208_v2, 7  ;;  %v4211_v40 = vshll.u32 %v8508_v44, 16  ;;  %v4194_v30 = vshll.u32 %v8506_v20, 16  ;;  %6854 = vrot.lane.b32.xlu0 %v8379_v13, %s8925_s28 }
 0x201   : > { %v3613_v55 = vsel %vm3581_vm2, %v10865_v41, %v3082_v5  ;;  %v4206_v27 = vrot.slane %v4202_v9, 4  ;;  %v4188_v31 = vor.u32 %v4186_v59, %v4185_v57  ;;  %v4193_v63 = vrot.slane %v4191_v58, 7 }
 0x202   : > { %v4491_v19 = vsel %vm9030_vm10, %v4205_v54, %v4490_v46  ;;  %v4189_v26 = vrot.slane %v4185_v57, 4  ;;  %v4213_v48 = vor.u32 %v4211_v40, %v4210_v18  ;;  %v4215_v53 = vrot.slane %v4210_v18, 4 }
 0x203   : > { %4492 = vst [vmem:[#allocation3 + $0x30] sm:$0xf] %v4491_v19  ;;  %v4484_v10 = vsel %vm9030_vm10, %v4188_v31, %v4483_v35  ;;  %v4196_v15 = vor.u32 %v4194_v30, %v4193_v63  ;;  %v4198_v12 = vrot.slane %v4193_v63, 4  ;;  %v5278_v49 = vor.u32 %v5277_v36, %v5273_v32 }
 0x204   : > { %4485 = vst [vmem:[#allocation3 + $0x24] sm:$0xf] %v4484_v10  ;;  %v4214_v41 = vsel %vm9036_vm11, %v4206_v27, %v4213_v48  ;;  %v4495_v17 = vsel %vm8972_vm3, %v4215_v53, %v4494_v25  ;;  %v5281_v24 = vshll.u32 %v10830_v0, 16  ;;  %v5853_v44 = vor.u32 %v10837_v45, %v10826_v42  ;;  %v3336_v38 = vpop.permute.xlu0 %3335 }
 0x205   : > { %4493 = vst.msk [vmem:[#allocation3 + $0x34] sm:$0xf] %vm226_vm0, %v4214_v41  ;;  %4496 = vst [vmem:[#allocation3 + $0x38] sm:$0x1] %v4495_v17  ;;  %v4197_v6 = vsel %vm9036_vm11, %v4189_v26, %v4196_v15  ;;  %v4488_v20 = vsel %vm8972_vm3, %v4198_v12, %v4487_v7  ;;  %v5279_v36 = vrot.slane %v5278_v49, 4  ;;  %v5856_v9 = vshll.u32 %v10812_v56, 16 }
 0x206   : > { %v3677_v0 = vsel %vm3647_vm6, %v3644_v43, %v3240_v21  ;;  %4486 = vst.msk [vmem:[#allocation3 + $0x28] sm:$0xf] %vm226_vm0, %v4197_v6  ;;  %4489 = vst [vmem:[#allocation3 + $0x2c] sm:$0x1] %v4488_v20  ;;  %v5274_v42 = vsel %vm9111_vm14, %v10907_v37, %v5273_v32  ;;  %v5283_v45 = vrot.slane %v5281_v24, 5  ;;  %v5862_v2 = vrot.slane %v5860_v11, 4 }
 0x207   : > { %v5858_v13 = vrot.slane %v5856_v9, 5  ;;  %v5866_v46 = vshll.u32 %v10841_v23, 16  ;;  %v4678_v57 = vshrl.u32 %v10926_v47, 16  ;;  %v4681_v59 = vshll.u32 %v10926_v47, 16 }
 0x208   : > { %v3710_v43 = vsel %vm3680_vm8, %v3677_v0, %v3336_v38  ;;  %v5284_v58 = vsel %vm9111_vm14, %v5279_v36, %v5283_v45  ;;  %v5854_v5 = vrot.slane %v5853_v44, 4  ;;  %v4687_v21 = vshll.u32 %v10860_v16, 16  ;;  %v3162_v37 = vpop.permute.xlu1 %3161 }
 0x209   : > { %v5863_v32 = vor.u32 %v5862_v2, %v5858_v13  ;;  %v5868_v54 = vrot.slane %v5866_v46, 5  ;;  %v4691_v56 = vshrl.u32 %v10860_v16, 16  ;;  %v4697_v11 = vshll.u32 %v10871_v50, 16 }
 0x20a   : > { %v3646_v23 = vsel %vm3614_vm4, %v3613_v55, %v3162_v37  ;;  %v5195_v35 = vld [vmem:[#allocation3 + $0x30] sm:$0xf]  ;;  %v8364_v40 = vcombine.low %v5274_v42, %v5284_v58  ;;  %v4680_v30 = vrot.slane %v4678_v57, 4  ;;  %v4683_v27 = vrot.slane %v4681_v59, 5 }
 0x20b   : > { %v5802_v18 = vld [vmem:[#allocation3 + $0x30] sm:$0xf]  ;;  %v5310_v31 = vshrl.u32 %v5195_v35, 16  ;;  %v5313_v25 = vshll.u32 %v5195_v35, 16  ;;  %v5800_v26 = vld [vmem:[#allocation3 + $0x24] sm:$0xf]  ;;  %v5859_v7 = vsel %vm9111_vm14, %v5854_v5, %v5858_v13  ;;  %v5244_v55 = vor.u32 %v10845_v28, %v10843_v22 }
 0x20c   : > { %v5895_v63 = vshrl.u32 %v5802_v18, 16  ;;  %v5898_v19 = vshll.u32 %v5802_v18, 16  ;;  %v10951_v48 = vld [vmem:[#allocation3 + $0x34] sm:$0xf]  ;;  %v5864_v50 = vrot.slane %v5863_v32, 4  ;;  %v5871_v10 = vshrl.u32 %v5800_v26, 16  ;;  %v3242_v15 = vpop.permute.xlu1 %3241 }
 0x20d   : > { %v10953_v53 = vld [vmem:[#allocation3 + $0x34] sm:$0xf]  ;;  %v10959_v12 = vrot.slane %v5310_v31, 4  ;;  %v8350_v49 = vcombine.low %v5195_v35, %v10951_v48  ;;  %v10962_v41 = vld [vmem:[#allocation3 + $0x28] sm:$0xf]  ;;  %v4684_v17 = vor.u32 %v4683_v27, %v4680_v30  ;;  %v8299_v24 = vcombine.low %v10716_v3, %v10678_v14 }
 0x20e   : > { %v3679_v44 = vsel %vm3647_vm6, %v3646_v23, %v3242_v15  ;;  %v10967_v38 = vrot.slane %v5313_v25, 5  ;;  %v5323_v6 = vshrl.u32 %v10951_v48, 16  ;;  %v10970_v20 = vrot.slane %v5895_v63, 4  ;;  %v5193_v22 = vld [vmem:[#allocation3 + $0x24] sm:$0xf] }
 0x20f   : > { %6700 = vrot.lane.b32.xlu1 %v8350_v49, %s8922_s25  ;;  %v10973_v28 = vrot.slane %v5898_v19, 5  ;;  %v5908_v36 = vshrl.u32 %v10953_v53, 16  ;;  %v8397_v9 = vcombine.low %v5802_v18, %v10953_v53  ;;  %v5869_v0 = vsel %vm9111_vm14, %v5864_v50, %v5868_v54  ;;  %v10979_v42 = vld [vmem:[#allocation3 + $0x28] sm:$0xf]  ;;  %v10990_v30 = vld [vmem:[#allocation3 + $0xc] sm:$0xf] }
 0x210   : > { %v5884_v45 = vshrl.u32 %v10962_v41, 16  ;;  %v8396_v2 = vcombine.low %v5800_v26, %v10962_v41  ;;  %v5874_v13 = vshll.u32 %v5800_v26, 16  ;;  %v5286_v46 = vshrl.u32 %v5193_v22, 16  ;;  %v3338_v57 = vpop.permute.xlu1 %3337  ;;  %v3416_v59 = vpop.permute.xlu0 %3415 }
 0x211   : > { %6954 = vrot.lane.b32.xlu0 %v8397_v9, %s8923_s26  ;;  %v8411_v58 = vcombine.low %v5859_v7, %v5869_v0  ;;  %v10984_v5 = vrot.slane %v5871_v10, 4  ;;  %v5289_v37 = vshll.u32 %v5193_v22, 16  ;;  %v5299_v32 = vshrl.u32 %v10979_v42, 16 }
 0x212   : > { %v3712_v54 = vsel %vm3680_vm8, %v3679_v44, %v3338_v57  ;;  %v3743_v23 = vsel %vm3713_vm12, %v3710_v43, %v3416_v59  ;;  %v8349_v35 = vcombine.low %v5193_v22, %v10979_v42  ;;  %v4685_v18 = vrot.slane %v4684_v17, 4  ;;  %v6232_v57 = vld [vmem:[#allocation3 + $0x30] sm:$0xe] }
 0x213   : > { %6776 = vrot.lane.b32.xlu1 %v8364_v40, %s8927_s30  ;;  %v10993_v27 = vrot.slane %v5874_v13, 5  ;;  %v10995_v31 = vrot.slane %v5286_v46, 4  ;;  %v4689_v25 = vrot.slane %v4687_v21, 5  ;;  %v4693_v63 = vrot.slane %v4691_v56, 4 }
 0x214   : > { %v10997_v19 = vrot.slane %v5289_v37, 5  ;;  %v4699_v26 = vrot.slane %v4697_v11, 5  ;;  %v5247_v7 = vshll.u32 %v10828_v60, 16  ;;  %v5253_v43 = vrot.slane %v5251_v52, 4  ;;  %v3418_v50 = vpop.permute.xlu1 %3417  ;;  %v3496_v10 = vpop.permute.xlu0 %3495 }
 0x215   : > { %7030 = vrot.lane.b32.xlu0 %v8411_v58, %s8928_s6  ;;  %v4694_v15 = vor.u32 %v4693_v63, %v4689_v25  ;;  %v5257_v40 = vshll.u32 %v10881_v4, 16  ;;  %v4654_v49 = vshrl.u32 %v10990_v30, 16  ;;  %v4657_v21 = vshll.u32 %v10990_v30, 16  ;;  %v11019_v63 = vld [vmem:[#allocation3 + $0x38] sm:$0x1] }
 0x216   : > { %v3776_v56 = vsel %vm3746_vm13, %v3743_v23, %v3496_v10  ;;  %v4690_v11 = vsel %vm9111_vm14, %v4685_v18, %v4689_v25  ;;  %v5245_v17 = vrot.slane %v5244_v55, 4  ;;  %v5249_v44 = vrot.slane %v5247_v7, 5  ;;  %v5624_v7 = vld [vmem:[#allocation3 + $0x30] sm:$0xe] }
 0x217   : > { %8724 = vmatprep.mubr.msk.bf16.mxu0 %vm12915_vm7, %v3776_v56  ;;  %6952 = vrot.lane.b32.xlu1 %v8396_v2, %s8923_s26  ;;  %v4695_v60 = vrot.slane %v4694_v15, 4  ;;  %v4656_v52 = vrot.slane %v4654_v49, 4  ;;  %v4659_v22 = vrot.slane %v4657_v21, 5  ;;  %v4663_v4 = vshll.u32 %v10848_v61, 16  ;;  %v11031_v21 = vld [vmem:[#allocation3 + $0x34] sm:$0xf] }
 0x218   : > { %v3745_v9 = vsel %vm3713_vm12, %v3712_v54, %v3418_v50  ;;  %v5254_v0 = vor.u32 %v5253_v43, %v5249_v44  ;;  %v4667_v13 = vshrl.u32 %v10848_v61, 16  ;;  %v4673_v46 = vshll.u32 %v10855_v51, 16  ;;  %v3498_v59 = vpop.permute.xlu1 %3497  ;;  %v11025_v50 = vld [vmem:[#allocation3 + $0x38] sm:$0x1] }
 0x219   : > { %6698 = vrot.lane.b32.xlu0 %v8349_v35, %s8922_s25  ;;  %v4700_v55 = vsel %vm9111_vm14, %v4695_v60, %v4699_v26  ;;  %v5259_v2 = vrot.slane %v5257_v40, 5  ;;  %v4660_v58 = vor.u32 %v4659_v22, %v4656_v52  ;;  %v4665_v37 = vrot.slane %v4663_v4, 5  ;;  %v11033_v56 = vld [vmem:[#allocation3 + $0x38] sm:$0x1]  ;;  %v5017_v52 = vld [vmem:[#allocation3 + $0x30] sm:$0xe] }
 0x21a   : > { %v3778_v23 = vsel %vm3746_vm13, %v3745_v9, %v3498_v59  ;;  %v8317_v18 = vcombine.low %v4690_v11, %v4700_v55  ;;  %v5255_v25 = vrot.slane %v5254_v0, 4  ;;  %v4669_v54 = vrot.slane %v4667_v13, 4  ;;  %v5016_v13 = vld [vmem:[#allocation3 + $0x24] sm:$0xe] }
 0x21b   : > { %8725 = vmatmul.mubr.msk.bf16.gmra.mrb[28].mxu0 %vm12915_vm7, %v3778_v23  ;;  %v5250_v51 = vsel %vm9111_vm14, %v5245_v17, %v5249_v44  ;;  %v4661_v35 = vrot.slane %v4660_v58, 4  ;;  %v8285_v43 = vrot.slane %v6232_v57, 9  ;;  %v6310_v26 = vrot.slane %v10953_v53, 5 }
 0x21c   : > { %6522 = vrot.lane.b32.xlu1 %v8317_v18, %s8924_s27  ;;  %v5260_v10 = vsel %vm9111_vm14, %v5255_v25, %v5259_v2  ;;  %v4670_v15 = vor.u32 %v4669_v54, %v4665_v37  ;;  %v4675_v40 = vrot.slane %v4673_v46, 5  ;;  %v5708_v49 = vrot.slane %v10951_v48, 5  ;;  %v11047_v2 = vld [vmem:[#allocation3 + $0x28] sm:$0xf]  ;;  %v11054_v25 = vld [vmem:[#allocation3 + $0x2c] sm:$0x1] }
 0x21d   : > { %v8363_v11 = vcombine.low %v5250_v51, %v5260_v10  ;;  %v6312_v17 = vrot.slane %v6310_v26, 4  ;;  %v6313_v44 = vrot.slane %v11019_v63, 5  ;;  %v8270_v60 = vrot.slane %v5624_v7, 9  ;;  %v6231_v54 = vld [vmem:[#allocation3 + $0x24] sm:$0xe] }
 0x21e   : > { %v4666_v22 = vsel %vm9111_vm14, %v4661_v35, %v4665_v37  ;;  %v4671_v4 = vrot.slane %v4670_v15, 4  ;;  %v5710_v9 = vrot.slane %v5708_v49, 4  ;;  %v5711_v0 = vrot.slane %v11025_v50, 5  ;;  %v5623_v10 = vld [vmem:[#allocation3 + $0x24] sm:$0xe] }
 0x21f   : > { %6774 = vrot.lane.b32.xlu0 %v8363_v11, %s8927_s30  ;;  %v6311_v46 = vsel %vm9024_vm9, %v8285_v43, %v6310_v26  ;;  %v6314_v57 = vsel %vm9024_vm9, %v6312_v17, %v6313_v44  ;;  %v5709_v59 = vsel %vm9024_vm9, %v8270_v60, %v5708_v49  ;;  %v5107_v55 = vrot.slane %v11031_v21, 5  ;;  %v11056_v26 = vld [vmem:[#allocation3 + $0x2c] sm:$0x1] }
 0x220   : > { %v4676_v58 = vsel %vm9111_vm14, %v4671_v4, %v4675_v40  ;;  %v5712_v37 = vsel %vm9024_vm9, %v5710_v9, %v5711_v0  ;;  %v8255_v23 = vrot.slane %v5017_v52, 9  ;;  %v5110_v18 = vrot.slane %v11033_v56, 5  ;;  %v11062_v17 = vld [vmem:[#allocation3 + $0x2c] sm:$0x1] }
 0x221   : > { %v8316_v7 = vcombine.low %v4666_v22, %v4676_v58  ;;  %v8429_v51 = vcombine.low %v6311_v46, %v6314_v57  ;;  %v5109_v35 = vrot.slane %v5107_v55, 4  ;;  %v8254_v43 = vrot.slane %v5016_v13, 9 }
 0x222   : > { %v8382_v15 = vcombine.low %v5709_v59, %v5712_v37  ;;  %v5108_v40 = vsel %vm9024_vm9, %v8255_v23, %v5107_v55  ;;  %v5100_v49 = vrot.slane %v11047_v2, 5  ;;  %v6303_v11 = vrot.slane %v10962_v41, 5 }
 0x223   : > { %6520 = vrot.lane.b32.xlu1 %v8316_v7, %s8924_s27  ;;  %7114 = vrot.lane.b32.xlu0 %v8429_v51, %s8926_s29  ;;  %v5111_v44 = vsel %vm9024_vm9, %v5109_v35, %v5110_v18  ;;  %v5103_v60 = vrot.slane %v11054_v25, 5  ;;  %v8284_v52 = vrot.slane %v6231_v54, 9  ;;  %v5701_v22 = vrot.slane %v10979_v42, 5 }
 0x224   : > { %v8335_v4 = vcombine.low %v5108_v40, %v5111_v44  ;;  %v5102_v9 = vrot.slane %v5100_v49, 4  ;;  %v6306_v0 = vrot.slane %v11056_v26, 5  ;;  %v8269_v13 = vrot.slane %v5623_v10, 9 }
 0x225   : > { %v5101_v46 = vsel %vm9024_vm9, %v8254_v43, %v5100_v49  ;;  %v6305_v57 = vrot.slane %v6303_v11, 4  ;;  %v5703_v59 = vrot.slane %v5701_v22, 4  ;;  %v5704_v55 = vrot.slane %v11062_v17, 5 }
 0x226   : > { %v5104_v58 = vsel %vm9024_vm9, %v5102_v9, %v5103_v60  ;;  %v6304_v37 = vsel %vm9024_vm9, %v8284_v52, %v6303_v11  ;;  %v5316_v23 = vor.u32 %v10967_v38, %v10959_v12  ;;  %v5319_v18 = vshll.u32 %v10951_v48, 16  ;;  %v8706_v54 = vpop.f32.mrb[8].mxu0 }
 0x227   : > { %6860 = vrot.lane.b32.xlu1 %v8382_v15, %s8925_s28  ;;  %6606 = vrot.lane.b32.xlu0 %v8335_v4, %s8921_s24  ;;  %v6307_v7 = vsel %vm9024_vm9, %v6305_v57, %v6306_v0  ;;  %v5705_v51 = vsel %vm9024_vm9, %v5703_v59, %v5704_v55  ;;  %v5325_v35 = vrot.slane %v5323_v6, 4  ;;  %v5329_v43 = vshll.u32 %v11025_v50, 16  ;;  %v3925_v38 = vpop.f32.mrb[9].mxu0 }
 0x228   : > { %v3934_v12 = vadd.f32 %v8706_v54, %v10767_v34  ;;  %v8334_v10 = vcombine.low %v5101_v46, %v5104_v58  ;;  %v8428_v40 = vcombine.low %v6304_v37, %v6307_v7  ;;  %v5702_v15 = vsel %vm9024_vm9, %v8269_v13, %v5701_v22  ;;  %v8707_v11 = vpop.f32.mrb[10].mxu0 }
 0x229   : > { %v3926_v49 = vadd.f32 %v10767_v34, %v3925_v38  ;;  %v8381_v44 = vcombine.low %v5702_v15, %v5705_v51  ;;  %v11094_v60 = vrot.slane %v5319_v18, 5  ;;  %v5901_v48 = vor.u32 %v10973_v28, %v10970_v20  ;;  %v3928_v52 = vpop.f32.mrb[11].mxu0 }
 0x22a   : > { %v4030_v6 = vmax.f32 %v3934_v12, 0.0  ;;  %v3937_v50 = vadd.f32 %v8707_v11, %v10767_v34  ;;  %v11099_v4 = vrot.slane %v5316_v23, 4  ;;  %v5904_v9 = vshll.u32 %v10953_v53, 16 }
 0x22b   : > { %v4028_v0 = vmax.f32 %v3926_v49, 0.0  ;;  %v3929_v22 = vadd.f32 %v10767_v34, %v3928_v52  ;;  %6604 = vrot.lane.b32.xlu1 %v8334_v10, %s8921_s24  ;;  %7112 = vrot.lane.b32.xlu0 %v8428_v40, %s8926_s29  ;;  %v5326_v13 = vor.u32 %v5325_v35, %v11094_v60  ;;  %v11106_v46 = vrot.slane %v5329_v43, 5  ;;  %v4504_v35 = vld [vmem:[#allocation3 + $0x48] sm:$0xf]  ;;  %v4497_v10 = vld [vmem:[#allocation3 + $0x3c] sm:$0xf] }
 0x22c   : > { %v8511_v20 = vpack.c.bf16 %v4030_v6, %v4030_v6  ;;  %v4031_v28 = vmax.f32 %v3937_v50, 0.0  ;;  %v11108_v57 = vrot.slane %v5901_v48, 4  ;;  %v5910_v59 = vrot.slane %v5908_v36, 4  ;;  %v430_v48 = vld [vmem:[#allocation3 + $0x5c] sm:$0x1] }
 0x22d   : > { %v8509_v55 = vpack.c.bf16 %v4028_v0, %v4028_v0  ;;  %v4029_v58 = vmax.f32 %v3929_v22, 0.0  ;;  %v5327_v37 = vrot.slane %v5326_v13, 4  ;;  %v11112_v23 = vrot.slane %v5904_v9, 5  ;;  %v4508_v52 = vld [vmem:[#allocation3 + $0x50] sm:$0x1] }
 0x22e   : > { %v4234_v34 = vshrl.u32 %v8511_v20, 16  ;;  %v8512_v18 = vpack.c.bf16 %v4031_v28, %v4031_v28  ;;  %v5322_v54 = vsel %vm9111_vm14, %v11099_v4, %v11094_v60  ;;  %v5914_v7 = vshll.u32 %v11019_v63, 16 }
 0x22f   : > { %v4237_v51 = vshll.u32 %v8511_v20, 16  ;;  %v4217_v43 = vshrl.u32 %v8509_v55, 16  ;;  %v8510_v12 = vpack.c.bf16 %v4029_v58, %v4029_v58  ;;  %6858 = vrot.lane.b32.xlu0 %v8381_v44, %s8925_s28  ;;  %v5907_v53 = vsel %vm9111_vm14, %v11108_v57, %v11112_v23  ;;  %v4589_v20 = vld [vmem:[#allocation3 + $0x30] sm:$0xf] }
 0x230   : > { %v4236_v36 = vrot.slane %v4234_v34, 7  ;;  %v4220_v38 = vshll.u32 %v8509_v55, 16  ;;  %v4242_v40 = vshrl.u32 %v8512_v18, 16  ;;  %v5332_v15 = vsel %vm9111_vm14, %v5327_v37, %v11106_v46  ;;  %v4501_v55 = vld [vmem:[#allocation3 + $0x44] sm:$0x1] }
 0x231   : > { %v4219_v63 = vrot.slane %v4217_v43, 7  ;;  %v4245_v49 = vshll.u32 %v8512_v18, 16  ;;  %v4225_v11 = vshrl.u32 %v8510_v12, 16  ;;  %v5911_v60 = vor.u32 %v5910_v59, %v11112_v23 }
 0x232   : > { %v4239_v44 = vor.u32 %v4237_v51, %v4236_v36  ;;  %v4240_v6 = vrot.slane %v4236_v36, 4  ;;  %v4244_v50 = vrot.slane %v4242_v40, 7  ;;  %v4228_v4 = vshll.u32 %v8510_v12, 16 }
 0x233   : > { %v4222_v9 = vor.u32 %v4220_v38, %v4219_v63  ;;  %v4227_v0 = vrot.slane %v4225_v11, 7  ;;  %v5912_v22 = vrot.slane %v5911_v60, 4  ;;  %v5916_v13 = vrot.slane %v5914_v7, 5 }
 0x234   : > { %v4505_v28 = vsel %vm9030_vm10, %v4239_v44, %v4504_v35  ;;  %v4247_v46 = vor.u32 %v4245_v49, %v4244_v50  ;;  %v4249_v57 = vrot.slane %v4244_v50, 4  ;;  %v431_v59 = vsel %vm8995_vm5, 0, %v430_v48 }
 0x235   : > { %4506 = vst [vmem:[#allocation3 + $0x48] sm:$0xf] %v4505_v28  ;;  %v4223_v58 = vrot.slane %v4219_v63, 4  ;;  %v4498_v37 = vsel %vm9030_vm10, %v4222_v9, %v4497_v10  ;;  %v4230_v23 = vor.u32 %v4228_v4, %v4227_v0  ;;  %v4232_v34 = vrot.slane %v4227_v0, 4  ;;  %432 = vst [vmem:[#allocation3 + $0x5c] sm:$0x1] %v431_v59 }
 0x236   : > { %4499 = vst [vmem:[#allocation3 + $0x3c] sm:$0xf] %v4498_v37  ;;  %v4248_v18 = vsel %vm9036_vm11, %v4240_v6, %v4247_v46  ;;  %v4509_v7 = vsel %vm8972_vm3, %v4249_v57, %v4508_v52  ;;  %v5917_v51 = vsel %vm9111_vm14, %v5912_v22, %v5916_v13  ;;  %v4726_v35 = vshrl.u32 %v4589_v20, 16 }
 0x237   : > { %4507 = vst.msk [vmem:[#allocation3 + $0x4c] sm:$0xf] %vm226_vm0, %v4248_v18  ;;  %4510 = vst [vmem:[#allocation3 + $0x50] sm:$0x1] %v4509_v7  ;;  %v4231_v43 = vsel %vm9036_vm11, %v4223_v58, %v4230_v23  ;;  %v4502_v12 = vsel %vm8972_vm3, %v4232_v34, %v4501_v55  ;;  %v4729_v36 = vshll.u32 %v4589_v20, 16  ;;  %v4735_v38 = vshll.u32 %v11031_v21, 16 }
 0x238   : > { %4500 = vst.msk [vmem:[#allocation3 + $0x40] sm:$0xf] %vm226_vm0, %v4231_v43  ;;  %4503 = vst [vmem:[#allocation3 + $0x44] sm:$0x1] %v4502_v12  ;;  %v4728_v10 = vrot.slane %v4726_v35, 4  ;;  %v4739_v40 = vshrl.u32 %v11031_v21, 16  ;;  %v5292_v49 = vor.u32 %v10997_v19, %v10995_v31  ;;  %v8366_v11 = vcombine.low %v5322_v54, %v5332_v15  ;;  %v6519_v19 = vpop.permute.xlu0 %6518 }
 0x239   : > { %v4745_v63 = vshll.u32 %v11033_v56, 16  ;;  %v4731_v60 = vrot.slane %v4729_v36, 5  ;;  %v11151_v48 = vrot.slane %v4735_v38, 5  ;;  %v5295_v44 = vshll.u32 %v10979_v42, 16 }
 0x23a   : > { %v8413_v6 = vcombine.low %v5907_v53, %v5917_v51  ;;  %v4741_v50 = vrot.slane %v4739_v40, 4  ;;  %v5301_v4 = vrot.slane %v5299_v32, 4  ;;  %v11158_v21 = vrot.slane %v5292_v49, 4 }
 0x23b   : > { %v11154_v52 = vrot.slane %v4745_v63, 5  ;;  %v4732_v9 = vor.u32 %v4731_v60, %v4728_v10  ;;  %v11160_v56 = vrot.slane %v5295_v44, 5  ;;  %v5305_v31 = vshll.u32 %v11062_v17, 16 }
 0x23c   : > { %v5199_v54 = vld [vmem:[#allocation3 + $0x48] sm:$0xf]  ;;  %v4742_v0 = vor.u32 %v4741_v50, %v11151_v48  ;;  %v5877_v53 = vor.u32 %v10993_v27, %v10984_v5  ;;  %v5880_v22 = vshll.u32 %v10962_v41, 16  ;;  %v11171_v42 = vsel %vm3499_vm15, %v8299_v24, %v6519_v19 }
 0x23d   : > { %v5806_v15 = vld [vmem:[#allocation3 + $0x48] sm:$0xf]  ;;  %v5358_v32 = vshrl.u32 %v5199_v54, 16  ;;  %v5361_v13 = vshll.u32 %v5199_v54, 16  ;;  %v5804_v28 = vld [vmem:[#allocation3 + $0x3c] sm:$0xf]  ;;  %v5298_v58 = vsel %vm9111_vm14, %v11158_v21, %v11160_v56  ;;  %v5302_v37 = vor.u32 %v5301_v4, %v11160_v56 }
 0x23e   : > { %v5943_v20 = vshrl.u32 %v5806_v15, 16  ;;  %v5946_v17 = vshll.u32 %v5806_v15, 16  ;;  %v11173_v46 = vld [vmem:[#allocation3 + $0x4c] sm:$0xf]  ;;  %v5919_v55 = vshrl.u32 %v5804_v28, 16  ;;  %v5922_v59 = vshll.u32 %v5804_v28, 16 }
 0x23f   : > { %v11175_v57 = vld [vmem:[#allocation3 + $0x4c] sm:$0xf]  ;;  %v11181_v3 = vrot.slane %v5358_v32, 4  ;;  %v8352_v24 = vcombine.low %v5199_v54, %v11173_v46  ;;  %v11184_v27 = vld [vmem:[#allocation3 + $0x40] sm:$0xf]  ;;  %v11191_v23 = vrot.slane %v5361_v13, 5 }
 0x240   : > { %v5371_v34 = vshrl.u32 %v11173_v46, 16  ;;  %v11194_v18 = vrot.slane %v5943_v20, 4  ;;  %v8399_v7 = vcombine.low %v5806_v15, %v11175_v57  ;;  %v5197_v51 = vld [vmem:[#allocation3 + $0x3c] sm:$0xf]  ;;  %v11198_v35 = vrot.slane %v5946_v17, 5 }
 0x241   : > { %6704 = vrot.lane.b32.xlu1 %v8352_v24, %s8922_s25  ;;  %v5956_v43 = vshrl.u32 %v11175_v57, 16  ;;  %v5932_v12 = vshrl.u32 %v11184_v27, 16  ;;  %v8398_v36 = vcombine.low %v5804_v28, %v11184_v27  ;;  %v11203_v38 = vld [vmem:[#allocation3 + $0x40] sm:$0xf]  ;;  %v11206_v10 = vrot.slane %v5919_v55, 4 }
 0x242   : > { %6958 = vrot.lane.b32.xlu0 %v8399_v7, %s8923_s26  ;;  %v11208_v40 = vrot.slane %v5922_v59, 5  ;;  %v5334_v63 = vshrl.u32 %v5197_v51, 16  ;;  %v5337_v49 = vshll.u32 %v5197_v51, 16  ;;  %v4733_v60 = vrot.slane %v4732_v9, 4  ;;  %v6234_v15 = vld [vmem:[#allocation3 + $0x48] sm:$0xe] }
 0x243   : > { %v4743_v44 = vrot.slane %v4742_v0, 4  ;;  %v5303_v50 = vrot.slane %v5302_v37, 4  ;;  %v5307_v4 = vrot.slane %v5305_v31, 5  ;;  %v5347_v56 = vshrl.u32 %v11203_v38, 16  ;;  %v11225_v13 = vld [vmem:[#allocation3 + $0x50] sm:$0x1] }
 0x244   : > { %v11210_v21 = vrot.slane %v5334_v63, 4  ;;  %v8351_v19 = vcombine.low %v5197_v51, %v11203_v38  ;;  %v5882_v54 = vrot.slane %v5880_v22, 5  ;;  %v4738_v32 = vsel %vm9111_vm14, %v4733_v60, %v11151_v48  ;;  %v4587_v22 = vld [vmem:[#allocation3 + $0x24] sm:$0xf]  ;;  %v5019_v63 = vld [vmem:[#allocation3 + $0x48] sm:$0xe] }
 0x245   : > { %6780 = vrot.lane.b32.xlu1 %v8366_v11, %s8927_s30  ;;  %v4748_v9 = vsel %vm9111_vm14, %v4743_v44, %v11154_v52  ;;  %v5308_v31 = vsel %vm9111_vm14, %v5303_v50, %v5307_v4  ;;  %v5886_v0 = vrot.slane %v5884_v45, 4  ;;  %v11228_v11 = vrot.slane %v5337_v49, 5  ;;  %v11238_v44 = vld [vmem:[#allocation3 + $0x4c] sm:$0xf] }
 0x246   : > { %7034 = vrot.lane.b32.xlu0 %v8413_v6, %s8928_s6  ;;  %v8319_v20 = vcombine.low %v4738_v32, %v4748_v9  ;;  %v5878_v17 = vrot.slane %v5877_v53, 4  ;;  %v5890_v48 = vshll.u32 %v11056_v26, 16  ;;  %v8365_v28 = vcombine.low %v5298_v58, %v5308_v31 }
 0x247   : > { %v5887_v55 = vor.u32 %v5886_v0, %v5882_v54  ;;  %v8287_v52 = vrot.slane %v6234_v15, 9  ;;  %v6324_v59 = vrot.slane %v11175_v57, 5  ;;  %v6327_v24 = vrot.slane %v11225_v13, 5  ;;  %v11246_v15 = vld [vmem:[#allocation3 + $0x50] sm:$0x1] }
 0x248   : > { %v4702_v41 = vshrl.u32 %v4587_v22, 16  ;;  %v4705_v45 = vshll.u32 %v4587_v22, 16  ;;  %v4711_v37 = vshll.u32 %v11047_v2, 16  ;;  %v5892_v7 = vrot.slane %v5890_v48, 5  ;;  %v11250_v0 = vld [vmem:[#allocation3 + $0x50] sm:$0x1] }
 0x249   : > { %6956 = vrot.lane.b32.xlu1 %v8398_v36, %s8923_s26  ;;  %v5888_v6 = vrot.slane %v5887_v55, 4  ;;  %v6326_v51 = vrot.slane %v6324_v59, 4  ;;  %v4715_v53 = vshrl.u32 %v11047_v2, 16  ;;  %v4721_v60 = vshll.u32 %v11054_v25, 16  ;;  %v6233_v55 = vld [vmem:[#allocation3 + $0x3c] sm:$0xe] }
 0x24a   : > { %6702 = vrot.lane.b32.xlu0 %v8351_v19, %s8922_s25  ;;  %v4704_v26 = vrot.slane %v4702_v41, 4  ;;  %v4707_v58 = vrot.slane %v4705_v45, 5  ;;  %v4713_v49 = vrot.slane %v4711_v37, 5  ;;  %v5883_v50 = vsel %vm9111_vm14, %v5878_v17, %v5882_v54  ;;  %v5626_v19 = vld [vmem:[#allocation3 + $0x48] sm:$0xe] }
 0x24b   : > { %v5893_v36 = vsel %vm9111_vm14, %v5888_v6, %v5892_v7  ;;  %v6328_v4 = vsel %vm9024_vm9, %v6326_v51, %v6327_v24  ;;  %v4717_v2 = vrot.slane %v4715_v53, 4  ;;  %v6325_v9 = vsel %vm9024_vm9, %v8287_v52, %v6324_v59  ;;  %v11257_v59 = vld [vmem:[#allocation3 + $0x44] sm:$0x1] }
 0x24c   : > { %v8412_v32 = vcombine.low %v5883_v50, %v5893_v36  ;;  %v4708_v25 = vor.u32 %v4707_v58, %v4704_v26  ;;  %v8257_v31 = vrot.slane %v5019_v63, 9  ;;  %v8431_v54 = vcombine.low %v6325_v9, %v6328_v4  ;;  %v11265_v26 = vld [vmem:[#allocation3 + $0x40] sm:$0xf]  ;;  %v5018_v58 = vld [vmem:[#allocation3 + $0x3c] sm:$0xe] }
 0x24d   : > { %6526 = vrot.lane.b32.xlu1 %v8319_v20, %s8924_s27  ;;  %v4718_v22 = vor.u32 %v4717_v2, %v4713_v49  ;;  %v4723_v17 = vrot.slane %v4721_v60, 5  ;;  %v5121_v48 = vrot.slane %v11238_v44, 5  ;;  %v5124_v41 = vrot.slane %v11246_v15, 5 }
 0x24e   : > { %6778 = vrot.lane.b32.xlu0 %v8365_v28, %s8927_s30  ;;  %v4709_v24 = vrot.slane %v4708_v25, 4  ;;  %v8272_v45 = vrot.slane %v5626_v19, 9  ;;  %v5722_v52 = vrot.slane %v11173_v46, 5  ;;  %v5725_v20 = vrot.slane %v11250_v0, 5  ;;  %v5625_v25 = vld [vmem:[#allocation3 + $0x3c] sm:$0xe] }
 0x24f   : > { %v4719_v37 = vrot.slane %v4718_v22, 4  ;;  %v5123_v6 = vrot.slane %v5121_v48, 4  ;;  %v6317_v7 = vrot.slane %v11184_v27, 5  ;;  %v5122_v28 = vsel %vm9024_vm9, %v8257_v31, %v5121_v48 }
 0x250   : > { %v4714_v51 = vsel %vm9111_vm14, %v4709_v24, %v4713_v49  ;;  %v5724_v53 = vrot.slane %v5722_v52, 4  ;;  %v8286_v63 = vrot.slane %v6233_v55, 9  ;;  %v6320_v4 = vrot.slane %v11257_v59, 5  ;;  %v11273_v49 = vld [vmem:[#allocation3 + $0x44] sm:$0x1] }
 0x251   : > { %7032 = vrot.lane.b32.xlu1 %v8412_v32, %s8928_s6  ;;  %v4724_v60 = vsel %vm9111_vm14, %v4719_v37, %v4723_v17  ;;  %v5125_v50 = vsel %vm9024_vm9, %v5123_v6, %v5124_v41  ;;  %v6319_v36 = vrot.slane %v6317_v7, 4  ;;  %v5723_v19 = vsel %vm9024_vm9, %v8272_v45, %v5722_v52  ;;  %v11285_v55 = vld [vmem:[#allocation3 + $0x44] sm:$0x1] }
 0x252   : > { %7118 = vrot.lane.b32.xlu0 %v8431_v54, %s8926_s29  ;;  %v8318_v2 = vcombine.low %v4714_v51, %v4724_v60  ;;  %v5726_v32 = vsel %vm9024_vm9, %v5724_v53, %v5725_v20  ;;  %v6318_v9 = vsel %vm9024_vm9, %v8286_v63, %v6317_v7  ;;  %v8337_v31 = vcombine.low %v5122_v28, %v5125_v50 }
 0x253   : > { %v6321_v22 = vsel %vm9024_vm9, %v6319_v36, %v6320_v4  ;;  %v8256_v17 = vrot.slane %v5018_v58, 9  ;;  %v5114_v48 = vrot.slane %v11265_v26, 5  ;;  %v8384_v54 = vcombine.low %v5723_v19, %v5726_v32 }
 0x254   : > { %v8430_v24 = vcombine.low %v6318_v9, %v6321_v22  ;;  %v5117_v41 = vrot.slane %v11273_v49, 5  ;;  %v5715_v45 = vrot.slane %v11203_v38, 5  ;;  %v8271_v37 = vrot.slane %v5625_v25, 9 }
 0x255   : > { %6524 = vrot.lane.b32.xlu1 %v8318_v2, %s8924_s27  ;;  %v5116_v52 = vrot.slane %v5114_v48, 4  ;;  %v5364_v6 = vor.u32 %v11191_v23, %v11181_v3  ;;  %v5367_v20 = vshll.u32 %v11173_v46, 16  ;;  %v5718_v51 = vrot.slane %v11285_v55, 5 }
 0x256   : > { %6610 = vrot.lane.b32.xlu0 %v8337_v31, %s8921_s24  ;;  %v5717_v7 = vrot.slane %v5715_v45, 4  ;;  %v5373_v28 = vrot.slane %v5371_v34, 4  ;;  %v5377_v53 = vshll.u32 %v11250_v0, 16  ;;  %v5115_v63 = vsel %vm9024_vm9, %v8256_v17, %v5114_v48  ;;  %v11310_v34 = vld [vmem:[%s12908_s2] ss:$0 sm:$0xff] }
 0x257   : > { %v5118_v58 = vsel %vm9024_vm9, %v5116_v52, %v5117_v41  ;;  %v5369_v60 = vrot.slane %v5367_v20, 5  ;;  %v5949_v3 = vor.u32 %v11198_v35, %v11194_v18  ;;  %v8710_v23 = vpop.f32.mrb[12].mxu0  ;;  %v5716_v36 = vsel %vm9024_vm9, %v8271_v37, %v5715_v45  ;;  %v385_v20 = vld [vmem:[#allocation3 + $0x78] sm:$0x1] }
 0x258   : > { %v8336_v50 = vcombine.low %v5115_v63, %v5118_v58  ;;  %v5365_v4 = vrot.slane %v5364_v6, 4  ;;  %v5952_v46 = vshll.u32 %v11175_v57, 16  ;;  %v3950_v0 = vadd.f32 %v11310_v34, %v8710_v23  ;;  %v3941_v2 = vpop.f32.mrb[13].mxu0 }
 0x259   : > { %6864 = vrot.lane.b32.xlu1 %v8384_v54, %s8925_s28  ;;  %v5719_v18 = vsel %vm9024_vm9, %v5717_v7, %v5718_v51  ;;  %v5374_v35 = vor.u32 %v5373_v28, %v5369_v60  ;;  %v5379_v19 = vrot.slane %v5377_v53, 5  ;;  %v3942_v32 = vadd.f32 %v11310_v34, %v3941_v2  ;;  %v8711_v9 = vpop.f32.mrb[14].mxu0 }
 0x25a   : > { %7116 = vrot.lane.b32.xlu0 %v8430_v24, %s8926_s29  ;;  %v11318_v25 = vrot.slane %v5949_v3, 4  ;;  %v11320_v31 = vrot.slane %v5952_v46, 5  ;;  %v5958_v22 = vrot.slane %v5956_v43, 4  ;;  %v4034_v17 = vmax.f32 %v3950_v0, 0.0  ;;  %v3944_v54 = vpop.f32.mrb[15].mxu0 }
 0x25b   : > { %v3953_v48 = vadd.f32 %v11310_v34, %v8711_v9  ;;  %v5375_v41 = vrot.slane %v5374_v35, 4  ;;  %v5962_v45 = vshll.u32 %v11225_v13, 16  ;;  %v4032_v52 = vmax.f32 %v3942_v32, 0.0 }
 0x25c   : > { %v3945_v37 = vadd.f32 %v11310_v34, %v3944_v54  ;;  %v8383_v6 = vcombine.low %v5716_v36, %v5719_v18  ;;  %v5959_v24 = vor.u32 %v5958_v22, %v11320_v31  ;;  %v8515_v7 = vpack.c.bf16 %v4034_v17, %v4034_v17  ;;  %v439_v18 = vld [vmem:[#allocation3 + $0x80] sm:$0x1]  ;;  %v436_v22 = vld [vmem:[#allocation3 + $0x74] sm:$0x1] }
 0x25d   : > { %v4035_v51 = vmax.f32 %v3953_v48, 0.0  ;;  %6608 = vrot.lane.b32.xlu1 %v8336_v50, %s8921_s24  ;;  %v5370_v57 = vsel %vm9111_vm14, %v5365_v4, %v5369_v60  ;;  %v5380_v43 = vsel %vm9111_vm14, %v5375_v41, %v5379_v19  ;;  %v8513_v28 = vpack.c.bf16 %v4032_v52, %v4032_v52  ;;  %v382_v50 = vld [vmem:[#allocation3 + $0x6c] sm:$0x1]  ;;  %v4518_v4 = vld [vmem:[#allocation3 + $0x60] sm:$0xf] }
 0x25e   : > { %v4033_v53 = vmax.f32 %v3945_v37, 0.0  ;;  %6862 = vrot.lane.b32.xlu0 %v8383_v6, %s8925_s28  ;;  %v5955_v13 = vsel %vm9111_vm14, %v11318_v25, %v11320_v31  ;;  %v11338_v63 = vrot.slane %v5962_v45, 5  ;;  %v4268_v58 = vshrl.u32 %v8515_v7, 16  ;;  %v4593_v45 = vld [vmem:[#allocation3 + $0x48] sm:$0xf] }
 0x25f   : > { %v8516_v3 = vpack.c.bf16 %v4035_v51, %v4035_v51  ;;  %v11340_v23 = vcombine.low %v5370_v57, %v5380_v43  ;;  %v386_v60 = vsel %vm8972_vm3, 0, %v385_v20  ;;  %v4271_v36 = vshll.u32 %v8515_v7, 16  ;;  %v4511_v6 = vld [vmem:[#allocation3 + $0x54] sm:$0xf]  ;;  %v4522_v57 = vld [vmem:[#allocation3 + $0x68] sm:$0x1] }
 0x260   : > { %v4251_v46 = vshrl.u32 %v8513_v28, 16  ;;  %v8514_v0 = vpack.c.bf16 %v4033_v53, %v4033_v53  ;;  %v11344_v2 = vrot.slane %v5959_v24, 4  ;;  %387 = vst [vmem:[#allocation3 + $0x78] sm:$0x1] %v386_v60  ;;  %v4270_v35 = vrot.slane %v4268_v58, 7 }
 0x261   : > { %v4254_v19 = vshll.u32 %v8513_v28, 16  ;;  %v4276_v32 = vshrl.u32 %v8516_v3, 16  ;;  %v4279_v9 = vshll.u32 %v8516_v3, 16  ;;  %v383_v41 = vsel %vm8972_vm3, 0, %v382_v50  ;;  %v4515_v60 = vld [vmem:[#allocation3 + $0x5c] sm:$0x1] }
 0x262   : > { %v4253_v17 = vrot.slane %v4251_v46, 7  ;;  %v4259_v48 = vshrl.u32 %v8514_v0, 16  ;;  %v4262_v54 = vshll.u32 %v8514_v0, 16  ;;  %v4273_v52 = vor.u32 %v4271_v36, %v4270_v35  ;;  %384 = vst [vmem:[#allocation3 + $0x6c] sm:$0x1] %v383_v41 }
 0x263   : > { %v4274_v37 = vrot.slane %v4270_v35, 4  ;;  %v4278_v20 = vrot.slane %v4276_v32, 7  ;;  %v440_v24 = vsel %vm8995_vm5, 0, %v439_v18  ;;  %v437_v28 = vsel %vm8995_vm5, 0, %v436_v22 }
 0x264   : > { %v4256_v7 = vor.u32 %v4254_v19, %v4253_v17  ;;  %v4257_v51 = vrot.slane %v4253_v17, 4  ;;  %v4261_v43 = vrot.slane %v4259_v48, 7  ;;  %441 = vst [vmem:[#allocation3 + $0x80] sm:$0x1] %v440_v24  ;;  %v4519_v53 = vsel %vm9030_vm10, %v4273_v52, %v4518_v4  ;;  %438 = vst [vmem:[#allocation3 + $0x74] sm:$0x1] %v437_v28  ;;  %v6599_v28 = vpop.permute.xlu0 %6598 }
 0x265   : > { %v4281_v58 = vor.u32 %v4279_v9, %v4278_v20  ;;  %v4283_v3 = vrot.slane %v4278_v20, 4  ;;  %v4774_v50 = vshrl.u32 %v4593_v45, 16  ;;  %4520 = vst [vmem:[#allocation3 + $0x60] sm:$0xf] %v4519_v53  ;;  %v4777_v18 = vshll.u32 %v4593_v45, 16 }
 0x266   : > { %v4512_v36 = vsel %vm9030_vm10, %v4256_v7, %v4511_v6  ;;  %v4264_v46 = vor.u32 %v4262_v54, %v4261_v43  ;;  %v4266_v0 = vrot.slane %v4261_v43, 4  ;;  %v4783_v32 = vshll.u32 %v11238_v44, 16 }
 0x267   : > { %4513 = vst [vmem:[#allocation3 + $0x54] sm:$0xf] %v4512_v36  ;;  %v4282_v35 = vsel %vm9036_vm11, %v4274_v37, %v4281_v58  ;;  %v4523_v19 = vsel %vm8972_vm3, %v4283_v3, %v4522_v57  ;;  %v4776_v4 = vrot.slane %v4774_v50, 4  ;;  %v4779_v17 = vrot.slane %v4777_v18, 5 }
 0x268   : > { %4521 = vst.msk [vmem:[#allocation3 + $0x64] sm:$0xf] %vm226_vm0, %v4282_v35  ;;  %4524 = vst [vmem:[#allocation3 + $0x68] sm:$0x1] %v4523_v19  ;;  %v4265_v9 = vsel %vm9036_vm11, %v4257_v51, %v4264_v46  ;;  %v4516_v22 = vsel %vm8972_vm3, %v4266_v0, %v4515_v60  ;;  %v4787_v48 = vshrl.u32 %v11238_v44, 16  ;;  %v11368_v54 = vrot.slane %v4783_v32, 5 }
 0x269   : > { %4514 = vst.msk [vmem:[#allocation3 + $0x58] sm:$0xf] %vm226_vm0, %v4265_v9  ;;  %4517 = vst [vmem:[#allocation3 + $0x5c] sm:$0x1] %v4516_v22  ;;  %v4793_v41 = vshll.u32 %v11246_v15, 16  ;;  %v5340_v45 = vor.u32 %v11228_v11, %v11210_v21  ;;  %v5343_v52 = vshll.u32 %v11203_v38, 16  ;;  %v5965_v37 = vsel %vm9111_vm14, %v11344_v2, %v11338_v63 }
 0x26a   : > { %v4780_v6 = vor.u32 %v4779_v17, %v4776_v4  ;;  %v4789_v20 = vrot.slane %v4787_v48, 4  ;;  %v5353_v44 = vshll.u32 %v11285_v55, 16  ;;  %v5349_v15 = vrot.slane %v5347_v56, 4  ;;  %v8849_v11 = vld [vmem:[%s12909_s3] sm:$0xff]   ;;  %v8850_v4 = vld [vmem:[%s12909_s3 + $0x8] sm:$0xff]  }
 0x26b   : > { %v11379_v24 = vrot.slane %v5340_v45, 4  ;;  %v11381_v7 = vrot.slane %v5343_v52, 5  ;;  %v5925_v21 = vor.u32 %v11208_v40, %v11206_v10  ;;  %v11392_v63 = vrot.slane %v4793_v41, 5  ;;  %8728 = vmatprep.subr.bf16.mxu1 %v8849_v11 }
 0x26c   : > { %v11390_v51 = vrot.slane %v4780_v6, 4  ;;  %v11394_v2 = vrot.slane %v5353_v44, 5  ;;  %v5928_v55 = vshll.u32 %v11184_v27, 16  ;;  %v5203_v57 = vld [vmem:[#allocation3 + $0x60] sm:$0xf]  ;;  %v8415_v38 = vcombine.low %v5955_v13, %v5965_v37  ;;  %8729 = vmatpush3.bf16.msra.mxu1 %v8849_v11 }
 0x26d   : > { %v5810_v43 = vld [vmem:[#allocation3 + $0x60] sm:$0xf]  ;;  %v4790_v10 = vor.u32 %v4789_v20, %v11368_v54  ;;  %v11403_v40 = vrot.slane %v5925_v21, 4  ;;  %v11407_v56 = vrot.slane %v5932_v12, 4  ;;  %v5406_v53 = vshrl.u32 %v5203_v57, 16  ;;  %8730 = vmatprep.subr.bf16.mxu1 %v8850_v4 }
 0x26e   : > { %v5409_v58 = vshll.u32 %v5203_v57, 16  ;;  %v5991_v3 = vshrl.u32 %v5810_v43, 16  ;;  %v5994_v60 = vshll.u32 %v5810_v43, 16  ;;  %v11409_v50 = vld [vmem:[#allocation3 + $0x54] sm:$0xf]  ;;  %v5346_v27 = vsel %vm9111_vm14, %v11379_v24, %v11381_v7 }
 0x26f   : > { %v11411_v36 = vld [vmem:[#allocation3 + $0x64] sm:$0xf]  ;;  %v5967_v31 = vshrl.u32 %v11409_v50, 16  ;;  %v5970_v13 = vshll.u32 %v11409_v50, 16  ;;  %v5350_v12 = vor.u32 %v5349_v15, %v11381_v7  ;;  %v11422_v46 = vrot.slane %v5406_v53, 4  ;;  %v11462_v7 = vpop.permute.xlu0 %6950 }
 0x270   : > { %v11413_v25 = vld [vmem:[#allocation3 + $0x64] sm:$0xf]  ;;  %v8354_v0 = vcombine.low %v5203_v57, %v11411_v36  ;;  %v11425_v18 = vld [vmem:[#allocation3 + $0x58] sm:$0xf]  ;;  %v4786_v35 = vsel %vm9111_vm14, %v11390_v51, %v11368_v54  ;;  %v11433_v19 = vsel %vm3548_vm1, %v11171_v42, %v6599_v28  ;;  %v11438_v32 = vrot.slane %v5409_v58, 5  ;;  %8731 = vmatpush3.bf16.msra.mxu1 %v8850_v4 }
 0x271   : > { %v11441_v22 = vrot.slane %v5991_v3, 4  ;;  %v8401_v17 = vcombine.low %v5810_v43, %v11413_v25  ;;  %v11444_v48 = vld [vmem:[#allocation3 + $0x54] sm:$0xf]  ;;  %v11447_v54 = vrot.slane %v5994_v60, 5  ;;  %v8400_v45 = vcombine.low %v11409_v50, %v11425_v18  ;;  %v11453_v52 = vld [vmem:[#allocation3 + $0x58] sm:$0xf] }
 0x272   : > { %6708 = vrot.lane.b32.xlu1 %v8354_v0, %s8922_s25  ;;  %v8714_v37 = vpop.f32.mrb[16].mxu0  ;;  %v11456_v6 = vrot.slane %v5967_v31, 4  ;;  %v11458_v20 = vrot.slane %v5970_v13, 5  ;;  %v5382_v44 = vshrl.u32 %v11444_v48, 16  ;;  %v5385_v24 = vshll.u32 %v11444_v48, 16  ;;  %v8851_v4 = vld [vmem:[%s12909_s3 + $0x10] sm:$0xff]  }
 0x273   : > { %6962 = vrot.lane.b32.xlu0 %v8401_v17, %s8923_s26  ;;  %v3966_v15 = vadd.f32 %v11310_v34, %v8714_v37  ;;  %v3957_v21 = vpop.f32.mrb[17].mxu0  ;;  %v4791_v11 = vrot.slane %v4790_v10, 4  ;;  %v5351_v51 = vrot.slane %v5350_v12, 4  ;;  %v5930_v57 = vrot.slane %v5928_v55, 5  ;;  %v6236_v13 = vld [vmem:[#allocation3 + $0x60] sm:$0xe]  ;;  %8732 = vmatprep.subr.bf16.mxu1 %v8851_v4 }
 0x274   : > { %v3958_v43 = vadd.f32 %v11310_v34, %v3957_v21  ;;  %v8715_v28 = vpop.f32.mrb[18].mxu0  ;;  %v8353_v58 = vcombine.low %v11444_v48, %v11453_v52  ;;  %v5938_v3 = vshll.u32 %v11257_v59, 16  ;;  %8733 = vmatpush3.bf16.msra.mxu1 %v8851_v4  ;;  %vm12940_vm7 = vcmask 1043456   ;;  %v5627_v14 = vld [vmem:[#allocation3 + $0x54] sm:$0xe] }
 0x275   : > { %v4038_v60 = vmax.f32 %v3966_v15, 0.0  ;;  %v3969_v50 = vadd.f32 %v11310_v34, %v8715_v28  ;;  %v3960_v31 = vpop.f32.mrb[19].mxu0  ;;  %v4796_v55 = vsel %vm9111_vm14, %v4791_v11, %v11392_v63  ;;  %v5356_v10 = vsel %vm9111_vm14, %v5351_v51, %v11394_v2  ;;  %v11488_v51 = vpop.permute.xlu0 %6694 }
 0x276   : > { %6784 = vrot.lane.b32.xlu1 %v11340_v23, %s8927_s30  ;;  %v4036_v12 = vmax.f32 %v3958_v43, 0.0  ;;  %v3961_v59 = vadd.f32 %v11310_v34, %v3960_v31  ;;  %v8321_v0 = vcombine.low %v4786_v35, %v4796_v55  ;;  %v8367_v23 = vcombine.low %v5346_v27, %v5356_v10  ;;  %v4532_v31 = vld [vmem:[#allocation3 + $0x78] sm:$0xf] }
 0x277   : > { %7038 = vrot.lane.b32.xlu0 %v8415_v38, %s8928_s6  ;;  %v8519_v17 = vpack.c.bf16 %v4038_v60, %v4038_v60  ;;  %v4039_v37 = vmax.f32 %v3969_v50, 0.0  ;;  %v5931_v63 = vsel %vm9111_vm14, %v11403_v40, %v5930_v57  ;;  %v5935_v2 = vor.u32 %v11407_v56, %v5930_v57  ;;  %v8852_v57 = vld [vmem:[%s12909_s3 + $0x18] sm:$0xff]  }
 0x278   : > { %v8517_v15 = vpack.c.bf16 %v4036_v12, %v4036_v12  ;;  %v4037_v21 = vmax.f32 %v3961_v59, 0.0  ;;  %v5940_v38 = vrot.slane %v5938_v3, 5  ;;  %v8289_v11 = vrot.slane %v6236_v13, 9  ;;  %8734 = vmatprep.subr.bf16.mxu1 %v8852_v57 }
 0x279   : > { %v4302_v27 = vshrl.u32 %v8519_v17, 16  ;;  %v4305_v35 = vshll.u32 %v8519_v17, 16  ;;  %v8520_v43 = vpack.c.bf16 %v4039_v37, %v4039_v37  ;;  %v5936_v28 = vrot.slane %v5935_v2, 4  ;;  %v11498_v17 = vld [vmem:[#allocation3 + $0x68] sm:$0x1]  ;;  %8735 = vmatpush3.bf16.msra.mxu1 %v8852_v57 }
 0x27a   : > { %6960 = vrot.lane.b32.xlu1 %v8400_v45, %s8923_s26  ;;  %v4285_v60 = vshrl.u32 %v8517_v15, 16  ;;  %v4288_v50 = vshll.u32 %v8517_v15, 16  ;;  %v8518_v40 = vpack.c.bf16 %v4037_v21, %v4037_v21  ;;  %v6338_v56 = vrot.slane %v11413_v25, 5  ;;  %v4525_v2 = vld [vmem:[#allocation3 + $0x6c] sm:$0xf] }
 0x27b   : > { %6706 = vrot.lane.b32.xlu0 %v8353_v58, %s8922_s25  ;;  %v4304_v3 = vrot.slane %v4302_v27, 7  ;;  %v4310_v55 = vshrl.u32 %v8520_v43, 16  ;;  %v4313_v10 = vshll.u32 %v8520_v43, 16  ;;  %v5941_v45 = vsel %vm9111_vm14, %v5936_v28, %v5940_v38  ;;  %v4591_v27 = vld [vmem:[#allocation3 + $0x3c] sm:$0xf] }
 0x27c   : > { %v4287_v13 = vrot.slane %v4285_v60, 7  ;;  %v4293_v12 = vshrl.u32 %v8518_v40, 16  ;;  %v4296_v59 = vshll.u32 %v8518_v40, 16  ;;  %v8414_v4 = vcombine.low %v5931_v63, %v5941_v45  ;;  %v4536_v28 = vld [vmem:[#allocation3 + $0x80] sm:$0x1]  ;;  %v11504_v40 = vpop.permute.xlu0 %7110 }
 0x27d   : > { %v4307_v58 = vor.u32 %v4305_v35, %v4304_v3  ;;  %v4308_v37 = vrot.slane %v4304_v3, 4  ;;  %v4312_v15 = vrot.slane %v4310_v55, 7  ;;  %v6339_v21 = vsel %vm9024_vm9, %v8289_v11, %v6338_v56  ;;  %12939 = vst [vmem:[#allocation5_spill] sm:$0xff] %v11504_v40  ;;  %v8853_v11 = vld [vmem:[%s12909_s3 + $0x20] ss:$0 sps:$4 sm:$0xff]  }
 0x27e   : > { %6530 = vrot.lane.b32.xlu1 %v8321_v0, %s8924_s27  ;;  %v4290_v43 = vor.u32 %v4288_v50, %v4287_v13  ;;  %v4291_v38 = vrot.slane %v4287_v13, 4  ;;  %v4295_v60 = vrot.slane %v4293_v12, 7  ;;  %v6340_v63 = vrot.slane %v6338_v56, 4  ;;  %v4529_v0 = vld [vmem:[#allocation3 + $0x74] sm:$0x1]  ;;  %8771 = vmatprep.subr.msk.bf16.mxu1 %vm12940_vm7, %v8853_v11 }
 0x27f   : > { %6782 = vrot.lane.b32.xlu0 %v8367_v23, %s8927_s30  ;;  %v4533_v35 = vsel %vm9030_vm10, %v4307_v58, %v4532_v31  ;;  %v4315_v3 = vor.u32 %v4313_v10, %v4312_v15  ;;  %v4317_v55 = vrot.slane %v4312_v15, 4  ;;  %v6341_v45 = vrot.slane %v11498_v17, 5  ;;  %v11521_v58 = vld [vmem:[#allocation3 + $0x64] sm:$0xf]  ;;  %v5021_v15 = vld [vmem:[#allocation3 + $0x60] sm:$0xe] }
 0x280   : > { %4534 = vst [vmem:[#allocation3 + $0x78] sm:$0xf] %v4533_v35  ;;  %v4526_v50 = vsel %vm9030_vm10, %v4290_v43, %v4525_v2  ;;  %v4298_v23 = vor.u32 %v4296_v59, %v4295_v60  ;;  %v4300_v56 = vrot.slane %v4295_v60, 4  ;;  %v4750_v57 = vshrl.u32 %v4591_v27, 16  ;;  %v11549_v11 = vpop.permute.xlu0 %6602 }
 0x281   : > { %4527 = vst [vmem:[#allocation3 + $0x6c] sm:$0xf] %v4526_v50  ;;  %v4316_v31 = vsel %vm9036_vm11, %v4308_v37, %v4315_v3  ;;  %v4537_v10 = vsel %vm8972_vm3, %v4317_v55, %v4536_v28  ;;  %v6342_v13 = vsel %vm9024_vm9, %v6340_v63, %v6341_v45  ;;  %v4753_v12 = vshll.u32 %v4591_v27, 16  ;;  %v11531_v28 = vld [vmem:[#allocation3 + $0x68] sm:$0x1] }
 0x282   : > { %7036 = vrot.lane.b32.xlu1 %v8414_v4, %s8928_s6  ;;  %4535 = vst.msk [vmem:[#allocation3 + $0x7c] sm:$0xf] %vm226_vm0, %v4316_v31  ;;  %4538 = vst [vmem:[#allocation3 + $0x80] sm:$0x1] %v4537_v10  ;;  %v4299_v59 = vsel %vm9036_vm11, %v4291_v38, %v4298_v23  ;;  %v4530_v37 = vsel %vm8972_vm3, %v4300_v56, %v4529_v0  ;;  %v8433_v2 = vcombine.low %v6339_v21, %v6342_v13  ;;  %v11529_v4 = vpop.permute.xlu1 %6696  ;;  %v5628_v38 = vld [vmem:[#allocation3 + $0x60] sm:$0xe] }
 0x283   : > { %v4752_v43 = vrot.slane %v4750_v57, 4  ;;  %4528 = vst.msk [vmem:[#allocation3 + $0x70] sm:$0xf] %vm226_vm0, %v4299_v59  ;;  %4531 = vst [vmem:[#allocation3 + $0x74] sm:$0x1] %v4530_v37  ;;  %v4755_v27 = vrot.slane %v4753_v12, 5 }
 0x284   : > { %v4759_v60 = vshll.u32 %v11265_v26, 16  ;;  %v4763_v63 = vshrl.u32 %v11265_v26, 16  ;;  %v4769_v35 = vshll.u32 %v11273_v49, 16  ;;  %v11539_v3 = vrot.slane %v5382_v44, 4  ;;  %7122 = vrot.lane.b32.xlu0 %v8433_v2, %s8926_s29  ;;  %v11547_v45 = vld [vmem:[#allocation3 + $0x68] sm:$0x1] }
 0x285   : > { %v11543_v21 = vrot.slane %v5385_v24, 5  ;;  %v8259_v55 = vrot.slane %v5021_v15, 9  ;;  %v5135_v0 = vrot.slane %v11521_v58, 5  ;;  %v4756_v26 = vor.u32 %v4755_v27, %v4752_v43  ;;  %v6235_v44 = vld [vmem:[#allocation3 + $0x54] sm:$0xe] }
 0x286   : > { %v4761_v49 = vrot.slane %v4759_v60, 5  ;;  %v4765_v50 = vrot.slane %v4763_v63, 4  ;;  %v5138_v23 = vrot.slane %v11531_v28, 5  ;;  %v4771_v56 = vrot.slane %v4769_v35, 5  ;;  %v11553_v31 = vld [vmem:[#allocation3 + $0x5c] sm:$0x1]  ;;  %v11563_v60 = vpop.permute.xlu1 %6856 }
 0x287   : > { %v5137_v57 = vrot.slane %v5135_v0, 4  ;;  %v8274_v48 = vrot.slane %v5628_v38, 9  ;;  %v5736_v24 = vrot.slane %v11411_v36, 5  ;;  %v4757_v10 = vrot.slane %v4756_v26, 4  ;;  %v11558_v59 = vld [vmem:[#allocation3 + $0x58] sm:$0xf] }
 0x288   : > { %v4766_v13 = vor.u32 %v4765_v50, %v4761_v49  ;;  %v5136_v12 = vsel %vm9024_vm9, %v8259_v55, %v5135_v0  ;;  %v6331_v15 = vrot.slane %v11425_v18, 5  ;;  %v5739_v43 = vrot.slane %v11547_v45, 5  ;;  %12941 = vst [vmem:[#allocation4_spill] sm:$0xff] %v11563_v60  ;;  %v5020_v63 = vld [vmem:[#allocation3 + $0x54] sm:$0xe] }
 0x289   : > { %v5139_v37 = vsel %vm9024_vm9, %v5137_v57, %v5138_v23  ;;  %v5738_v2 = vrot.slane %v5736_v24, 4  ;;  %v8288_v27 = vrot.slane %v6235_v44, 9  ;;  %v5737_v26 = vsel %vm9024_vm9, %v8274_v48, %v5736_v24  ;;  %v11574_v57 = vld [vmem:[#allocation3 + $0x5c] sm:$0x1] }
 0x28a   : > { %v4767_v35 = vrot.slane %v4766_v13, 4  ;;  %v8339_v38 = vcombine.low %v5136_v12, %v5139_v37  ;;  %v6334_v55 = vrot.slane %v11553_v31, 5  ;;  %v4762_v0 = vsel %vm9111_vm14, %v4757_v10, %v4761_v49  ;;  %v11576_v13 = vpop.permute.xlu0 %6854  ;;  %v11587_v12 = vld [vmem:[#allocation3 + $0x5c] sm:$0x1] }
 0x28b   : > { %v5740_v50 = vsel %vm9024_vm9, %v5738_v2, %v5739_v43  ;;  %v6332_v23 = vsel %vm9024_vm9, %v8288_v27, %v6331_v15  ;;  %v6333_v44 = vrot.slane %v6331_v15, 4  ;;  %v11584_v49 = vsel %vm3581_vm2, %v11433_v19, %v11488_v51  ;;  %v11589_v15 = vld [vmem:[#allocation3 + $0x78] sm:$0xf]  ;;  %v11617_v9 = vld [vmem:[#allocation3 + $0x7c] sm:$0xf] }
 0x28c   : > { %v4772_v48 = vsel %vm9111_vm14, %v4767_v35, %v4771_v56  ;;  %6614 = vrot.lane.b32.xlu0 %v8339_v38, %s8921_s24  ;;  %v8258_v24 = vrot.slane %v5020_v63, 9  ;;  %v5128_v10 = vrot.slane %v11558_v59, 5  ;;  %v8386_v2 = vcombine.low %v5737_v26, %v5740_v50  ;;  %v5814_v27 = vld [vmem:[#allocation3 + $0x78] sm:$0xf]  ;;  %v11595_v63 = vld [vmem:[#allocation3 + $0x7c] sm:$0xf] }
 0x28d   : > { %v8320_v37 = vcombine.low %v4762_v0, %v4772_v48  ;;  %v6335_v43 = vsel %vm9024_vm9, %v6333_v44, %v6334_v55  ;;  %v5729_v56 = vrot.slane %v11453_v52, 5  ;;  %v5131_v19 = vrot.slane %v11574_v57, 5  ;;  %v11599_v0 = vpop.permute.xlu1 %6600 }
 0x28e   : > { %v8432_v35 = vcombine.low %v6332_v23, %v6335_v43  ;;  %v5130_v38 = vrot.slane %v5128_v10, 4  ;;  %v8273_v51 = vrot.slane %v5627_v14, 9  ;;  %v5732_v41 = vrot.slane %v11587_v12, 5  ;;  %v11603_v50 = vpop.permute.xlu0 %6954 }
 0x28f   : > { %6528 = vrot.lane.b32.xlu1 %v8320_v37, %s8924_s27  ;;  %v5731_v5 = vrot.slane %v5729_v56, 4  ;;  %v5454_v26 = vshrl.u32 %v11589_v15, 16  ;;  %v5457_v55 = vshll.u32 %v11589_v15, 16  ;;  %12942 = vst [vmem:[#allocation6_spill] sm:$0xff] %v11603_v50  ;;  %v5129_v14 = vsel %vm9024_vm9, %v8258_v24, %v5128_v10  ;;  %v8718_v37 = vpop.f32.mrb[20].mxu0 }
 0x290   : > { %7120 = vrot.lane.b32.xlu0 %v8432_v35, %s8926_s29  ;;  %v5132_v23 = vsel %vm9024_vm9, %v5130_v38, %v5131_v19  ;;  %v5730_v44 = vsel %vm9024_vm9, %v8273_v51, %v5729_v56  ;;  %v6039_v48 = vshrl.u32 %v5814_v27, 16  ;;  %v8356_v42 = vcombine.low %v11589_v15, %v11595_v63  ;;  %v3973_v24 = vpop.f32.mrb[21].mxu0  ;;  %v388_v50 = vld [vmem:[#allocation3 + $0x84] sm:$0x1] }
 0x291   : > { %v8338_v43 = vcombine.low %v5129_v14, %v5132_v23  ;;  %v5733_v53 = vsel %vm9024_vm9, %v5731_v5, %v5732_v41  ;;  %v11619_v60 = vrot.slane %v5454_v26, 4  ;;  %v11621_v38 = vrot.slane %v5457_v55, 5  ;;  %v8719_v19 = vpop.f32.mrb[22].mxu0  ;;  %v391_v23 = vld [vmem:[#allocation3 + $0x90] sm:$0x1]  ;;  %v11633_v26 = vpop.permute.xlu1 %6700 }
 0x292   : > { %v8385_v10 = vcombine.low %v5730_v44, %v5733_v53  ;;  %v11623_v56 = vrot.slane %v6039_v48, 4  ;;  %v6042_v51 = vshll.u32 %v5814_v27, 16  ;;  %v5412_v5 = vor.u32 %v11438_v32, %v11422_v46  ;;  %v11631_v53 = vpop.f32.mrb[23].mxu0  ;;  %12944 = vst [vmem:[#allocation7_spill] sm:$0xff] %v11633_v26  ;;  %v11644_v26 = vpop.permute.xlu0 %7030 }
 0x293   : > { %6868 = vrot.lane.b32.xlu1 %v8386_v2, %s8925_s28  ;;  %v5415_v41 = vshll.u32 %v11411_v36, 16  ;;  %v12943_v15 = vshrl.u32 %v11411_v36, 16  ;;  %v8403_v55 = vcombine.low %v5814_v27, %v11617_v9  ;;  %v5425_v2 = vshll.u32 %v11547_v45, 16 }
 0x294   : > { %6866 = vrot.lane.b32.xlu0 %v8385_v10, %s8925_s28  ;;  %v5997_v44 = vor.u32 %v11447_v54, %v11441_v22  ;;  %v6000_v46 = vshll.u32 %v11413_v25, 16  ;;  %v5413_v32 = vrot.slane %v5412_v5, 4  ;;  %v12945_v36 = vshrl.u32 %v11413_v25, 16 }
 0x295   : > { %v5421_v14 = vrot.slane %v12943_v15, 4  ;;  %v5417_v48 = vrot.slane %v5415_v41, 5  ;;  %v6010_v35 = vshll.u32 %v11498_v17, 16  ;;  %v392_v45 = vsel %vm8972_vm3, 0, %v391_v23  ;;  %v11653_v17 = vld [vmem:[#allocation3 + $0x6c] sm:$0xf] }
 0x296   : > { %v6006_v15 = vrot.slane %v12945_v36, 4  ;;  %v5998_v27 = vrot.slane %v5997_v44, 4  ;;  %v6002_v40 = vrot.slane %v6000_v46, 5  ;;  %v11650_v22 = vrot.slane %v6042_v51, 5  ;;  %393 = vst [vmem:[#allocation3 + $0x90] sm:$0x1] %v392_v45 }
 0x297   : > { %6612 = vrot.lane.b32.xlu1 %v8338_v43, %s8921_s24  ;;  %v5422_v54 = vor.u32 %v5421_v14, %v5417_v48  ;;  %v5427_v5 = vrot.slane %v5425_v2, 5  ;;  %v3982_v25 = vadd.f32 %v11310_v34, %v8718_v37  ;;  %v5418_v41 = vsel %vm9111_vm14, %v5413_v32, %v5417_v48  ;;  %v445_v51 = vld [vmem:[#allocation3 + $0x98] sm:$0x1]  ;;  %v11663_v36 = vld [vmem:[#allocation3 + $0x70] sm:$0xf] }
 0x298   : > { %6966 = vrot.lane.b32.xlu0 %v8403_v55, %s8923_s26  ;;  %v6007_v44 = vor.u32 %v6006_v15, %v6002_v40  ;;  %v389_v23 = vsel %vm8972_vm3, 0, %v388_v50  ;;  %v3974_v43 = vadd.f32 %v11310_v34, %v3973_v24  ;;  %v6003_v14 = vsel %vm9111_vm14, %v5998_v27, %v6002_v40  ;;  %v11665_v55 = vpop.permute.xlu1 %6776  ;;  %v11675_v27 = vld [vmem:[#allocation3 + $0x6c] sm:$0xf] }
 0x299   : > { %v5423_v46 = vrot.slane %v5422_v54, 4  ;;  %v6012_v2 = vrot.slane %v6010_v35, 5  ;;  %v4042_v37 = vmax.f32 %v3982_v25, 0.0  ;;  %390 = vst [vmem:[#allocation3 + $0x84] sm:$0x1] %v389_v23  ;;  %12946 = vst [vmem:[#allocation8_spill] sm:$0xff] %v11665_v55  ;;  %v3985_v35 = vadd.f32 %v11310_v34, %v8719_v19  ;;  %v11677_v54 = vpop.permute.xlu0 %6698 }
 0x29a   : > { %v6008_v45 = vrot.slane %v6007_v44, 4  ;;  %v4040_v32 = vmax.f32 %v3974_v43, 0.0  ;;  %v6015_v48 = vshrl.u32 %v11653_v17, 16  ;;  %v6018_v50 = vshll.u32 %v11653_v17, 16  ;;  %12947 = vst [vmem:[#allocation9_spill] sm:$0xff] %v11677_v54 }
 0x29b   : > { %6712 = vrot.lane.b32.xlu1 %v8356_v42, %s8922_s25  ;;  %v5428_v24 = vsel %vm9111_vm14, %v5423_v46, %v5427_v5  ;;  %v8523_v15 = vpack.c.bf16 %v4042_v37, %v4042_v37  ;;  %v446_v40 = vsel %vm8995_vm5, 0, %v445_v51  ;;  %v8402_v42 = vcombine.low %v11653_v17, %v11663_v36  ;;  %v11686_v19 = vld [vmem:[#allocation3 + $0x70] sm:$0xf]  ;;  %v442_v37 = vld [vmem:[#allocation3 + $0x8c] sm:$0x1] }
 0x29c   : > { %v6013_v25 = vsel %vm9111_vm14, %v6008_v45, %v6012_v2  ;;  %v8521_v44 = vpack.c.bf16 %v4040_v32, %v4040_v32  ;;  %447 = vst [vmem:[#allocation3 + $0x98] sm:$0x1] %v446_v40  ;;  %v8370_v5 = vcombine.low %v5418_v41, %v5428_v24  ;;  %v11684_v51 = vrot.slane %v6015_v48, 4  ;;  %v11694_v48 = vpop.permute.xlu1 %6952 }
 0x29d   : > { %v8417_v43 = vcombine.low %v6003_v14, %v6013_v25  ;;  %v4336_v46 = vshrl.u32 %v8523_v15, 16  ;;  %v4339_v10 = vshll.u32 %v8523_v15, 16  ;;  %v4043_v54 = vmax.f32 %v3985_v35, 0.0  ;;  %v4597_v14 = vld [vmem:[#allocation3 + $0x60] sm:$0xf]  ;;  %12950 = vst [vmem:[#allocation12_spill] sm:$0xff] %v11694_v48  ;;  %v11707_v23 = vpop.permute.xlu0 %6774 }
 0x29e   : > { %12948 = vst [vmem:[#allocation10_spill] sm:$0xff] %v11684_v51  ;;  %v4319_v55 = vshrl.u32 %v8521_v44, 16  ;;  %v5430_v2 = vshrl.u32 %v11675_v27, 16  ;;  %v4322_v17 = vshll.u32 %v8521_v44, 16  ;;  %v11691_v32 = vrot.slane %v6018_v50, 5 }
 0x29f   : > { %6788 = vrot.lane.b32.xlu1 %v8370_v5, %s8927_s30  ;;  %7042 = vrot.lane.b32.xlu0 %v8417_v43, %s8928_s6  ;;  %v4338_v45 = vrot.slane %v4336_v46, 7  ;;  %v4546_v24 = vld [vmem:[#allocation3 + $0x90] sm:$0xf]  ;;  %v8524_v15 = vpack.c.bf16 %v4043_v54, %v4043_v54  ;;  %v443_v25 = vsel %vm8995_vm5, 0, %v442_v37  ;;  %v8355_v50 = vcombine.low %v11675_v27, %v11686_v19 }
 0x2a0   : > { %12949 = vst [vmem:[#allocation11_spill] sm:$0xff] %v11691_v32  ;;  %v11696_v40 = vrot.slane %v4319_v55, 7  ;;  %v4539_v43 = vld [vmem:[#allocation3 + $0x84] sm:$0xf]  ;;  %v11701_v46 = vrot.slane %v5430_v2, 4  ;;  %v3977_v44 = vadd.f32 %v11310_v34, %v11631_v53  ;;  %v4822_v2 = vshrl.u32 %v4597_v14, 16 }
 0x2a1   : > { %v4341_v5 = vor.u32 %v4339_v10, %v4338_v45  ;;  %444 = vst [vmem:[#allocation3 + $0x8c] sm:$0x1] %v443_v25  ;;  %v4342_v55 = vrot.slane %v4338_v45, 4  ;;  %v4344_v35 = vshrl.u32 %v8524_v15, 16  ;;  %v4347_v41 = vshll.u32 %v8524_v15, 16 }
 0x2a2   : > { %12951 = vst [vmem:[#allocation13_spill] sm:$0xff] %v11701_v46  ;;  %v4324_v54 = vor.u32 %v4322_v17, %v11696_v40  ;;  %v4041_v37 = vmax.f32 %v3977_v44, 0.0  ;;  %v4825_v25 = vshll.u32 %v4597_v14, 16  ;;  %v4831_v45 = vshll.u32 %v11521_v58, 16  ;;  %v11722_v46 = vpop.permute.xlu0 %7114 }
 0x2a3   : > { %v4547_v10 = vsel %vm9030_vm10, %v4341_v5, %v4546_v24  ;;  %6964 = vrot.lane.b32.xlu1 %v8402_v42, %s8923_s26  ;;  %6710 = vrot.lane.b32.xlu0 %v8355_v50, %s8922_s25  ;;  %v4346_v53 = vrot.slane %v4344_v35, 7  ;;  %v4835_v17 = vshrl.u32 %v11521_v58, 16  ;;  %v4550_v15 = vld [vmem:[#allocation3 + $0x98] sm:$0x1]  ;;  %v4824_v24 = vrot.slane %v4822_v2, 4  ;;  %v11719_v50 = vpop.permute.xlu1 %6522 }
 0x2a4   : > { %4548 = vst [vmem:[#allocation3 + $0x90] sm:$0xf] %v4547_v10  ;;  %v4540_v34 = vsel %vm9030_vm10, %v4324_v54, %v4539_v43  ;;  %v8522_v48 = vpack.c.bf16 %v4041_v37, %v4041_v37  ;;  %v4827_v5 = vrot.slane %v4825_v25, 5  ;;  %v4841_v42 = vshll.u32 %v11531_v28, 16 }
 0x2a5   : > { %4541 = vst [vmem:[#allocation3 + $0x84] sm:$0xf] %v4540_v34  ;;  %v4349_v44 = vor.u32 %v4347_v41, %v4346_v53  ;;  %v4351_v14 = vrot.slane %v4346_v53, 4  ;;  %v4833_v10 = vrot.slane %v4831_v45, 5  ;;  %v4837_v32 = vrot.slane %v4835_v17, 4 }
 0x2a6   : > { %v4325_v43 = vrot.slane %v11696_v40, 4  ;;  %v4327_v35 = vshrl.u32 %v8522_v48, 16  ;;  %v4330_v54 = vshll.u32 %v8522_v48, 16  ;;  %v4828_v51 = vor.u32 %v4827_v5, %v4824_v24 }
 0x2a7   : > { %v4350_v58 = vsel %vm9036_vm11, %v4342_v55, %v4349_v44  ;;  %v4551_v37 = vsel %vm8972_vm3, %v4351_v14, %v4550_v15  ;;  %v4838_v28 = vor.u32 %v4837_v32, %v4833_v10  ;;  %v5388_v41 = vor.u32 %v11543_v21, %v11539_v3  ;;  %v11737_v5 = vpop.permute.xlu1 %6520  ;;  %v6238_v14 = vld [vmem:[#allocation3 + $0x78] sm:$0xe] }
 0x2a8   : > { %4549 = vst.msk [vmem:[#allocation3 + $0x94] sm:$0xf] %vm226_vm0, %v4350_v58  ;;  %4552 = vst [vmem:[#allocation3 + $0x98] sm:$0x1] %v4551_v37  ;;  %v4329_v2 = vrot.slane %v4327_v35, 7  ;;  %v4829_v40 = vrot.slane %v4828_v51, 4  ;;  %v5973_v32 = vor.u32 %v11458_v20, %v11456_v6  ;;  %v11750_v37 = vpop.permute.xlu0 %6606 }
 0x2a9   : > { %v4843_v25 = vrot.slane %v4841_v42, 5  ;;  %v5391_v48 = vshll.u32 %v11453_v52, 16  ;;  %v4543_v34 = vld [vmem:[#allocation3 + $0x8c] sm:$0x1]  ;;  %v4839_v53 = vrot.slane %v4838_v28, 4  ;;  %v12952_v45 = vshrl.u32 %v11453_v52, 16 }
 0x2aa   : > { %v5401_v17 = vshll.u32 %v11587_v12, 16  ;;  %v4332_v15 = vor.u32 %v4330_v54, %v4329_v2  ;;  %v4334_v3 = vrot.slane %v4329_v2, 4  ;;  %v5389_v21 = vrot.slane %v5388_v41, 4  ;;  %v4595_v12 = vld [vmem:[#allocation3 + $0x54] sm:$0xf] }
 0x2ab   : > { %v5397_v55 = vrot.slane %v12952_v45, 4  ;;  %v5393_v24 = vrot.slane %v5391_v48, 5  ;;  %v4834_v51 = vsel %vm9111_vm14, %v4829_v40, %v4833_v10  ;;  %v4844_v42 = vsel %vm9111_vm14, %v4839_v53, %v4843_v25  ;;  %v11748_v58 = vld [vmem:[#allocation3 + $0x80] sm:$0x1] }
 0x2ac   : > { %v5974_v44 = vrot.slane %v5973_v32, 4  ;;  %v5976_v52 = vshll.u32 %v11425_v18, 16  ;;  %v4333_v6 = vsel %vm9036_vm11, %v4325_v43, %v4332_v15  ;;  %v4544_v20 = vsel %vm8972_vm3, %v4334_v3, %v4543_v34  ;;  %v11763_v3 = vpop.permute.xlu1 %6860 }
 0x2ad   : > { %v8323_v35 = vcombine.low %v4834_v51, %v4844_v42  ;;  %v5403_v54 = vrot.slane %v5401_v17, 5  ;;  %4542 = vst.msk [vmem:[#allocation3 + $0x88] sm:$0xf] %vm226_vm0, %v4333_v6  ;;  %4545 = vst [vmem:[#allocation3 + $0x8c] sm:$0x1] %v4544_v20  ;;  %v5398_v10 = vor.u32 %v5397_v55, %v5393_v24  ;;  %v12953_v41 = vshrl.u32 %v11425_v18, 16 }
 0x2ae   : > { %v5978_v28 = vrot.slane %v5976_v52, 5  ;;  %v5986_v40 = vshll.u32 %v11553_v31, 16  ;;  %v5394_v43 = vsel %vm9111_vm14, %v5389_v21, %v5393_v24  ;;  %v8291_v25 = vrot.slane %v6238_v14, 9  ;;  %12954 = vst [vmem:[#allocation14_spill] sm:$0xff] %v11763_v3  ;;  %v11772_v20 = vld [vmem:[#allocation3 + $0x7c] sm:$0xf] }
 0x2af   : > { %v5982_v2 = vrot.slane %v12953_v41, 4  ;;  %6534 = vrot.lane.b32.xlu1 %v8323_v35, %s8924_s27  ;;  %v6352_v48 = vrot.slane %v11617_v9, 5  ;;  %v4798_v34 = vshrl.u32 %v4595_v12, 16  ;;  %v5399_v53 = vrot.slane %v5398_v10, 4  ;;  %v11774_v35 = vpop.permute.xlu0 %7112  ;;  %v11780_v41 = vld [vmem:[#allocation3 + $0x80] sm:$0x1] }
 0x2b0   : > { %v5979_v45 = vsel %vm9111_vm14, %v5974_v44, %v5978_v28  ;;  %v6355_v17 = vrot.slane %v11748_v58, 5  ;;  %v5988_v18 = vrot.slane %v5986_v40, 5  ;;  %v4801_v31 = vshll.u32 %v4595_v12, 16  ;;  %v5023_v12 = vld [vmem:[#allocation3 + $0x78] sm:$0xe] }
 0x2b1   : > { %v5983_v55 = vor.u32 %v5982_v2, %v5978_v28  ;;  %v6354_v32 = vrot.slane %v6352_v48, 4  ;;  %v4800_v15 = vrot.slane %v4798_v34, 4  ;;  %v5404_v21 = vsel %vm9111_vm14, %v5399_v53, %v5403_v54  ;;  %v5630_v2 = vld [vmem:[#allocation3 + $0x78] sm:$0xe] }
 0x2b2   : > { %v4807_v51 = vshll.u32 %v11558_v59, 16  ;;  %v4811_v42 = vshrl.u32 %v11558_v59, 16  ;;  %v8369_v52 = vcombine.low %v5394_v43, %v5404_v21  ;;  %v4803_v14 = vrot.slane %v4801_v31, 5 }
 0x2b3   : > { %v5984_v24 = vrot.slane %v5983_v55, 4  ;;  %v6356_v44 = vsel %vm9024_vm9, %v6354_v32, %v6355_v17  ;;  %v4817_v6 = vshll.u32 %v11574_v57, 16  ;;  %v6353_v10 = vsel %vm9024_vm9, %v8291_v25, %v6352_v48  ;;  %v11787_v55 = vld [vmem:[#allocation3 + $0x80] sm:$0x1]  ;;  %v6237_v48 = vld [vmem:[#allocation3 + $0x6c] sm:$0xe] }
 0x2b4   : > { %v4809_v28 = vrot.slane %v4807_v51, 5  ;;  %v4813_v59 = vrot.slane %v4811_v42, 4  ;;  %v12955_v40 = vshll.u32 %v11675_v27, 16  ;;  %6786 = vrot.lane.b32.xlu0 %v8369_v52, %s8927_s30  ;;  %v8435_v34 = vcombine.low %v6353_v10, %v6356_v44  ;;  %v11793_v51 = vld [vmem:[#allocation3 + $0x74] sm:$0x1] }
 0x2b5   : > { %v5989_v54 = vsel %vm9111_vm14, %v5984_v24, %v5988_v18  ;;  %v4804_v53 = vor.u32 %v4803_v14, %v4800_v15  ;;  %v4819_v18 = vrot.slane %v4817_v6, 5  ;;  %v8261_v32 = vrot.slane %v5023_v12, 9  ;;  %v11804_v10 = vld [vmem:[#allocation3 + $0x70] sm:$0xf] }
 0x2b6   : > { %v11784_v43 = vrot.slane %v12955_v40, 5  ;;  %v8416_v57 = vcombine.low %v5979_v45, %v5989_v54  ;;  %v4814_v17 = vor.u32 %v4813_v59, %v4809_v28  ;;  %v5149_v25 = vrot.slane %v11772_v20, 5  ;;  %v11795_v45 = vpop.permute.xlu1 %6604  ;;  %v5022_v59 = vld [vmem:[#allocation3 + $0x6c] sm:$0xe] }
 0x2b7   : > { %v4805_v31 = vrot.slane %v4804_v53, 4  ;;  %v5152_v27 = vrot.slane %v11780_v41, 5  ;;  %v8276_v21 = vrot.slane %v5630_v2, 9  ;;  %v5750_v24 = vrot.slane %v11595_v63, 5  ;;  %12956 = vst [vmem:[#allocation15_spill] sm:$0xff] %v11795_v45  ;;  %v11806_v2 = vpop.permute.xlu0 %6858 }
 0x2b8   : > { %7040 = vrot.lane.b32.xlu1 %v8416_v57, %s8928_s6  ;;  %v4815_v15 = vrot.slane %v4814_v17, 4  ;;  %v5151_v42 = vrot.slane %v5149_v25, 4  ;;  %v5753_v52 = vrot.slane %v11787_v55, 5  ;;  %v6345_v44 = vrot.slane %v11663_v36, 5  ;;  %7126 = vrot.lane.b32.xlu0 %v8435_v34, %s8926_s29  ;;  %v5629_v17 = vld [vmem:[#allocation3 + $0x6c] sm:$0xe] }
 0x2b9   : > { %v4810_v14 = vsel %vm9111_vm14, %v4805_v31, %v4809_v28  ;;  %v5150_v6 = vsel %vm9024_vm9, %v8261_v32, %v5149_v25  ;;  %v5752_v12 = vrot.slane %v5750_v24, 4  ;;  %v8290_v54 = vrot.slane %v6237_v48, 9  ;;  %v11813_v28 = vld [vmem:[#allocation3 + $0x74] sm:$0x1] }
 0x2ba   : > { %v4820_v40 = vsel %vm9111_vm14, %v4815_v15, %v4819_v18  ;;  %v5153_v57 = vsel %vm9024_vm9, %v5151_v42, %v5152_v27  ;;  %v6347_v34 = vrot.slane %v6345_v44, 4  ;;  %v6348_v53 = vrot.slane %v11793_v51, 5  ;;  %v11819_v3 = vpop.permute.xlu1 %6704  ;;  %v11826_v45 = vld [vmem:[#allocation3 + $0x74] sm:$0x1] }
 0x2bb   : > { %v8322_v32 = vcombine.low %v4810_v14, %v4820_v40  ;;  %v8341_v25 = vcombine.low %v5150_v6, %v5153_v57  ;;  %v5751_v48 = vsel %vm9024_vm9, %v8276_v21, %v5750_v24  ;;  %v5754_v31 = vsel %vm9024_vm9, %v5752_v12, %v5753_v52  ;;  %12957 = vst [vmem:[#allocation16_spill] sm:$0xff] %v11819_v3  ;;  %v11832_v6 = vld [vmem:[#allocation3 + $0x90] sm:$0xf]  ;;  %v11842_v57 = vld [vmem:[#allocation3 + $0x94] sm:$0xf] }
 0x2bc   : > { %v6346_v18 = vsel %vm9024_vm9, %v8290_v54, %v6345_v44  ;;  %v6349_v27 = vsel %vm9024_vm9, %v6347_v34, %v6348_v53  ;;  %v8260_v15 = vrot.slane %v5022_v59, 9  ;;  %v5142_v42 = vrot.slane %v11804_v10, 5  ;;  %v5818_v34 = vld [vmem:[#allocation3 + $0x90] sm:$0xf] }
 0x2bd   : > { %6532 = vrot.lane.b32.xlu1 %v8322_v32, %s8924_s27  ;;  %6618 = vrot.lane.b32.xlu0 %v8341_v25, %s8921_s24  ;;  %v8388_v21 = vcombine.low %v5751_v48, %v5754_v31  ;;  %v5145_v24 = vrot.slane %v11813_v28, 5  ;;  %v8275_v52 = vrot.slane %v5629_v17, 9  ;;  %v5743_v14 = vrot.slane %v11686_v19, 5  ;;  %v11849_v48 = vpop.permute.xlu0 %6958 }
 0x2be   : > { %v8434_v44 = vcombine.low %v6346_v18, %v6349_v27  ;;  %v5144_v12 = vrot.slane %v5142_v42, 4  ;;  %v12958_v54 = vcombine.low %v10926_v47, %v10860_v16  ;;  %v7255_v40 = vsel %vm3614_vm4, %v11584_v49, %v11707_v23 }
 0x2bf   : > { %v5143_v53 = vsel %vm9024_vm9, %v8260_v15, %v5142_v42  ;;  %v5744_v17 = vsel %vm9024_vm9, %v8275_v52, %v5743_v14  ;;  %v5745_v32 = vrot.slane %v5743_v14, 4  ;;  %v5746_v25 = vrot.slane %v11826_v45, 5 }
 0x2c0   : > { %v7150_v59 = vsel %vm3499_vm15, %v12958_v54, %v11719_v50  ;;  %v5146_v16 = vsel %vm9024_vm9, %v5144_v12, %v5145_v24  ;;  %v5502_v49 = vshrl.u32 %v11832_v6, 16  ;;  %v5505_v23 = vshll.u32 %v11832_v6, 16  ;;  %v8722_v50 = vpop.f32.mrb[24].mxu0  ;;  %v11869_v24 = vpop.permute.xlu1 %6780 }
 0x2c1   : > { %v11855_v47 = vsel %vm3548_vm1, %v7150_v59, %v11549_v11  ;;  %6872 = vrot.lane.b32.xlu1 %v8388_v21, %s8925_s28  ;;  %7124 = vrot.lane.b32.xlu0 %v8434_v44, %s8926_s29  ;;  %v5747_v31 = vsel %vm9024_vm9, %v5745_v32, %v5746_v25  ;;  %v7287_v18 = vsel %vm3647_vm6, %v7255_v40, %v11576_v13  ;;  %v11867_v11 = vld [vmem:[#allocation3 + $0x94] sm:$0xf]  ;;  %v6087_v15 = vshrl.u32 %v5818_v34, 16  ;;  %v3989_v42 = vpop.f32.mrb[25].mxu0 }
 0x2c2   : > { %v8358_v27 = vcombine.low %v11832_v6, %v11842_v57  ;;  %12959 = vst [vmem:[#allocation17_spill] sm:$0xff] %v11869_v24  ;;  %v8340_v52 = vcombine.low %v5143_v53, %v5146_v16  ;;  %v8387_v14 = vcombine.low %v5744_v17, %v5747_v31  ;;  %v11871_v21 = vrot.slane %v5502_v49, 4  ;;  %v11874_v12 = vpop.f32.mrb[26].mxu0 }
 0x2c3   : > { %v11876_v54 = vrot.slane %v5505_v23, 5  ;;  %v11878_v13 = vrot.slane %v6087_v15, 4  ;;  %v6090_v59 = vshll.u32 %v5818_v34, 16  ;;  %v12960_v6 = vcombine.low %v10990_v30, %v10848_v61  ;;  %v11885_v32 = vpop.f32.mrb[27].mxu0  ;;  %v11901_v23 = vpop.permute.xlu0 %7034 }
 0x2c4   : > { %v8405_v17 = vcombine.low %v5818_v34, %v11867_v11  ;;  %v5460_v25 = vor.u32 %v11621_v38, %v11619_v60  ;;  %v5463_v16 = vshll.u32 %v11595_v63, 16  ;;  %v12961_v30 = vshrl.u32 %v11595_v63, 16 }
 0x2c5   : > { %v7147_v40 = vsel %vm3499_vm15, %v12960_v6, %v11737_v5  ;;  %6616 = vrot.lane.b32.xlu1 %v8340_v52, %s8921_s24  ;;  %6870 = vrot.lane.b32.xlu0 %v8387_v14, %s8925_s28  ;;  %v5473_v49 = vshll.u32 %v11787_v55, 16  ;;  %v6045_v34 = vor.u32 %v11650_v22, %v11623_v56  ;;  %v6048_v31 = vshll.u32 %v11617_v9, 16  ;;  %v397_v14 = vld [vmem:[#allocation3 + $0xa8] sm:$0x1]  ;;  %v11911_v56 = vpop.permute.xlu1 %6956 }
 0x2c6   : > { %v7193_v61 = vsel %vm3548_vm1, %v7147_v40, %v11599_v0  ;;  %v5469_v5 = vrot.slane %v12961_v30, 4  ;;  %v5461_v60 = vrot.slane %v5460_v25, 4  ;;  %v5465_v38 = vrot.slane %v5463_v16, 5  ;;  %v394_v40 = vld [vmem:[#allocation3 + $0x9c] sm:$0x1]  ;;  %12963 = vst [vmem:[#allocation18_spill] sm:$0xff] %v11911_v56 }
 0x2c7   : > { %v12962_v15 = vshrl.u32 %v11617_v9, 16  ;;  %v11906_v6 = vrot.slane %v6090_v59, 5  ;;  %v6046_v0 = vrot.slane %v6045_v34, 4  ;;  %v6058_v63 = vshll.u32 %v11748_v58, 16  ;;  %v12964_v59 = vld [vmem:[#allocation5_spill] sm:$0xff] }
 0x2c8   : > { %v7319_v55 = vsel %vm3680_vm8, %v7287_v18, %v11462_v7  ;;  %v11915_v22 = vsel %vm3581_vm2, %v7193_v61, %v11529_v4  ;;  %v5470_v25 = vor.u32 %v5469_v5, %v5465_v38  ;;  %v6050_v16 = vrot.slane %v6048_v31, 5  ;;  %v11928_v4 = vld [vmem:[%s12908_s2] ss:$0 sm:$0xff] }
 0x2c9   : > { %v6054_v52 = vrot.slane %v12962_v15, 4  ;;  %v7351_v9 = vsel %vm3713_vm12, %v7319_v55, %v11644_v26  ;;  %6716 = vrot.lane.b32.xlu1 %v8358_v27, %s8922_s25  ;;  %6970 = vrot.lane.b32.xlu0 %v8405_v17, %s8923_s26  ;;  %v5475_v58 = vrot.slane %v5473_v49, 5  ;;  %v398_v18 = vsel %vm8972_vm3, 0, %v397_v14  ;;  %v11931_v30 = vld [vmem:[#allocation3 + $0x88] sm:$0xf] }
 0x2ca   : > { %v7383_v7 = vsel %vm3746_vm13, %v7351_v9, %v12964_v59  ;;  %v3998_v61 = vadd.f32 %v11928_v4, %v8722_v50  ;;  %v5466_v26 = vsel %vm9111_vm14, %v5461_v60, %v5465_v38  ;;  %v5471_v27 = vrot.slane %v5470_v25, 4  ;;  %399 = vst [vmem:[#allocation3 + $0xa8] sm:$0x1] %v398_v18  ;;  %v451_v49 = vld [vmem:[#allocation3 + $0xb0] sm:$0x1]  ;;  %v11943_v60 = vpop.permute.xlu0 %6702  ;;  %v11954_v59 = vpop.permute.xlu1 %6526 }
 0x2cb   : > { %v6055_v17 = vor.u32 %v6054_v52, %v6050_v16  ;;  %vm12965_vm7 = vcmask 588800   ;;  %v395_v5 = vsel %vm8972_vm3, 0, %v394_v40  ;;  %v6051_v34 = vsel %vm9111_vm14, %v6046_v0, %v6050_v16  ;;  %v11941_v14 = vld [vmem:[#allocation3 + $0x84] sm:$0xf]  ;;  %v11952_v9 = vld [vmem:[#allocation3 + $0x88] sm:$0xf] }
 0x2cc   : > { %8738 = vmatprep.mubr.msk.bf16.mxu1 %vm12965_vm7, %v7383_v7  ;;  %v6060_v31 = vrot.slane %v6058_v63, 5  ;;  %v4046_v15 = vmax.f32 %v3998_v61, 0.0  ;;  %396 = vst [vmem:[#allocation3 + $0x9c] sm:$0x1] %v395_v5  ;;  %v3990_v50 = vadd.f32 %v11928_v4, %v3989_v42  ;;  %v5476_v38 = vsel %vm9111_vm14, %v5471_v27, %v5475_v58  ;;  %v5209_v42 = vld [vmem:[#allocation3 + $0x84] sm:$0xf] }
 0x2cd   : > { %v6056_v52 = vrot.slane %v6055_v17, 4  ;;  %v8404_v40 = vcombine.low %v11941_v14, %v11931_v30  ;;  %v8372_v25 = vcombine.low %v5466_v26, %v5476_v38  ;;  %v452_v16 = vsel %vm8995_vm5, 0, %v451_v49  ;;  %v448_v49 = vld [vmem:[#allocation3 + $0xa4] sm:$0x1] }
 0x2ce   : > { %v8527_v0 = vpack.c.bf16 %v4046_v15, %v4046_v15  ;;  %v4044_v63 = vmax.f32 %v3990_v50, 0.0  ;;  %453 = vst [vmem:[#allocation3 + $0xb0] sm:$0x1] %v452_v16  ;;  %v4001_v61 = vadd.f32 %v11928_v4, %v11874_v12  ;;  %v5478_v50 = vshrl.u32 %v5209_v42, 16  ;;  %v4601_v12 = vld [vmem:[#allocation3 + $0x78] sm:$0xf]  ;;  %v11966_v18 = vpop.permute.xlu0 %6778 }
 0x2cf   : > { %v6061_v58 = vsel %vm9111_vm14, %v6056_v52, %v6060_v31  ;;  %6792 = vrot.lane.b32.xlu1 %v8372_v25, %s8927_s30  ;;  %v5481_v38 = vshll.u32 %v5209_v42, 16  ;;  %v8357_v44 = vcombine.low %v5209_v42, %v11952_v9  ;;  %v3993_v42 = vadd.f32 %v11928_v4, %v11885_v32 }
 0x2d0   : > { %v8419_v26 = vcombine.low %v6051_v34, %v6061_v58  ;;  %v4370_v27 = vshrl.u32 %v8527_v0, 16  ;;  %v4373_v17 = vshll.u32 %v8527_v0, 16  ;;  %v8525_v5 = vpack.c.bf16 %v4044_v63, %v4044_v63 }
 0x2d1   : > { %v4047_v15 = vmax.f32 %v4001_v61, 0.0  ;;  %v4560_v34 = vld [vmem:[#allocation3 + $0xa8] sm:$0xf]  ;;  %v11968_v0 = vrot.slane %v5478_v50, 4  ;;  %v11970_v63 = vrot.slane %v5481_v38, 5  ;;  %v449_v58 = vsel %vm8995_vm5, 0, %v448_v49 }
 0x2d2   : > { %7046 = vrot.lane.b32.xlu0 %v8419_v26, %s8928_s6  ;;  %v4372_v52 = vrot.slane %v4370_v27, 7  ;;  %v4353_v55 = vshrl.u32 %v8525_v5, 16  ;;  %v4356_v16 = vshll.u32 %v8525_v5, 16  ;;  %450 = vst [vmem:[#allocation3 + $0xa4] sm:$0x1] %v449_v58  ;;  %v11979_v27 = vpop.permute.xlu1 %7032  ;;  %v4870_v38 = vshrl.u32 %v4601_v12, 16 }
 0x2d3   : > { %v8528_v25 = vpack.c.bf16 %v4047_v15, %v4047_v15  ;;  %6968 = vrot.lane.b32.xlu1 %v8404_v40, %s8923_s26  ;;  %v4553_v5 = vld [vmem:[#allocation3 + $0x9c] sm:$0xf]  ;;  %v4873_v7 = vshll.u32 %v4601_v12, 16  ;;  %v4045_v40 = vmax.f32 %v3993_v42, 0.0  ;;  %v4879_v53 = vshll.u32 %v11772_v20, 16 }
 0x2d4   : > { %v4375_v61 = vor.u32 %v4373_v17, %v4372_v52  ;;  %v4376_v31 = vrot.slane %v4372_v52, 4  ;;  %v11974_v26 = vrot.slane %v4353_v55, 7  ;;  %v4872_v32 = vrot.slane %v4870_v38, 4 }
 0x2d5   : > { %v4378_v15 = vshrl.u32 %v8528_v25, 16  ;;  %v4381_v50 = vshll.u32 %v8528_v25, 16  ;;  %v4875_v58 = vrot.slane %v4873_v7, 5  ;;  %v4564_v12 = vld [vmem:[#allocation3 + $0xb0] sm:$0x1]  ;;  %v8526_v3 = vpack.c.bf16 %v4045_v40, %v4045_v40 }
 0x2d6   : > { %v4561_v49 = vsel %vm9030_vm10, %v4375_v61, %v4560_v34  ;;  %v4358_v17 = vor.u32 %v4356_v16, %v11974_v26  ;;  %v4359_v55 = vrot.slane %v11974_v26, 4  ;;  %6714 = vrot.lane.b32.xlu0 %v8357_v44, %s8922_s25  ;;  %v4883_v34 = vshrl.u32 %v11772_v20, 16  ;;  %v11991_v61 = vpop.permute.xlu0 %7118  ;;  %v11993_v24 = vpop.permute.xlu1 %6524 }
 0x2d7   : > { %4562 = vst [vmem:[#allocation3 + $0xa8] sm:$0xf] %v4561_v49  ;;  %v4380_v52 = vrot.slane %v4378_v15, 7  ;;  %v4889_v16 = vshll.u32 %v11780_v41, 16  ;;  %v4876_v42 = vor.u32 %v4875_v58, %v4872_v32  ;;  %v4881_v15 = vrot.slane %v4879_v53, 5 }
 0x2d8   : > { %v4554_v25 = vsel %vm9030_vm10, %v4358_v17, %v4553_v5  ;;  %v4361_v38 = vshrl.u32 %v8526_v3, 16  ;;  %v4364_v7 = vshll.u32 %v8526_v3, 16  ;;  %v4885_v49 = vrot.slane %v4883_v34, 4  ;;  %v12966_v17 = vld [vmem:[#allocation13_spill] sm:$0xff]  ;;  %v12968_v34 = vld [vmem:[#allocation10_spill] sm:$0xff] }
 0x2d9   : > { %4555 = vst [vmem:[#allocation3 + $0x9c] sm:$0xf] %v4554_v25  ;;  %v4383_v44 = vor.u32 %v4381_v50, %v4380_v52  ;;  %v4385_v26 = vrot.slane %v4380_v52, 4  ;;  %v4891_v56 = vrot.slane %v4889_v16, 5  ;;  %v4877_v41 = vrot.slane %v4876_v42, 4  ;;  %v12969_v16 = vld [vmem:[#allocation11_spill] sm:$0xff] }
 0x2da   : > { %v5436_v40 = vor.u32 %v11784_v43, %v12966_v17  ;;  %v4363_v53 = vrot.slane %v4361_v38, 7  ;;  %v4886_v50 = vor.u32 %v4885_v49, %v4881_v15  ;;  %v5439_v3 = vshll.u32 %v11686_v19, 16  ;;  %v4557_v58 = vld [vmem:[#allocation3 + $0xa4] sm:$0x1] }
 0x2db   : > { %v4384_v5 = vsel %vm9036_vm11, %v4376_v31, %v4383_v44  ;;  %v4565_v20 = vsel %vm8972_vm3, %v4385_v26, %v4564_v12  ;;  %v12967_v52 = vshrl.u32 %v11686_v19, 16  ;;  %v4882_v31 = vsel %vm9111_vm14, %v4877_v41, %v4881_v15  ;;  %v4599_v44 = vld [vmem:[#allocation3 + $0x6c] sm:$0xf] }
 0x2dc   : > { %4563 = vst.msk [vmem:[#allocation3 + $0xac] sm:$0xf] %vm226_vm0, %v4384_v5  ;;  %4566 = vst [vmem:[#allocation3 + $0xb0] sm:$0x1] %v4565_v20  ;;  %v5437_v25 = vrot.slane %v5436_v40, 4  ;;  %v5449_v12 = vshll.u32 %v11826_v45, 16  ;;  %v6021_v43 = vor.u32 %v12969_v16, %v12968_v34  ;;  %v4366_v26 = vor.u32 %v4364_v7, %v4363_v53  ;;  %v12010_v20 = vpop.permute.xlu0 %6610 }
 0x2dd   : > { %v5445_v32 = vrot.slane %v12967_v52, 4  ;;  %v4368_v42 = vrot.slane %v4363_v53, 4  ;;  %v4887_v38 = vrot.slane %v4886_v50, 4  ;;  %v5441_v49 = vrot.slane %v5439_v3, 5  ;;  %v6239_v5 = vld [vmem:[#allocation3 + $0x84] sm:$0xe]  ;;  %v12025_v3 = vpop.permute.xlu1 %6864 }
 0x2de   : > { %v5451_v19 = vrot.slane %v5449_v12, 5  ;;  %v6022_v17 = vrot.slane %v6021_v43, 4  ;;  %v6024_v52 = vshll.u32 %v11663_v36, 16  ;;  %v12970_v15 = vshrl.u32 %v11663_v36, 16  ;;  %v12015_v40 = vld [vmem:[#allocation3 + $0x8c] sm:$0x1] }
 0x2df   : > { %v4367_v45 = vsel %vm9036_vm11, %v4359_v55, %v4366_v26  ;;  %v4558_v7 = vsel %vm8972_vm3, %v4368_v42, %v4557_v58  ;;  %v4892_v53 = vsel %vm9111_vm14, %v4887_v38, %v4891_v56  ;;  %v5442_v50 = vsel %vm9111_vm14, %v5437_v25, %v5441_v49  ;;  %12971 = vst [vmem:[#allocation5_spill] sm:$0xff] %v12025_v3 }
 0x2e0   : > { %v6030_v41 = vrot.slane %v12970_v15, 4  ;;  %4556 = vst.msk [vmem:[#allocation3 + $0xa0] sm:$0xf] %vm226_vm0, %v4367_v45  ;;  %4559 = vst [vmem:[#allocation3 + $0xa4] sm:$0x1] %v4558_v7  ;;  %v8325_v36 = vcombine.low %v4882_v31, %v4892_v53  ;;  %v5446_v12 = vor.u32 %v5445_v32, %v5441_v49  ;;  %v6026_v34 = vrot.slane %v6024_v52, 5 }
 0x2e1   : > { %v6034_v16 = vshll.u32 %v11793_v51, 16  ;;  %v8292_v55 = vrot.slane %v6239_v5, 9  ;;  %v6359_v43 = vrot.slane %v11931_v30, 5  ;;  %v6362_v58 = vrot.slane %v12015_v40, 5  ;;  %v12036_v5 = vpop.permute.xlu0 %7116  ;;  %v5631_v53 = vld [vmem:[#allocation3 + $0x84] sm:$0xe] }
 0x2e2   : > { %v4846_v26 = vshrl.u32 %v4599_v44, 16  ;;  %6538 = vrot.lane.b32.xlu1 %v8325_v36, %s8924_s27  ;;  %v5447_v56 = vrot.slane %v5446_v12, 4  ;;  %v6027_v25 = vsel %vm9111_vm14, %v6022_v17, %v6026_v34  ;;  %v6031_v42 = vor.u32 %v6030_v41, %v6026_v34  ;;  %v12045_v34 = vld [vmem:[#allocation3 + $0x8c] sm:$0x1] }
 0x2e3   : > { %v6036_v38 = vrot.slane %v6034_v16, 5  ;;  %v6360_v32 = vsel %vm9024_vm9, %v8292_v55, %v6359_v43  ;;  %v6361_v31 = vrot.slane %v6359_v43, 4  ;;  %v4849_v51 = vshll.u32 %v4599_v44, 16  ;;  %v5632_v44 = vld [vmem:[#allocation3 + $0x90] sm:$0xe]  ;;  %v12047_v16 = vpop.permute.xlu1 %6608 }
 0x2e4   : > { %v4848_v49 = vrot.slane %v4846_v26, 4  ;;  %v5452_v52 = vsel %vm9111_vm14, %v5447_v56, %v5451_v19  ;;  %v6032_v15 = vrot.slane %v6031_v42, 4  ;;  %v4855_v45 = vshll.u32 %v11804_v10, 16 }
 0x2e5   : > { %v4859_v7 = vshrl.u32 %v11804_v10, 16  ;;  %v8371_v17 = vcombine.low %v5442_v50, %v5452_v52  ;;  %v6363_v41 = vsel %vm9024_vm9, %v6361_v31, %v6362_v58  ;;  %v4851_v36 = vrot.slane %v4849_v51, 5  ;;  %v12051_v10 = vld [vmem:[#allocation3 + $0x98] sm:$0x1] }
 0x2e6   : > { %v4865_v12 = vshll.u32 %v11813_v28, 16  ;;  %v6037_v19 = vsel %vm9111_vm14, %v6032_v15, %v6036_v38  ;;  %v8436_v55 = vcombine.low %v6360_v32, %v6363_v41  ;;  %v4857_v43 = vrot.slane %v4855_v45, 5 }
 0x2e7   : > { %v4861_v26 = vrot.slane %v4859_v7, 4  ;;  %6790 = vrot.lane.b32.xlu0 %v8371_v17, %s8927_s30  ;;  %v8418_v50 = vcombine.low %v6027_v25, %v6037_v19  ;;  %v4852_v58 = vor.u32 %v4851_v36, %v4848_v49  ;;  %v8277_v42 = vrot.slane %v5631_v53, 9  ;;  %v12061_v25 = vpop.permute.xlu0 %6862  ;;  %v12065_v17 = vld [vmem:[#allocation3 + $0x98] sm:$0x1] }
 0x2e8   : > { %v4867_v56 = vrot.slane %v4865_v12, 5  ;;  %v5757_v31 = vrot.slane %v11952_v9, 5  ;;  %v5760_v51 = vrot.slane %v12045_v34, 5  ;;  %v8278_v52 = vrot.slane %v5632_v44, 9  ;;  %v12073_v44 = vpop.permute.xlu1 %6708 }
 0x2e9   : > { %v4862_v28 = vor.u32 %v4861_v26, %v4857_v43  ;;  %7044 = vrot.lane.b32.xlu1 %v8418_v50, %s8928_s6  ;;  %v4853_v38 = vrot.slane %v4852_v58, 4  ;;  %v5764_v32 = vrot.slane %v11842_v57, 5  ;;  %v5767_v15 = vrot.slane %v12051_v10, 5  ;;  %12972 = vst [vmem:[#allocation13_spill] sm:$0xff] %v12073_v44  ;;  %v12977_v44 = vld [vmem:[#allocation9_spill] sm:$0xff] }
 0x2ea   : > { %v6093_v45 = vor.u32 %v11906_v6, %v11878_v13  ;;  %v5758_v7 = vsel %vm9024_vm9, %v8277_v42, %v5757_v31  ;;  %v5759_v53 = vrot.slane %v5757_v31, 4  ;;  %v6096_v41 = vshll.u32 %v11867_v11, 16  ;;  %v12081_v42 = vld [vmem:[#allocation3 + $0x88] sm:$0xf] }
 0x2eb   : > { %v4863_v49 = vrot.slane %v4862_v28, 4  ;;  %7128 = vrot.lane.b32.xlu0 %v8436_v55, %s8926_s29  ;;  %v4858_v36 = vsel %vm9111_vm14, %v4853_v38, %v4857_v43  ;;  %v5765_v12 = vsel %vm9024_vm9, %v8278_v52, %v5764_v32  ;;  %v5766_v13 = vrot.slane %v5764_v32, 4  ;;  %v5024_v43 = vld [vmem:[#allocation3 + $0x84] sm:$0xe] }
 0x2ec   : > { %v6094_v6 = vrot.slane %v6093_v45, 4  ;;  %v5761_v26 = vsel %vm9024_vm9, %v5759_v53, %v5760_v51  ;;  %v6098_v50 = vrot.slane %v6096_v41, 5  ;;  %v12973_v58 = vshrl.u32 %v11867_v11, 16  ;;  %v12092_v53 = vld [vmem:[#allocation3 + $0x8c] sm:$0x1] }
 0x2ed   : > { %v4868_v19 = vsel %vm9111_vm14, %v4863_v49, %v4867_v56  ;;  %v8389_v31 = vcombine.low %v5758_v7, %v5761_v26  ;;  %v5768_v52 = vsel %vm9024_vm9, %v5766_v13, %v5767_v15  ;;  %v6106_v38 = vshll.u32 %v12065_v17, 16 }
 0x2ee   : > { %v6102_v55 = vrot.slane %v12973_v58, 4  ;;  %v8324_v28 = vcombine.low %v4858_v36, %v4868_v19  ;;  %v12974_v32 = vshrl.u32 %v11941_v14, 16  ;;  %v8390_v45 = vcombine.low %v5765_v12, %v5768_v52  ;;  %v12094_v41 = vpop.f32.mrb[28].mxu0  ;;  %v12103_v19 = vpop.permute.xlu0 %6962  ;;  %v8892_v52 = vld [vmem:[#allocation3 + $0x30] sm:$0xf] }
 0x2ef   : > { %v6099_v51 = vsel %vm9111_vm14, %v6094_v6, %v6098_v50  ;;  %6874 = vrot.lane.b32.xlu0 %v8389_v31, %s8925_s28  ;;  %v6108_v15 = vrot.slane %v6106_v38, 5  ;;  %v8262_v7 = vrot.slane %v5024_v43, 9  ;;  %v5156_v36 = vrot.slane %v12081_v42, 5  ;;  %v12101_v12 = vpop.f32.mrb[29].mxu0 }
 0x2f0   : > { %v12088_v56 = vrot.slane %v12974_v32, 4  ;;  %v6103_v49 = vor.u32 %v6102_v55, %v6098_v50  ;;  %6536 = vrot.lane.b32.xlu1 %v8324_v28, %s8924_s27  ;;  %v5484_v13 = vor.u32 %v11970_v63, %v11968_v0  ;;  %v5487_v26 = vshll.u32 %v11952_v9, 16  ;;  %v12109_v28 = vpop.f32.mrb[30].mxu0  ;;  %v8891_v63 = vld [vmem:[#allocation3 + $0x34] sm:$0xf] }
 0x2f1   : > { %v12975_v50 = vshrl.u32 %v11952_v9, 16  ;;  %v5497_v55 = vshll.u32 %v12045_v34, 16  ;;  %v5157_v43 = vsel %vm9024_vm9, %v8262_v7, %v5156_v36  ;;  %v5158_v31 = vrot.slane %v5156_v36, 4  ;;  %v12114_v32 = vpop.f32.mrb[31].mxu0 }
 0x2f2   : > { %v6104_v6 = vrot.slane %v6103_v49, 4  ;;  %v5159_v0 = vrot.slane %v12092_v53, 5  ;;  %v8303_v38 = vcombine.low %v8892_v52, %v8891_v63  ;;  %v12116_v49 = vpop.permute.xlu1 %6784  ;;  %v5489_v34 = vrot.slane %v5487_v26, 5 }
 0x2f3   : > { %v5493_v58 = vrot.slane %v12975_v50, 4  ;;  %12976 = vst [vmem:[#allocation10_spill] sm:$0xff] %v12116_v49  ;;  %v5485_v50 = vrot.slane %v5484_v13, 4  ;;  %v7227_v3 = vsel %vm3581_vm2, %v11855_v47, %v12977_v44  ;;  %v5499_v49 = vrot.slane %v5497_v55, 5 }
 0x2f4   : > { %v6109_v9 = vsel %vm9111_vm14, %v6104_v6, %v6108_v15  ;;  %6876 = vrot.lane.b32.xlu1 %v8390_v45, %s8925_s28  ;;  %v5160_v36 = vsel %vm9024_vm9, %v5158_v31, %v5159_v0  ;;  %v7156_v63 = vsel %vm3499_vm15, %v8303_v38, %v11954_v59  ;;  %v7259_v52 = vsel %vm3614_vm4, %v7227_v3, %v11966_v18  ;;  %v6240_v3 = vld [vmem:[#allocation3 + $0x90] sm:$0xe]  ;;  %v403_v0 = vld [vmem:[#allocation3 + $0xc0] sm:$0x1] }
 0x2f5   : > { %v8421_v7 = vcombine.low %v6099_v51, %v6109_v9  ;;  %v12978_v15 = vshll.u32 %v11941_v14, 16  ;;  %v8342_v6 = vcombine.low %v5157_v43, %v5160_v36  ;;  %v5494_v26 = vor.u32 %v5493_v58, %v5489_v34  ;;  %v12142_v14 = vpop.permute.xlu0 %7038 }
 0x2f6   : > { %v7291_v47 = vsel %vm3647_vm6, %v7259_v52, %v11806_v2  ;;  %v5508_v44 = vor.u32 %v11876_v54, %v11871_v21  ;;  %v5511_v59 = vshll.u32 %v11842_v57, 16  ;;  %v12979_v45 = vshrl.u32 %v11842_v57, 16  ;;  %v12980_v21 = vld [vmem:[#allocation6_spill] sm:$0xff]  ;;  %v12157_v38 = vpop.permute.xlu1 %6960 }
 0x2f7   : > { %v12132_v13 = vrot.slane %v12978_v15, 5  ;;  %7050 = vrot.lane.b32.xlu0 %v8421_v7, %s8928_s6  ;;  %v5490_v51 = vsel %vm9111_vm14, %v5485_v50, %v5489_v34  ;;  %v5495_v58 = vrot.slane %v5494_v26, 4  ;;  %v12148_v55 = vsel %vm3548_vm1, %v7156_v63, %v11750_v37  ;;  %v12982_v34 = vld [vmem:[#allocation8_spill] sm:$0xff] }
 0x2f8   : > { %v5517_v18 = vrot.slane %v12979_v45, 4  ;;  %v5521_v2 = vshll.u32 %v12051_v10, 16  ;;  %6620 = vrot.lane.b32.xlu1 %v8342_v6, %s8921_s24  ;;  %v12154_v54 = vsel %vm3680_vm8, %v7291_v47, %v12980_v21  ;;  %v5509_v57 = vrot.slane %v5508_v44, 4  ;;  %v8893_v10 = vld [vmem:[%s12909_s3 + $0x20] ss:$0 sps:$4 sm:$0xff]   ;;  %v12983_v6 = vld [vmem:[#allocation4_spill] sm:$0xff] }
 0x2f9   : > { %v5513_v43 = vrot.slane %v5511_v59, 5  ;;  %v6366_v31 = vrot.slane %v11867_v11, 5  ;;  %v5500_v9 = vsel %vm9111_vm14, %v5495_v58, %v5499_v49  ;;  %v8293_v37 = vrot.slane %v6240_v3, 9  ;;  %v12169_v15 = vld [vmem:[#allocation3 + $0x9c] sm:$0xf]  ;;  %v12186_v58 = vpop.permute.xlu0 %6706 }
 0x2fa   : > { %vm12981_vm7 = vcmask 1043456   ;;  %v7257_v7 = vsel %vm3614_vm4, %v11915_v22, %v12982_v34  ;;  %v8373_v36 = vcombine.low %v5490_v51, %v5500_v9  ;;  %v5523_v11 = vrot.slane %v5521_v2, 5  ;;  %v400_v59 = vld [vmem:[#allocation3 + $0xb4] sm:$0x1]  ;;  %v12184_v51 = vld [vmem:[#allocation3 + $0xa0] sm:$0xf] }
 0x2fb   : > { %v7490_v50 = vsel %vm12981_vm7, %v8893_v10, 0  ;;  %v5518_v63 = vor.u32 %v5517_v18, %v5513_v43  ;;  %v6369_v52 = vrot.slane %v12065_v17, 5  ;;  %v6368_v49 = vrot.slane %v6366_v31, 4  ;;  %v12984_v18 = vld [vmem:[#allocation12_spill] sm:$0xff]  ;;  %v12198_v10 = vpop.permute.xlu1 %6530 }
 0x2fc   : > { %8737 = vmatpush3.bf16.msra.mxu1 %v7490_v50  ;;  %v7289_v26 = vsel %vm3647_vm6, %v7257_v7, %v12983_v6  ;;  %v404_v47 = vsel %vm8972_vm3, 0, %v403_v0  ;;  %v4014_v44 = vadd.f32 %v11928_v4, %v12094_v41  ;;  %6794 = vrot.lane.b32.xlu0 %v8373_v36, %s8927_s30  ;;  %v5514_v22 = vsel %vm9111_vm14, %v5509_v57, %v5513_v43  ;;  %v457_v43 = vld [vmem:[#allocation3 + $0xc8] sm:$0x1]  ;;  %v454_v36 = vld [vmem:[#allocation3 + $0xbc] sm:$0x1] }
 0x2fd   : > { %v5519_v17 = vrot.slane %v5518_v63, 4  ;;  %v6367_v45 = vsel %vm9024_vm9, %v8293_v37, %v6366_v31  ;;  %v7321_v3 = vsel %vm3680_vm8, %v7289_v26, %v12984_v18  ;;  %405 = vst [vmem:[#allocation3 + $0xc0] sm:$0x1] %v404_v47  ;;  %v6370_v41 = vsel %vm9024_vm9, %v6368_v49, %v6369_v52  ;;  %v12224_v18 = vpop.permute.xlu0 %6782 }
 0x2fe   : > { %v7353_v2 = vsel %vm3713_vm12, %v7321_v3, %v11979_v27  ;;  %v4050_v21 = vmax.f32 %v4014_v44, 0.0  ;;  %v6111_v57 = vshrl.u32 %v12169_v15, 16  ;;  %v8437_v0 = vcombine.low %v6367_v45, %v6370_v41  ;;  %v12222_v45 = vld [vmem:[#allocation3 + $0xa4] sm:$0x1] }
 0x2ff   : > { %v5524_v31 = vsel %vm9111_vm14, %v5519_v17, %v5523_v11  ;;  %v6114_v9 = vshll.u32 %v12169_v15, 16  ;;  %v401_v37 = vsel %vm8972_vm3, 0, %v400_v59  ;;  %v6124_v7 = vshrl.u32 %v12184_v51, 16  ;;  %v8894_v59 = vld [vmem:[#allocation3 + $0x28] sm:$0xf] }
 0x300   : > { %v8374_v50 = vcombine.low %v5514_v22, %v5524_v31  ;;  %v8531_v34 = vpack.c.bf16 %v4050_v21, %v4050_v21  ;;  %402 = vst [vmem:[#allocation3 + $0xb4] sm:$0x1] %v401_v37  ;;  %v4006_v27 = vadd.f32 %v11928_v4, %v12101_v12  ;;  %7130 = vrot.lane.b32.xlu0 %v8437_v0, %s8926_s29  ;;  %v458_v11 = vsel %vm8995_vm5, 0, %v457_v43  ;;  %v8895_v22 = vld [vmem:[#allocation3 + $0x24] sm:$0xf]  ;;  %v12229_v37 = vpop.permute.xlu1 %7036 }
 0x301   : > { %v8406_v63 = vcombine.low %v12169_v15, %v12184_v51  ;;  %v4017_v52 = vadd.f32 %v11928_v4, %v12109_v28  ;;  %v7385_v49 = vsel %vm3746_vm13, %v7353_v2, %v11774_v35  ;;  %v12213_v26 = vrot.slane %v6111_v57, 4  ;;  %459 = vst [vmem:[#allocation3 + $0xc8] sm:$0x1] %v458_v11  ;;  %v6241_v15 = vld [vmem:[#allocation3 + $0x9c] sm:$0xe] }
 0x302   : > { %6796 = vrot.lane.b32.xlu1 %v8374_v50, %s8927_s30  ;;  %v4404_v6 = vshrl.u32 %v8531_v34, 16  ;;  %v12215_v12 = vrot.slane %v6114_v9, 5  ;;  %v4048_v47 = vmax.f32 %v4006_v27, 0.0  ;;  %vm12985_vm7 = vcmask 588800  }
 0x303   : > { %8739 = vmatmul.mubr.msk.bf16.vlgmr.msra.gmra.mrb[0].mxu1 %vm12985_vm7, %v7385_v49  ;;  %v4051_v44 = vmax.f32 %v4017_v52, 0.0  ;;  %v8302_v17 = vcombine.low %v8895_v22, %v8894_v59  ;;  %v455_v28 = vsel %vm8995_vm5, 0, %v454_v36  ;;  %v4009_v35 = vadd.f32 %v11928_v4, %v12114_v32 }
 0x304   : > { %v4406_v3 = vrot.slane %v4404_v6, 7  ;;  %v4407_v41 = vshll.u32 %v8531_v34, 16  ;;  %v8529_v2 = vpack.c.bf16 %v4048_v47, %v4048_v47  ;;  %456 = vst [vmem:[#allocation3 + $0xbc] sm:$0x1] %v455_v28  ;;  %v6373_v21 = vrot.slane %v12184_v51, 5 }
 0x305   : > { %v4574_v57 = vld [vmem:[#allocation3 + $0xc0] sm:$0xf]  ;;  %v8532_v43 = vpack.c.bf16 %v4051_v44, %v4051_v44  ;;  %v7153_v31 = vsel %vm3499_vm15, %v8302_v17, %v11993_v24  ;;  %v4049_v0 = vmax.f32 %v4009_v35, 0.0  ;;  %v8294_v9 = vrot.slane %v6241_v15, 9  ;;  %v12240_v17 = vpop.permute.xlu0 %7122 }
 0x306   : > { %v4409_v4 = vor.u32 %v4407_v41, %v4406_v3  ;;  %v4410_v32 = vrot.slane %v4406_v3, 4  ;;  %6972 = vrot.lane.b32.xlu1 %v8406_v63, %s8923_s26  ;;  %v4387_v50 = vshrl.u32 %v8529_v2, 16  ;;  %v6376_v34 = vrot.slane %v12222_v45, 5 }
 0x307   : > { %v4390_v27 = vshll.u32 %v8529_v2, 16  ;;  %v4412_v36 = vshrl.u32 %v8532_v43, 16  ;;  %v4415_v11 = vshll.u32 %v8532_v43, 16  ;;  %v8530_v52 = vpack.c.bf16 %v4049_v0, %v4049_v0  ;;  %v4567_v15 = vld [vmem:[#allocation3 + $0xb4] sm:$0xf] }
 0x308   : > { %v4575_v49 = vsel %vm9030_vm10, %v4409_v4, %v4574_v57  ;;  %v4389_v6 = vrot.slane %v4387_v50, 7  ;;  %v6374_v24 = vsel %vm9024_vm9, %v8294_v9, %v6373_v21  ;;  %v6375_v47 = vrot.slane %v6373_v21, 4  ;;  %v4578_v3 = vld [vmem:[#allocation3 + $0xc8] sm:$0x1]  ;;  %v12247_v9 = vld [vmem:[#allocation3 + $0x94] sm:$0xf] }
 0x309   : > { %4576 = vst [vmem:[#allocation3 + $0xc0] sm:$0xf] %v4575_v49  ;;  %v4414_v44 = vrot.slane %v4412_v36, 7  ;;  %v4395_v59 = vshrl.u32 %v8530_v52, 16  ;;  %v4398_v63 = vshll.u32 %v8530_v52, 16  ;;  %v7355_v22 = vsel %vm3713_vm12, %v12154_v54, %v11901_v23  ;;  %v12249_v23 = vpop.permute.xlu1 %6528 }
 0x30a   : > { %v4392_v28 = vor.u32 %v4390_v27, %v4389_v6  ;;  %v4393_v35 = vrot.slane %v4389_v6, 4  ;;  %v6377_v41 = vsel %vm9024_vm9, %v6375_v47, %v6376_v34  ;;  %v7387_v2 = vsel %vm3746_vm13, %v7355_v22, %v11722_v46  ;;  %v5025_v36 = vld [vmem:[#allocation3 + $0x90] sm:$0xe]  ;;  %v12263_v6 = vld [vmem:[#allocation3 + $0x98] sm:$0x1]  ;;  %v12276_v22 = vpop.permute.xlu0 %6614 }
 0x30b   : > { %v4417_v21 = vor.u32 %v4415_v11, %v4414_v44  ;;  %v4419_v57 = vrot.slane %v4414_v44, 4  ;;  %v4397_v43 = vrot.slane %v4395_v59, 7  ;;  %v8438_v0 = vcombine.low %v6374_v24, %v6377_v41  ;;  %8742 = vmatprep.mubr.msk.bf16.mxu1 %vm12985_vm7, %v7387_v2  ;;  %v4571_v4 = vld [vmem:[#allocation3 + $0xbc] sm:$0x1] }
 0x30c   : > { %v4568_v54 = vsel %vm9030_vm10, %v4392_v28, %v4567_v15  ;;  %v6069_v50 = vor.u32 %v12132_v13, %v12088_v56  ;;  %v6072_v34 = vshll.u32 %v11931_v30, 16  ;;  %v12986_v46 = vshrl.u32 %v11931_v30, 16  ;;  %v4603_v56 = vld [vmem:[#allocation3 + $0x84] sm:$0xf]  ;;  %v12987_v30 = vld [vmem:[#allocation15_spill] sm:$0xff]  ;;  %vm12994_vm10 = vmmov %vm12985_vm7 }
 0x30d   : > { %4569 = vst [vmem:[#allocation3 + $0xb4] sm:$0xf] %v4568_v54  ;;  %v4418_v11 = vsel %vm9036_vm11, %v4410_v32, %v4417_v21  ;;  %v4579_v52 = vsel %vm8972_vm3, %v4419_v57, %v4578_v3  ;;  %v4400_v49 = vor.u32 %v4398_v63, %v4397_v43  ;;  %v4402_v33 = vrot.slane %v4397_v43, 4  ;;  %7132 = vrot.lane.b32.xlu0 %v8438_v0, %s8926_s29  ;;  %v12283_v57 = vpop.permute.xlu1 %6868 }
 0x30e   : > { %v6078_v27 = vrot.slane %v12986_v46, 4  ;;  %4577 = vst.msk [vmem:[#allocation3 + $0xc4] sm:$0xf] %vm226_vm0, %v4418_v11  ;;  %4580 = vst [vmem:[#allocation3 + $0xc8] sm:$0x1] %v4579_v52  ;;  %v12268_v13 = vsel %vm3548_vm1, %v7153_v31, %v12987_v30  ;;  %v6070_v24 = vrot.slane %v6069_v50, 4 }
 0x30f   : > { %v6074_v47 = vrot.slane %v6072_v34, 5  ;;  %v6082_v32 = vshll.u32 %v12015_v40, 16  ;;  %v4401_v15 = vsel %vm9036_vm11, %v4393_v35, %v4400_v49  ;;  %v4572_v44 = vsel %vm8972_vm3, %v4402_v33, %v4571_v4  ;;  %v5213_v40 = vld [vmem:[#allocation3 + $0x9c] sm:$0xf]  ;;  %v4605_v50 = vld [vmem:[#allocation3 + $0x90] sm:$0xf]  ;;  %vm12995_vm11 = vmmov %vm12985_vm7 }
 0x310   : > { %v8263_v59 = vrot.slane %v5025_v36, 9  ;;  %v5163_v63 = vrot.slane %v12247_v9, 5  ;;  %4570 = vst.msk [vmem:[#allocation3 + $0xb8] sm:$0xf] %vm226_vm0, %v4401_v15  ;;  %4573 = vst [vmem:[#allocation3 + $0xbc] sm:$0x1] %v4572_v44  ;;  %v12295_v15 = vpop.permute.xlu0 %7120 }
 0x311   : > { %v6079_v31 = vor.u32 %v6078_v27, %v6074_v47  ;;  %v6084_v28 = vrot.slane %v6082_v32, 5  ;;  %v5166_v3 = vrot.slane %v12263_v6, 5  ;;  %v4894_v41 = vshrl.u32 %v4603_v56, 16  ;;  %v12289_v36 = vld [vmem:[#allocation3 + $0xa0] sm:$0xf] }
 0x312   : > { %v5164_v39 = vsel %vm9024_vm9, %v8263_v59, %v5163_v63  ;;  %v5165_v35 = vrot.slane %v5163_v63, 4  ;;  %v4897_v2 = vshll.u32 %v4603_v56, 16  ;;  %v4903_v21 = vshll.u32 %v12081_v42, 16 }
 0x313   : > { %v6080_v43 = vrot.slane %v6079_v31, 4  ;;  %v4896_v0 = vrot.slane %v4894_v41, 4  ;;  %v4907_v54 = vshrl.u32 %v12081_v42, 16  ;;  %v4913_v4 = vshll.u32 %v12092_v53, 16  ;;  %v12301_v41 = vpop.permute.xlu1 %6612 }
 0x314   : > { %v5167_v34 = vsel %vm9024_vm9, %v5165_v35, %v5166_v3  ;;  %v4899_v46 = vrot.slane %v4897_v2, 5  ;;  %v4905_v27 = vrot.slane %v4903_v21, 5  ;;  %v5526_v11 = vshrl.u32 %v5213_v40, 16 }
 0x315   : > { %v6075_v52 = vsel %vm9111_vm14, %v6070_v24, %v6074_v47  ;;  %v6085_v49 = vsel %vm9111_vm14, %v6080_v43, %v6084_v28  ;;  %v8343_v33 = vcombine.low %v5164_v39, %v5167_v34  ;;  %v4909_v56 = vrot.slane %v4907_v54, 4 }
 0x316   : > { %v8420_v42 = vcombine.low %v6075_v52, %v6085_v49  ;;  %v4900_v30 = vor.u32 %v4899_v46, %v4896_v0  ;;  %v5528_v53 = vrot.slane %v5526_v11, 4  ;;  %v5529_v32 = vshll.u32 %v5213_v40, 16 }
 0x317   : > { %6622 = vrot.lane.b32.xlu0 %v8343_v33, %s8921_s24  ;;  %v4910_v44 = vor.u32 %v4909_v56, %v4905_v27  ;;  %v4915_v59 = vrot.slane %v4913_v4, 5  ;;  %v5539_v63 = vshrl.u32 %v12289_v36, 16  ;;  %v4918_v31 = vshrl.u32 %v4605_v50, 16  ;;  %v5233_v4 = vld [vmem:[#allocation3 + $0xa4] sm:$0x1]  ;;  %v12312_v56 = vpop.permute.xlu0 %6866 }
 0x318   : > { %7048 = vrot.lane.b32.xlu1 %v8420_v42, %s8928_s6  ;;  %v4901_v24 = vrot.slane %v4900_v30, 4  ;;  %v5531_v47 = vrot.slane %v5529_v32, 5  ;;  %v4921_v28 = vshll.u32 %v4605_v50, 16  ;;  %v4927_v3 = vshll.u32 %v12247_v9, 16 }
 0x319   : > { %v4911_v39 = vrot.slane %v4910_v44, 4  ;;  %v8359_v35 = vcombine.low %v5213_v40, %v12289_v36  ;;  %v4920_v2 = vrot.slane %v4918_v31, 4  ;;  %v4931_v21 = vshrl.u32 %v12247_v9, 16  ;;  %v12321_v31 = vpop.permute.xlu1 %6712 }
 0x31a   : > { %v4923_v43 = vrot.slane %v4921_v28, 5  ;;  %v4929_v0 = vrot.slane %v4927_v3, 5  ;;  %v4937_v54 = vshll.u32 %v12263_v6, 16  ;;  %v5532_v34 = vor.u32 %v5531_v47, %v5528_v53 }
 0x31b   : > { %v4906_v46 = vsel %vm9111_vm14, %v4901_v24, %v4905_v27  ;;  %v4916_v50 = vsel %vm9111_vm14, %v4911_v39, %v4915_v59  ;;  %6718 = vrot.lane.b32.xlu0 %v8359_v35, %s8922_s25  ;;  %v4933_v11 = vrot.slane %v4931_v21, 4  ;;  %v5535_v40 = vshll.u32 %v12289_v36, 16 }
 0x31c   : > { %v8326_v52 = vcombine.low %v4906_v46, %v4916_v50  ;;  %v4924_v49 = vor.u32 %v4923_v43, %v4920_v2  ;;  %v5533_v9 = vrot.slane %v5532_v34, 4  ;;  %v5541_v33 = vrot.slane %v5539_v63, 4  ;;  %v12988_v63 = vld [vmem:[#allocation7_spill] sm:$0xff]  ;;  %v12337_v43 = vld [vmem:[#allocation3 + $0xa0] sm:$0xf] }
 0x31d   : > { %v4934_v6 = vor.u32 %v4933_v11, %v4929_v0  ;;  %v5537_v42 = vrot.slane %v5535_v40, 5  ;;  %v5545_v30 = vshll.u32 %v5233_v4, 16  ;;  %v6117_v27 = vor.u32 %v12215_v12, %v12213_v26  ;;  %v5633_v12 = vld [vmem:[#allocation3 + $0x9c] sm:$0xe]  ;;  %12990 = vst [vmem:[#allocation9_spill] sm:$0xff] %v12337_v43  ;;  %v12339_v11 = vpop.permute.xlu0 %6966 }
 0x31e   : > { %6540 = vrot.lane.b32.xlu1 %v8326_v52, %s8924_s27  ;;  %v4925_v53 = vrot.slane %v4924_v49, 4  ;;  %v6120_v32 = vshll.u32 %v12184_v51, 16  ;;  %v6126_v44 = vrot.slane %v6124_v7, 4  ;;  %v6130_v59 = vshll.u32 %v12222_v45, 16  ;;  %v12332_v45 = vld [vmem:[#allocation3 + $0x9c] sm:$0xf] }
 0x31f   : > { %v12326_v24 = vsel %vm3581_vm2, %v12268_v13, %v12988_v63  ;;  %v4935_v47 = vrot.slane %v4934_v6, 4  ;;  %v4939_v28 = vrot.slane %v4937_v54, 5  ;;  %v5542_v26 = vor.u32 %v5541_v33, %v5537_v42  ;;  %12989 = vst [vmem:[#allocation11_spill] sm:$0xff] %v12332_v45  ;;  %v4626_v50 = vld [vmem:[#allocation3 + $0xa4] sm:$0x1] }
 0x320   : > { %v4930_v3 = vsel %vm9111_vm14, %v4925_v53, %v4929_v0  ;;  %v5538_v51 = vsel %vm9111_vm14, %v5533_v9, %v5537_v42  ;;  %v5547_v7 = vrot.slane %v5545_v30, 5  ;;  %v6122_v39 = vrot.slane %v6120_v32, 5  ;;  %v5822_v30 = vld [vmem:[#allocation3 + $0xa8] sm:$0xf] }
 0x321   : > { %v4940_v35 = vsel %vm9111_vm14, %v4935_v47, %v4939_v28  ;;  %v5543_v2 = vrot.slane %v5542_v26, 4  ;;  %v6118_v13 = vrot.slane %v6117_v27, 4  ;;  %v5771_v21 = vrot.slane %v12289_v36, 5  ;;  %v12347_v27 = vpop.permute.xlu1 %6788 }
 0x322   : > { %v8327_v54 = vcombine.low %v4930_v3, %v4940_v35  ;;  %v6127_v34 = vor.u32 %v6126_v44, %v6122_v39  ;;  %v6132_v46 = vrot.slane %v6130_v59, 5  ;;  %v8279_v0 = vrot.slane %v5633_v12, 9  ;;  %v12352_v59 = vld [vmem:[#allocation3 + $0xac] sm:$0xf]  ;;  %v5026_v35 = vld [vmem:[#allocation3 + $0x9c] sm:$0xe] }
 0x323   : > { %v5548_v40 = vsel %vm9111_vm14, %v5543_v2, %v5547_v7  ;;  %v5773_v52 = vrot.slane %v5771_v21, 4  ;;  %v5774_v49 = vrot.slane %v5233_v4, 5  ;;  %v4942_v9 = vshrl.u32 %v12332_v45, 16 }
 0x324   : > { %6542 = vrot.lane.b32.xlu1 %v8327_v54, %s8924_s27  ;;  %v8375_v33 = vcombine.low %v5538_v51, %v5548_v40  ;;  %v6128_v36 = vrot.slane %v6127_v34, 4  ;;  %v4945_v6 = vshll.u32 %v12332_v45, 16  ;;  %v4951_v42 = vshll.u32 %v12337_v43, 16  ;;  %v5028_v45 = vld [vmem:[#allocation3 + $0xb4] sm:$0xe] }
 0x325   : > { %v5775_v53 = vsel %vm9024_vm9, %v5773_v52, %v5774_v49  ;;  %v4944_v32 = vrot.slane %v4942_v9, 4  ;;  %v4955_v44 = vshrl.u32 %v12337_v43, 16  ;;  %v4961_v4 = vshll.u32 %v4626_v50, 16  ;;  %v12362_v52 = vpop.permute.xlu0 %7042 }
 0x326   : > { %6798 = vrot.lane.b32.xlu0 %v8375_v33, %s8927_s30  ;;  %v6123_v63 = vsel %vm9111_vm14, %v6118_v13, %v6122_v39  ;;  %v6133_v47 = vsel %vm9111_vm14, %v6128_v36, %v6132_v46  ;;  %v4947_v28 = vrot.slane %v4945_v6, 5  ;;  %v4953_v26 = vrot.slane %v4951_v42, 5  ;;  %v12368_v36 = vpop.permute.xlu1 %6964 }
 0x327   : > { %v8422_v12 = vcombine.low %v6123_v63, %v6133_v47  ;;  %v5772_v3 = vsel %vm9024_vm9, %v8279_v0, %v5771_v21  ;;  %v4957_v51 = vrot.slane %v4955_v44, 4  ;;  %v6135_v7 = vshrl.u32 %v5822_v30, 16  ;;  %v8896_v63 = vld [vmem:[#allocation3 + $0x4c] sm:$0xf]  ;;  %v8897_v47 = vld [vmem:[#allocation3 + $0x48] sm:$0xf] }
 0x328   : > { %v8391_v2 = vcombine.low %v5772_v3, %v5775_v53  ;;  %v4948_v54 = vor.u32 %v4947_v28, %v4944_v32  ;;  %v6138_v34 = vshll.u32 %v5822_v30, 16  ;;  %v6148_v40 = vshrl.u32 %v12352_v59, 16  ;;  %v12370_v32 = vld [vmem:[#allocation3 + $0xb0] sm:$0x1] }
 0x329   : > { %7052 = vrot.lane.b32.xlu1 %v8422_v12, %s8928_s6  ;;  %v4958_v39 = vor.u32 %v4957_v51, %v4953_v26  ;;  %v4963_v13 = vrot.slane %v4961_v4, 5  ;;  %v6137_v46 = vrot.slane %v6135_v7, 4  ;;  %v5170_v49 = vrot.slane %v12337_v43, 5  ;;  %v5215_v51 = vld [vmem:[#allocation3 + $0xa8] sm:$0xf] }
 0x32a   : > { %6878 = vrot.lane.b32.xlu0 %v8391_v2, %s8925_s28  ;;  %v4949_v21 = vrot.slane %v4948_v54, 4  ;;  %v6140_v0 = vrot.slane %v6138_v34, 5  ;;  %v8407_v9 = vcombine.low %v5822_v30, %v12352_v59  ;;  %v8264_v33 = vrot.slane %v5026_v35, 9  ;;  %v12381_v2 = vld [vmem:[#allocation3 + $0xac] sm:$0xf] }
 0x32b   : > { %v4959_v6 = vrot.slane %v4958_v39, 4  ;;  %v5172_v42 = vrot.slane %v5170_v49, 4  ;;  %v5173_v53 = vrot.slane %v4626_v50, 5  ;;  %v6144_v44 = vshll.u32 %v12352_v59, 16 }
 0x32c   : > { %v5171_v4 = vsel %vm9024_vm9, %v8264_v33, %v5170_v49  ;;  %v8305_v28 = vcombine.low %v8897_v47, %v8896_v63  ;;  %v6141_v12 = vor.u32 %v6140_v0, %v6137_v46  ;;  %v6150_v3 = vrot.slane %v6148_v40, 4 }
 0x32d   : > { %v4954_v30 = vsel %vm9111_vm14, %v4949_v21, %v4953_v26  ;;  %v4964_v7 = vsel %vm9111_vm14, %v4959_v6, %v4963_v13  ;;  %v5174_v50 = vsel %vm9024_vm9, %v5172_v42, %v5173_v53  ;;  %v6146_v35 = vrot.slane %v6144_v44, 5  ;;  %v12389_v26 = vpop.permute.xlu0 %6710  ;;  %v6242_v6 = vld [vmem:[#allocation3 + $0xa8] sm:$0xe]  ;;  %v12398_v42 = vpop.permute.xlu1 %6534 }
 0x32e   : > { %v8328_v54 = vcombine.low %v4954_v30, %v4964_v7  ;;  %6974 = vrot.lane.b32.xlu0 %v8407_v9, %s8923_s26  ;;  %v12386_v34 = vsel %vm3499_vm15, %v8305_v28, %v12198_v10  ;;  %v6142_v40 = vrot.slane %v6141_v12, 4  ;;  %v6154_v39 = vshll.u32 %v12370_v32, 16 }
 0x32f   : > { %v6151_v46 = vor.u32 %v6150_v3, %v6146_v35  ;;  %v7231_v13 = vsel %vm3581_vm2, %v12148_v55, %v11943_v60  ;;  %v5550_v49 = vshrl.u32 %v5215_v51, 16  ;;  %v5553_v21 = vshll.u32 %v5215_v51, 16  ;;  %v12992_v3 = vld [vmem:[#allocation14_spill] sm:$0xff] }
 0x330   : > { %6544 = vrot.lane.b32.xlu1 %v8328_v54, %s8924_s27  ;;  %v8344_v0 = vcombine.low %v5171_v4, %v5174_v50  ;;  %v6156_v9 = vrot.slane %v6154_v39, 5  ;;  %v7263_v10 = vsel %vm3614_vm4, %v7231_v13, %v12224_v18  ;;  %v5563_v33 = vshrl.u32 %v12381_v2, 16  ;;  %v12991_v18 = vld [vmem:[#allocation17_spill] sm:$0xff]  ;;  %v12415_v50 = vld [vmem:[#allocation3 + $0xb0] sm:$0x1] }
 0x331   : > { %v6152_v53 = vrot.slane %v6151_v46, 4  ;;  %v7295_v44 = vsel %vm3647_vm6, %v7263_v10, %v12061_v25  ;;  %v5552_v63 = vrot.slane %v5550_v49, 4  ;;  %v5555_v60 = vrot.slane %v5553_v21, 5  ;;  %v12423_v39 = vpop.permute.xlu0 %6786  ;;  %v6243_v21 = vld [vmem:[#allocation3 + $0xb4] sm:$0xe] }
 0x332   : > { %v6147_v55 = vsel %vm9111_vm14, %v6142_v40, %v6146_v35  ;;  %v7327_v4 = vsel %vm3680_vm8, %v7295_v44, %v11849_v48  ;;  %v8360_v47 = vcombine.low %v5215_v51, %v12381_v2  ;;  %v7261_v28 = vsel %vm3614_vm4, %v12326_v24, %v12991_v18  ;;  %v12993_v35 = vld [vmem:[#allocation18_spill] sm:$0xff]  ;;  %v12421_v40 = vld [vmem:[#allocation3 + $0xb8] sm:$0xf]  ;;  %v12434_v44 = vpop.permute.xlu1 %7040 }
 0x333   : > { %v6157_v12 = vsel %vm9111_vm14, %v6152_v53, %v6156_v9  ;;  %v7293_v25 = vsel %vm3647_vm6, %v7261_v28, %v12992_v3  ;;  %v8295_v30 = vrot.slane %v6242_v6, 9  ;;  %v6380_v7 = vrot.slane %v12352_v59, 5  ;;  %v12432_v53 = vld [vmem:[#allocation3 + $0xbc] sm:$0x1]  ;;  %v5634_v3 = vld [vmem:[#allocation3 + $0xa8] sm:$0xe] }
 0x334   : > { %6624 = vrot.lane.b32.xlu1 %v8344_v0, %s8921_s24  ;;  %v8423_v48 = vcombine.low %v6147_v55, %v6157_v12  ;;  %v7325_v51 = vsel %vm3680_vm8, %v7293_v25, %v12993_v35  ;;  %v5556_v54 = vor.u32 %v5555_v60, %v5552_v63  ;;  %v5559_v24 = vshll.u32 %v12381_v2, 16  ;;  %v8899_v63 = vld [vmem:[#allocation3 + $0x3c] sm:$0xf]  ;;  %v5027_v35 = vld [vmem:[#allocation3 + $0xa8] sm:$0xe] }
 0x335   : > { %v7357_v46 = vsel %vm3713_vm12, %v7325_v51, %v12229_v37  ;;  %v6382_v13 = vrot.slane %v6380_v7, 4  ;;  %v6383_v59 = vrot.slane %v12370_v32, 5  ;;  %v5565_v49 = vrot.slane %v5563_v33, 4  ;;  %v8898_v33 = vld [vmem:[#allocation3 + $0x40] sm:$0xf] }
 0x336   : > { %7054 = vrot.lane.b32.xlu0 %v8423_v48, %s8928_s6  ;;  %v5557_v0 = vrot.slane %v5556_v54, 4  ;;  %v5561_v9 = vrot.slane %v5559_v24, 5  ;;  %v5569_v10 = vshll.u32 %v12415_v50, 16  ;;  %v7389_v6 = vsel %vm3746_vm13, %v7357_v46, %v12036_v5  ;;  %v12457_v46 = vld [vmem:[#allocation3 + $0xac] sm:$0xf] }
 0x337   : > { %v6381_v37 = vsel %vm9024_vm9, %v8295_v30, %v6380_v7  ;;  %v6384_v32 = vsel %vm9024_vm9, %v6382_v13, %v6383_v59  ;;  %8743 = vmatmul.mubr.msk.bf16.gmra.mrb[4].mxu1 %vm12994_vm10, %v7389_v6  ;;  %v8304_v60 = vcombine.low %v8899_v63, %v8898_v33  ;;  %v6387_v55 = vrot.slane %v12421_v40, 5  ;;  %v5217_v6 = vld [vmem:[#allocation3 + $0xb4] sm:$0xf]  ;;  %vm13000_vm10 = vmmov %vm12985_vm7 }
 0x338   : > { %6720 = vrot.lane.b32.xlu1 %v8360_v47, %s8922_s25  ;;  %v8439_v5 = vcombine.low %v6381_v37, %v6384_v32  ;;  %v5562_v18 = vsel %vm9111_vm14, %v5557_v0, %v5561_v9  ;;  %v5566_v28 = vor.u32 %v5565_v49, %v5561_v9  ;;  %v8296_v12 = vrot.slane %v6243_v21, 9  ;;  %v12466_v21 = vld [vmem:[#allocation3 + $0xb0] sm:$0x1]  ;;  %v5824_v0 = vld [vmem:[#allocation3 + $0xb4] sm:$0xf]  ;;  %v12472_v37 = vpop.permute.xlu1 %6532 }
 0x339   : > { %v5571_v25 = vrot.slane %v5569_v10, 5  ;;  %v7159_v30 = vsel %vm3499_vm15, %v8304_v60, %v12249_v23  ;;  %v6389_v7 = vrot.slane %v6387_v55, 4  ;;  %v6390_v48 = vrot.slane %v12432_v53, 5  ;;  %v12459_v23 = vpop.permute.xlu0 %7126 }
 0x33a   : > { %7134 = vrot.lane.b32.xlu0 %v8439_v5, %s8926_s29  ;;  %v5567_v51 = vrot.slane %v5566_v28, 4  ;;  %v12451_v47 = vsel %vm3548_vm1, %v7159_v30, %v12047_v16  ;;  %v6388_v54 = vsel %vm9024_vm9, %v8296_v12, %v6387_v55  ;;  %v7359_v24 = vsel %vm3713_vm12, %v7327_v4, %v12142_v14 }
 0x33b   : > { %v6391_v13 = vsel %vm9024_vm9, %v6389_v7, %v6390_v48  ;;  %v7391_v59 = vsel %vm3746_vm13, %v7359_v24, %v11991_v61  ;;  %v8280_v49 = vrot.slane %v5634_v3, 9  ;;  %v5778_v16 = vrot.slane %v12381_v2, 5 }
 0x33c   : > { %v5572_v9 = vsel %vm9111_vm14, %v5567_v51, %v5571_v25  ;;  %v8440_v14 = vcombine.low %v6388_v54, %v6391_v13  ;;  %8746 = vmatprep.mubr.msk.bf16.mxu1 %vm12995_vm11, %v7391_v59  ;;  %v5781_v4 = vrot.slane %v12415_v50, 5  ;;  %v8265_v10 = vrot.slane %v5027_v35, 9  ;;  %v12480_v50 = vld [vmem:[#allocation3 + $0xb8] sm:$0xf]  ;;  %v12493_v59 = vld [vmem:[#allocation3 + $0xbc] sm:$0x1] }
 0x33d   : > { %v8376_v32 = vcombine.low %v5562_v18, %v5572_v9  ;;  %v5779_v61 = vsel %vm9024_vm9, %v8280_v49, %v5778_v16  ;;  %v5780_v2 = vrot.slane %v5778_v16, 4  ;;  %v5177_v33 = vrot.slane %v12457_v46, 5  ;;  %v12487_v35 = vpop.permute.xlu0 %6618 }
 0x33e   : > { %7136 = vrot.lane.b32.xlu0 %v8440_v14, %s8926_s29  ;;  %v5180_v63 = vrot.slane %v12466_v21, 5  ;;  %v8408_v60 = vcombine.low %v5824_v0, %v12421_v40  ;;  %v6159_v55 = vshrl.u32 %v5824_v0, 16  ;;  %v6162_v5 = vshll.u32 %v5824_v0, 16  ;;  %v12496_v14 = vld [vmem:[#allocation3 + $0xa8] sm:$0xf] }
 0x33f   : > { %6800 = vrot.lane.b32.xlu1 %v8376_v32, %s8927_s30  ;;  %v5782_v18 = vsel %vm9024_vm9, %v5780_v2, %v5781_v4  ;;  %v5178_v28 = vsel %vm9024_vm9, %v8265_v10, %v5177_v33  ;;  %v5179_v12 = vrot.slane %v5177_v33, 4  ;;  %v5574_v3 = vshrl.u32 %v5217_v6, 16  ;;  %v12498_v4 = vpop.permute.xlu1 %6872 }
 0x340   : > { %v8392_v25 = vcombine.low %v5779_v61, %v5782_v18  ;;  %v6161_v30 = vrot.slane %v6159_v55, 4  ;;  %v6164_v7 = vrot.slane %v6162_v5, 5  ;;  %v5577_v48 = vshll.u32 %v5217_v6, 16 }
 0x341   : > { %v5181_v51 = vsel %vm9024_vm9, %v5179_v12, %v5180_v63  ;;  %v5576_v54 = vrot.slane %v5574_v3, 4  ;;  %v5587_v24 = vshrl.u32 %v12480_v50, 16  ;;  %v8361_v13 = vcombine.low %v5217_v6, %v12480_v50 }
 0x342   : > { %v8345_v49 = vcombine.low %v5178_v28, %v5181_v51  ;;  %v5579_v16 = vrot.slane %v5577_v48, 5  ;;  %v6165_v0 = vor.u32 %v6164_v7, %v6161_v30  ;;  %v6168_v9 = vshll.u32 %v12421_v40, 16  ;;  %v5635_v30 = vld [vmem:[#allocation3 + $0xb4] sm:$0xe]  ;;  %v12510_v7 = vpop.permute.xlu0 %7124 }
 0x343   : > { %6880 = vrot.lane.b32.xlu1 %v8392_v25, %s8925_s28  ;;  %v6172_v10 = vshrl.u32 %v12421_v40, 16  ;;  %v6178_v32 = vshll.u32 %v12432_v53, 16  ;;  %v5583_v61 = vshll.u32 %v12480_v50, 16  ;;  %v5589_v6 = vrot.slane %v5587_v24, 4 }
 0x344   : > { %6626 = vrot.lane.b32.xlu0 %v8345_v49, %s8921_s24  ;;  %v6166_v2 = vrot.slane %v6165_v0, 4  ;;  %v6170_v33 = vrot.slane %v6168_v9, 5  ;;  %v5580_v63 = vor.u32 %v5579_v16, %v5576_v54  ;;  %v5593_v55 = vshll.u32 %v12493_v59, 16 }
 0x345   : > { %v6174_v5 = vrot.slane %v6172_v10, 4  ;;  %v6180_v18 = vrot.slane %v6178_v32, 5  ;;  %v5585_v28 = vrot.slane %v5583_v61, 5  ;;  %v4966_v12 = vshrl.u32 %v12496_v14, 16  ;;  %v12519_v10 = vld [vmem:[#allocation3 + $0xb4] sm:$0xf]  ;;  %v12521_v32 = vpop.permute.xlu1 %6616 }
 0x346   : > { %v6171_v40 = vsel %vm9111_vm14, %v6166_v2, %v6170_v33  ;;  %v5581_v3 = vrot.slane %v5580_v63, 4  ;;  %v5595_v53 = vrot.slane %v5593_v55, 5  ;;  %v4969_v25 = vshll.u32 %v12496_v14, 16 }
 0x347   : > { %6976 = vrot.lane.b32.xlu1 %v8408_v60, %s8923_s26  ;;  %v6175_v48 = vor.u32 %v6174_v5, %v6170_v33  ;;  %v5590_v51 = vor.u32 %v5589_v6, %v5585_v28  ;;  %v4968_v54 = vrot.slane %v4966_v12, 4  ;;  %v4975_v24 = vshll.u32 %v12457_v46, 16  ;;  %v12529_v12 = vld [vmem:[#allocation3 + $0xb8] sm:$0xf] }
 0x348   : > { %6722 = vrot.lane.b32.xlu0 %v8361_v13, %s8922_s25  ;;  %v5586_v49 = vsel %vm9111_vm14, %v5581_v3, %v5585_v28  ;;  %v4971_v16 = vrot.slane %v4969_v25, 5  ;;  %v4979_v0 = vshrl.u32 %v12457_v46, 16  ;;  %v4985_v9 = vshll.u32 %v12466_v21, 16 }
 0x349   : > { %v6176_v60 = vrot.slane %v6175_v48, 4  ;;  %v5591_v61 = vrot.slane %v5590_v51, 4  ;;  %v4977_v6 = vrot.slane %v4975_v24, 5  ;;  %v8281_v2 = vrot.slane %v5635_v30, 9  ;;  %v5826_v24 = vld [vmem:[#allocation3 + $0xc0] sm:$0xf] }
 0x34a   : > { %v4972_v33 = vor.u32 %v4971_v16, %v4968_v54  ;;  %v4981_v63 = vrot.slane %v4979_v0, 4  ;;  %v4987_v55 = vrot.slane %v4985_v9, 5  ;;  %v5785_v13 = vrot.slane %v12480_v50, 5  ;;  %v4628_v54 = vld [vmem:[#allocation3 + $0xbc] sm:$0x1]  ;;  %v12532_v16 = vpop.permute.xlu0 %6870 }
 0x34b   : > { %v6181_v5 = vsel %vm9111_vm14, %v6176_v60, %v6180_v18  ;;  %v5596_v28 = vsel %vm9111_vm14, %v5591_v61, %v5595_v53  ;;  %v5788_v21 = vrot.slane %v12493_v59, 5  ;;  %v4990_v3 = vshrl.u32 %v12519_v10, 16  ;;  %v12543_v60 = vpop.permute.xlu1 %6716 }
 0x34c   : > { %v8424_v25 = vcombine.low %v6171_v40, %v6181_v5  ;;  %v8377_v48 = vcombine.low %v5586_v49, %v5596_v28  ;;  %v4973_v30 = vrot.slane %v4972_v33, 4  ;;  %v4982_v51 = vor.u32 %v4981_v63, %v4977_v6  ;;  %12996 = vst [vmem:[#allocation6_spill] sm:$0xff] %v12543_v60  ;;  %v12547_v63 = vld [vmem:[#allocation3 + $0xc4] sm:$0xf] }
 0x34d   : > { %v5786_v50 = vsel %vm9024_vm9, %v8281_v2, %v5785_v13  ;;  %v5787_v18 = vrot.slane %v5785_v13, 4  ;;  %v4992_v0 = vrot.slane %v4990_v3, 4  ;;  %v4993_v53 = vshll.u32 %v12519_v10, 16 }
 0x34e   : > { %7056 = vrot.lane.b32.xlu1 %v8424_v25, %s8928_s6  ;;  %6802 = vrot.lane.b32.xlu0 %v8377_v48, %s8927_s30  ;;  %v4978_v59 = vsel %vm9111_vm14, %v4973_v30, %v4977_v6  ;;  %v4983_v40 = vrot.slane %v4982_v51, 4  ;;  %v4999_v49 = vshll.u32 %v12529_v12, 16  ;;  %v5003_v9 = vshrl.u32 %v12529_v12, 16  ;;  %v12556_v43 = vpop.permute.xlu0 %6970 }
 0x34f   : > { %v5789_v61 = vsel %vm9024_vm9, %v5787_v18, %v5788_v21  ;;  %v4995_v2 = vrot.slane %v4993_v53, 5  ;;  %v5009_v33 = vshll.u32 %v4628_v54, 16  ;;  %v6183_v13 = vshrl.u32 %v5826_v24, 16 }
 0x350   : > { %v4988_v5 = vsel %vm9111_vm14, %v4983_v40, %v4987_v55  ;;  %v8393_v28 = vcombine.low %v5786_v50, %v5789_v61  ;;  %v5001_v6 = vrot.slane %v4999_v49, 5  ;;  %v5005_v3 = vrot.slane %v5003_v9, 4  ;;  %v12997_v55 = vld [vmem:[#allocation16_spill] sm:$0xff]  ;;  %v5844_v9 = vld [vmem:[#allocation3 + $0xc8] sm:$0x1] }
 0x351   : > { %v7203_v25 = vsel %vm3548_vm1, %v12386_v34, %v12010_v20  ;;  %v8329_v48 = vcombine.low %v4978_v59, %v4988_v5  ;;  %v4996_v30 = vor.u32 %v4995_v2, %v4992_v0  ;;  %v6185_v51 = vrot.slane %v6183_v13, 4  ;;  %v12565_v2 = vpop.permute.xlu1 %6792 }
 0x352   : > { %6882 = vrot.lane.b32.xlu0 %v8393_v28, %s8925_s28  ;;  %v5006_v21 = vor.u32 %v5005_v3, %v5001_v6  ;;  %v6186_v18 = vshll.u32 %v5826_v24, 16  ;;  %v6196_v53 = vshrl.u32 %v12547_v63, 16  ;;  %v7233_v50 = vsel %vm3581_vm2, %v12451_v47, %v12997_v55  ;;  %v8900_v55 = vld [vmem:[#allocation3 + $0x64] sm:$0xf] }
 0x353   : > { %6546 = vrot.lane.b32.xlu1 %v8329_v48, %s8924_s27  ;;  %v4997_v40 = vrot.slane %v4996_v30, 4  ;;  %v5011_v20 = vrot.slane %v5009_v33, 5  ;;  %v5184_v34 = vrot.slane %v12529_v12, 5  ;;  %v8409_v49 = vcombine.low %v5826_v24, %v12547_v63  ;;  %v5219_v24 = vld [vmem:[#allocation3 + $0xc0] sm:$0xf] }
 0x354   : > { %v5007_v0 = vrot.slane %v5006_v21, 4  ;;  %v6188_v59 = vrot.slane %v6186_v18, 5  ;;  %v6192_v61 = vshll.u32 %v12547_v63, 16  ;;  %v8266_v13 = vrot.slane %v5028_v45, 9  ;;  %v8901_v45 = vld [vmem:[#allocation3 + $0x60] sm:$0xf] }
 0x355   : > { %v5186_v5 = vrot.slane %v5184_v34, 4  ;;  %v5187_v28 = vrot.slane %v4628_v54, 5  ;;  %v6198_v3 = vrot.slane %v6196_v53, 4  ;;  %v5002_v47 = vsel %vm9111_vm14, %v4997_v40, %v5001_v6 }
 0x356   : > { %v5012_v33 = vsel %vm9111_vm14, %v5007_v0, %v5011_v20  ;;  %6978 = vrot.lane.b32.xlu0 %v8409_v49, %s8923_s26  ;;  %v6189_v48 = vor.u32 %v6188_v59, %v6185_v51  ;;  %v6194_v30 = vrot.slane %v6192_v61, 5  ;;  %v8307_v60 = vcombine.low %v8901_v45, %v8900_v55  ;;  %v12578_v0 = vld [vmem:[#allocation3 + $0xc4] sm:$0xf]  ;;  %v12580_v51 = vpop.permute.xlu0 %7046  ;;  %v5236_v45 = vld [vmem:[#allocation3 + $0xc8] sm:$0x1] }
 0x357   : > { %v8330_v21 = vcombine.low %v5002_v47, %v5012_v33  ;;  %v5188_v18 = vsel %vm9024_vm9, %v5186_v5, %v5187_v28  ;;  %v6202_v54 = vshll.u32 %v5844_v9, 16  ;;  %v5185_v53 = vsel %vm9024_vm9, %v8266_v13, %v5184_v34 }
 0x358   : > { %v6190_v6 = vrot.slane %v6189_v48, 4  ;;  %v6199_v40 = vor.u32 %v6198_v3, %v6194_v30  ;;  %v7235_v20 = vsel %vm3581_vm2, %v7203_v25, %v12186_v58  ;;  %v8346_v59 = vcombine.low %v5185_v53, %v5188_v18  ;;  %v6244_v25 = vld [vmem:[#allocation3 + $0xc0] sm:$0xe]  ;;  %v12589_v3 = vpop.permute.xlu1 %6968  ;;  %v12998_v18 = vld [vmem:[#allocation10_spill] sm:$0xff] }
 0x359   : > { %6548 = vrot.lane.b32.xlu1 %v8330_v21, %s8924_s27  ;;  %v7267_v49 = vsel %vm3614_vm4, %v7235_v20, %v12423_v39  ;;  %v5598_v61 = vshrl.u32 %v5219_v24, 16  ;;  %v5601_v5 = vshll.u32 %v5219_v24, 16  ;;  %v6204_v28 = vrot.slane %v6202_v54, 5  ;;  %v12999_v53 = vld [vmem:[#allocation5_spill] sm:$0xff] }
 0x35a   : > { %v6195_v34 = vsel %vm9111_vm14, %v6190_v6, %v6194_v30  ;;  %v6200_v13 = vrot.slane %v6199_v40, 4  ;;  %v7299_v58 = vsel %vm3647_vm6, %v7267_v49, %v12312_v56  ;;  %v5611_v39 = vshrl.u32 %v12578_v0, 16 }
 0x35b   : > { %v7331_v47 = vsel %vm3680_vm8, %v7299_v58, %v12103_v19  ;;  %v5600_v33 = vrot.slane %v5598_v61, 4  ;;  %v5603_v48 = vrot.slane %v5601_v5, 5  ;;  %v8362_v30 = vcombine.low %v5219_v24, %v12578_v0  ;;  %v12606_v5 = vpop.permute.xlu0 %6714  ;;  %v8903_v58 = vld [vmem:[#allocation3 + $0x54] sm:$0xf] }
 0x35c   : > { %v6205_v21 = vsel %vm9111_vm14, %v6200_v13, %v6204_v28  ;;  %v7265_v55 = vsel %vm3614_vm4, %v7233_v50, %v12998_v18  ;;  %v6394_v56 = vrot.slane %v12547_v63, 5  ;;  %v8297_v6 = vrot.slane %v6244_v25, 9  ;;  %v8902_v28 = vld [vmem:[#allocation3 + $0x58] sm:$0xf]  ;;  %v12623_v18 = vld [vmem:[#allocation3 + $0xd0] sm:$0xf] }
 0x35d   : > { %6628 = vrot.lane.b32.xlu1 %v8346_v59, %s8921_s24  ;;  %v8425_v54 = vcombine.low %v6195_v34, %v6205_v21  ;;  %v7297_v19 = vsel %vm3647_vm6, %v7265_v55, %v12999_v53  ;;  %v5604_v40 = vor.u32 %v5603_v48, %v5600_v33  ;;  %v6397_v61 = vrot.slane %v5844_v9, 5  ;;  %v406_v33 = vld [vmem:[#allocation3 + $0xcc] sm:$0x1]  ;;  %v12617_v48 = vpop.permute.xlu1 %6538  ;;  %v460_v55 = vld [vmem:[#allocation3 + $0xd4] sm:$0x1] }
 0x35e   : > { %v7329_v20 = vsel %vm3680_vm8, %v7297_v19, %v12157_v38  ;;  %v6396_v49 = vrot.slane %v6394_v56, 4  ;;  %v5607_v24 = vshll.u32 %v12578_v0, 16  ;;  %v6395_v50 = vsel %vm9024_vm9, %v8297_v6, %v6394_v56 }
 0x35f   : > { %7058 = vrot.lane.b32.xlu0 %v8425_v54, %s8928_s6  ;;  %v7361_v63 = vsel %vm3713_vm12, %v7329_v20, %v12434_v44  ;;  %v5613_v59 = vrot.slane %v5611_v39, 4  ;;  %v5617_v34 = vshll.u32 %v5236_v45, 16  ;;  %v8306_v25 = vcombine.low %v8903_v58, %v8902_v28  ;;  %v6791_v19 = vpop.permute.xlu0 %6790 }
 0x360   : > { %v6398_v13 = vsel %vm9024_vm9, %v6396_v49, %v6397_v61  ;;  %v5609_v38 = vrot.slane %v5607_v24, 5  ;;  %v7393_v9 = vsel %vm3746_vm13, %v7361_v63, %v12295_v15  ;;  %v5605_v21 = vrot.slane %v5604_v40, 4  ;;  %v5636_v40 = vld [vmem:[#allocation3 + $0xc0] sm:$0xe] }
 0x361   : > { %6724 = vrot.lane.b32.xlu1 %v8362_v30, %s8922_s25  ;;  %v8441_v44 = vcombine.low %v6395_v50, %v6398_v13  ;;  %8747 = vmatmul.mubr.msk.bf16.gmra.mrb[8].mxu1 %vm12985_vm7, %v7393_v9  ;;  %v7363_v39 = vsel %vm3713_vm12, %v7331_v47, %v12362_v52  ;;  %v7168_v15 = vsel %vm3499_vm15, %v8307_v60, %v12398_v42  ;;  %v5792_v52 = vrot.slane %v12578_v0, 5  ;;  %v13001_v49 = vld [vmem:[#allocation13_spill] sm:$0xff]  ;;  %v7045_v63 = vpop.permute.xlu1 %7044 }
 0x362   : > { %v5614_v56 = vor.u32 %v5613_v59, %v5609_v38  ;;  %v7165_v54 = vsel %vm3499_vm15, %v8306_v25, %v12472_v37  ;;  %v7395_v30 = vsel %vm3746_vm13, %v7363_v39, %v12240_v17  ;;  %v407_v47 = vsel %vm8972_vm3, 0, %v406_v33  ;;  %vm13002_vm3 = vmmov %vm12985_vm7 }
 0x363   : > { %7138 = vrot.lane.b32.xlu0 %v8441_v44, %s8926_s29  ;;  %v7205_v53 = vsel %vm3548_vm1, %v7165_v54, %v12301_v41  ;;  %8750 = vmatprep.mubr.msk.bf16.mxu1 %vm13000_vm10, %v7395_v30  ;;  %v5619_v60 = vrot.slane %v5617_v34, 5  ;;  %408 = vst [vmem:[#allocation3 + $0xcc] sm:$0x1] %v407_v47  ;;  %v6220_v37 = vshrl.u32 %v12623_v18, 16  ;;  %v461_v17 = vsel %vm8995_vm5, 0, %v460_v55  ;;  %v12664_v33 = vpop.permute.xlu0 %7128  ;;  %vm13003_vm5 = vmmov %vm13002_vm3 }
 0x364   : > { %v5615_v42 = vrot.slane %v5614_v56, 4  ;;  %v7207_v6 = vsel %vm3548_vm1, %v7168_v15, %v12276_v22  ;;  %v5610_v41 = vsel %vm9111_vm14, %v5605_v21, %v5609_v38  ;;  %v5794_v0 = vrot.slane %v5792_v52, 4  ;;  %462 = vst [vmem:[#allocation3 + $0xd4] sm:$0x1] %v461_v17  ;;  %vm13007_vm11 = vmmov %vm13002_vm3 }
 0x365   : > { %v6216_v1 = vshll.u32 %v12623_v18, 16  ;;  %v7237_v61 = vsel %vm3581_vm2, %v7205_v53, %v13001_v49  ;;  %v5795_v8 = vrot.slane %v5236_v45, 5  ;;  %v6222_v24 = vrot.slane %v6220_v37, 4  ;;  %v6537_v54 = vpop.permute.xlu1 %6536  ;;  %v6245_v53 = vld [vmem:[#allocation3 + $0xcc] sm:$0xe]  ;;  %vm13008_vm7 = vmmov %vm13002_vm3 }
 0x366   : > { %v5620_v20 = vsel %vm9111_vm14, %v5615_v42, %v5619_v60  ;;  %v8282_v22 = vrot.slane %v5636_v40, 9  ;;  %v7239_v13 = vsel %vm3581_vm2, %v7207_v6, %v12389_v26  ;;  %v7269_v9 = vsel %vm3614_vm4, %v7237_v61, %v12347_v27  ;;  %vm13011_vm10 = vmmov %vm13002_vm3 }
 0x367   : > { %v8378_v50 = vcombine.low %v5610_v41, %v5620_v20  ;;  %v6218_v59 = vrot.slane %v6216_v1, 5  ;;  %v5796_v34 = vsel %vm9024_vm9, %v5794_v0, %v5795_v8  ;;  %v7271_v38 = vsel %vm3614_vm4, %v7239_v13, %v6791_v19  ;;  %v6875_v41 = vpop.permute.xlu0 %6874  ;;  %v8906_v13 = vld [vmem:[#allocation3 + $0x70] sm:$0xf] }
 0x368   : > { %v5793_v45 = vsel %vm9024_vm9, %v8282_v22, %v5792_v52  ;;  %v7303_v58 = vsel %vm3647_vm6, %v7271_v38, %v12532_v16  ;;  %v7301_v25 = vsel %vm3647_vm6, %v7269_v9, %v12283_v57  ;;  %v6401_v56 = vrot.slane %v12623_v18, 5  ;;  %v8907_v38 = vld [vmem:[#allocation3 + $0x6c] sm:$0xf] }
 0x369   : > { %6804 = vrot.lane.b32.xlu1 %v8378_v50, %s8927_s30  ;;  %v6223_v28 = vor.u32 %v6222_v24, %v6218_v59  ;;  %v8394_v26 = vcombine.low %v5793_v45, %v5796_v34  ;;  %v7335_v21 = vsel %vm3680_vm8, %v7303_v58, %v12339_v11  ;;  %v7333_v27 = vsel %vm3680_vm8, %v7301_v25, %v12368_v36  ;;  %v6877_v0 = vpop.permute.xlu1 %6876  ;;  %v8905_v50 = vld [vmem:[#allocation3 + $0x78] sm:$0xf] }
 0x36a   : > { %v5828_v44 = vld [vmem:[#allocation3 + $0xcc] sm:$0xf]  ;;  %v7365_v16 = vsel %vm3713_vm12, %v7333_v27, %v7045_v63  ;;  %v7367_v42 = vsel %vm3713_vm12, %v7335_v21, %v12580_v51  ;;  %v8298_v19 = vrot.slane %v6245_v53, 9  ;;  %v8313_v51 = vcombine.low %v12496_v14, %v12457_v46  ;;  %v8904_v63 = vld [vmem:[#allocation3 + $0x7c] sm:$0xf] }
 0x36b   : > { %v6207_v39 = vshrl.u32 %v5828_v44, 16  ;;  %v6210_v55 = vshll.u32 %v5828_v44, 16  ;;  %v5845_v15 = vld [vmem:[#allocation3 + $0xd4] sm:$0x1]  ;;  %v8410_v57 = vcombine.low %v5828_v44, %v12623_v18  ;;  %v7397_v11 = vsel %vm3746_vm13, %v7365_v16, %v12510_v7  ;;  %v7051_v8 = vpop.permute.xlu0 %7050  ;;  %v12769_v46 = vld [vmem:[%s12910_s4] ss:$0 sm:$0xff] }
 0x36c   : > { %v6226_v30 = vshll.u32 %v5845_v15, 16  ;;  %v6224_v36 = vrot.slane %v6223_v28, 4  ;;  %8751 = vmatmul.mubr.msk.bf16.gmra.mrb[12].mxu1 %vm13002_vm3, %v7397_v11  ;;  %v7399_v37 = vsel %vm3746_vm13, %v7367_v42, %v12459_v23  ;;  %v6403_v18 = vrot.slane %v6401_v56, 4 }
 0x36d   : > { %6884 = vrot.lane.b32.xlu1 %v8394_v26, %s8925_s28  ;;  %v6209_v52 = vrot.slane %v6207_v39, 4  ;;  %v6212_v47 = vrot.slane %v6210_v55, 5  ;;  %v6404_v6 = vrot.slane %v5845_v15, 5  ;;  %8754 = vmatprep.mubr.msk.bf16.mxu1 %vm13003_vm5, %v7399_v37  ;;  %v8314_v23 = vcombine.low %v12519_v10, %v12529_v12  ;;  %v6621_v34 = vpop.permute.xlu1 %6620  ;;  %s12783_s28 = scalar_lea.vmem %s12911_s5, %s8499_s20  ;;  %vm13012_vm5 = vmmov %vm13002_vm3  ;;  %v8631_v10 = vld [vmem:[%s9005_s23 + $0x18] sm:$0xff]   ;;  %v8630_v12 = vld [vmem:[%s9005_s23 + $0x10] sm:$0xff]  }
 0x36e   : > { %v6228_v60 = vrot.slane %v6226_v30, 5  ;;  %v6402_v20 = vsel %vm9024_vm9, %v8298_v19, %v6401_v56  ;;  %v8309_v22 = vcombine.low %v8905_v50, %v8904_v63  ;;  %v8308_v9 = vcombine.low %v8907_v38, %v8906_v13 }
 0x36f   : > { %v6213_v17 = vor.u32 %v6212_v47, %v6209_v52  ;;  %v6405_v49 = vsel %vm9024_vm9, %v6403_v18, %v6404_v6  ;;  %vm13004_vm9 = vmmov %vm13002_vm3  ;;  %v13006_v52 = vld [vmem:[#allocation6_spill] sm:$0xff] }
 0x370   : > { %v6229_v40 = vsel %vm9111_vm14, %v6224_v36, %v6228_v60  ;;  %v8442_v24 = vcombine.low %v6402_v20, %v6405_v49  ;;  %v7174_v62 = vsel %vm3499_vm15, %v8309_v22, %v12617_v48  ;;  %v7171_v29 = vsel %vm3499_vm15, %v8308_v9, %v6537_v54 }
 0x371   : > { %6980 = vrot.lane.b32.xlu1 %v8410_v57, %s8923_s26  ;;  %v6214_v7 = vrot.slane %v6213_v17, 4  ;;  %v7211_v45 = vsel %vm3548_vm1, %v7174_v62, %v12487_v35  ;;  %v7209_v28 = vsel %vm3548_vm1, %v7171_v29, %v12521_v32 }
 0x372   : > { %v7243_v25 = vsel %vm3581_vm2, %v7211_v45, %v12606_v5  ;;  %v7241_v26 = vsel %vm3581_vm2, %v7209_v28, %v12321_v31  ;;  %v13009_v28 = vld [vmem:[#allocation9_spill] sm:$0xff] }
 0x373   : > { %v6219_v1 = vsel %vm9111_vm14, %v6214_v7, %v6218_v59  ;;  %v6795_v59 = vpop.permute.xlu0 %6794  ;;  %v7273_v39 = vsel %vm3614_vm4, %v7241_v26, %v12565_v2  ;;  %vm13005_vm14 = vmmov %vm13002_vm3  ;;  %v8911_v7 = vld [vmem:[#allocation3 + $0x90] sm:$0xf] }
 0x374   : > { %v8426_v61 = vcombine.low %v6219_v1, %v6229_v40  ;;  %v6797_v58 = vpop.permute.xlu1 %6796  ;;  %v7275_v48 = vsel %vm3614_vm4, %v7243_v25, %v6795_v59  ;;  %v7305_v55 = vsel %vm3647_vm6, %v7273_v39, %v12498_v4  ;;  %v8909_v4 = vld [vmem:[#allocation3 + $0x84] sm:$0xf] }
 0x375   : > { %v7307_v21 = vsel %vm3647_vm6, %v7275_v48, %v6875_v41  ;;  %v7337_v31 = vsel %vm3680_vm8, %v7305_v55, %v12589_v3  ;;  %v8910_v41 = vld [vmem:[#allocation3 + $0x94] sm:$0xf] }
 0x376   : > { %7060 = vrot.lane.b32.xlu1 %v8426_v61, %s8928_s6  ;;  %v7339_v32 = vsel %vm3680_vm8, %v7307_v21, %v12556_v43  ;;  %v8908_v43 = vld [vmem:[#allocation3 + $0x88] sm:$0xf]  ;;  %v8311_v40 = vcombine.low %v8911_v7, %v8910_v41 }
 0x377   : > { %v7131_v44 = vpop.permute.xlu0 %7130  ;;  %v7371_v5 = vsel %vm3713_vm12, %v7339_v32, %v7051_v8  ;;  %v8310_v57 = vcombine.low %v8909_v4, %v8908_v43 }
 0x378   : > { %v6973_v27 = vpop.permute.xlu1 %6972  ;;  %v7403_v2 = vsel %vm3746_vm13, %v7371_v5, %v7131_v44 }
 0x37a   : > { %7140 = vrot.lane.b32.xlu1 %v8442_v24, %s8926_s29 }
 0x37f   : > { %v7133_v35 = vpop.permute.xlu0 %7132 }
 0x389   : > { %v6623_v16 = vpop.permute.xlu0 %6622 }
 0x38a   : > { %v7049_v15 = vpop.permute.xlu1 %7048 }
 0x38b   : > { %v7369_v56 = vsel %vm3713_vm12, %v7337_v31, %v7049_v15 }
 0x38c   : > { %v7401_v54 = vsel %vm3746_vm13, %v7369_v56, %v12664_v33 }
 0x38d   : > { %8755 = vmatmul.mubr.msk.bf16.gmra.mrb[16].mxu1 %vm13004_vm9, %v7401_v54  ;;  %v6719_v11 = vpop.permute.xlu0 %6718 }
 0x38e   : > { %8758 = vmatprep.mubr.msk.bf16.mxu1 %vm13005_vm14, %v7403_v2 }
 0x390   : > { %v6541_v30 = vpop.permute.xlu1 %6540 }
 0x391   : > { %v7177_v53 = vsel %vm3499_vm15, %v8310_v57, %v6541_v30 }
 0x392   : > { %v7213_v3 = vsel %vm3548_vm1, %v7177_v53, %v6621_v34 }
 0x393   : > { %v7245_v47 = vsel %vm3581_vm2, %v7213_v3, %v13006_v52  ;;  %v8629_v52 = vld [vmem:[%s9005_s23 + $0x8] sm:$0xff]  }
 0x394   : > { %v7277_v33 = vsel %vm3614_vm4, %v7245_v47, %v6797_v58  ;;  %v13010_v58 = vld [vmem:[#allocation11_spill] sm:$0xff]  ;;  %v8566_v47 = vld [vmem:[%s9005_s23] sm:$0xff]  }
 0x395   : > { %v7309_v60 = vsel %vm3647_vm6, %v7277_v33, %v6877_v0  ;;  %v8312_v25 = vcombine.low %v13010_v58, %v13009_v28 }
 0x396   : > { %v6543_v36 = vpop.permute.xlu1 %6542  ;;  %v7341_v37 = vsel %vm3680_vm8, %v7309_v60, %v6973_v27 }
 0x397   : > { %v7180_v1 = vsel %vm3499_vm15, %v8311_v40, %v6543_v36  ;;  %v8568_v40 = vunpack.c.h.bf16 %v8566_v47 }
 0x398   : > { %v6799_v42 = vpop.permute.xlu0 %6798  ;;  %v7215_v61 = vsel %vm3548_vm1, %v7180_v1, %v6623_v16 }
 0x399   : > { %v7247_v0 = vsel %vm3581_vm2, %v7215_v61, %v6719_v11 }
 0x39a   : > { %v7279_v63 = vsel %vm3614_vm4, %v7247_v0, %v6799_v42  ;;  %v8571_v42 = vunpack.c.l.bf16 %v8629_v52 }
 0x39b   : > { %v7053_v17 = vpop.permute.xlu1 %7052 }
 0x39c   : > { %v7373_v19 = vsel %vm3713_vm12, %v7341_v37, %v7053_v17  ;;  %v6879_v18 = vpop.permute.xlu0 %6878  ;;  %v8567_v17 = vunpack.c.l.bf16 %v8566_v47 }
 0x39d   : > { %v7405_v6 = vsel %vm3746_vm13, %v7373_v19, %v7133_v35  ;;  %v7311_v50 = vsel %vm3647_vm6, %v7279_v63, %v6879_v18 }
 0x39e   : > { %8759 = vmatmul.mubr.msk.bf16.gmra.mrb[20].mxu1 %vm13007_vm11, %v7405_v6  ;;  %v8572_v6 = vunpack.c.h.bf16 %v8629_v52 }
 0x3a0   : > { %v6975_v49 = vpop.permute.xlu0 %6974 }
 0x3a1   : > { %v7343_v22 = vsel %vm3680_vm8, %v7311_v50, %v6975_v49 }
 0x3a2   : > { %v6545_v20 = vpop.permute.xlu1 %6544 }
 0x3a3   : > { %v7183_v44 = vsel %vm3499_vm15, %v8312_v25, %v6545_v20 }
 0x3a6   : > { %v6625_v8 = vpop.permute.xlu1 %6624 }
 0x3a7   : > { %v7217_v21 = vsel %vm3548_vm1, %v7183_v44, %v6625_v8 }
 0x3a8   : > { %v7055_v24 = vpop.permute.xlu0 %7054 }
 0x3a9   : > { %v7375_v13 = vsel %vm3713_vm12, %v7343_v22, %v7055_v24 }
 0x3aa   : > { %v6721_v34 = vpop.permute.xlu1 %6720 }
 0x3ab   : > { %v7249_v27 = vsel %vm3581_vm2, %v7217_v21, %v6721_v34 }
 0x3ac   : > { %v7135_v38 = vpop.permute.xlu0 %7134 }
 0x3ad   : > { %v7407_v9 = vsel %vm3746_vm13, %v7375_v13, %v7135_v38 }
 0x3ae   : > { %8762 = vmatprep.mubr.msk.bf16.mxu1 %vm13008_vm7, %v7407_v9 }
 0x3b0   : > { %v7137_v62 = vpop.permute.xlu0 %7136 }
 0x3b1   : > { %v6801_v29 = vpop.permute.xlu1 %6800 }
 0x3b2   : > { %v7281_v39 = vsel %vm3614_vm4, %v7249_v27, %v6801_v29 }
 0x3b5   : > { %v6881_v59 = vpop.permute.xlu1 %6880 }
 0x3b6   : > { %v6627_v45 = vpop.permute.xlu0 %6626  ;;  %v7313_v35 = vsel %vm3647_vm6, %v7281_v39, %v6881_v59 }
 0x3b9   : > { %v6977_v26 = vpop.permute.xlu1 %6976 }
 0x3ba   : > { %v6723_v48 = vpop.permute.xlu0 %6722  ;;  %v7345_v32 = vsel %vm3680_vm8, %v7313_v35, %v6977_v26 }
 0x3c0   : > { %v7057_v55 = vpop.permute.xlu1 %7056  ;;  %v6803_v5 = vpop.permute.xlu0 %6802 }
 0x3c1   : > { %v7377_v31 = vsel %vm3713_vm12, %v7345_v32, %v7057_v55  ;;  %v8575_v55 = vunpack.c.l.bf16 %v8630_v12 }
 0x3c2   : > { %v7409_v15 = vsel %vm3746_vm13, %v7377_v31, %v7137_v62 }
 0x3c3   : > { %8763 = vmatmul.mubr.msk.bf16.gmra.mrb[24].mxu1 %vm13011_vm10, %v7409_v15  ;;  %v8580_v15 = vunpack.c.h.bf16 %v8631_v10 }
 0x3c4   : > { %v6883_v16 = vpop.permute.xlu0 %6882 }
 0x3c5   : > { %v6547_v56 = vpop.permute.xlu1 %6546 }
 0x3c6   : > { %v7186_v54 = vsel %vm3499_vm15, %v8313_v51, %v6547_v56 }
 0x3c7   : > { %v7219_v2 = vsel %vm3548_vm1, %v7186_v54, %v6627_v45  ;;  %v8576_v54 = vunpack.c.h.bf16 %v8630_v12 }
 0x3c8   : > { %v7251_v43 = vsel %vm3581_vm2, %v7219_v2, %v6723_v48  ;;  %v6979_v57 = vpop.permute.xlu0 %6978 }
 0x3c9   : > { %v7283_v30 = vsel %vm3614_vm4, %v7251_v43, %v6803_v5 }
 0x3ca   : > { %v7315_v3 = vsel %vm3647_vm6, %v7283_v30, %v6883_v16 }
 0x3cb   : > { %v6549_v4 = vpop.permute.xlu1 %6548  ;;  %v7347_v33 = vsel %vm3680_vm8, %v7315_v3, %v6979_v57 }
 0x3cc   : > { %v7189_v28 = vsel %vm3499_vm15, %v8314_v23, %v6549_v4  ;;  %v8579_v23 = vunpack.c.l.bf16 %v8631_v10 }
 0x3cf   : > { %v6629_v53 = vpop.permute.xlu1 %6628 }
 0x3d0   : > { %v7221_v58 = vsel %vm3548_vm1, %v7189_v28, %v6629_v53  ;;  %v8634_v28 = vld [vmem:[%s9005_s23 + $0x30] sm:$0xff]  }
 0x3d1   : > { %v7059_v11 = vpop.permute.xlu0 %7058 }
 0x3d2   : > { %v7379_v14 = vsel %vm3713_vm12, %v7347_v33, %v7059_v11 }
 0x3d3   : > { %v6725_v51 = vpop.permute.xlu1 %6724 }
 0x3d4   : > { %v7253_v25 = vsel %vm3581_vm2, %v7221_v58, %v6725_v51 }
 0x3d5   : > { %v7139_v36 = vpop.permute.xlu0 %7138 }
 0x3d6   : > { %v7411_v60 = vsel %vm3746_vm13, %v7379_v14, %v7139_v36  ;;  %v8740_v37 = vpop.f32.mrb[0].mxu1 }
 0x3d7   : > { %8766 = vmatprep.mubr.msk.bf16.mxu1 %vm13002_vm3, %v7411_v60  ;;  %v7535_v19 = vadd.f32 %v8740_v37, %v12769_v46  ;;  %v7526_v18 = vpop.f32.mrb[1].mxu1  ;;  %v8633_v60 = vld [vmem:[%s9005_s23 + $0x28] sm:$0xff]   ;;  %v8632_v37 = vld [vmem:[%s9005_s23 + $0x20] sm:$0xff]  }
 0x3d8   : > { %v7527_v41 = vadd.f32 %v12769_v46, %v7526_v18  ;;  %v8741_v7 = vpop.f32.mrb[2].mxu1  ;;  %v8583_v18 = vunpack.c.l.bf16 %v8632_v37 }
 0x3d9   : > { %v7719_v1 = vadd.f32 %v8571_v42, %v7535_v19  ;;  %v7538_v20 = vadd.f32 %v8741_v7, %v12769_v46  ;;  %v7529_v49 = vpop.f32.mrb[3].mxu1  ;;  %v8588_v7 = vunpack.c.h.bf16 %v8633_v60 }
 0x3da   : > { %v7717_v61 = vadd.f32 %v8567_v17, %v7527_v41  ;;  %v7530_v0 = vadd.f32 %v12769_v46, %v7529_v49  ;;  %v8587_v17 = vunpack.c.l.bf16 %v8633_v60 }
 0x3db   : > { %v6805_v8 = vpop.permute.xlu1 %6804  ;;  %v7751_v24 = vmax.f32 %v7719_v1, 0.0  ;;  %v7720_v63 = vadd.f32 %v8572_v6, %v7538_v20  ;;  %v8584_v20 = vunpack.c.h.bf16 %v8632_v37 }
 0x3dc   : > { %v7749_v50 = vmax.f32 %v7717_v61, 0.0  ;;  %v7718_v22 = vadd.f32 %v8568_v40, %v7530_v0  ;;  %v7285_v48 = vsel %vm3614_vm4, %v7253_v25, %v6805_v8 }
 0x3dd   : > { %v8535_v34 = vpack.c.bf16 %v7751_v24, %v7751_v24  ;;  %v7752_v13 = vmax.f32 %v7720_v63, 0.0 }
 0x3de   : > { %v8533_v38 = vpack.c.bf16 %v7749_v50, %v7749_v50  ;;  %v7750_v9 = vmax.f32 %v7718_v22, 0.0 }
 0x3df   : > { %v6885_v62 = vpop.permute.xlu1 %6884  ;;  %7911 = vst.msk [vmem:[%s12783_s28 + $0x8] sm:$0xf] %vm226_vm0, %v8535_v34  ;;  %v8536_v29 = vpack.c.bf16 %v7752_v13, %v7752_v13 }
 0x3e0   : > { %7909 = vst.msk [vmem:[%s12783_s28] sm:$0xf] %vm226_vm0, %v8533_v38  ;;  %v8534_v59 = vpack.c.bf16 %v7750_v9, %v7750_v9  ;;  %v7317_v44 = vsel %vm3647_vm6, %v7285_v48, %v6885_v62 }
 0x3e1   : > { %7912 = vst.msk [vmem:[%s12783_s28 + $0xc] sm:$0xf] %vm226_vm0, %v8536_v29 }
 0x3e2   : > { %7910 = vst.msk [vmem:[%s12783_s28 + $0x4] sm:$0xf] %vm226_vm0, %v8534_v59  ;;  %v8635_v59 = vld [vmem:[%s9005_s23 + $0x38] sm:$0xff]  }
 0x3e3   : > { %v6981_v45 = vpop.permute.xlu1 %6980  ;;  %v8595_v58 = vunpack.c.l.bf16 %v8635_v59 }
 0x3e4   : > { %v7349_v21 = vsel %vm3680_vm8, %v7317_v44, %v6981_v45 }
 0x3e8   : > { %v7061_v26 = vpop.permute.xlu1 %7060 }
 0x3e9   : > { %v7381_v27 = vsel %vm3713_vm12, %v7349_v21, %v7061_v26  ;;  %v8591_v26 = vunpack.c.l.bf16 %v8634_v28  ;;  %v8596_v21 = vunpack.c.h.bf16 %v8635_v59 }
 0x3ec   : > { %v7141_v39 = vpop.permute.xlu1 %7140 }
 0x3ed   : > { %v7413_v35 = vsel %vm3746_vm13, %v7381_v27, %v7141_v39 }
 0x3ee   : > { %8767 = vmatmul.mubr.msk.bf16.gmra.mrb[28].mxu1 %vm13012_vm5, %v7413_v35  ;;  %v8592_v35 = vunpack.c.h.bf16 %v8634_v28 }
 0x40a   : > { %v8744_v32 = vpop.f32.mrb[4].mxu1 }
 0x40b   : > { %v7551_v5 = vadd.f32 %v8744_v32, %v12769_v46  ;;  %v7542_v31 = vpop.f32.mrb[5].mxu1 }
 0x40c   : > { %v7543_v56 = vadd.f32 %v12769_v46, %v7542_v31  ;;  %v8745_v16 = vpop.f32.mrb[6].mxu1 }
 0x40d   : > { %v7723_v2 = vadd.f32 %v8579_v23, %v7551_v5  ;;  %v7554_v43 = vadd.f32 %v8745_v16, %v12769_v46  ;;  %v7545_v4 = vpop.f32.mrb[7].mxu1 }
 0x40e   : > { %v7721_v57 = vadd.f32 %v8575_v55, %v7543_v56  ;;  %v7546_v30 = vadd.f32 %v12769_v46, %v7545_v4 }
 0x40f   : > { %v7755_v53 = vmax.f32 %v7723_v2, 0.0  ;;  %v7724_v3 = vadd.f32 %v8580_v15, %v7554_v43 }
 0x410   : > { %v7753_v11 = vmax.f32 %v7721_v57, 0.0  ;;  %v7722_v52 = vadd.f32 %v8576_v54, %v7546_v30  ;;  %v8637_v30 = vld [vmem:[%s9005_s23 + $0x48] sm:$0xff]  }
 0x411   : > { %v8539_v47 = vpack.c.bf16 %v7755_v53, %v7755_v53  ;;  %v7756_v33 = vmax.f32 %v7724_v3, 0.0  ;;  %v8636_v53 = vld [vmem:[%s9005_s23 + $0x40] sm:$0xff]   ;;  %v8603_v3 = vunpack.c.l.bf16 %v8637_v30 }
 0x412   : > { %v8537_v14 = vpack.c.bf16 %v7753_v11, %v7753_v11  ;;  %v7754_v51 = vmax.f32 %v7722_v52, 0.0  ;;  %v8599_v52 = vunpack.c.l.bf16 %v8636_v53 }
 0x413   : > { %7915 = vst.msk [vmem:[%s12783_s28 + $0x18] sm:$0xf] %vm226_vm0, %v8539_v47  ;;  %v8540_v36 = vpack.c.bf16 %v7756_v33, %v7756_v33 }
 0x414   : > { %7913 = vst.msk [vmem:[%s12783_s28 + $0x10] sm:$0xf] %vm226_vm0, %v8537_v14  ;;  %v8538_v42 = vpack.c.bf16 %v7754_v51, %v7754_v51  ;;  %v8604_v14 = vunpack.c.h.bf16 %v8637_v30 }
 0x415   : > { %7916 = vst.msk [vmem:[%s12783_s28 + $0x1c] sm:$0xf] %vm226_vm0, %v8540_v36 }
 0x416   : > { %7914 = vst.msk [vmem:[%s12783_s28 + $0x14] sm:$0xf] %vm226_vm0, %v8538_v42  ;;  %v8600_v42 = vunpack.c.h.bf16 %v8636_v53 }
 0x434   : > { %v8748_v19 = vpop.f32.mrb[8].mxu1 }
 0x435   : > { %v7567_v6 = vadd.f32 %v8748_v19, %v12769_v46  ;;  %v7558_v41 = vpop.f32.mrb[9].mxu1 }
 0x436   : > { %v7559_v40 = vadd.f32 %v12769_v46, %v7558_v41  ;;  %v8749_v1 = vpop.f32.mrb[10].mxu1 }
 0x437   : > { %v7727_v49 = vadd.f32 %v8587_v17, %v7567_v6  ;;  %v7570_v61 = vadd.f32 %v8749_v1, %v12769_v46  ;;  %v7561_v0 = vpop.f32.mrb[11].mxu1 }
 0x438   : > { %v7725_v8 = vadd.f32 %v8583_v18, %v7559_v40  ;;  %v7562_v24 = vadd.f32 %v12769_v46, %v7561_v0 }
 0x439   : > { %v7759_v63 = vmax.f32 %v7727_v49, 0.0  ;;  %v7728_v50 = vadd.f32 %v8588_v7, %v7570_v61 }
 0x43a   : > { %v7757_v22 = vmax.f32 %v7725_v8, 0.0  ;;  %v7726_v34 = vadd.f32 %v8584_v20, %v7562_v24  ;;  %v8639_v24 = vld [vmem:[%s9005_s23 + $0x58] sm:$0xff]  }
 0x43b   : > { %v8543_v13 = vpack.c.bf16 %v7759_v63, %v7759_v63  ;;  %v7760_v38 = vmax.f32 %v7728_v50, 0.0  ;;  %v8638_v63 = vld [vmem:[%s9005_s23 + $0x50] sm:$0xff]   ;;  %v8611_v50 = vunpack.c.l.bf16 %v8639_v24 }
 0x43c   : > { %v8541_v9 = vpack.c.bf16 %v7757_v22, %v7757_v22  ;;  %v7758_v62 = vmax.f32 %v7726_v34, 0.0  ;;  %v8607_v34 = vunpack.c.l.bf16 %v8638_v63  ;;  %v8608_v59 = vunpack.c.h.bf16 %v8638_v63 }
 0x43d   : > { %7919 = vst.msk [vmem:[%s12783_s28 + $0x28] sm:$0xf] %vm226_vm0, %v8543_v13  ;;  %v8544_v29 = vpack.c.bf16 %v7760_v38, %v7760_v38 }
 0x43e   : > { %7917 = vst.msk [vmem:[%s12783_s28 + $0x20] sm:$0xf] %vm226_vm0, %v8541_v9  ;;  %v8542_v45 = vpack.c.bf16 %v7758_v62, %v7758_v62  ;;  %v8612_v9 = vunpack.c.h.bf16 %v8639_v24 }
 0x43f   : > { %7920 = vst.msk [vmem:[%s12783_s28 + $0x2c] sm:$0xf] %vm226_vm0, %v8544_v29  ;;  %v8752_v25 = vpop.f32.mrb[12].mxu1 }
 0x440   : > { %7918 = vst.msk [vmem:[%s12783_s28 + $0x24] sm:$0xf] %vm226_vm0, %v8542_v45  ;;  %v7583_v48 = vadd.f32 %v8752_v25, %v12769_v46  ;;  %v7574_v44 = vpop.f32.mrb[13].mxu1 }
 0x441   : > { %v7575_v27 = vadd.f32 %v12769_v46, %v7574_v44  ;;  %v8753_v39 = vpop.f32.mrb[14].mxu1 }
 0x442   : > { %v7731_v10 = vadd.f32 %v8595_v58, %v7583_v48  ;;  %v7586_v12 = vadd.f32 %v8753_v39, %v12769_v46  ;;  %v7577_v23 = vpop.f32.mrb[15].mxu1 }
 0x443   : > { %v7729_v32 = vadd.f32 %v8591_v26, %v7575_v27  ;;  %v7578_v55 = vadd.f32 %v12769_v46, %v7577_v23 }
 0x444   : > { %v7763_v5 = vmax.f32 %v7731_v10, 0.0  ;;  %v7732_v31 = vadd.f32 %v8596_v21, %v7586_v12 }
 0x445   : > { %v7761_v15 = vmax.f32 %v7729_v32, 0.0  ;;  %v7730_v56 = vadd.f32 %v8592_v35, %v7578_v55  ;;  %v8641_v55 = vld [vmem:[%s9005_s23 + $0x68] sm:$0xff]  }
 0x446   : > { %v8547_v16 = vpack.c.bf16 %v7763_v5, %v7763_v5  ;;  %v7764_v54 = vmax.f32 %v7732_v31, 0.0  ;;  %v8640_v5 = vld [vmem:[%s9005_s23 + $0x60] sm:$0xff]   ;;  %v8619_v31 = vunpack.c.l.bf16 %v8641_v55 }
 0x447   : > { %v8545_v2 = vpack.c.bf16 %v7761_v15, %v7761_v15  ;;  %v7762_v43 = vmax.f32 %v7730_v56, 0.0  ;;  %v8615_v56 = vunpack.c.l.bf16 %v8640_v5 }
 0x448   : > { %7923 = vst.msk [vmem:[%s12783_s28 + $0x38] sm:$0xf] %vm226_vm0, %v8547_v16  ;;  %v8548_v4 = vpack.c.bf16 %v7764_v54, %v7764_v54 }
 0x449   : > { %7921 = vst.msk [vmem:[%s12783_s28 + $0x30] sm:$0xf] %vm226_vm0, %v8545_v2  ;;  %v8546_v57 = vpack.c.bf16 %v7762_v43, %v7762_v43  ;;  %v8620_v2 = vunpack.c.h.bf16 %v8641_v55 }
 0x44a   : > { %7924 = vst.msk [vmem:[%s12783_s28 + $0x3c] sm:$0xf] %vm226_vm0, %v8548_v4 }
 0x44b   : > { %7922 = vst.msk [vmem:[%s12783_s28 + $0x34] sm:$0xf] %vm226_vm0, %v8546_v57  ;;  %v8616_v57 = vunpack.c.h.bf16 %v8640_v5 }
 0x460   : > { %v8756_v11 = vpop.f32.mrb[16].mxu1 }
 0x461   : > { %v7599_v47 = vadd.f32 %v8756_v11, %v12769_v46  ;;  %v7590_v33 = vpop.f32.mrb[17].mxu1 }
 0x462   : > { %v7591_v51 = vadd.f32 %v12769_v46, %v7590_v33  ;;  %v8757_v36 = vpop.f32.mrb[18].mxu1 }
 0x463   : > { %v7735_v60 = vadd.f32 %v8603_v3, %v7599_v47  ;;  %v7602_v37 = vadd.f32 %v8757_v36, %v12769_v46  ;;  %v7593_v17 = vpop.f32.mrb[19].mxu1 }
 0x464   : > { %v7733_v19 = vadd.f32 %v8599_v52, %v7591_v51  ;;  %v7594_v18 = vadd.f32 %v12769_v46, %v7593_v17 }
 0x465   : > { %v7767_v6 = vmax.f32 %v7735_v60, 0.0  ;;  %v7736_v41 = vadd.f32 %v8604_v14, %v7602_v37 }
 0x466   : > { %v7765_v7 = vmax.f32 %v7733_v19, 0.0  ;;  %v7734_v40 = vadd.f32 %v8600_v42, %v7594_v18  ;;  %v8643_v18 = vld [vmem:[%s9005_s23 + $0x78] sm:$0xff]  }
 0x467   : > { %v8551_v1 = vpack.c.bf16 %v7767_v6, %v7767_v6  ;;  %v7768_v20 = vmax.f32 %v7736_v41, 0.0  ;;  %v8642_v6 = vld [vmem:[%s9005_s23 + $0x70] sm:$0xff]   ;;  %v8627_v41 = vunpack.c.l.bf16 %v8643_v18 }
 0x468   : > { %v8549_v49 = vpack.c.bf16 %v7765_v7, %v7765_v7  ;;  %v7766_v61 = vmax.f32 %v7734_v40, 0.0  ;;  %v8623_v40 = vunpack.c.l.bf16 %v8642_v6 }
 0x469   : > { %7927 = vst.msk [vmem:[%s12783_s28 + $0x48] sm:$0xf] %vm226_vm0, %v8551_v1  ;;  %v8552_v0 = vpack.c.bf16 %v7768_v20, %v7768_v20 }
 0x46a   : > { %7925 = vst.msk [vmem:[%s12783_s28 + $0x40] sm:$0xf] %vm226_vm0, %v8549_v49  ;;  %v8550_v8 = vpack.c.bf16 %v7766_v61, %v7766_v61  ;;  %v8628_v49 = vunpack.c.h.bf16 %v8643_v18 }
 0x46b   : > { %7928 = vst.msk [vmem:[%s12783_s28 + $0x4c] sm:$0xf] %vm226_vm0, %v8552_v0 }
 0x46c   : > { %7926 = vst.msk [vmem:[%s12783_s28 + $0x44] sm:$0xf] %vm226_vm0, %v8550_v8  ;;  %v8624_v8 = vunpack.c.h.bf16 %v8642_v6 }
 0x471   : > { %v8760_v22 = vpop.f32.mrb[20].mxu1 }
 0x472   : > { %v7615_v13 = vadd.f32 %v8760_v22, %v12769_v46  ;;  %v7606_v38 = vpop.f32.mrb[21].mxu1 }
 0x473   : > { %v7607_v62 = vadd.f32 %v12769_v46, %v7606_v38  ;;  %v8761_v29 = vpop.f32.mrb[22].mxu1 }
 0x474   : > { %v7739_v45 = vadd.f32 %v8611_v50, %v7615_v13  ;;  %v7618_v28 = vadd.f32 %v8761_v29, %v12769_v46  ;;  %v7609_v58 = vpop.f32.mrb[23].mxu1 }
 0x475   : > { %v7737_v25 = vadd.f32 %v8607_v34, %v7607_v62  ;;  %v7610_v26 = vadd.f32 %v12769_v46, %v7609_v58 }
 0x476   : > { %v7771_v48 = vmax.f32 %v7739_v45, 0.0  ;;  %v7740_v44 = vadd.f32 %v8612_v9, %v7618_v28 }
 0x477   : > { %v7769_v21 = vmax.f32 %v7737_v25, 0.0  ;;  %v7738_v27 = vadd.f32 %v8608_v59, %v7610_v26 }
 0x478   : > { %v8555_v39 = vpack.c.bf16 %v7771_v48, %v7771_v48  ;;  %v7772_v35 = vmax.f32 %v7740_v44, 0.0 }
 0x479   : > { %v8553_v10 = vpack.c.bf16 %v7769_v21, %v7769_v21  ;;  %v7770_v12 = vmax.f32 %v7738_v27, 0.0 }
 0x47a   : > { %7931 = vst.msk [vmem:[%s12783_s28 + $0x58] sm:$0xf] %vm226_vm0, %v8555_v39  ;;  %v8556_v23 = vpack.c.bf16 %v7772_v35, %v7772_v35 }
 0x47b   : > { %7929 = vst.msk [vmem:[%s12783_s28 + $0x50] sm:$0xf] %vm226_vm0, %v8553_v10  ;;  %v8554_v32 = vpack.c.bf16 %v7770_v12, %v7770_v12 }
 0x47c   : > { %7932 = vst.msk [vmem:[%s12783_s28 + $0x5c] sm:$0xf] %vm226_vm0, %v8556_v23 }
 0x47d   : > { %7930 = vst.msk [vmem:[%s12783_s28 + $0x54] sm:$0xf] %vm226_vm0, %v8554_v32 }
 0x496   : > { %v8764_v15 = vpop.f32.mrb[24].mxu1 }
 0x497   : > { %v7631_v16 = vadd.f32 %v8764_v15, %v12769_v46  ;;  %v7622_v54 = vpop.f32.mrb[25].mxu1 }
 0x498   : > { %v7623_v43 = vadd.f32 %v12769_v46, %v7622_v54  ;;  %v8765_v4 = vpop.f32.mrb[26].mxu1 }
 0x499   : > { %v7743_v30 = vadd.f32 %v8619_v31, %v7631_v16  ;;  %v7634_v53 = vadd.f32 %v8765_v4, %v12769_v46  ;;  %v7625_v3 = vpop.f32.mrb[27].mxu1 }
 0x49a   : > { %v7741_v11 = vadd.f32 %v8615_v56, %v7623_v43  ;;  %v7626_v52 = vadd.f32 %v12769_v46, %v7625_v3 }
 0x49b   : > { %v7775_v47 = vmax.f32 %v7743_v30, 0.0  ;;  %v7744_v33 = vadd.f32 %v8620_v2, %v7634_v53 }
 0x49c   : > { %v7773_v14 = vmax.f32 %v7741_v11, 0.0  ;;  %v7742_v51 = vadd.f32 %v8616_v57, %v7626_v52 }
 0x49d   : > { %v8559_v36 = vpack.c.bf16 %v7775_v47, %v7775_v47  ;;  %v7776_v42 = vmax.f32 %v7744_v33, 0.0 }
 0x49e   : > { %v8557_v60 = vpack.c.bf16 %v7773_v14, %v7773_v14  ;;  %v7774_v37 = vmax.f32 %v7742_v51, 0.0 }
 0x49f   : > { %7935 = vst.msk [vmem:[%s12783_s28 + $0x68] sm:$0xf] %vm226_vm0, %v8559_v36  ;;  %v8560_v17 = vpack.c.bf16 %v7776_v42, %v7776_v42 }
 0x4a0   : > { %7933 = vst.msk [vmem:[%s12783_s28 + $0x60] sm:$0xf] %vm226_vm0, %v8557_v60  ;;  %v8558_v19 = vpack.c.bf16 %v7774_v37, %v7774_v37 }
 0x4a1   : > { %7936 = vst.msk [vmem:[%s12783_s28 + $0x6c] sm:$0xf] %vm226_vm0, %v8560_v17 }
 0x4a2   : > { %7934 = vst.msk [vmem:[%s12783_s28 + $0x64] sm:$0xf] %vm226_vm0, %v8558_v19 }
 0x4c1   : > { %v8768_v7 = vpop.f32.mrb[28].mxu1 }
 0x4c2   : > { %v7647_v1 = vadd.f32 %v8768_v7, %v12769_v46  ;;  %v7638_v20 = vpop.f32.mrb[29].mxu1 }
 0x4c3   : > { %v7639_v61 = vadd.f32 %v12769_v46, %v7638_v20  ;;  %v8769_v0 = vpop.f32.mrb[30].mxu1 }
 0x4c4   : > { %v7747_v24 = vadd.f32 %v8627_v41, %v7647_v1  ;;  %v7650_v63 = vadd.f32 %v8769_v0, %v12769_v46  ;;  %v7641_v50 = vpop.f32.mrb[31].mxu1 }
 0x4c5   : > { %v7745_v22 = vadd.f32 %v8623_v40, %v7639_v61  ;;  %v7642_v34 = vadd.f32 %v12769_v46, %v7641_v50 }
 0x4c6   : > { %v7779_v13 = vmax.f32 %v7747_v24, 0.0  ;;  %v7748_v38 = vadd.f32 %v8628_v49, %v7650_v63 }
 0x4c7   : > { %v7777_v9 = vmax.f32 %v7745_v22, 0.0  ;;  %v7746_v62 = vadd.f32 %v8624_v8, %v7642_v34 }
 0x4c8   : > { %v8563_v29 = vpack.c.bf16 %v7779_v13, %v7779_v13  ;;  %v7780_v59 = vmax.f32 %v7748_v38, 0.0 }
 0x4c9   : > { %v8561_v45 = vpack.c.bf16 %v7777_v9, %v7777_v9  ;;  %v7778_v28 = vmax.f32 %v7746_v62, 0.0 }
 0x4ca   : > { %7939 = vst.msk [vmem:[%s12783_s28 + $0x78] sm:$0xf] %vm226_vm0, %v8563_v29  ;;  %v8564_v58 = vpack.c.bf16 %v7780_v59, %v7780_v59 }
 0x4cb   : > { %7937 = vst.msk [vmem:[%s12783_s28 + $0x70] sm:$0xf] %vm226_vm0, %v8561_v45  ;;  %v8562_v25 = vpack.c.bf16 %v7778_v28, %v7778_v28 }
 0x4cc   : > { %7940 = vst.msk [vmem:[%s12783_s28 + $0x7c] sm:$0xf] %vm226_vm0, %v8564_v58 }
 0x4cd   : > { %7938 = vst.msk [vmem:[%s12783_s28 + $0x74] sm:$0xf] %vm226_vm0, %v8562_v25 }
 0x4ce PF: > { %s15_s18 = sadd.s32 1, %s8918_s18  }
 0x4cf   : > { %p12_p4 = scmp.ge.s32.totalorder %s15_s18, 4  }
 0x4d1   :  { %14 = sbr.rel (!%p12_p4) target bundleno = 1 (0x1), region = 76 }

</bundles_post_ra>
